<compile_context>
chip_gen: v7x
topology: tpu7x:2x2x1
jax: 0.10.0
libtpu: 0.0.40
codegen_flags: <defaults>
</compile_context>

<pallas_src>
import numpy as np
import jax
import jax.numpy as jnp
from jax.experimental import pallas as pl
from jax.experimental.pallas import tpu as pltpu

EPS = 1e-5
H = W = 4          # spatial size forced by fc1 (128 * 4 * 4 input features)
CPAD = 128         # conv channel lanes padded to a full vreg row
FC2_PAD = 128      # fc2 output lanes padded to a full vreg row


def _round_up(v, d):
    return (v + d - 1) // d * d


# ----------------------------- fused Pallas kernel ---------------------------

def net_kernel(x_ref, masks_ref,
               w1_ref, g1_ref, be1_ref,
               w2_ref, g2_ref, be2_ref,
               w3_ref, g3_ref, be3_ref,
               w4_ref, g4_ref, be4_ref,
               wf1_hbm, bf1_ref, wf2_ref, bf2_ref,
               o_ref,
               wf1_vmem, wf1_sem):
    """Whole Net forward.  Conv activation rows are pixel-major:
    row = (h*W + w)*N + n, columns are channels (lane axis)."""
    m = x_ref.shape[0]                 # N * H * W
    n_batch = o_ref.shape[0]           # N
    hw = m // n_batch                  # H * W
    inv_m = 1.0 / m
    pad_rows = _round_up((W + 1) * n_batch, 8)   # sublane-aligned zero pad

    # Stream the big fc1 weight (HBM -> VMEM) underneath the conv stack.
    wf1_copy = pltpu.make_async_copy(wf1_hbm, wf1_vmem, wf1_sem)
    wf1_copy.start()

    def bn_relu(y, g_ref, b_ref):
        # Training-mode BatchNorm2d (biased batch stats), one-pass statistics.
        # Conv bias omitted: cancelled exactly by the batch-mean subtraction.
        mean = jnp.sum(y, axis=0, keepdims=True) * inv_m
        ex2 = jnp.sum(y * y, axis=0, keepdims=True) * inv_m
        var = jnp.maximum(ex2 - mean * mean, 0.0)
        yn = (y - mean) * jax.lax.rsqrt(var + EPS)
        return jnp.maximum(yn * g_ref[...] + b_ref[...], 0.0)

    def conv3x3(act, w_ref):
        # act: (m, C) pixel-major / channel-last.  Build the 9 shifted taps
        # (static sublane shift of a zero-padded copy + boundary mask),
        # K-concatenate them and run ONE (m, 9C) x (9C, Cout) MXU matmul.
        c = act.shape[1]
        zpad = jnp.zeros((pad_rows, c), jnp.float32)
        padded = jnp.concatenate([zpad, act, zpad], axis=0)
        taps = []
        for t in range(9):                                   # unrolled
            di, dj = t // 3 - 1, t % 3 - 1
            start = pad_rows + (di * W + dj) * n_batch       # static offset
            taps.append(padded[start:start + m, :] * masks_ref[t])
        cat = jnp.concatenate(taps, axis=1)                  # (m, 9*C)
        return jnp.dot(cat, w_ref[...], preferred_element_type=jnp.float32)

    # conv1 was im2col'ed on the host (x_ref is already (m, 9*Cin padded)).
    h = bn_relu(jnp.dot(x_ref[...], w1_ref[...],
                        preferred_element_type=jnp.float32), g1_ref, be1_ref)
    h = bn_relu(conv3x3(h, w2_ref), g2_ref, be2_ref)
    h = bn_relu(conv3x3(h, w3_ref), g3_ref, be3_ref)
    h = bn_relu(conv3x3(h, w4_ref), g4_ref, be4_ref)

    # Repack (m, 128) -> (N, hw*128); wf1 rows were pre-permuted in
    # prepare_params so this matches torch's NCHW .view(N, -1).
    flat = jnp.concatenate(
        [h[p * n_batch:(p + 1) * n_batch, :] for p in range(hw)], axis=1)

    wf1_copy.wait()                                   # fc1 weight has landed
    fc1 = (jnp.dot(flat.astype(jnp.bfloat16), wf1_vmem[...],
                   preferred_element_type=jnp.float32) + bf1_ref[...])
    # fc2 (no activation between fc1 and fc2 in the reference module);
    # weight/bias were zero-padded to 128 output lanes for a lane-dense store.
    o_ref[...] = (jnp.dot(fc1.astype(jnp.bfloat16), wf2_ref[...],
                          preferred_element_type=jnp.float32) + bf2_ref[...])


# ------------------------------- wrappers ------------------------------------

def _vmem_spec():
    return pl.BlockSpec(memory_space=pltpu.MemorySpace.VMEM)


def _tap_masks(n, hgt, wid):
    """(9, M, 1) f32 boundary masks; mask[t, r] = 1 iff tap t of pixel-major
    row r (row = (h*wid + w)*n + b) stays inside the image."""
    m = n * hgt * wid
    masks = np.zeros((9, m, 1), np.float32)
    t = 0
    for di in (-1, 0, 1):
        for dj in (-1, 0, 1):
            for hh in range(hgt):
                for ww in range(wid):
                    if 0 <= hh + di < hgt and 0 <= ww + dj < wid:
                        r0 = (hh * wid + ww) * n
                        masks[t, r0:r0 + n, 0] = 1.0
            t += 1
    return jnp.asarray(masks)


def _im2col_conv1(x, k_pad):
    """Host-side im2col for conv1: (N,C,H,W) -> (M, k_pad), pixel-major rows,
    tap-major / channel-minor columns (matches the w1 tap reshape)."""
    n, c, hgt, wid = x.shape
    m = n * hgt * wid
    xp = jnp.pad(x, ((0, 0), (0, 0), (1, 1), (1, 1)))
    cols = []
    for di in range(3):
        for dj in range(3):
            patch = xp[:, :, di:di + hgt, dj:dj + wid]        # (N, C, H, W)
            cols.append(jnp.transpose(patch, (2, 3, 0, 1)).reshape(m, c))
    xcat = jnp.concatenate(cols, axis=1)                      # (M, 9C)
    return jnp.pad(xcat, ((0, 0), (0, k_pad - 9 * c)))


def prepare_params(params):
    """One-time conversion of PyTorch-layout parameters to the kernel layout."""
    prep = {}

    # conv1: a (K1, 128) matmul against the host-side im2col input.
    w, _b, g, be = params["conv1"]            # conv bias dropped (BN cancels it)
    cout, cin = w.shape[0], w.shape[1]
    k1 = _round_up(9 * cin, 8)
    taps = jnp.transpose(w, (2, 3, 1, 0)).reshape(9 * cin, cout)
    prep["w1"] = jnp.zeros((k1, CPAD), jnp.float32).at[:9 * cin, :cout].set(taps)
    prep["g1"] = jnp.zeros((1, CPAD), jnp.float32).at[:, :cout].set(g)
    prep["be1"] = jnp.zeros((1, CPAD), jnp.float32).at[:, :cout].set(be)

    # conv2..conv4: (9*128, 128) matmuls, Cin/Cout zero-padded to 128 lanes
    # (padded channels carry gamma=beta=0 and propagate as exact zeros).
    for i, name in enumerate(("conv2", "conv3", "conv4"), start=2):
        w, _b, g, be = params[name]
        cout, cin = w.shape[0], w.shape[1]
        taps = jnp.transpose(w, (2, 3, 1, 0)).reshape(9, cin, cout)
        taps = jnp.pad(taps, ((0, 0), (0, CPAD - cin), (0, CPAD - cout)))
        prep[f"w{i}"] = taps.reshape(9 * CPAD, CPAD)
        prep[f"g{i}"] = jnp.pad(g, (0, CPAD - cout)).reshape(1, CPAD)
        prep[f"be{i}"] = jnp.pad(be, (0, CPAD - cout)).reshape(1, CPAD)

    # fc1: rows permuted so kernel flat column q = p*128 + c matches torch's
    # flatten index f = c*(H*W) + p.  bf16 weights, f32 accumulation in-kernel.
    w1, b1 = params["fc1"]                    # (1024, 2048), (1024,)
    c4 = params["conv4"][0].shape[0]          # 128
    npix = w1.shape[1] // c4                  # 16
    wf1 = jnp.transpose(w1.reshape(w1.shape[0], c4, npix), (2, 1, 0))
    prep["wf1"] = wf1.reshape(npix * c4, w1.shape[0]).astype(jnp.bfloat16)
    prep["bf1"] = b1.reshape(1, -1)

    # fc2: transposed, output lanes zero-padded to 128 (lane-dense store).
    w2, b2 = params["fc2"]                    # (10, 1024), (10,)
    nout = w2.shape[0]
    wf2 = jnp.zeros((w2.shape[1], FC2_PAD), jnp.float32).at[:, :nout].set(w2.T)
    prep["wf2"] = wf2.astype(jnp.bfloat16)
    prep["bf2"] = jnp.zeros((1, FC2_PAD), jnp.float32).at[:, :nout].set(
        b2.reshape(1, -1))
    return prep


def net_forward(x, prep):
    """x: (N, 3, H, W) NCHW float32.  Returns (N, 10)."""
    n, c, hgt, wid = x.shape
    assert (hgt, wid) == (H, W), "fc1 fixes the spatial size to 4x4"
    x_cat = _im2col_conv1(x, prep["w1"].shape[0])     # tiny, trace-time plumbing
    masks = _tap_masks(n, hgt, wid)                   # trace-time constant

    ins = (x_cat, masks,
           prep["w1"], prep["g1"], prep["be1"],
           prep["w2"], prep["g2"], prep["be2"],
           prep["w3"], prep["g3"], prep["be3"],
           prep["w4"], prep["g4"], prep["be4"],
           prep["wf1"], prep["bf1"], prep["wf2"], prep["bf2"])

    vm = _vmem_spec()
    hbm = pl.BlockSpec(memory_space=pl.ANY)           # wf1 stays in HBM
    in_specs = [vm, vm,
                vm, vm, vm,        # conv1
                vm, vm, vm,        # conv2
                vm, vm, vm,        # conv3
                vm, vm, vm,        # conv4
                hbm, vm, vm, vm]   # wf1 (streamed), bf1, wf2, bf2

    out = pl.pallas_call(
        net_kernel,
        out_shape=jax.ShapeDtypeStruct((n, FC2_PAD), jnp.float32),
        in_specs=in_specs,
        out_specs=vm,
        scratch_shapes=[pltpu.VMEM(prep["wf1"].shape, jnp.bfloat16),
                        pltpu.SemaphoreType.DMA],
    )(*ins)
    return out[:, :10]


# ------------------------------- reference -----------------------------------

def reference_forward(x, params):
    """Pure-JAX/XLA reference of the PyTorch Net forward (training-mode BN)."""
    hi = jax.lax.Precision.HIGHEST
    h = x
    for name in ("conv1", "conv2", "conv3", "conv4"):
        w, b, gamma, beta = params[name]
        h = jax.lax.conv_general_dilated(
            h, w, window_strides=(1, 1), padding=((1, 1), (1, 1)),
            dimension_numbers=("NCHW", "OIHW", "NCHW"), precision=hi)
        h = h + b[None, :, None, None]
        mean = jnp.mean(h, axis=(0, 2, 3), keepdims=True)
        var = jnp.mean((h - mean) ** 2, axis=(0, 2, 3), keepdims=True)
        h = (h - mean) * jax.lax.rsqrt(var + EPS)
        h = h * gamma[None, :, None, None] + beta[None, :, None, None]
        h = jnp.maximum(h, 0.0)
    flat = h.reshape(h.shape[0], -1)
    w1, b1 = params["fc1"]
    w2, b2 = params["fc2"]
    y = jnp.dot(flat, w1.T, precision=hi) + b1
    y = jnp.dot(y, w2.T, precision=hi) + b2
    return y


# ------------------------------- parameters ----------------------------------

def init_params(key):
    ks = jax.random.split(key, 6)
    params = {}

    def conv_p(k, cout, cin):
        kw, kb = jax.random.split(k)
        w = jax.random.normal(kw, (cout, cin, 3, 3), jnp.float32) * 0.05
        b = jax.random.normal(kb, (cout,), jnp.float32) * 0.05
        gamma = jnp.ones((cout,), jnp.float32)
        beta = jnp.zeros((cout,), jnp.float32)
        return (w, b, gamma, beta)

    params["conv1"] = conv_p(ks[0], 64, 3)
    params["conv2"] = conv_p(ks[1], 64, 64)
    params["conv3"] = conv_p(ks[2], 128, 64)
    params["conv4"] = conv_p(ks[3], 128, 128)

    def lin_p(k, fout, fin):
        kw, kb = jax.random.split(k)
        w = jax.random.normal(kw, (fout, fin), jnp.float32) * 0.02
        b = jax.random.normal(kb, (fout,), jnp.float32) * 0.02
        return (w, b)

    params["fc1"] = lin_p(ks[4], 1024, 128 * H * W)
    params["fc2"] = lin_p(ks[5], 10, 1024)
    return params


if __name__ == "__main__":
    key = jax.random.PRNGKey(0)
    k_param, k_x = jax.random.split(key)
    params = init_params(k_param)
    prep = prepare_params(params)            # one-time layout prep (outside jit)

    x = jax.random.normal(k_x, (2, 3, H, W), jnp.float32)

    fwd = jax.jit(net_forward)
    out = jax.block_until_ready(fwd(x, prep))
    assert out.shape == (2, 10) and out.dtype == jnp.float32

    ref = jax.block_until_ready(reference_forward(x, params))
    err = float(jnp.max(jnp.abs(out - ref)))
    assert err < 2e-2, f"mismatch vs reference: max abs err {err}"

    print("KERNEL_OK")
</pallas_src>

<mosaic_0001>
module attributes {stable_mosaic.version = 11 : i64} {
  func.func @net_kernel(%arg0: memref<32x32xf32, #tpu.memory_space<vmem>>, %arg1: memref<9x32x1xf32, #tpu.memory_space<vmem>>, %arg2: memref<32x128xf32, #tpu.memory_space<vmem>>, %arg3: memref<1x128xf32, #tpu.memory_space<vmem>>, %arg4: memref<1x128xf32, #tpu.memory_space<vmem>>, %arg5: memref<1152x128xf32, #tpu.memory_space<vmem>>, %arg6: memref<1x128xf32, #tpu.memory_space<vmem>>, %arg7: memref<1x128xf32, #tpu.memory_space<vmem>>, %arg8: memref<1152x128xf32, #tpu.memory_space<vmem>>, %arg9: memref<1x128xf32, #tpu.memory_space<vmem>>, %arg10: memref<1x128xf32, #tpu.memory_space<vmem>>, %arg11: memref<1152x128xf32, #tpu.memory_space<vmem>>, %arg12: memref<1x128xf32, #tpu.memory_space<vmem>>, %arg13: memref<1x128xf32, #tpu.memory_space<vmem>>, %arg14: memref<2048x1024xbf16, #tpu.memory_space<any>>, %arg15: memref<1x1024xf32, #tpu.memory_space<vmem>>, %arg16: memref<1024x128xbf16, #tpu.memory_space<vmem>>, %arg17: memref<1x128xf32, #tpu.memory_space<vmem>>, %arg18: memref<2x128xf32, #tpu.memory_space<vmem>>, %arg19: memref<2048x1024xbf16, #tpu.memory_space<vmem>>, %arg20: memref<!tpu.dma_semaphore, #tpu.memory_space<semaphore_mem>>) attributes {dimension_semantics = [], scalar_prefetch = 0 : i64, scratch_operands = 2 : i64, tpu.core_type = #tpu.core_type<tc>} {
    tpu.enqueue_dma source(%arg14 : memref<2048x1024xbf16, #tpu.memory_space<any>>) target(%arg19 : memref<2048x1024xbf16, #tpu.memory_space<vmem>>) target_semaphore(%arg20 : memref<!tpu.dma_semaphore, #tpu.memory_space<semaphore_mem>>)
    %c0 = arith.constant 0 : index
    %c0_0 = arith.constant 0 : index
    %0 = vector.load %arg0[%c0, %c0_0] : memref<32x32xf32, #tpu.memory_space<vmem>>, vector<32x32xf32>
    %c0_1 = arith.constant 0 : index
    %c0_2 = arith.constant 0 : index
    %1 = vector.load %arg2[%c0_1, %c0_2] : memref<32x128xf32, #tpu.memory_space<vmem>>, vector<32x128xf32>
    %cst = arith.constant dense<0.000000e+00> : vector<32x128xf32>
    %2 = tpu.matmul %0, %1, %cst {dimension_numbers = #tpu.dot_dimension_numbers<[1], [0], [0], [1], [0, 0, 1, 1], [], []>} : vector<32x32xf32>, vector<32x128xf32>, vector<32x128xf32> -> vector<32x128xf32>
    %cst_3 = arith.constant dense<0.000000e+00> : vector<128xf32>
    %3 = vector.multi_reduction <add>, %2, %cst_3 [0] : vector<32x128xf32> to vector<128xf32>
    %4 = vector.shape_cast %3 : vector<128xf32> to vector<1x128xf32>
    %cst_4 = arith.constant 3.125000e-02 : f32
    %5 = vector.broadcast %cst_4 : f32 to vector<1x128xf32>
    %6 = arith.mulf %4, %5 : vector<1x128xf32>
    %7 = arith.mulf %2, %2 : vector<32x128xf32>
    %cst_5 = arith.constant dense<0.000000e+00> : vector<128xf32>
    %8 = vector.multi_reduction <add>, %7, %cst_5 [0] : vector<32x128xf32> to vector<128xf32>
    %9 = vector.shape_cast %8 : vector<128xf32> to vector<1x128xf32>
    %cst_6 = arith.constant 3.125000e-02 : f32
    %10 = vector.broadcast %cst_6 : f32 to vector<1x128xf32>
    %11 = arith.mulf %9, %10 : vector<1x128xf32>
    %12 = arith.mulf %6, %6 : vector<1x128xf32>
    %13 = arith.subf %11, %12 : vector<1x128xf32>
    %cst_7 = arith.constant 0.000000e+00 : f32
    %14 = vector.broadcast %cst_7 : f32 to vector<1x128xf32>
    %15 = arith.maximumf %13, %14 : vector<1x128xf32>
    %16 = vector.broadcast %6 : vector<1x128xf32> to vector<32x128xf32>
    %17 = arith.subf %2, %16 : vector<32x128xf32>
    %cst_8 = arith.constant 9.99999974E-6 : f32
    %18 = vector.broadcast %cst_8 : f32 to vector<1x128xf32>
    %19 = arith.addf %15, %18 : vector<1x128xf32>
    %20 = math.rsqrt %19 : vector<1x128xf32>
    %21 = vector.broadcast %20 : vector<1x128xf32> to vector<32x128xf32>
    %22 = arith.mulf %17, %21 : vector<32x128xf32>
    %c0_9 = arith.constant 0 : index
    %c0_10 = arith.constant 0 : index
    %23 = vector.load %arg3[%c0_9, %c0_10] : memref<1x128xf32, #tpu.memory_space<vmem>>, vector<1x128xf32>
    %24 = vector.broadcast %23 : vector<1x128xf32> to vector<32x128xf32>
    %25 = arith.mulf %22, %24 : vector<32x128xf32>
    %c0_11 = arith.constant 0 : index
    %c0_12 = arith.constant 0 : index
    %26 = vector.load %arg4[%c0_11, %c0_12] : memref<1x128xf32, #tpu.memory_space<vmem>>, vector<1x128xf32>
    %27 = vector.broadcast %26 : vector<1x128xf32> to vector<32x128xf32>
    %28 = arith.addf %25, %27 : vector<32x128xf32>
    %cst_13 = arith.constant 0.000000e+00 : f32
    %29 = vector.broadcast %cst_13 : f32 to vector<32x128xf32>
    %30 = arith.maximumf %28, %29 : vector<32x128xf32>
    %cst_14 = arith.constant 0.000000e+00 : f32
    %31 = vector.broadcast %cst_14 : f32 to vector<16x128xf32>
    %32 = tpu.concatenate %31, %30, %31 in 0 : vector<16x128xf32>, vector<32x128xf32>, vector<16x128xf32> -> vector<64x128xf32>
    %33 = vector.extract_strided_slice %32 {offsets = [6, 0], sizes = [32, 128], strides = [1, 1]} : vector<64x128xf32> to vector<32x128xf32>
    %c0_15 = arith.constant 0 : index
    %c0_16 = arith.constant 0 : index
    %c0_17 = arith.constant 0 : index
    %34 = vector.load %arg1[%c0_15, %c0_16, %c0_17] : memref<9x32x1xf32, #tpu.memory_space<vmem>>, vector<1x32x1xf32>
    %35 = vector.shape_cast %34 : vector<1x32x1xf32> to vector<32x1xf32>
    %36 = vector.broadcast %35 : vector<32x1xf32> to vector<32x128xf32>
    %37 = arith.mulf %33, %36 : vector<32x128xf32>
    %38 = vector.extract_strided_slice %32 {offsets = [8, 0], sizes = [32, 128], strides = [1, 1]} : vector<64x128xf32> to vector<32x128xf32>
    %c1 = arith.constant 1 : index
    %c0_18 = arith.constant 0 : index
    %c0_19 = arith.constant 0 : index
    %39 = vector.load %arg1[%c1, %c0_18, %c0_19] : memref<9x32x1xf32, #tpu.memory_space<vmem>>, vector<1x32x1xf32>
    %40 = vector.shape_cast %39 : vector<1x32x1xf32> to vector<32x1xf32>
    %41 = vector.broadcast %40 : vector<32x1xf32> to vector<32x128xf32>
    %42 = arith.mulf %38, %41 : vector<32x128xf32>
    %43 = vector.extract_strided_slice %32 {offsets = [10, 0], sizes = [32, 128], strides = [1, 1]} : vector<64x128xf32> to vector<32x128xf32>
    %c2 = arith.constant 2 : index
    %c0_20 = arith.constant 0 : index
    %c0_21 = arith.constant 0 : index
    %44 = vector.load %arg1[%c2, %c0_20, %c0_21] : memref<9x32x1xf32, #tpu.memory_space<vmem>>, vector<1x32x1xf32>
    %45 = vector.shape_cast %44 : vector<1x32x1xf32> to vector<32x1xf32>
    %46 = vector.broadcast %45 : vector<32x1xf32> to vector<32x128xf32>
    %47 = arith.mulf %43, %46 : vector<32x128xf32>
    %48 = vector.extract_strided_slice %32 {offsets = [14, 0], sizes = [32, 128], strides = [1, 1]} : vector<64x128xf32> to vector<32x128xf32>
    %c3 = arith.constant 3 : index
    %c0_22 = arith.constant 0 : index
    %c0_23 = arith.constant 0 : index
    %49 = vector.load %arg1[%c3, %c0_22, %c0_23] : memref<9x32x1xf32, #tpu.memory_space<vmem>>, vector<1x32x1xf32>
    %50 = vector.shape_cast %49 : vector<1x32x1xf32> to vector<32x1xf32>
    %51 = vector.broadcast %50 : vector<32x1xf32> to vector<32x128xf32>
    %52 = arith.mulf %48, %51 : vector<32x128xf32>
    %53 = vector.extract_strided_slice %32 {offsets = [16, 0], sizes = [32, 128], strides = [1, 1]} : vector<64x128xf32> to vector<32x128xf32>
    %c4 = arith.constant 4 : index
    %c0_24 = arith.constant 0 : index
    %c0_25 = arith.constant 0 : index
    %54 = vector.load %arg1[%c4, %c0_24, %c0_25] : memref<9x32x1xf32, #tpu.memory_space<vmem>>, vector<1x32x1xf32>
    %55 = vector.shape_cast %54 : vector<1x32x1xf32> to vector<32x1xf32>
    %56 = vector.broadcast %55 : vector<32x1xf32> to vector<32x128xf32>
    %57 = arith.mulf %53, %56 : vector<32x128xf32>
    %58 = vector.extract_strided_slice %32 {offsets = [18, 0], sizes = [32, 128], strides = [1, 1]} : vector<64x128xf32> to vector<32x128xf32>
    %c5 = arith.constant 5 : index
    %c0_26 = arith.constant 0 : index
    %c0_27 = arith.constant 0 : index
    %59 = vector.load %arg1[%c5, %c0_26, %c0_27] : memref<9x32x1xf32, #tpu.memory_space<vmem>>, vector<1x32x1xf32>
    %60 = vector.shape_cast %59 : vector<1x32x1xf32> to vector<32x1xf32>
    %61 = vector.broadcast %60 : vector<32x1xf32> to vector<32x128xf32>
    %62 = arith.mulf %58, %61 : vector<32x128xf32>
    %63 = vector.extract_strided_slice %32 {offsets = [22, 0], sizes = [32, 128], strides = [1, 1]} : vector<64x128xf32> to vector<32x128xf32>
    %c6 = arith.constant 6 : index
    %c0_28 = arith.constant 0 : index
    %c0_29 = arith.constant 0 : index
    %64 = vector.load %arg1[%c6, %c0_28, %c0_29] : memref<9x32x1xf32, #tpu.memory_space<vmem>>, vector<1x32x1xf32>
    %65 = vector.shape_cast %64 : vector<1x32x1xf32> to vector<32x1xf32>
    %66 = vector.broadcast %65 : vector<32x1xf32> to vector<32x128xf32>
    %67 = arith.mulf %63, %66 : vector<32x128xf32>
    %68 = vector.extract_strided_slice %32 {offsets = [24, 0], sizes = [32, 128], strides = [1, 1]} : vector<64x128xf32> to vector<32x128xf32>
    %c7 = arith.constant 7 : index
    %c0_30 = arith.constant 0 : index
    %c0_31 = arith.constant 0 : index
    %69 = vector.load %arg1[%c7, %c0_30, %c0_31] : memref<9x32x1xf32, #tpu.memory_space<vmem>>, vector<1x32x1xf32>
    %70 = vector.shape_cast %69 : vector<1x32x1xf32> to vector<32x1xf32>
    %71 = vector.broadcast %70 : vector<32x1xf32> to vector<32x128xf32>
    %72 = arith.mulf %68, %71 : vector<32x128xf32>
    %73 = vector.extract_strided_slice %32 {offsets = [26, 0], sizes = [32, 128], strides = [1, 1]} : vector<64x128xf32> to vector<32x128xf32>
    %c8 = arith.constant 8 : index
    %c0_32 = arith.constant 0 : index
    %c0_33 = arith.constant 0 : index
    %74 = vector.load %arg1[%c8, %c0_32, %c0_33] : memref<9x32x1xf32, #tpu.memory_space<vmem>>, vector<1x32x1xf32>
    %75 = vector.shape_cast %74 : vector<1x32x1xf32> to vector<32x1xf32>
    %76 = vector.broadcast %75 : vector<32x1xf32> to vector<32x128xf32>
    %77 = arith.mulf %73, %76 : vector<32x128xf32>
    %78 = tpu.concatenate %37, %42, %47, %52, %57, %62, %67, %72, %77 in 1 : vector<32x128xf32>, vector<32x128xf32>, vector<32x128xf32>, vector<32x128xf32>, vector<32x128xf32>, vector<32x128xf32>, vector<32x128xf32>, vector<32x128xf32>, vector<32x128xf32> -> vector<32x1152xf32>
    %c0_34 = arith.constant 0 : index
    %c0_35 = arith.constant 0 : index
    %79 = vector.load %arg5[%c0_34, %c0_35] : memref<1152x128xf32, #tpu.memory_space<vmem>>, vector<1152x128xf32>
    %cst_36 = arith.constant dense<0.000000e+00> : vector<32x128xf32>
    %80 = tpu.matmul %78, %79, %cst_36 {dimension_numbers = #tpu.dot_dimension_numbers<[1], [0], [0], [1], [0, 0, 1, 1], [], []>} : vector<32x1152xf32>, vector<1152x128xf32>, vector<32x128xf32> -> vector<32x128xf32>
    %cst_37 = arith.constant dense<0.000000e+00> : vector<128xf32>
    %81 = vector.multi_reduction <add>, %80, %cst_37 [0] : vector<32x128xf32> to vector<128xf32>
    %82 = vector.shape_cast %81 : vector<128xf32> to vector<1x128xf32>
    %cst_38 = arith.constant 3.125000e-02 : f32
    %83 = vector.broadcast %cst_38 : f32 to vector<1x128xf32>
    %84 = arith.mulf %82, %83 : vector<1x128xf32>
    %85 = arith.mulf %80, %80 : vector<32x128xf32>
    %cst_39 = arith.constant dense<0.000000e+00> : vector<128xf32>
    %86 = vector.multi_reduction <add>, %85, %cst_39 [0] : vector<32x128xf32> to vector<128xf32>
    %87 = vector.shape_cast %86 : vector<128xf32> to vector<1x128xf32>
    %cst_40 = arith.constant 3.125000e-02 : f32
    %88 = vector.broadcast %cst_40 : f32 to vector<1x128xf32>
    %89 = arith.mulf %87, %88 : vector<1x128xf32>
    %90 = arith.mulf %84, %84 : vector<1x128xf32>
    %91 = arith.subf %89, %90 : vector<1x128xf32>
    %cst_41 = arith.constant 0.000000e+00 : f32
    %92 = vector.broadcast %cst_41 : f32 to vector<1x128xf32>
    %93 = arith.maximumf %91, %92 : vector<1x128xf32>
    %94 = vector.broadcast %84 : vector<1x128xf32> to vector<32x128xf32>
    %95 = arith.subf %80, %94 : vector<32x128xf32>
    %cst_42 = arith.constant 9.99999974E-6 : f32
    %96 = vector.broadcast %cst_42 : f32 to vector<1x128xf32>
    %97 = arith.addf %93, %96 : vector<1x128xf32>
    %98 = math.rsqrt %97 : vector<1x128xf32>
    %99 = vector.broadcast %98 : vector<1x128xf32> to vector<32x128xf32>
    %100 = arith.mulf %95, %99 : vector<32x128xf32>
    %c0_43 = arith.constant 0 : index
    %c0_44 = arith.constant 0 : index
    %101 = vector.load %arg6[%c0_43, %c0_44] : memref<1x128xf32, #tpu.memory_space<vmem>>, vector<1x128xf32>
    %102 = vector.broadcast %101 : vector<1x128xf32> to vector<32x128xf32>
    %103 = arith.mulf %100, %102 : vector<32x128xf32>
    %c0_45 = arith.constant 0 : index
    %c0_46 = arith.constant 0 : index
    %104 = vector.load %arg7[%c0_45, %c0_46] : memref<1x128xf32, #tpu.memory_space<vmem>>, vector<1x128xf32>
    %105 = vector.broadcast %104 : vector<1x128xf32> to vector<32x128xf32>
    %106 = arith.addf %103, %105 : vector<32x128xf32>
    %cst_47 = arith.constant 0.000000e+00 : f32
    %107 = vector.broadcast %cst_47 : f32 to vector<32x128xf32>
    %108 = arith.maximumf %106, %107 : vector<32x128xf32>
    %cst_48 = arith.constant 0.000000e+00 : f32
    %109 = vector.broadcast %cst_48 : f32 to vector<16x128xf32>
    %110 = tpu.concatenate %109, %108, %109 in 0 : vector<16x128xf32>, vector<32x128xf32>, vector<16x128xf32> -> vector<64x128xf32>
    %111 = vector.extract_strided_slice %110 {offsets = [6, 0], sizes = [32, 128], strides = [1, 1]} : vector<64x128xf32> to vector<32x128xf32>
    %c0_49 = arith.constant 0 : index
    %c0_50 = arith.constant 0 : index
    %c0_51 = arith.constant 0 : index
    %112 = vector.load %arg1[%c0_49, %c0_50, %c0_51] : memref<9x32x1xf32, #tpu.memory_space<vmem>>, vector<1x32x1xf32>
    %113 = vector.shape_cast %112 : vector<1x32x1xf32> to vector<32x1xf32>
    %114 = vector.broadcast %113 : vector<32x1xf32> to vector<32x128xf32>
    %115 = arith.mulf %111, %114 : vector<32x128xf32>
    %116 = vector.extract_strided_slice %110 {offsets = [8, 0], sizes = [32, 128], strides = [1, 1]} : vector<64x128xf32> to vector<32x128xf32>
    %c1_52 = arith.constant 1 : index
    %c0_53 = arith.constant 0 : index
    %c0_54 = arith.constant 0 : index
    %117 = vector.load %arg1[%c1_52, %c0_53, %c0_54] : memref<9x32x1xf32, #tpu.memory_space<vmem>>, vector<1x32x1xf32>
    %118 = vector.shape_cast %117 : vector<1x32x1xf32> to vector<32x1xf32>
    %119 = vector.broadcast %118 : vector<32x1xf32> to vector<32x128xf32>
    %120 = arith.mulf %116, %119 : vector<32x128xf32>
    %121 = vector.extract_strided_slice %110 {offsets = [10, 0], sizes = [32, 128], strides = [1, 1]} : vector<64x128xf32> to vector<32x128xf32>
    %c2_55 = arith.constant 2 : index
    %c0_56 = arith.constant 0 : index
    %c0_57 = arith.constant 0 : index
    %122 = vector.load %arg1[%c2_55, %c0_56, %c0_57] : memref<9x32x1xf32, #tpu.memory_space<vmem>>, vector<1x32x1xf32>
    %123 = vector.shape_cast %122 : vector<1x32x1xf32> to vector<32x1xf32>
    %124 = vector.broadcast %123 : vector<32x1xf32> to vector<32x128xf32>
    %125 = arith.mulf %121, %124 : vector<32x128xf32>
    %126 = vector.extract_strided_slice %110 {offsets = [14, 0], sizes = [32, 128], strides = [1, 1]} : vector<64x128xf32> to vector<32x128xf32>
    %c3_58 = arith.constant 3 : index
    %c0_59 = arith.constant 0 : index
    %c0_60 = arith.constant 0 : index
    %127 = vector.load %arg1[%c3_58, %c0_59, %c0_60] : memref<9x32x1xf32, #tpu.memory_space<vmem>>, vector<1x32x1xf32>
    %128 = vector.shape_cast %127 : vector<1x32x1xf32> to vector<32x1xf32>
    %129 = vector.broadcast %128 : vector<32x1xf32> to vector<32x128xf32>
    %130 = arith.mulf %126, %129 : vector<32x128xf32>
    %131 = vector.extract_strided_slice %110 {offsets = [16, 0], sizes = [32, 128], strides = [1, 1]} : vector<64x128xf32> to vector<32x128xf32>
    %c4_61 = arith.constant 4 : index
    %c0_62 = arith.constant 0 : index
    %c0_63 = arith.constant 0 : index
    %132 = vector.load %arg1[%c4_61, %c0_62, %c0_63] : memref<9x32x1xf32, #tpu.memory_space<vmem>>, vector<1x32x1xf32>
    %133 = vector.shape_cast %132 : vector<1x32x1xf32> to vector<32x1xf32>
    %134 = vector.broadcast %133 : vector<32x1xf32> to vector<32x128xf32>
    %135 = arith.mulf %131, %134 : vector<32x128xf32>
    %136 = vector.extract_strided_slice %110 {offsets = [18, 0], sizes = [32, 128], strides = [1, 1]} : vector<64x128xf32> to vector<32x128xf32>
    %c5_64 = arith.constant 5 : index
    %c0_65 = arith.constant 0 : index
    %c0_66 = arith.constant 0 : index
    %137 = vector.load %arg1[%c5_64, %c0_65, %c0_66] : memref<9x32x1xf32, #tpu.memory_space<vmem>>, vector<1x32x1xf32>
    %138 = vector.shape_cast %137 : vector<1x32x1xf32> to vector<32x1xf32>
    %139 = vector.broadcast %138 : vector<32x1xf32> to vector<32x128xf32>
    %140 = arith.mulf %136, %139 : vector<32x128xf32>
    %141 = vector.extract_strided_slice %110 {offsets = [22, 0], sizes = [32, 128], strides = [1, 1]} : vector<64x128xf32> to vector<32x128xf32>
    %c6_67 = arith.constant 6 : index
    %c0_68 = arith.constant 0 : index
    %c0_69 = arith.constant 0 : index
    %142 = vector.load %arg1[%c6_67, %c0_68, %c0_69] : memref<9x32x1xf32, #tpu.memory_space<vmem>>, vector<1x32x1xf32>
    %143 = vector.shape_cast %142 : vector<1x32x1xf32> to vector<32x1xf32>
    %144 = vector.broadcast %143 : vector<32x1xf32> to vector<32x128xf32>
    %145 = arith.mulf %141, %144 : vector<32x128xf32>
    %146 = vector.extract_strided_slice %110 {offsets = [24, 0], sizes = [32, 128], strides = [1, 1]} : vector<64x128xf32> to vector<32x128xf32>
    %c7_70 = arith.constant 7 : index
    %c0_71 = arith.constant 0 : index
    %c0_72 = arith.constant 0 : index
    %147 = vector.load %arg1[%c7_70, %c0_71, %c0_72] : memref<9x32x1xf32, #tpu.memory_space<vmem>>, vector<1x32x1xf32>
    %148 = vector.shape_cast %147 : vector<1x32x1xf32> to vector<32x1xf32>
    %149 = vector.broadcast %148 : vector<32x1xf32> to vector<32x128xf32>
    %150 = arith.mulf %146, %149 : vector<32x128xf32>
    %151 = vector.extract_strided_slice %110 {offsets = [26, 0], sizes = [32, 128], strides = [1, 1]} : vector<64x128xf32> to vector<32x128xf32>
    %c8_73 = arith.constant 8 : index
    %c0_74 = arith.constant 0 : index
    %c0_75 = arith.constant 0 : index
    %152 = vector.load %arg1[%c8_73, %c0_74, %c0_75] : memref<9x32x1xf32, #tpu.memory_space<vmem>>, vector<1x32x1xf32>
    %153 = vector.shape_cast %152 : vector<1x32x1xf32> to vector<32x1xf32>
    %154 = vector.broadcast %153 : vector<32x1xf32> to vector<32x128xf32>
    %155 = arith.mulf %151, %154 : vector<32x128xf32>
    %156 = tpu.concatenate %115, %120, %125, %130, %135, %140, %145, %150, %155 in 1 : vector<32x128xf32>, vector<32x128xf32>, vector<32x128xf32>, vector<32x128xf32>, vector<32x128xf32>, vector<32x128xf32>, vector<32x128xf32>, vector<32x128xf32>, vector<32x128xf32> -> vector<32x1152xf32>
    %c0_76 = arith.constant 0 : index
    %c0_77 = arith.constant 0 : index
    %157 = vector.load %arg8[%c0_76, %c0_77] : memref<1152x128xf32, #tpu.memory_space<vmem>>, vector<1152x128xf32>
    %cst_78 = arith.constant dense<0.000000e+00> : vector<32x128xf32>
    %158 = tpu.matmul %156, %157, %cst_78 {dimension_numbers = #tpu.dot_dimension_numbers<[1], [0], [0], [1], [0, 0, 1, 1], [], []>} : vector<32x1152xf32>, vector<1152x128xf32>, vector<32x128xf32> -> vector<32x128xf32>
    %cst_79 = arith.constant dense<0.000000e+00> : vector<128xf32>
    %159 = vector.multi_reduction <add>, %158, %cst_79 [0] : vector<32x128xf32> to vector<128xf32>
    %160 = vector.shape_cast %159 : vector<128xf32> to vector<1x128xf32>
    %cst_80 = arith.constant 3.125000e-02 : f32
    %161 = vector.broadcast %cst_80 : f32 to vector<1x128xf32>
    %162 = arith.mulf %160, %161 : vector<1x128xf32>
    %163 = arith.mulf %158, %158 : vector<32x128xf32>
    %cst_81 = arith.constant dense<0.000000e+00> : vector<128xf32>
    %164 = vector.multi_reduction <add>, %163, %cst_81 [0] : vector<32x128xf32> to vector<128xf32>
    %165 = vector.shape_cast %164 : vector<128xf32> to vector<1x128xf32>
    %cst_82 = arith.constant 3.125000e-02 : f32
    %166 = vector.broadcast %cst_82 : f32 to vector<1x128xf32>
    %167 = arith.mulf %165, %166 : vector<1x128xf32>
    %168 = arith.mulf %162, %162 : vector<1x128xf32>
    %169 = arith.subf %167, %168 : vector<1x128xf32>
    %cst_83 = arith.constant 0.000000e+00 : f32
    %170 = vector.broadcast %cst_83 : f32 to vector<1x128xf32>
    %171 = arith.maximumf %169, %170 : vector<1x128xf32>
    %172 = vector.broadcast %162 : vector<1x128xf32> to vector<32x128xf32>
    %173 = arith.subf %158, %172 : vector<32x128xf32>
    %cst_84 = arith.constant 9.99999974E-6 : f32
    %174 = vector.broadcast %cst_84 : f32 to vector<1x128xf32>
    %175 = arith.addf %171, %174 : vector<1x128xf32>
    %176 = math.rsqrt %175 : vector<1x128xf32>
    %177 = vector.broadcast %176 : vector<1x128xf32> to vector<32x128xf32>
    %178 = arith.mulf %173, %177 : vector<32x128xf32>
    %c0_85 = arith.constant 0 : index
    %c0_86 = arith.constant 0 : index
    %179 = vector.load %arg9[%c0_85, %c0_86] : memref<1x128xf32, #tpu.memory_space<vmem>>, vector<1x128xf32>
    %180 = vector.broadcast %179 : vector<1x128xf32> to vector<32x128xf32>
    %181 = arith.mulf %178, %180 : vector<32x128xf32>
    %c0_87 = arith.constant 0 : index
    %c0_88 = arith.constant 0 : index
    %182 = vector.load %arg10[%c0_87, %c0_88] : memref<1x128xf32, #tpu.memory_space<vmem>>, vector<1x128xf32>
    %183 = vector.broadcast %182 : vector<1x128xf32> to vector<32x128xf32>
    %184 = arith.addf %181, %183 : vector<32x128xf32>
    %cst_89 = arith.constant 0.000000e+00 : f32
    %185 = vector.broadcast %cst_89 : f32 to vector<32x128xf32>
    %186 = arith.maximumf %184, %185 : vector<32x128xf32>
    %cst_90 = arith.constant 0.000000e+00 : f32
    %187 = vector.broadcast %cst_90 : f32 to vector<16x128xf32>
    %188 = tpu.concatenate %187, %186, %187 in 0 : vector<16x128xf32>, vector<32x128xf32>, vector<16x128xf32> -> vector<64x128xf32>
    %189 = vector.extract_strided_slice %188 {offsets = [6, 0], sizes = [32, 128], strides = [1, 1]} : vector<64x128xf32> to vector<32x128xf32>
    %c0_91 = arith.constant 0 : index
    %c0_92 = arith.constant 0 : index
    %c0_93 = arith.constant 0 : index
    %190 = vector.load %arg1[%c0_91, %c0_92, %c0_93] : memref<9x32x1xf32, #tpu.memory_space<vmem>>, vector<1x32x1xf32>
    %191 = vector.shape_cast %190 : vector<1x32x1xf32> to vector<32x1xf32>
    %192 = vector.broadcast %191 : vector<32x1xf32> to vector<32x128xf32>
    %193 = arith.mulf %189, %192 : vector<32x128xf32>
    %194 = vector.extract_strided_slice %188 {offsets = [8, 0], sizes = [32, 128], strides = [1, 1]} : vector<64x128xf32> to vector<32x128xf32>
    %c1_94 = arith.constant 1 : index
    %c0_95 = arith.constant 0 : index
    %c0_96 = arith.constant 0 : index
    %195 = vector.load %arg1[%c1_94, %c0_95, %c0_96] : memref<9x32x1xf32, #tpu.memory_space<vmem>>, vector<1x32x1xf32>
    %196 = vector.shape_cast %195 : vector<1x32x1xf32> to vector<32x1xf32>
    %197 = vector.broadcast %196 : vector<32x1xf32> to vector<32x128xf32>
    %198 = arith.mulf %194, %197 : vector<32x128xf32>
    %199 = vector.extract_strided_slice %188 {offsets = [10, 0], sizes = [32, 128], strides = [1, 1]} : vector<64x128xf32> to vector<32x128xf32>
    %c2_97 = arith.constant 2 : index
    %c0_98 = arith.constant 0 : index
    %c0_99 = arith.constant 0 : index
    %200 = vector.load %arg1[%c2_97, %c0_98, %c0_99] : memref<9x32x1xf32, #tpu.memory_space<vmem>>, vector<1x32x1xf32>
    %201 = vector.shape_cast %200 : vector<1x32x1xf32> to vector<32x1xf32>
    %202 = vector.broadcast %201 : vector<32x1xf32> to vector<32x128xf32>
    %203 = arith.mulf %199, %202 : vector<32x128xf32>
    %204 = vector.extract_strided_slice %188 {offsets = [14, 0], sizes = [32, 128], strides = [1, 1]} : vector<64x128xf32> to vector<32x128xf32>
    %c3_100 = arith.constant 3 : index
    %c0_101 = arith.constant 0 : index
    %c0_102 = arith.constant 0 : index
    %205 = vector.load %arg1[%c3_100, %c0_101, %c0_102] : memref<9x32x1xf32, #tpu.memory_space<vmem>>, vector<1x32x1xf32>
    %206 = vector.shape_cast %205 : vector<1x32x1xf32> to vector<32x1xf32>
    %207 = vector.broadcast %206 : vector<32x1xf32> to vector<32x128xf32>
    %208 = arith.mulf %204, %207 : vector<32x128xf32>
    %209 = vector.extract_strided_slice %188 {offsets = [16, 0], sizes = [32, 128], strides = [1, 1]} : vector<64x128xf32> to vector<32x128xf32>
    %c4_103 = arith.constant 4 : index
    %c0_104 = arith.constant 0 : index
    %c0_105 = arith.constant 0 : index
    %210 = vector.load %arg1[%c4_103, %c0_104, %c0_105] : memref<9x32x1xf32, #tpu.memory_space<vmem>>, vector<1x32x1xf32>
    %211 = vector.shape_cast %210 : vector<1x32x1xf32> to vector<32x1xf32>
    %212 = vector.broadcast %211 : vector<32x1xf32> to vector<32x128xf32>
    %213 = arith.mulf %209, %212 : vector<32x128xf32>
    %214 = vector.extract_strided_slice %188 {offsets = [18, 0], sizes = [32, 128], strides = [1, 1]} : vector<64x128xf32> to vector<32x128xf32>
    %c5_106 = arith.constant 5 : index
    %c0_107 = arith.constant 0 : index
    %c0_108 = arith.constant 0 : index
    %215 = vector.load %arg1[%c5_106, %c0_107, %c0_108] : memref<9x32x1xf32, #tpu.memory_space<vmem>>, vector<1x32x1xf32>
    %216 = vector.shape_cast %215 : vector<1x32x1xf32> to vector<32x1xf32>
    %217 = vector.broadcast %216 : vector<32x1xf32> to vector<32x128xf32>
    %218 = arith.mulf %214, %217 : vector<32x128xf32>
    %219 = vector.extract_strided_slice %188 {offsets = [22, 0], sizes = [32, 128], strides = [1, 1]} : vector<64x128xf32> to vector<32x128xf32>
    %c6_109 = arith.constant 6 : index
    %c0_110 = arith.constant 0 : index
    %c0_111 = arith.constant 0 : index
    %220 = vector.load %arg1[%c6_109, %c0_110, %c0_111] : memref<9x32x1xf32, #tpu.memory_space<vmem>>, vector<1x32x1xf32>
    %221 = vector.shape_cast %220 : vector<1x32x1xf32> to vector<32x1xf32>
    %222 = vector.broadcast %221 : vector<32x1xf32> to vector<32x128xf32>
    %223 = arith.mulf %219, %222 : vector<32x128xf32>
    %224 = vector.extract_strided_slice %188 {offsets = [24, 0], sizes = [32, 128], strides = [1, 1]} : vector<64x128xf32> to vector<32x128xf32>
    %c7_112 = arith.constant 7 : index
    %c0_113 = arith.constant 0 : index
    %c0_114 = arith.constant 0 : index
    %225 = vector.load %arg1[%c7_112, %c0_113, %c0_114] : memref<9x32x1xf32, #tpu.memory_space<vmem>>, vector<1x32x1xf32>
    %226 = vector.shape_cast %225 : vector<1x32x1xf32> to vector<32x1xf32>
    %227 = vector.broadcast %226 : vector<32x1xf32> to vector<32x128xf32>
    %228 = arith.mulf %224, %227 : vector<32x128xf32>
    %229 = vector.extract_strided_slice %188 {offsets = [26, 0], sizes = [32, 128], strides = [1, 1]} : vector<64x128xf32> to vector<32x128xf32>
    %c8_115 = arith.constant 8 : index
    %c0_116 = arith.constant 0 : index
    %c0_117 = arith.constant 0 : index
    %230 = vector.load %arg1[%c8_115, %c0_116, %c0_117] : memref<9x32x1xf32, #tpu.memory_space<vmem>>, vector<1x32x1xf32>
    %231 = vector.shape_cast %230 : vector<1x32x1xf32> to vector<32x1xf32>
    %232 = vector.broadcast %231 : vector<32x1xf32> to vector<32x128xf32>
    %233 = arith.mulf %229, %232 : vector<32x128xf32>
    %234 = tpu.concatenate %193, %198, %203, %208, %213, %218, %223, %228, %233 in 1 : vector<32x128xf32>, vector<32x128xf32>, vector<32x128xf32>, vector<32x128xf32>, vector<32x128xf32>, vector<32x128xf32>, vector<32x128xf32>, vector<32x128xf32>, vector<32x128xf32> -> vector<32x1152xf32>
    %c0_118 = arith.constant 0 : index
    %c0_119 = arith.constant 0 : index
    %235 = vector.load %arg11[%c0_118, %c0_119] : memref<1152x128xf32, #tpu.memory_space<vmem>>, vector<1152x128xf32>
    %cst_120 = arith.constant dense<0.000000e+00> : vector<32x128xf32>
    %236 = tpu.matmul %234, %235, %cst_120 {dimension_numbers = #tpu.dot_dimension_numbers<[1], [0], [0], [1], [0, 0, 1, 1], [], []>} : vector<32x1152xf32>, vector<1152x128xf32>, vector<32x128xf32> -> vector<32x128xf32>
    %cst_121 = arith.constant dense<0.000000e+00> : vector<128xf32>
    %237 = vector.multi_reduction <add>, %236, %cst_121 [0] : vector<32x128xf32> to vector<128xf32>
    %238 = vector.shape_cast %237 : vector<128xf32> to vector<1x128xf32>
    %cst_122 = arith.constant 3.125000e-02 : f32
    %239 = vector.broadcast %cst_122 : f32 to vector<1x128xf32>
    %240 = arith.mulf %238, %239 : vector<1x128xf32>
    %241 = arith.mulf %236, %236 : vector<32x128xf32>
    %cst_123 = arith.constant dense<0.000000e+00> : vector<128xf32>
    %242 = vector.multi_reduction <add>, %241, %cst_123 [0] : vector<32x128xf32> to vector<128xf32>
    %243 = vector.shape_cast %242 : vector<128xf32> to vector<1x128xf32>
    %cst_124 = arith.constant 3.125000e-02 : f32
    %244 = vector.broadcast %cst_124 : f32 to vector<1x128xf32>
    %245 = arith.mulf %243, %244 : vector<1x128xf32>
    %246 = arith.mulf %240, %240 : vector<1x128xf32>
    %247 = arith.subf %245, %246 : vector<1x128xf32>
    %cst_125 = arith.constant 0.000000e+00 : f32
    %248 = vector.broadcast %cst_125 : f32 to vector<1x128xf32>
    %249 = arith.maximumf %247, %248 : vector<1x128xf32>
    %250 = vector.broadcast %240 : vector<1x128xf32> to vector<32x128xf32>
    %251 = arith.subf %236, %250 : vector<32x128xf32>
    %cst_126 = arith.constant 9.99999974E-6 : f32
    %252 = vector.broadcast %cst_126 : f32 to vector<1x128xf32>
    %253 = arith.addf %249, %252 : vector<1x128xf32>
    %254 = math.rsqrt %253 : vector<1x128xf32>
    %255 = vector.broadcast %254 : vector<1x128xf32> to vector<32x128xf32>
    %256 = arith.mulf %251, %255 : vector<32x128xf32>
    %c0_127 = arith.constant 0 : index
    %c0_128 = arith.constant 0 : index
    %257 = vector.load %arg12[%c0_127, %c0_128] : memref<1x128xf32, #tpu.memory_space<vmem>>, vector<1x128xf32>
    %258 = vector.broadcast %257 : vector<1x128xf32> to vector<32x128xf32>
    %259 = arith.mulf %256, %258 : vector<32x128xf32>
    %c0_129 = arith.constant 0 : index
    %c0_130 = arith.constant 0 : index
    %260 = vector.load %arg13[%c0_129, %c0_130] : memref<1x128xf32, #tpu.memory_space<vmem>>, vector<1x128xf32>
    %261 = vector.broadcast %260 : vector<1x128xf32> to vector<32x128xf32>
    %262 = arith.addf %259, %261 : vector<32x128xf32>
    %cst_131 = arith.constant 0.000000e+00 : f32
    %263 = vector.broadcast %cst_131 : f32 to vector<32x128xf32>
    %264 = arith.maximumf %262, %263 : vector<32x128xf32>
    %265 = vector.extract_strided_slice %264 {offsets = [0, 0], sizes = [2, 128], strides = [1, 1]} : vector<32x128xf32> to vector<2x128xf32>
    %266 = vector.extract_strided_slice %264 {offsets = [2, 0], sizes = [2, 128], strides = [1, 1]} : vector<32x128xf32> to vector<2x128xf32>
    %267 = vector.extract_strided_slice %264 {offsets = [4, 0], sizes = [2, 128], strides = [1, 1]} : vector<32x128xf32> to vector<2x128xf32>
    %268 = vector.extract_strided_slice %264 {offsets = [6, 0], sizes = [2, 128], strides = [1, 1]} : vector<32x128xf32> to vector<2x128xf32>
    %269 = vector.extract_strided_slice %264 {offsets = [8, 0], sizes = [2, 128], strides = [1, 1]} : vector<32x128xf32> to vector<2x128xf32>
    %270 = vector.extract_strided_slice %264 {offsets = [10, 0], sizes = [2, 128], strides = [1, 1]} : vector<32x128xf32> to vector<2x128xf32>
    %271 = vector.extract_strided_slice %264 {offsets = [12, 0], sizes = [2, 128], strides = [1, 1]} : vector<32x128xf32> to vector<2x128xf32>
    %272 = vector.extract_strided_slice %264 {offsets = [14, 0], sizes = [2, 128], strides = [1, 1]} : vector<32x128xf32> to vector<2x128xf32>
    %273 = vector.extract_strided_slice %264 {offsets = [16, 0], sizes = [2, 128], strides = [1, 1]} : vector<32x128xf32> to vector<2x128xf32>
    %274 = vector.extract_strided_slice %264 {offsets = [18, 0], sizes = [2, 128], strides = [1, 1]} : vector<32x128xf32> to vector<2x128xf32>
    %275 = vector.extract_strided_slice %264 {offsets = [20, 0], sizes = [2, 128], strides = [1, 1]} : vector<32x128xf32> to vector<2x128xf32>
    %276 = vector.extract_strided_slice %264 {offsets = [22, 0], sizes = [2, 128], strides = [1, 1]} : vector<32x128xf32> to vector<2x128xf32>
    %277 = vector.extract_strided_slice %264 {offsets = [24, 0], sizes = [2, 128], strides = [1, 1]} : vector<32x128xf32> to vector<2x128xf32>
    %278 = vector.extract_strided_slice %264 {offsets = [26, 0], sizes = [2, 128], strides = [1, 1]} : vector<32x128xf32> to vector<2x128xf32>
    %279 = vector.extract_strided_slice %264 {offsets = [28, 0], sizes = [2, 128], strides = [1, 1]} : vector<32x128xf32> to vector<2x128xf32>
    %280 = vector.extract_strided_slice %264 {offsets = [30, 0], sizes = [2, 128], strides = [1, 1]} : vector<32x128xf32> to vector<2x128xf32>
    %281 = tpu.concatenate %265, %266, %267, %268, %269, %270, %271, %272, %273, %274, %275, %276, %277, %278, %279, %280 in 1 : vector<2x128xf32>, vector<2x128xf32>, vector<2x128xf32>, vector<2x128xf32>, vector<2x128xf32>, vector<2x128xf32>, vector<2x128xf32>, vector<2x128xf32>, vector<2x128xf32>, vector<2x128xf32>, vector<2x128xf32>, vector<2x128xf32>, vector<2x128xf32>, vector<2x128xf32>, vector<2x128xf32>, vector<2x128xf32> -> vector<2x2048xf32>
    tpu.wait_dma2 semaphore(%arg20 : memref<!tpu.dma_semaphore, #tpu.memory_space<semaphore_mem>>) src(%arg14 : memref<2048x1024xbf16, #tpu.memory_space<any>>) dst(%arg19 : memref<2048x1024xbf16, #tpu.memory_space<vmem>>)
    %282 = arith.truncf %281 : vector<2x2048xf32> to vector<2x2048xbf16>
    %c0_132 = arith.constant 0 : index
    %c0_133 = arith.constant 0 : index
    %283 = vector.load %arg19[%c0_132, %c0_133] : memref<2048x1024xbf16, #tpu.memory_space<vmem>>, vector<2048x1024xbf16>
    %cst_134 = arith.constant dense<0.000000e+00> : vector<2x1024xf32>
    %284 = tpu.matmul %282, %283, %cst_134 {dimension_numbers = #tpu.dot_dimension_numbers<[1], [0], [0], [1], [0, 0, 1, 1], [], []>} : vector<2x2048xbf16>, vector<2048x1024xbf16>, vector<2x1024xf32> -> vector<2x1024xf32>
    %c0_135 = arith.constant 0 : index
    %c0_136 = arith.constant 0 : index
    %285 = vector.load %arg15[%c0_135, %c0_136] : memref<1x1024xf32, #tpu.memory_space<vmem>>, vector<1x1024xf32>
    %286 = vector.broadcast %285 : vector<1x1024xf32> to vector<2x1024xf32>
    %287 = arith.addf %284, %286 : vector<2x1024xf32>
    %288 = arith.truncf %287 : vector<2x1024xf32> to vector<2x1024xbf16>
    %c0_137 = arith.constant 0 : index
    %c0_138 = arith.constant 0 : index
    %289 = vector.load %arg16[%c0_137, %c0_138] : memref<1024x128xbf16, #tpu.memory_space<vmem>>, vector<1024x128xbf16>
    %cst_139 = arith.constant dense<0.000000e+00> : vector<2x128xf32>
    %290 = tpu.matmul %288, %289, %cst_139 {dimension_numbers = #tpu.dot_dimension_numbers<[1], [0], [0], [1], [0, 0, 1, 1], [], []>} : vector<2x1024xbf16>, vector<1024x128xbf16>, vector<2x128xf32> -> vector<2x128xf32>
    %c0_140 = arith.constant 0 : index
    %c0_141 = arith.constant 0 : index
    %291 = vector.load %arg17[%c0_140, %c0_141] : memref<1x128xf32, #tpu.memory_space<vmem>>, vector<1x128xf32>
    %292 = vector.broadcast %291 : vector<1x128xf32> to vector<2x128xf32>
    %293 = arith.addf %290, %292 : vector<2x128xf32>
    %c0_142 = arith.constant 0 : index
    %c0_143 = arith.constant 0 : index
    %294 = vector.load %arg18[%c0_142, %c0_143] : memref<2x128xf32, #tpu.memory_space<vmem>>, vector<2x128xf32>
    tpu.vector_store %arg18[%c0_142, %c0_143], %293 {strides = array<i32>} : memref<2x128xf32, #tpu.memory_space<vmem>>, vector<2x128xf32>,
    return
  }
}

</mosaic_0001>

<bundles_post_ra>
// kernel: net_forward.1
= control target key start
LH: loop header
LB: loop body
LE: loop exit
PB: predicated region body
PF: predicated region fallthrough
CT: control target
= control target key end

     0   :  { %s10713_s0 = inlined_call_operand.vmem [shape: f32[32,32], index: 0, kind: input, shape index: {}]   ;;  %s10714_s1 = inlined_call_operand.hbm [shape: f32[9,32,1], index: 1, kind: input, shape index: {}]   ;;  %s10715_s2 = inlined_call_operand.hbm [shape: f32[32,128], index: 2, kind: input, shape index: {}]   ;;  %s10716_s3 = inlined_call_operand.hbm [shape: f32[1,128], index: 3, kind: input, shape index: {}]   ;;  %s10717_s4 = inlined_call_operand.hbm [shape: f32[1,128], index: 4, kind: input, shape index: {}]   ;;  %s10718_s5 = inlined_call_operand.hbm [shape: f32[1152,128], index: 5, kind: input, shape index: {}]   ;;  %s10719_s6 = inlined_call_operand.hbm [shape: f32[1,128], index: 6, kind: input, shape index: {}]   ;;  %s10720_s7 = inlined_call_operand.hbm [shape: f32[1,128], index: 7, kind: input, shape index: {}]   ;;  %s10721_s8 = inlined_call_operand.hbm [shape: f32[1152,128], index: 8, kind: input, shape index: {}]   ;;  %s10722_s9 = inlined_call_operand.hbm [shape: f32[1,128], index: 9, kind: input, shape index: {}]   ;;  %s10723_s10 = inlined_call_operand.hbm [shape: f32[1,128], index: 10, kind: input, shape index: {}]   ;;  %s10724_s11 = inlined_call_operand.hbm [shape: f32[1152,128], index: 11, kind: input, shape index: {}]   ;;  %s10725_s12 = inlined_call_operand.hbm [shape: f32[1,128], index: 12, kind: input, shape index: {}]   ;;  %s10726_s13 = inlined_call_operand.hbm [shape: f32[1,128], index: 13, kind: input, shape index: {}]   ;;  %s10727_s14 = inlined_call_operand.hbm [shape: bf16[2048,1024], index: 14, kind: input, shape index: {}]   ;;  %s10728_s15 = inlined_call_operand.hbm [shape: f32[1,1024], index: 15, kind: input, shape index: {}]   ;;  %s10729_s16 = inlined_call_operand.hbm [shape: bf16[1024,128], index: 16, kind: input, shape index: {}]   ;;  %s10730_s17 = inlined_call_operand.hbm [shape: f32[1,128], index: 17, kind: input, shape index: {}]   ;;  %s10731_s18 = inlined_call_operand.hbm [shape: f32[2,128], index: 18, kind: output, shape index: {}]  }
   0x1   :  { %10901 = sst [smem:[#allocation115_spill]] %s10713_s0 }
   0x2   :  { %10902 = sst [smem:[#allocation116_spill]] %s10714_s1 }
   0x3   :  { %10903 = sst [smem:[#allocation117_spill]] %s10715_s2 }
   0x4   :  { %23 = vsyncpa [#allocation5], 0 }
   0x5   :  { %24 = vsyncpa [#allocation8], 0 }
   0x6   :  { %25 = vsyncpa [#allocation11], 0 }
   0x7   :  { %26 = vsyncpa [#allocation14], 0 }
   0x8   :  { %27 = vsyncpa [#allocation17], 0 }
   0x9   :  { %28 = vsyncpa [#allocation20], 0 }
   0xa   :  { %29 = vsyncpa [#allocation23], 0 }
   0xb   :  { %30 = vsyncpa [#allocation26], 0 }
   0xc   :  { %31 = vsyncpa [#allocation29], 0 }
   0xd   :  { %32 = vsyncpa [#allocation6], 0  ;;  %s8445_s27 = smov [#allocation7]   ;;  %s8446_s29 = smov [#allocation10]  }
   0xe   :  { %s52_s28 = sshll.u32 %s8445_s27, 4  ;;  %s75_s30 = sshll.u32 %s8446_s29, 4  ;;  %s53_s28 = int_to_ptr.vmem [resolvable:$true] %s52_s28  ;;  %s8568_s30 = int_to_ptr.vmem [resolvable:$true] %s75_s30 }
   0xf   :  { %s10904_s1 = sld [smem:[#allocation117_spill]] }
  0x15   :  { %s8049_s20 = scalar_lea.hbm %s10904_s1, 512 }
  0x16   :  { %p8050_p0 = scmp.ne.s32.totalorder %s10904_s1, %s8049_s20  ;;  %p8053_p1 = scmp.lt.u32.totalorder %s8049_s20, %s10904_s1 }
  0x18   :  { %p8055_p2 = pnand %p8053_p1, %p8050_p0 }
  0x1a   :  { %8058 = shalt.err (!%p8055_p2)
}
  0x1b   :  { %s8059_s24 = scalar_lea.vmem %s53_s28, 512  ;;  %p8064_p4 = scmp.lt.s32.totalorder %s53_s28, %s53_s28 }
  0x1c   :  { %p8060_p3 = scmp.ne.s32.totalorder %s53_s28, %s8059_s24  ;;  %p8065_p5 = scmp.lt.s32.totalorder %s8059_s24, %s8059_s24 }
  0x1e   :  { %p8066_p6 = por %p8065_p5, %p8064_p4 }
  0x20   :  { %p8067_p7 = pnand %p8066_p6, %p8060_p3 }
  0x22   :  { %8070 = shalt.err (!%p8067_p7)
}
  0x23   :  { %s10735_s25 = smov 128   ;;  %s8448_s26 = smov 8  }
  0x24   :  { %58 = dma.hbm_to_vmem [thread:$0]  %s10904_s1, 512, %s53_s28, [#allocation8], %s10735_s25, %s10735_s25, %s8448_s26  }
  0x25   :  { %s8071_s20 = scalar_lea.hbm %s10717_s4, 16 }
  0x26   :  { %p8072_p8 = scmp.ne.s32.totalorder %s10717_s4, %s8071_s20  ;;  %p8075_p9 = scmp.lt.u32.totalorder %s8071_s20, %s10717_s4 }
  0x28   :  { %p8077_p10 = pnand %p8075_p9, %p8072_p8 }
  0x2a   :  { %8080 = shalt.err (!%p8077_p10)
}
  0x2b   :  { %s8081_s24 = scalar_lea.vmem %s8568_s30, 16  ;;  %s8085_s28 = scalar_lea.vmem %s8568_s30, 32 }
  0x2c   :  { %p8082_p11 = scmp.ne.s32.totalorder %s8568_s30, %s8081_s24  ;;  %p8086_p12 = scmp.lt.s32.totalorder %s8568_s30, %s8568_s30 }
  0x2d   :  { %p8087_p13 = scmp.lt.s32.totalorder %s8085_s28, %s8081_s24 }
  0x2f   :  { %p8088_p0 = por %p8087_p13, %p8086_p12 }
  0x31   :  { %p8089_p1 = pnand %p8088_p0, %p8082_p11 }
  0x33   :  { %8092 = shalt.err (!%p8089_p1)
}
  0x34   :  { %78 = dma.hbm_to_vmem [thread:$0]  %s10717_s4, 16, %s8568_s30, [#allocation11]  }
  0x35   :  { %s8449_s29 = smov [#allocation13]   ;;  %s8450_s19 = smov [#allocation16]  }
  0x36   :  { %s97_s0 = sshll.u32 %s8449_s29, 4  ;;  %s116_s20 = sshll.u32 %s8450_s19, 4  ;;  %s98_s0 = int_to_ptr.vmem [resolvable:$true] %s97_s0  ;;  %s8603_s20 = int_to_ptr.vmem [resolvable:$true] %s116_s20 }
  0x37   :  { %s8093_s2 = scalar_lea.hbm %s10719_s6, 16 }
  0x38   :  { %p8094_p2 = scmp.ne.s32.totalorder %s10719_s6, %s8093_s2  ;;  %p8097_p3 = scmp.lt.u32.totalorder %s8093_s2, %s10719_s6 }
  0x3a   :  { %p8099_p4 = pnand %p8097_p3, %p8094_p2 }
  0x3c   :  { %8102 = shalt.err (!%p8099_p4)
}
  0x3d   :  { %s8103_s4 = scalar_lea.vmem %s98_s0, 16  ;;  %s8107_s30 = scalar_lea.vmem %s98_s0, 32 }
  0x3e   :  { %p8104_p5 = scmp.ne.s32.totalorder %s98_s0, %s8103_s4  ;;  %p8108_p6 = scmp.lt.s32.totalorder %s98_s0, %s98_s0 }
  0x3f   :  { %p8109_p7 = scmp.lt.s32.totalorder %s8107_s30, %s8103_s4 }
  0x41   :  { %p8110_p8 = por %p8109_p7, %p8108_p6 }
  0x43   :  { %p8111_p9 = pnand %p8110_p8, %p8104_p5 }
  0x45   :  { %8114 = shalt.err (!%p8111_p9)
}
  0x46   :  { %100 = dma.hbm_to_vmem [thread:$0]  %s10719_s6, 16, %s98_s0, [#allocation14]  }
  0x47   :  { %s8115_s21 = scalar_lea.hbm %s10721_s8, 18432 }
  0x48   :  { %p8116_p10 = scmp.ne.s32.totalorder %s10721_s8, %s8115_s21  ;;  %p8119_p11 = scmp.lt.u32.totalorder %s8115_s21, %s10721_s8 }
  0x4a   :  { %p8121_p12 = pnand %p8119_p11, %p8116_p10 }
  0x4c   :  { %8124 = shalt.err (!%p8121_p12)
}
  0x4d   :  { %s8125_s24 = scalar_lea.vmem %s8603_s20, 18432  ;;  %p8130_p0 = scmp.lt.s32.totalorder %s8603_s20, %s8603_s20 }
  0x4e   :  { %p8126_p13 = scmp.ne.s32.totalorder %s8603_s20, %s8125_s24  ;;  %p8131_p1 = scmp.lt.s32.totalorder %s8125_s24, %s8125_s24 }
  0x50   :  { %p8132_p2 = por %p8131_p1, %p8130_p0 }
  0x52   :  { %p8133_p3 = pnand %p8132_p2, %p8126_p13 }
  0x54   :  { %8136 = shalt.err (!%p8133_p3)
}
  0x55   :  { %s10905_s6 = smov 128   ;;  %s8451_s4 = smov [#allocation19]  }
  0x56   :  { %122 = dma.hbm_to_vmem [thread:$0]  %s10721_s8, 18432, %s8603_s20, [#allocation17], %s10905_s6, %s10905_s6, %s8448_s26  }
  0x57   :  { %s139_s30 = sshll.u32 %s8451_s4, 4  ;;  %s8452_s1 = smov [#allocation22]   ;;  %s140_s30 = int_to_ptr.vmem [resolvable:$true] %s139_s30 }
  0x58   :  { %s161_s27 = sshll.u32 %s8452_s1, 4  ;;  %s8137_s21 = scalar_lea.hbm %s10723_s10, 16  ;;  %s162_s27 = int_to_ptr.vmem [resolvable:$true] %s161_s27 }
  0x59   :  { %p8138_p4 = scmp.ne.s32.totalorder %s10723_s10, %s8137_s21  ;;  %p8141_p5 = scmp.lt.u32.totalorder %s8137_s21, %s10723_s10 }
  0x5b   :  { %p8143_p6 = pnand %p8141_p5, %p8138_p4 }
  0x5d   :  { %8146 = shalt.err (!%p8143_p6)
}
  0x5e   :  { %s8147_s8 = scalar_lea.vmem %s140_s30, 16  ;;  %s8151_s20 = scalar_lea.vmem %s140_s30, 32 }
  0x5f   :  { %p8148_p7 = scmp.ne.s32.totalorder %s140_s30, %s8147_s8  ;;  %p8152_p8 = scmp.lt.s32.totalorder %s140_s30, %s140_s30 }
  0x60   :  { %p8153_p9 = scmp.lt.s32.totalorder %s8151_s20, %s8147_s8 }
  0x62   :  { %p8154_p10 = por %p8153_p9, %p8152_p8 }
  0x64   :  { %p8155_p11 = pnand %p8154_p10, %p8148_p7 }
  0x66   :  { %8158 = shalt.err (!%p8155_p11)
}
  0x67   :  { %142 = dma.hbm_to_vmem [thread:$0]  %s10723_s10, 16, %s140_s30, [#allocation20]  }
  0x68   :  { %s8159_s1 = scalar_lea.hbm %s10725_s12, 16 }
  0x69   :  { %p8160_p12 = scmp.ne.s32.totalorder %s10725_s12, %s8159_s1  ;;  %p8163_p13 = scmp.lt.u32.totalorder %s8159_s1, %s10725_s12 }
  0x6b   :  { %p8165_p0 = pnand %p8163_p13, %p8160_p12 }
  0x6d   :  { %8168 = shalt.err (!%p8165_p0)
}
  0x6e   :  { %s8169_s22 = scalar_lea.vmem %s162_s27, 16  ;;  %s8173_s2 = scalar_lea.vmem %s162_s27, 32 }
  0x6f   :  { %p8170_p1 = scmp.ne.s32.totalorder %s162_s27, %s8169_s22  ;;  %p8174_p2 = scmp.lt.s32.totalorder %s162_s27, %s162_s27 }
  0x70   :  { %p8175_p3 = scmp.lt.s32.totalorder %s8173_s2, %s8169_s22 }
  0x72   :  { %p8176_p4 = por %p8175_p3, %p8174_p2 }
  0x74   :  { %p8177_p5 = pnand %p8176_p4, %p8170_p1 }
  0x76   :  { %8180 = shalt.err (!%p8177_p5)
}
  0x77   :  { %164 = dma.hbm_to_vmem [thread:$0]  %s10725_s12, 16, %s162_s27, [#allocation23]  }
  0x78   :  { %s8453_s23 = smov [#allocation25]   ;;  %s8454_s20 = smov [#allocation4]  }
  0x79   :  { %s181_s8 = sshll.u32 %s8453_s23, 4  ;;  %s40_s24 = sshll.u32 %s8454_s20, 4  ;;  %s182_s8 = int_to_ptr.vmem [resolvable:$true] %s181_s8  ;;  %s8661_s24 = int_to_ptr.vmem [resolvable:$true] %s40_s24 }
  0x7a   :  { %s8181_s4 = scalar_lea.hbm %s10728_s15, 128 }
  0x7b   :  { %p8182_p6 = scmp.ne.s32.totalorder %s10728_s15, %s8181_s4  ;;  %p8185_p7 = scmp.lt.u32.totalorder %s8181_s4, %s10728_s15 }
  0x7d   :  { %p8187_p8 = pnand %p8185_p7, %p8182_p6 }
  0x7f   :  { %8190 = shalt.err (!%p8187_p8)
}
  0x80   :  { %s8191_s12 = scalar_lea.vmem %s182_s8, 128  ;;  %p8196_p10 = scmp.lt.s32.totalorder %s182_s8, %s182_s8 }
  0x81   :  { %p8192_p9 = scmp.ne.s32.totalorder %s182_s8, %s8191_s12  ;;  %p8197_p11 = scmp.lt.s32.totalorder %s8191_s12, %s8191_s12 }
  0x83   :  { %p8198_p12 = por %p8197_p11, %p8196_p10 }
  0x85   :  { %p8199_p13 = pnand %p8198_p12, %p8192_p9 }
  0x87   :  { %8202 = shalt.err (!%p8199_p13)
}
  0x88   :  { %184 = dma.hbm_to_vmem [thread:$0]  %s10728_s15, 128, %s182_s8, [#allocation26]  }
  0x89   :  { %s10906_s10 = sld [smem:[#allocation116_spill]] }
  0x8f   :  { %s8203_s30 = scalar_lea.hbm %s10906_s10, 4608 }
  0x90   :  { %p8204_p0 = scmp.ne.s32.totalorder %s10906_s10, %s8203_s30  ;;  %p8207_p1 = scmp.lt.u32.totalorder %s8203_s30, %s10906_s10 }
  0x92   :  { %p8209_p2 = pnand %p8207_p1, %p8204_p0 }
  0x94   :  { %8212 = shalt.err (!%p8209_p2)
}
  0x95   :  { %s8213_s4 = scalar_lea.vmem %s8661_s24, 4608  ;;  %p8218_p4 = scmp.lt.s32.totalorder %s8661_s24, %s8661_s24 }
  0x96   :  { %p8214_p3 = scmp.ne.s32.totalorder %s8661_s24, %s8213_s4  ;;  %p8219_p5 = scmp.lt.s32.totalorder %s8213_s4, %s8213_s4 }
  0x98   :  { %p8220_p6 = por %p8219_p5, %p8218_p4 }
  0x9a   :  { %p8221_p7 = pnand %p8220_p6, %p8214_p3 }
  0x9c   :  { %8224 = shalt.err (!%p8221_p7)
}
  0x9d   :  { %46 = dma.hbm_to_vmem [thread:$0]  %s10906_s10, 4608, %s8661_s24, [#allocation5], %s10905_s6, %s10905_s6, %s8448_s26  }
  0x9e   :  { %s8455_s1 = smov [#allocation9]   ;;  %s8456_s19 = smov [#allocation12]  }
  0x9f   :  { %s65_s29 = sshll.u32 %s8455_s1, 4  ;;  %s84_s21 = sshll.u32 %s8456_s19, 4  ;;  %s66_s29 = int_to_ptr.vmem [resolvable:$true] %s65_s29  ;;  %s8695_s21 = int_to_ptr.vmem [resolvable:$true] %s84_s21 }
  0xa0   :  { %s8225_s25 = scalar_lea.hbm %s10716_s3, 16 }
  0xa1   :  { %p8226_p8 = scmp.ne.s32.totalorder %s10716_s3, %s8225_s25  ;;  %p8229_p9 = scmp.lt.u32.totalorder %s8225_s25, %s10716_s3 }
  0xa3   :  { %p8231_p10 = pnand %p8229_p9, %p8226_p8 }
  0xa5   :  { %8234 = shalt.err (!%p8231_p10)
}
  0xa6   :  { %s8235_s24 = scalar_lea.vmem %s66_s29, 16  ;;  %s8239_s10 = scalar_lea.vmem %s66_s29, 32 }
  0xa7   :  { %p8236_p11 = scmp.ne.s32.totalorder %s66_s29, %s8235_s24  ;;  %p8240_p12 = scmp.lt.s32.totalorder %s66_s29, %s66_s29 }
  0xa8   :  { %p8241_p13 = scmp.lt.s32.totalorder %s8239_s10, %s8235_s24 }
  0xaa   :  { %p8242_p0 = por %p8241_p13, %p8240_p12 }
  0xac   :  { %p8243_p1 = pnand %p8242_p0, %p8236_p11 }
  0xae   :  { %8246 = shalt.err (!%p8243_p1)
}
  0xaf   :  { %68 = dma.hbm_to_vmem [thread:$0]  %s10716_s3, 16, %s66_s29, [#allocation8]  }
  0xb0   :  { %s8247_s15 = scalar_lea.hbm %s10718_s5, 18432 }
  0xb1   :  { %p8248_p2 = scmp.ne.s32.totalorder %s10718_s5, %s8247_s15  ;;  %p8251_p3 = scmp.lt.u32.totalorder %s8247_s15, %s10718_s5 }
  0xb3   :  { %p8253_p4 = pnand %p8251_p3, %p8248_p2 }
  0xb5   :  { %8256 = shalt.err (!%p8253_p4)
}
  0xb6   :  { %s8257_s27 = scalar_lea.vmem %s8695_s21, 18432  ;;  %p8262_p6 = scmp.lt.s32.totalorder %s8695_s21, %s8695_s21 }
  0xb7   :  { %p8258_p5 = scmp.ne.s32.totalorder %s8695_s21, %s8257_s27  ;;  %p8263_p7 = scmp.lt.s32.totalorder %s8257_s27, %s8257_s27 }
  0xb9   :  { %p8264_p8 = por %p8263_p7, %p8262_p6 }
  0xbb   :  { %p8265_p9 = pnand %p8264_p8, %p8258_p5 }
  0xbd   :  { %8268 = shalt.err (!%p8265_p9)
}
  0xbe   :  { %90 = dma.hbm_to_vmem [thread:$0]  %s10718_s5, 18432, %s8695_s21, [#allocation11], %s10905_s6, %s10905_s6, %s8448_s26  }
  0xbf   :  { %s8457_s25 = smov [#allocation15]   ;;  %s8458_s2 = smov [#allocation18]  }
  0xc0   :  { %s107_s22 = sshll.u32 %s8457_s25, 4  ;;  %s129_s30 = sshll.u32 %s8458_s2, 4  ;;  %s108_s22 = int_to_ptr.vmem [resolvable:$true] %s107_s22  ;;  %s130_s30 = int_to_ptr.vmem [resolvable:$true] %s129_s30 }
  0xc1   :  { %s8269_s10 = scalar_lea.hbm %s10720_s7, 16 }
  0xc2   :  { %p8270_p10 = scmp.ne.s32.totalorder %s10720_s7, %s8269_s10  ;;  %p8273_p11 = scmp.lt.u32.totalorder %s8269_s10, %s10720_s7 }
  0xc4   :  { %p8275_p12 = pnand %p8273_p11, %p8270_p10 }
  0xc6   :  { %8278 = shalt.err (!%p8275_p12)
}
  0xc7   :  { %s8279_s5 = scalar_lea.vmem %s108_s22, 16  ;;  %s8283_s21 = scalar_lea.vmem %s108_s22, 32 }
  0xc8   :  { %p8280_p13 = scmp.ne.s32.totalorder %s108_s22, %s8279_s5  ;;  %p8284_p0 = scmp.lt.s32.totalorder %s108_s22, %s108_s22 }
  0xc9   :  { %p8285_p1 = scmp.lt.s32.totalorder %s8283_s21, %s8279_s5 }
  0xcb   :  { %p8286_p2 = por %p8285_p1, %p8284_p0 }
  0xcd   :  { %p8287_p3 = pnand %p8286_p2, %p8280_p13 }
  0xcf   :  { %8290 = shalt.err (!%p8287_p3)
}
  0xd0   :  { %110 = dma.hbm_to_vmem [thread:$0]  %s10720_s7, 16, %s108_s22, [#allocation14]  }
  0xd1   :  { %s8291_s12 = scalar_lea.hbm %s10722_s9, 16 }
  0xd2   :  { %p8292_p4 = scmp.ne.s32.totalorder %s10722_s9, %s8291_s12  ;;  %p8295_p5 = scmp.lt.u32.totalorder %s8291_s12, %s10722_s9 }
  0xd4   :  { %p8297_p6 = pnand %p8295_p5, %p8292_p4 }
  0xd6   :  { %8300 = shalt.err (!%p8297_p6)
}
  0xd7   :  { %s8301_s2 = scalar_lea.vmem %s130_s30, 16  ;;  %s8305_s23 = scalar_lea.vmem %s130_s30, 32 }
  0xd8   :  { %p8302_p7 = scmp.ne.s32.totalorder %s130_s30, %s8301_s2  ;;  %p8306_p8 = scmp.lt.s32.totalorder %s130_s30, %s130_s30 }
  0xd9   :  { %p8307_p9 = scmp.lt.s32.totalorder %s8305_s23, %s8301_s2 }
  0xdb   :  { %p8308_p10 = por %p8307_p9, %p8306_p8 }
  0xdd   :  { %p8309_p11 = pnand %p8308_p10, %p8302_p7 }
  0xdf   :  { %8312 = shalt.err (!%p8309_p11)
}
  0xe0   :  { %132 = dma.hbm_to_vmem [thread:$0]  %s10722_s9, 16, %s130_s30, [#allocation17]  }
  0xe1   :  { %s8459_s24 = smov [#allocation21]   ;;  %s8460_s20 = smov [#allocation24]  }
  0xe2   :  { %s148_s10 = sshll.u32 %s8459_s24, 4  ;;  %s171_s0 = sshll.u32 %s8460_s20, 4  ;;  %s149_s10 = int_to_ptr.vmem [resolvable:$true] %s148_s10  ;;  %s172_s0 = int_to_ptr.vmem [resolvable:$true] %s171_s0 }
  0xe3   :  { %s8313_s5 = scalar_lea.hbm %s10724_s11, 18432 }
  0xe4   :  { %p8314_p12 = scmp.ne.s32.totalorder %s10724_s11, %s8313_s5  ;;  %p8317_p13 = scmp.lt.u32.totalorder %s8313_s5, %s10724_s11 }
  0xe6   :  { %p8319_p0 = pnand %p8317_p13, %p8314_p12 }
  0xe8   :  { %8322 = shalt.err (!%p8319_p0)
}
  0xe9   :  { %s8323_s9 = scalar_lea.vmem %s149_s10, 18432  ;;  %p8328_p2 = scmp.lt.s32.totalorder %s149_s10, %s149_s10 }
  0xea   :  { %p8324_p1 = scmp.ne.s32.totalorder %s149_s10, %s8323_s9  ;;  %p8329_p3 = scmp.lt.s32.totalorder %s8323_s9, %s8323_s9 }
  0xec   :  { %p8330_p4 = por %p8329_p3, %p8328_p2 }
  0xee   :  { %p8331_p5 = pnand %p8330_p4, %p8324_p1 }
  0xf0   :  { %8334 = shalt.err (!%p8331_p5)
}
  0xf1   :  { %154 = dma.hbm_to_vmem [thread:$0]  %s10724_s11, 18432, %s149_s10, [#allocation20], %s10905_s6, %s10905_s6, %s8448_s26  }
  0xf2   :  { %s8335_s3 = scalar_lea.hbm %s10726_s13, 16 }
  0xf3   :  { %p8336_p6 = scmp.ne.s32.totalorder %s10726_s13, %s8335_s3  ;;  %p8339_p7 = scmp.lt.u32.totalorder %s8335_s3, %s10726_s13 }
  0xf5   :  { %p8341_p8 = pnand %p8339_p7, %p8336_p6 }
  0xf7   :  { %8344 = shalt.err (!%p8341_p8)
}
  0xf8   :  { %s8345_s7 = scalar_lea.vmem %s172_s0, 16  ;;  %s8349_s22 = scalar_lea.vmem %s172_s0, 32 }
  0xf9   :  { %p8346_p9 = scmp.ne.s32.totalorder %s172_s0, %s8345_s7  ;;  %p8350_p10 = scmp.lt.s32.totalorder %s172_s0, %s172_s0 }
  0xfa   :  { %p8351_p11 = scmp.lt.s32.totalorder %s8349_s22, %s8345_s7 }
  0xfc   :  { %p8352_p12 = por %p8351_p11, %p8350_p10 }
  0xfe   :  { %p8353_p13 = pnand %p8352_p12, %p8346_p9 }
 0x100   :  { %8356 = shalt.err (!%p8353_p13)
}
 0x101   :  { %174 = dma.hbm_to_vmem [thread:$0]  %s10726_s13, 16, %s172_s0, [#allocation23]  }
 0x102   :  { %s8461_s10 = smov [#allocation27]   ;;  %s8357_s5 = scalar_lea.hbm %s10729_s16, 8192 }
 0x103   :  { %s190_s20 = sshll.u32 %s8461_s10, 4  ;;  %p8358_p0 = scmp.ne.s32.totalorder %s10729_s16, %s8357_s5  ;;  %s191_s20 = int_to_ptr.vmem [resolvable:$true] %s190_s20 }
 0x104   :  { %p8361_p1 = scmp.lt.u32.totalorder %s8357_s5, %s10729_s16 }
 0x106   :  { %p8363_p2 = pnand %p8361_p1, %p8358_p0 }
 0x108   :  { %8366 = shalt.err (!%p8363_p2)
}
 0x109   :  { %s8367_s9 = scalar_lea.vmem %s191_s20, 8192  ;;  %p8372_p4 = scmp.lt.s32.totalorder %s191_s20, %s191_s20 }
 0x10a   :  { %p8368_p3 = scmp.ne.s32.totalorder %s191_s20, %s8367_s9  ;;  %p8373_p5 = scmp.lt.s32.totalorder %s8367_s9, %s8367_s9 }
 0x10c   :  { %p8374_p6 = por %p8373_p5, %p8372_p4 }
 0x10e   :  { %p8375_p7 = pnand %p8374_p6, %p8368_p3 }
 0x110   :  { %8378 = shalt.err (!%p8375_p7)
}
 0x111   :  { %s8462_s13 = smov 64   ;;  %s8463_s0 = smov 4  }
 0x112   :  { %196 = dma.hbm_to_vmem [thread:$0]  %s10729_s16, 8192, %s191_s20, [#allocation26], %s8462_s13, %s8462_s13, %s8463_s0  }
 0x113   :  { %s8464_s12 = smov [#allocation28]   ;;  %s8379_s25 = scalar_lea.hbm %s10730_s17, 16 }
 0x114   :  { %s203_s27 = sshll.u32 %s8464_s12, 4  ;;  %p8380_p8 = scmp.ne.s32.totalorder %s10730_s17, %s8379_s25  ;;  %s204_s27 = int_to_ptr.vmem [resolvable:$true] %s203_s27 }
 0x115   :  { %p8383_p9 = scmp.lt.u32.totalorder %s8379_s25, %s10730_s17 }
 0x117   :  { %p8385_p10 = pnand %p8383_p9, %p8380_p8 }
 0x119   :  { %8388 = shalt.err (!%p8385_p10)
}
 0x11a   :  { %s8389_s11 = scalar_lea.vmem %s204_s27, 16  ;;  %s8393_s16 = scalar_lea.vmem %s204_s27, 32 }
 0x11b   :  { %p8390_p11 = scmp.ne.s32.totalorder %s204_s27, %s8389_s11  ;;  %p8394_p12 = scmp.lt.s32.totalorder %s204_s27, %s204_s27 }
 0x11c   :  { %p8395_p13 = scmp.lt.s32.totalorder %s8393_s16, %s8389_s11 }
 0x11e   :  { %p8396_p0 = por %p8395_p13, %p8394_p12 }
 0x120   :  { %p8397_p1 = pnand %p8396_p0, %p8390_p11 }
 0x122   :  { %8400 = shalt.err (!%p8397_p1)
}
 0x123   :  { %206 = dma.hbm_to_vmem [thread:$0]  %s10730_s17, 16, %s204_s27, [#allocation29]  }
 0x124   :  { %8423 = dma.done.wait [#allocation5], 4608  }
 0x125   :  { %8424 = vsyncadd [#allocation5], 4294962688 }
 0x126   :  { %8425 = dma.done.wait [#allocation8], 528  }
 0x127   :  { %8426 = vsyncadd [#allocation8], 4294966768 }
 0x128   :  { %8427 = dma.done.wait [#allocation11], 18448  }
 0x129   :  { %8428 = vsyncadd [#allocation11], 4294948848 }
 0x12a   :  { %8429 = dma.done.wait [#allocation14], 32  }
 0x12b   :  { %8430 = vsyncadd [#allocation14], 4294967264 }
 0x12c   :  { %8431 = dma.done.wait [#allocation17], 18448  }
 0x12d   :  { %8432 = vsyncadd [#allocation17], 4294948848 }
 0x12e   :  { %8433 = dma.done.wait [#allocation20], 18448  }
 0x12f   :  { %8434 = vsyncadd [#allocation20], 4294948848 }
 0x130   :  { %8435 = dma.done.wait [#allocation23], 32  }
 0x131   :  { %8436 = vsyncadd [#allocation23], 4294967264 }
 0x132   :  { %8437 = dma.done.wait [#allocation26], 8320  }
 0x133   :  { %8438 = vsyncadd [#allocation26], 4294958976 }
 0x134   :  { %8439 = dma.done.wait [#allocation29], 16  }
 0x135   :  { %8440 = vsyncadd [#allocation29], 4294967280  ;;  %s260_s20 = sld [smem:[#allocation0]]   ;;  %s8465_s17 = smov 1024   ;;  %v8466_v0 = vmov 0   ;;  %vm299_vm0 = vcmask 261120  }
 0x136   :  { %272 = sst [smem:[#allocation32]] %s8465_s17  ;;  %7975 = vset.pattern.permute.xlu0 %v8466_v0  ;;  %7976 = vset.pattern.permute.xlu1 %v8466_v0  ;;  %s8467_s28 = smov [#allocation2]   ;;  %vm480_vm1 = vcmask 1045504   ;;  %vm548_vm2 = vcmask 1041408   ;;  %vm792_vm3 = vcmask 1043456  }
 0x137   :  { %274 = sst [smem:[#allocation32 + $0x1]] %s8465_s17  ;;  %s268_s4 = sshll.u32 %s8467_s28, 4  ;;  %s269_s4 = int_to_ptr.vmem [resolvable:$true] %s268_s4 }
 0x138   :  { %276 = sst [smem:[#allocation32 + $0x2]] %s8448_s26  ;;  %s8468_s5 = smov 2  }
 0x139   :  { %278 = sst [smem:[#allocation32 + $0x3]] %s8462_s13  ;;  %s8469_s15 = smov 512  }
 0x13a   :  { %280 = sst [smem:[#allocation32 + $0x4]] %s10905_s6  ;;  %s8470_s1 = smov [#allocation3]  }
 0x13b   :  { %282 = sst [smem:[#allocation32 + $0x5]] %s8468_s5  ;;  %s6447_s21 = sshll.u32 %s260_s20, 26 }
 0x13c   :  { %284 = sst [smem:[#allocation32 + $0x6]] %s8469_s15  ;;  %s6448_s8 = sadd.s32 134217728, %s6447_s21 }
 0x13d   :  { %286 = sst [smem:[#allocation32 + $0x7]] %s8462_s13  ;;  %s8471_s9 = smov [#allocation31]  }
 0x13e   :  { %288 = sst [smem:[#allocation32 + $0x8]] %s8463_s0 }
 0x13f   :  { %290 = dma.general %s10727_s14, 131072, %s269_s4, %s8470_s1, %s8471_s9, [#allocation32], %s6448_s8, 0  }
 0x140   :  { %v295_v1 = vld [vmem:[#allocation7] sm:$0xff]  ;;  %v296_v2 = vld [vmem:[#allocation7 + $0x8] sm:$0xff]  ;;  %v297_v3 = vld [vmem:[#allocation7 + $0x10] sm:$0xff]  ;;  %s10907_s12 = sld [smem:[#allocation115_spill]] }
 0x141   :  { %v7339_v4 = vpack.c.bf16 %v296_v2, %v295_v1  ;;  %v298_v5 = vld [vmem:[#allocation7 + $0x18] sm:$0xff]  ;;  %v499_v8 = vld [vmem:[#allocation4 + $0x20] sm:$0xff]  ;;  %v500_v10 = vld [vmem:[#allocation4 + $0x28] sm:$0xff] }
 0x142   :  { %v7343_v7 = vpack.c.bf16 %v298_v5, %v297_v3  ;;  %505 = vperm.xlu0 %7975, %v499_v8   ;;  %v460_v9 = vld [vmem:[#allocation4] sm:$0xff]  ;;  %v461_v11 = vld [vmem:[#allocation4 + $0x8] sm:$0xff]  ;;  %v501_v13 = vld [vmem:[#allocation4 + $0x30] sm:$0xff] }
 0x143   :  { %7340 = vmatprep.subr.bf16.mxu0 %v7339_v4  ;;  %466 = vperm.xlu1 %7976, %v460_v9   ;;  %v528_v15 = vld [vmem:[#allocation4 + $0x40] sm:$0xff]  ;;  %v529_v17 = vld [vmem:[#allocation4 + $0x48] sm:$0xff]  ;;  %v462_v18 = vld [vmem:[#allocation4 + $0x10] sm:$0xff] }
 0x144   :  { %7342 = vmatpush3.bf16.msra.mxu0 %v7339_v4  ;;  %v567_v19 = vld [vmem:[#allocation4 + $0x60] sm:$0xff]  ;;  %v568_v20 = vld [vmem:[#allocation4 + $0x68] sm:$0xff]  ;;  %v502_v21 = vld [vmem:[#allocation4 + $0x38] sm:$0xff] }
 0x145   :  { %7344 = vmatprep.subr.bf16.mxu0 %v7343_v7  ;;  %v463_v22 = vld [vmem:[#allocation4 + $0x18] sm:$0xff]  ;;  %v634_v23 = vld [vmem:[#allocation4 + $0xa0] sm:$0xff]  ;;  %v635_v24 = vld [vmem:[#allocation4 + $0xa8] sm:$0xff] }
 0x146   :  { %v291_v6 = vld [vmem:[%s10907_s12] sm:$0xff]  ;;  %510 = vperm.xlu0 %7975, %v500_v10   ;;  %v292_v12 = vld [vmem:[%s10907_s12 + $0x8] sm:$0xff]  ;;  %v293_v14 = vld [vmem:[%s10907_s12 + $0x10] sm:$0xff] }
 0x147   :  { %7219 = vmatprep.mubr.msk.f32.mxu0 %vm299_vm0, %v291_v6  ;;  %470 = vperm.xlu1 %7976, %v461_v11   ;;  %v294_v16 = vld [vmem:[%s10907_s12 + $0x18] sm:$0xff]  ;;  %v605_v25 = vld [vmem:[#allocation4 + $0x80] sm:$0xff]  ;;  %v606_v26 = vld [vmem:[#allocation4 + $0x88] sm:$0xff] }
 0x148   :  { %7346 = vmatpush3.bf16.msra.mxu0 %v7343_v7  ;;  %v530_v27 = vld [vmem:[#allocation4 + $0x50] sm:$0xff]  ;;  %v531_v29 = vld [vmem:[#allocation4 + $0x58] sm:$0xff]  ;;  %v710_v34 = vld [vmem:[#allocation4 + $0xe0] sm:$0xff] }
 0x149   :  { %v569_v28 = vld [vmem:[#allocation4 + $0x70] sm:$0xff]  ;;  %v570_v30 = vld [vmem:[#allocation4 + $0x78] sm:$0xff]  ;;  %v711_v35 = vld [vmem:[#allocation4 + $0xe8] sm:$0xff] }
 0x14a   :  { %515 = vperm.xlu0 %7975, %v501_v13   ;;  %v636_v31 = vld [vmem:[#allocation4 + $0xb0] sm:$0xff]  ;;  %v637_v33 = vld [vmem:[#allocation4 + $0xb8] sm:$0xff]  ;;  %v672_v36 = vld [vmem:[#allocation4 + $0xc0] sm:$0xff] }
 0x14b   :  { %7220 = vmatmul.mubr.msk.f32.vlgmr.msra.gmra.mrb[0].mxu0 %vm299_vm0, %v292_v12  ;;  %534 = vperm.xlu1 %7976, %v528_v15   ;;  %v607_v32 = vld [vmem:[#allocation4 + $0x90] sm:$0xff]  ;;  %v673_v37 = vld [vmem:[#allocation4 + $0xc8] sm:$0xff]  ;;  %v608_v38 = vld [vmem:[#allocation4 + $0x98] sm:$0xff] }
 0x14c   :  { %7222 = vmatprep.mubr.msk.f32.mxu0 %vm299_vm0, %v293_v14  ;;  %v712_v39 = vld [vmem:[#allocation4 + $0xf0] sm:$0xff]  ;;  %v739_v41 = vld [vmem:[#allocation4 + $0x100] sm:$0xff]  ;;  %v740_v42 = vld [vmem:[#allocation4 + $0x108] sm:$0xff] }
 0x14d   :  { %v674_v40 = vld [vmem:[#allocation4 + $0xd0] sm:$0xff]  ;;  %v713_v43 = vld [vmem:[#allocation4 + $0xf8] sm:$0xff]  ;;  %v900_v47 = vld [vmem:[#allocation12 + $0x180] sm:$0xff] }
 0x14e   :  { %538 = vperm.xlu0 %7975, %v529_v17   ;;  %v741_v44 = vld [vmem:[#allocation4 + $0x110] sm:$0xff]  ;;  %v675_v45 = vld [vmem:[#allocation4 + $0xd8] sm:$0xff]  ;;  %v868_v50 = vld [vmem:[#allocation12 + $0x80] sm:$0xff] }
 0x14f   :  { %7223 = vmatmul.mubr.msk.f32.gmra.mrb[2].mxu0 %vm299_vm0, %v294_v16  ;;  %474 = vperm.xlu1 %7976, %v462_v18   ;;  %v742_v46 = vld [vmem:[#allocation4 + $0x118] sm:$0xff]  ;;  %v901_v48 = vld [vmem:[#allocation12 + $0x188] sm:$0xff]  ;;  %v884_v52 = vld [vmem:[#allocation12 + $0x100] sm:$0xff] }
 0x150   :  { %v7379_v49 = vpack.c.bf16 %v901_v48, %v900_v47  ;;  %v869_v51 = vld [vmem:[#allocation12 + $0x88] sm:$0xff]  ;;  %v852_v55 = vld [vmem:[#allocation12] sm:$0xff]  ;;  %v902_v59 = vld [vmem:[#allocation12 + $0x190] sm:$0xff] }
 0x151   :  { %v7347_v53 = vpack.c.bf16 %v869_v51, %v868_v50  ;;  %v885_v54 = vld [vmem:[#allocation12 + $0x108] sm:$0xff]  ;;  %v903_v60 = vld [vmem:[#allocation12 + $0x198] sm:$0xff]  ;;  %v870_v62 = vld [vmem:[#allocation12 + $0x90] sm:$0xff] }
 0x152   :  { %573 = vperm.xlu0 %7975, %v567_v19   ;;  %v853_v56 = vld [vmem:[#allocation12 + $0x8] sm:$0xff]  ;;  %7380 = vmatprep.subr.bf16.mxu0 %v7379_v49  ;;  %v7381_v57 = vpack.c.bf16 %v885_v54, %v884_v52  ;;  %v7383_v61 = vpack.c.bf16 %v903_v60, %v902_v59  ;;  %v871_v63 = vld [vmem:[#allocation12 + $0x98] sm:$0xff]  ;;  %v886_v0 = vld [vmem:[#allocation12 + $0x110] sm:$0xff] }
 0x153   :  { %577 = vperm.xlu1 %7976, %v568_v20   ;;  %v7349_v58 = vpack.c.bf16 %v853_v56, %v852_v55  ;;  %7348 = vmatprep.subr.bf16.mxu1 %v7347_v53  ;;  %v7351_v1 = vpack.c.bf16 %v871_v63, %v870_v62  ;;  %v887_v2 = vld [vmem:[#allocation12 + $0x118] sm:$0xff]  ;;  %v854_v3 = vld [vmem:[#allocation12 + $0x10] sm:$0xff]  ;;  %v904_v7 = vld [vmem:[#allocation12 + $0x1a0] sm:$0xff] }
 0x154   :  { %7382 = vmatpush3.bf16.msra.mxu0 %v7381_v57  ;;  %v855_v4 = vld [vmem:[#allocation12 + $0x18] sm:$0xff]  ;;  %v7385_v5 = vpack.c.bf16 %v887_v2, %v886_v0  ;;  %v905_v8 = vld [vmem:[#allocation12 + $0x1a8] sm:$0xff]  ;;  %v872_v10 = vld [vmem:[#allocation12 + $0xa0] sm:$0xff] }
 0x155   :  { %7350 = vmatpush3.bf16.msra.mxu1 %v7349_v58  ;;  %7384 = vmatprep.subr.bf16.mxu0 %v7383_v61  ;;  %v7353_v6 = vpack.c.bf16 %v855_v4, %v854_v3  ;;  %v7387_v9 = vpack.c.bf16 %v905_v8, %v904_v7  ;;  %v873_v11 = vld [vmem:[#allocation12 + $0xa8] sm:$0xff]  ;;  %v888_v12 = vld [vmem:[#allocation12 + $0x120] sm:$0xff]  ;;  %v906_v19 = vld [vmem:[#allocation12 + $0x1b0] sm:$0xff] }
 0x156   :  { %520 = vperm.xlu0 %7975, %v502_v21   ;;  %7352 = vmatprep.subr.bf16.mxu1 %v7351_v1  ;;  %v7355_v13 = vpack.c.bf16 %v873_v11, %v872_v10  ;;  %v889_v14 = vld [vmem:[#allocation12 + $0x128] sm:$0xff]  ;;  %v856_v15 = vld [vmem:[#allocation12 + $0x20] sm:$0xff]  ;;  %v907_v20 = vld [vmem:[#allocation12 + $0x1b8] sm:$0xff] }
 0x157   :  { %478 = vperm.xlu1 %7976, %v463_v22   ;;  %v857_v16 = vld [vmem:[#allocation12 + $0x28] sm:$0xff]  ;;  %v7389_v17 = vpack.c.bf16 %v889_v14, %v888_v12  ;;  %v7391_v21 = vpack.c.bf16 %v907_v20, %v906_v19  ;;  %v874_v22 = vld [vmem:[#allocation12 + $0xb0] sm:$0xff]  ;;  %v879_v47 = vld [vmem:[#allocation12 + $0xd8] sm:$0xff] }
 0x158   :  { %7386 = vmatpush3.bf16.msra.mxu0 %v7385_v5  ;;  %v7357_v18 = vpack.c.bf16 %v857_v16, %v856_v15  ;;  %v894_v48 = vld [vmem:[#allocation12 + $0x150] sm:$0xff]  ;;  %v895_v50 = vld [vmem:[#allocation12 + $0x158] sm:$0xff]  ;;  %v912_v55 = vld [vmem:[#allocation12 + $0x1e0] sm:$0xff] }
 0x159   :  { %7354 = vmatpush3.bf16.msra.mxu1 %v7353_v6  ;;  %7388 = vmatprep.subr.bf16.mxu0 %v7387_v9  ;;  %v862_v51 = vld [vmem:[#allocation12 + $0x50] sm:$0xff]  ;;  %v863_v52 = vld [vmem:[#allocation12 + $0x58] sm:$0xff]  ;;  %v7401_v53 = vpack.c.bf16 %v895_v50, %v894_v48  ;;  %v913_v56 = vld [vmem:[#allocation12 + $0x1e8] sm:$0xff] }
 0x15a   :  { %640 = vperm.xlu0 %7975, %v634_v23   ;;  %7356 = vmatprep.subr.bf16.mxu1 %v7355_v13  ;;  %v875_v23 = vld [vmem:[#allocation12 + $0xb8] sm:$0xff]  ;;  %v7369_v54 = vpack.c.bf16 %v863_v52, %v862_v51  ;;  %v7403_v57 = vpack.c.bf16 %v913_v56, %v912_v55  ;;  %v880_v58 = vld [vmem:[#allocation12 + $0xe0] sm:$0xff]  ;;  %v881_v59 = vld [vmem:[#allocation12 + $0xe8] sm:$0xff] }
 0x15b   :  { %644 = vperm.xlu1 %7976, %v635_v24   ;;  %v890_v24 = vld [vmem:[#allocation12 + $0x130] sm:$0xff]  ;;  %v896_v60 = vld [vmem:[#allocation12 + $0x160] sm:$0xff]  ;;  %v7371_v61 = vpack.c.bf16 %v881_v59, %v880_v58  ;;  %v897_v62 = vld [vmem:[#allocation12 + $0x168] sm:$0xff] }
 0x15c   :  { %7390 = vmatpush3.bf16.msra.mxu0 %v7389_v17  ;;  %v864_v63 = vld [vmem:[#allocation12 + $0x60] sm:$0xff]  ;;  %v865_v0 = vld [vmem:[#allocation12 + $0x68] sm:$0xff]  ;;  %v7405_v1 = vpack.c.bf16 %v897_v62, %v896_v60  ;;  %v914_v3 = vld [vmem:[#allocation12 + $0x1f0] sm:$0xff] }
 0x15d   :  { %7358 = vmatpush3.bf16.msra.mxu1 %v7357_v18  ;;  %7392 = vmatprep.subr.bf16.mxu0 %v7391_v21  ;;  %v7373_v2 = vpack.c.bf16 %v865_v0, %v864_v63  ;;  %v915_v4 = vld [vmem:[#allocation12 + $0x1f8] sm:$0xff]  ;;  %v882_v6 = vld [vmem:[#allocation12 + $0xf0] sm:$0xff]  ;;  %v964_v15 = vld [vmem:[#allocation12 + $0x380] sm:$0xff] }
 0x15e   :  { %611 = vperm.xlu0 %7975, %v605_v25   ;;  %v7359_v25 = vpack.c.bf16 %v875_v23, %v874_v22  ;;  %v7407_v5 = vpack.c.bf16 %v915_v4, %v914_v3  ;;  %v883_v7 = vld [vmem:[#allocation12 + $0xf8] sm:$0xff]  ;;  %v898_v8 = vld [vmem:[#allocation12 + $0x170] sm:$0xff]  ;;  %v965_v16 = vld [vmem:[#allocation12 + $0x388] sm:$0xff] }
 0x15f   :  { %616 = vperm.xlu1 %7976, %v606_v26   ;;  %v891_v26 = vld [vmem:[#allocation12 + $0x138] sm:$0xff]  ;;  %v7375_v9 = vpack.c.bf16 %v883_v7, %v882_v6  ;;  %v866_v11 = vld [vmem:[#allocation12 + $0x70] sm:$0xff]  ;;  %v7443_v17 = vpack.c.bf16 %v965_v16, %v964_v15  ;;  %v932_v18 = vld [vmem:[#allocation12 + $0x280] sm:$0xff] }
 0x160   :  { %7360 = vmatprep.subr.bf16.mxu1 %v7359_v25  ;;  %v899_v10 = vld [vmem:[#allocation12 + $0x178] sm:$0xff]  ;;  %v933_v19 = vld [vmem:[#allocation12 + $0x288] sm:$0xff] }
 0x161   :  { %v867_v12 = vld [vmem:[#allocation12 + $0x78] sm:$0xff]  ;;  %v7409_v13 = vpack.c.bf16 %v899_v10, %v898_v8  ;;  %v7411_v21 = vpack.c.bf16 %v933_v19, %v932_v18 }
 0x162   :  { %542 = vperm.xlu0 %7975, %v530_v27   ;;  %v858_v27 = vld [vmem:[#allocation12 + $0x30] sm:$0xff]  ;;  %v7377_v14 = vpack.c.bf16 %v867_v12, %v866_v11 }
 0x163   :  { %581 = vperm.xlu1 %7976, %v569_v28   ;;  %v859_v28 = vld [vmem:[#allocation12 + $0x38] sm:$0xff] }
 0x166   :  { %546 = vperm.xlu0 %7975, %v531_v29   ;;  %v7393_v29 = vpack.c.bf16 %v891_v26, %v890_v24 }
 0x167   :  { %585 = vperm.xlu1 %7976, %v570_v30   ;;  %v7361_v30 = vpack.c.bf16 %v859_v28, %v858_v27 }
 0x168   :  { %7394 = vmatpush3.bf16.msra.mxu0 %v7393_v29 }
 0x169   :  { %7362 = vmatpush3.bf16.msra.mxu1 %v7361_v30 }
 0x16a   :  { %648 = vperm.xlu0 %7975, %v636_v31   ;;  %v908_v31 = vld [vmem:[#allocation12 + $0x1c0] sm:$0xff] }
 0x16b   :  { %621 = vperm.xlu1 %7976, %v607_v32   ;;  %v909_v32 = vld [vmem:[#allocation12 + $0x1c8] sm:$0xff] }
 0x16e   :  { %652 = vperm.xlu0 %7975, %v637_v33   ;;  %v7395_v33 = vpack.c.bf16 %v909_v32, %v908_v31 }
 0x16f   :  { %716 = vperm.xlu1 %7976, %v710_v34   ;;  %v876_v34 = vld [vmem:[#allocation12 + $0xc0] sm:$0xff] }
 0x170   :  { %7396 = vmatprep.subr.bf16.mxu0 %v7395_v33 }
 0x172   :  { %721 = vperm.xlu0 %7975, %v711_v35   ;;  %v877_v35 = vld [vmem:[#allocation12 + $0xc8] sm:$0xff] }
 0x173   :  { %678 = vperm.xlu1 %7976, %v672_v36   ;;  %v7363_v36 = vpack.c.bf16 %v877_v35, %v876_v34 }
 0x175   :  { %7364 = vmatprep.subr.bf16.mxu1 %v7363_v36 }
 0x176   :  { %682 = vperm.xlu0 %7975, %v673_v37   ;;  %v892_v37 = vld [vmem:[#allocation12 + $0x140] sm:$0xff] }
 0x177   :  { %626 = vperm.xlu1 %7976, %v608_v38   ;;  %v893_v38 = vld [vmem:[#allocation12 + $0x148] sm:$0xff] }
 0x17a   :  { %726 = vperm.xlu0 %7975, %v712_v39   ;;  %v860_v39 = vld [vmem:[#allocation12 + $0x40] sm:$0xff] }
 0x17b   :  { %686 = vperm.xlu1 %7976, %v674_v40   ;;  %v7397_v40 = vpack.c.bf16 %v893_v38, %v892_v37 }
 0x17d   :  { %7398 = vmatpush3.bf16.msra.mxu0 %v7397_v40 }
 0x17e   :  { %745 = vperm.xlu0 %7975, %v739_v41   ;;  %v861_v41 = vld [vmem:[#allocation12 + $0x48] sm:$0xff] }
 0x17f   :  { %749 = vperm.xlu1 %7976, %v740_v42   ;;  %v7365_v42 = vpack.c.bf16 %v861_v41, %v860_v39 }
 0x181   :  { %7366 = vmatpush3.bf16.msra.mxu1 %v7365_v42 }
 0x182   :  { %731 = vperm.xlu0 %7975, %v713_v43   ;;  %v910_v43 = vld [vmem:[#allocation12 + $0x1d0] sm:$0xff] }
 0x183   :  { %753 = vperm.xlu1 %7976, %v741_v44   ;;  %v911_v44 = vld [vmem:[#allocation12 + $0x1d8] sm:$0xff] }
 0x186   :  { %690 = vperm.xlu0 %7975, %v675_v45   ;;  %v7399_v45 = vpack.c.bf16 %v911_v44, %v910_v43 }
 0x187   :  { %757 = vperm.xlu1 %7976, %v742_v46   ;;  %v878_v46 = vld [vmem:[#allocation12 + $0xd0] sm:$0xff] }
 0x188   :  { %v7367_v49 = vpack.c.bf16 %v879_v47, %v878_v46  ;;  %7400 = vmatprep.subr.bf16.mxu0 %v7399_v45 }
 0x189   :  { %7402 = vmatpush3.bf16.msra.mxu0 %v7401_v53 }
 0x18a   :  { %7368 = vmatprep.subr.bf16.mxu1 %v7367_v49  ;;  %7404 = vmatprep.subr.bf16.mxu0 %v7403_v57 }
 0x18b   :  { %7370 = vmatpush3.bf16.msra.mxu1 %v7369_v54 }
 0x18c   :  { %7372 = vmatprep.subr.bf16.mxu1 %v7371_v61 }
 0x18d   :  { %7406 = vmatpush3.bf16.msra.mxu0 %v7405_v1 }
 0x18e   :  { %7408 = vmatprep.subr.bf16.mxu0 %v7407_v5 }
 0x18f   :  { %7374 = vmatpush3.bf16.msra.mxu1 %v7373_v2 }
 0x190   :  { %7376 = vmatprep.subr.bf16.mxu1 %v7375_v9 }
 0x191   :  { %7410 = vmatpush3.bf16.msra.mxu0 %v7409_v13 }
 0x192   :  { %7444 = vmatprep.subr.bf16.mxu0 %v7443_v17 }
 0x193   :  { %7378 = vmatpush3.bf16.msra.mxu1 %v7377_v14 }
 0x194   :  { %7412 = vmatprep.subr.bf16.mxu1 %v7411_v21 }
 0x1c1   :  { %v506_v22 = vpop.permute.xlu0 %505 }
 0x1c2   :  { %v8831_v20 = vpop.permute.xlu1 %466  ;;  %v523_v16 = vmul.f32 0.0, %v506_v22 }
 0x1c3   :  { %v481_v3 = vrot.slane %v8831_v20, 2 }
 0x1c5   :  { %v8835_v24 = vpop.permute.xlu0 %510  ;;  %v8912_v17 = vmul.f32 0.0, %v481_v3 }
 0x1c6   :  { %v8833_v23 = vpop.permute.xlu1 %470  ;;  %10908 = vst [vmem:[#allocation44_spill] sm:$0xff] %v8835_v24 }
 0x1c7   :  { %v482_v4 = vrot.slane %v8833_v23, 2  ;;  %v9007_v23 = vld [vmem:[#allocation12 + $0x2a0] sm:$0xff] }
 0x1c9   :  { %v8839_v26 = vpop.permute.xlu0 %515  ;;  %v483_v10 = vsel %vm480_vm1, %v481_v3, %v482_v4 }
 0x1ca   :  { %v8837_v25 = vpop.permute.xlu1 %534  ;;  %10909 = vst [vmem:[#allocation45_spill] sm:$0xff] %v8839_v26  ;;  %v494_v18 = vmul.f32 0.0, %v483_v10  ;;  %v8953_v10 = vld [vmem:[#allocation12 + $0x208] sm:$0xff] }
 0x1cb   :  { %v549_v19 = vrot.slane %v8837_v25, 6 }
 0x1cd   :  { %v8843_v28 = vpop.permute.xlu0 %538 }
 0x1ce   :  { %v8841_v27 = vpop.permute.xlu1 %474 }
 0x1d1   :  { %v8847_v30 = vpop.permute.xlu0 %573 }
 0x1d2   :  { %v8845_v29 = vpop.permute.xlu1 %577 }
 0x1d5   :  { %v8851_v32 = vpop.permute.xlu0 %520 }
 0x1d6   :  { %v8849_v31 = vpop.permute.xlu1 %478  ;;  %10910 = vst [vmem:[#allocation46_spill] sm:$0xff] %v8851_v32 }
 0x1d9   :  { %v8855_v34 = vpop.permute.xlu0 %640 }
 0x1da   :  { %v8853_v33 = vpop.permute.xlu1 %644  ;;  %v8944_v3 = vrot.slane %v8855_v34, 6 }
 0x1dc   :  { %10922 = vst [vmem:[#allocation58_spill] sm:$0xff] %v8944_v3 }
 0x1dd   :  { %v8859_v36 = vpop.permute.xlu0 %611 }
 0x1de   :  { %v8857_v35 = vpop.permute.xlu1 %616  ;;  %10912 = vst [vmem:[#allocation48_spill] sm:$0xff] %v8859_v36 }
 0x1df   :  { %10911 = vst [vmem:[#allocation47_spill] sm:$0xff] %v8857_v35  ;;  %v9017_v35 = vld [vmem:[#allocation12 + $0x228] sm:$0xff] }
 0x1e0   :  { %10943 = vst [vmem:[#allocation79_spill] sm:$0xff] %v9017_v35  ;;  %v9123_v35 = vld [vmem:[#allocation12 + $0x2d0] sm:$0xff] }
 0x1e1   :  { %v8863_v38 = vpop.permute.xlu0 %542  ;;  %10965 = vst [vmem:[#allocation97_spill] sm:$0xff] %v9123_v35 }
 0x1e2   :  { %v8861_v37 = vpop.permute.xlu1 %581 }
 0x1e5   :  { %v8867_v40 = vpop.permute.xlu0 %546 }
 0x1e6   :  { %v8865_v39 = vpop.permute.xlu1 %585 }
 0x1e9   :  { %v8877_v45 = vpop.permute.xlu0 %648 }
 0x1ea   :  { %v8869_v41 = vpop.permute.xlu1 %621 }
 0x1eb   :  { %10913 = vst [vmem:[#allocation49_spill] sm:$0xff] %v8869_v41 }
 0x1ed   :  { %v8892_v54 = vpop.permute.xlu0 %652 }
 0x1ee   :  { %v8883_v48 = vpop.permute.xlu1 %716 }
 0x1ef   :  { %10914 = vst [vmem:[#allocation50_spill] sm:$0xff] %v8883_v48 }
 0x1f1   :  { %v8899_v63 = vpop.permute.xlu0 %721 }
 0x1f2   :  { %v8897_v58 = vpop.permute.xlu1 %678  ;;  %10915 = vst [vmem:[#allocation51_spill] sm:$0xff] %v8899_v63 }
 0x1f5   :  { %v8905_v9 = vpop.permute.xlu0 %682 }
 0x1f6   :  { %v8901_v2 = vpop.permute.xlu1 %626 }
 0x1f7   :  { %10916 = vst [vmem:[#allocation52_spill] sm:$0xff] %v8901_v2 }
 0x1f9   :  { %v8926_v25 = vpop.permute.xlu0 %726 }
 0x1fa   :  { %v8908_v13 = vpop.permute.xlu1 %686  ;;  %10917 = vst [vmem:[#allocation53_spill] sm:$0xff] %v8926_v25 }
 0x21e   :  { %v8871_v42 = vpop.f32.mrb[0].mxu0 }
 0x21f   :  { %v408_v43 = vmul.f32 %v8871_v42, %v8871_v42  ;;  %v8875_v44 = vpop.f32.mrb[1].mxu0 }
 0x220   :  { %v397_v46 = vadd.f32 %v8871_v42, %v8875_v44  ;;  %v407_v47 = vmul.f32 %v8875_v44, %v8875_v44 }
 0x222   :  { %v411_v49 = vadd.f32 %v408_v43, %v407_v47  ;;  %v8885_v50 = vpop.f32.mrb[2].mxu0  ;;  %v587_v47 = vrot.slane %v8847_v30, 2  ;;  %v1011_v30 = vrot.slane %v8912_v17, 6  ;;  %v8974_v17 = vld [vmem:[#allocation12 + $0x290] sm:$0xff] }
 0x223   :  { %v8887_v51 = vpop.f32.mrb[3].mxu0  ;;  %v410_v55 = vmul.f32 %v8885_v50, %v8885_v50  ;;  %10929 = vst [vmem:[#allocation65_spill] sm:$0xff] %v8974_v17  ;;  %v9086_v17 = vld [vmem:[#allocation12 + $0x2c8] sm:$0xff] }
 0x224   :  { %v398_v52 = vadd.f32 %v397_v46, %v8887_v51  ;;  %v409_v53 = vmul.f32 %v8887_v51, %v8887_v51  ;;  %v561_v46 = vmul.f32 0.0, %v549_v19 }
 0x226   :  { %v399_v56 = vadd.f32 %v8885_v50, %v398_v52  ;;  %v412_v57 = vadd.f32 %v411_v49, %v409_v53  ;;  %v10738_v53 = vrot.slane %v8843_v28, 6  ;;  %v8993_v49 = vld [vmem:[#allocation12 + $0x3a8] sm:$0xff] }
 0x227   :  { %10937 = vst [vmem:[#allocation73_spill] sm:$0xff] %v8993_v49  ;;  %v9106_v49 = vld [vmem:[#allocation12 + $0x3d0] sm:$0xff] }
 0x228   :  { %v400_v59 = vrot.slane %v399_v56, 4  ;;  %v413_v60 = vadd.f32 %v412_v57, %v410_v55  ;;  %v484_v55 = vrot.slane %v8841_v27, 2  ;;  %v8931_v57 = vpop.permute.xlu1 %749  ;;  %v9013_v27 = vld [vmem:[#allocation12 + $0x328] sm:$0xff]  ;;  %10960 = vst [vmem:[#allocation93_spill] sm:$0xff] %v9106_v49  ;;  %v9165_v49 = vld [vmem:[#allocation12 + $0x350] sm:$0xff] }
 0x229   :  { %10975 = vst [vmem:[#allocation103_spill] sm:$0xff] %v9165_v49 }
 0x22a   :  { %v401_v61 = vadd.f32 %v400_v59, %v399_v56  ;;  %v414_v62 = vrot.slane %v413_v60, 4  ;;  %v10737_v56 = vrot.slane %v8845_v29, 2  ;;  %v8933_v59 = vrot.slane %v523_v16, 2  ;;  %v8972_v16 = vpop.permute.xlu0 %745 }
 0x22b   :  { %v8965_v34 = vsel %vm480_vm1, %v482_v4, %v484_v55  ;;  %v590_v4 = vrot.slane %v8861_v37, 2  ;;  %v659_v37 = vrot.slane %v8892_v54, 6  ;;  %v9026_v54 = vrot.slane %v8865_v39, 2 }
 0x22c   :  { %v402_v0 = vrot.slane %v401_v61, 2  ;;  %v415_v1 = vadd.f32 %v414_v62, %v413_v60  ;;  %10918 = vst [vmem:[#allocation54_spill] sm:$0xff] %v8933_v59  ;;  %v8936_v60 = vrot.slane %v494_v18, 6  ;;  %v8938_v62 = vrot.slane %v561_v46, 4  ;;  %10927 = vst [vmem:[#allocation63_spill] sm:$0xff] %v8965_v34  ;;  %v8976_v18 = vld [vmem:[#allocation12 + $0x298] sm:$0xff]  ;;  %v9005_v43 = vpop.permute.xlu1 %753 }
 0x22d   :  { %10930 = vst [vmem:[#allocation66_spill] sm:$0xff] %v8976_v18  ;;  %v8985_v46 = vrot.slane %v8933_v59, 6  ;;  %v9039_v59 = vld [vmem:[#allocation12 + $0x2b0] sm:$0xff]  ;;  %v657_v39 = vrot.slane %v8877_v45, 6  ;;  %v10953_v45 = vrot.slane %v8845_v29, 2  ;;  %v670_v29 = vmul.f32 0.0, %v659_v37 }
 0x22e   :  { %v403_v5 = vadd.f32 %v402_v0, %v401_v61  ;;  %v416_v6 = vrot.slane %v415_v1, 2  ;;  %10919 = vst [vmem:[#allocation55_spill] sm:$0xff] %v8936_v60  ;;  %10920 = vst [vmem:[#allocation56_spill] sm:$0xff] %v8938_v62  ;;  %v599_v0 = vmul.f32 0.0, %v587_v47  ;;  %v9029_v36 = vrot.slane %v8938_v62, 6 }
 0x22f   :  { %10933 = vst [vmem:[#allocation69_spill] sm:$0xff] %v8985_v46  ;;  %v9037_v46 = vld [vmem:[#allocation12 + $0x3b8] sm:$0xff]  ;;  %10948 = vst [vmem:[#allocation83_spill] sm:$0xff] %v9039_v59  ;;  %v10951_v62 = vrot.slane %v8843_v28, 6  ;;  %v9136_v59 = vrot.slane %v670_v29, 4 }
 0x230   :  { %v404_v7 = vrot.slane %v403_v5, 1  ;;  %v417_v8 = vadd.f32 %v416_v6, %v415_v1  ;;  %v8941_v1 = vrot.slane %v8849_v31, 2  ;;  %v8947_v6 = vld [vmem:[#allocation12 + $0x300] sm:$0xff]  ;;  %v8962_v31 = vsel %vm548_vm2, %v549_v19, %v10738_v53  ;;  %10946 = vst [vmem:[#allocation81_spill] sm:$0xff] %v9029_v36  ;;  %v9054_v36 = vld [vmem:[#allocation12 + $0x230] sm:$0xff]  ;;  %v9167_v29 = vld [vmem:[#allocation12 + $0x358] sm:$0xff] }
 0x231   :  { %10926 = vst [vmem:[#allocation62_spill] sm:$0xff] %v8962_v31  ;;  %v552_v19 = vrot.slane %v8863_v38, 6  ;;  %v8995_v22 = vrot.slane %v599_v0, 6  ;;  %v9002_v38 = vrot.slane %v8867_v40, 6  ;;  %v9011_v53 = vld [vmem:[#allocation12 + $0x320] sm:$0xff]  ;;  %10968 = vst [vmem:[#allocation100_spill] sm:$0xff] %v9136_v59 }
 0x232   :  { %v405_v11 = vadd.f32 %v404_v7, %v403_v5  ;;  %v418_v12 = vrot.slane %v417_v8, 1  ;;  %10921 = vst [vmem:[#allocation57_spill] sm:$0xff] %v8941_v1  ;;  %v8949_v7 = vld [vmem:[#allocation12 + $0x308] sm:$0xff]  ;;  %10941 = vst [vmem:[#allocation77_spill] sm:$0xff] %v9011_v53  ;;  %v9015_v0 = vld [vmem:[#allocation12 + $0x220] sm:$0xff] }
 0x233   :  { %10938 = vst [vmem:[#allocation74_spill] sm:$0xff] %v8995_v22  ;;  %10940 = vst [vmem:[#allocation76_spill] sm:$0xff] %v9002_v38  ;;  %v9041_v22 = vld [vmem:[#allocation12 + $0x2b8] sm:$0xff]  ;;  %v9061_v32 = vsel %vm548_vm2, %v10951_v62, %v552_v19  ;;  %v9080_v28 = vsel %vm548_vm2, %v552_v19, %v9002_v38  ;;  %v732_v62 = vpop.permute.xlu0 %731 }
 0x234   :  { %v8910_v14 = vmul.f32 0.03125, %v405_v11  ;;  %v419_v15 = vadd.f32 %v418_v12, %v417_v8  ;;  %v8951_v8 = vld [vmem:[#allocation12 + $0x200] sm:$0xff]  ;;  %v8955_v11 = vld [vmem:[#allocation12 + $0x390] sm:$0xff]  ;;  %v8957_v12 = vld [vmem:[#allocation12 + $0x398] sm:$0xff]  ;;  %10942 = vst [vmem:[#allocation78_spill] sm:$0xff] %v9015_v0 }
 0x235   :  { %10923 = vst [vmem:[#allocation59_spill] sm:$0xff] %v8951_v8  ;;  %10924 = vst [vmem:[#allocation60_spill] sm:$0xff] %v8955_v11  ;;  %v9072_v11 = vld [vmem:[#allocation12 + $0x3c0] sm:$0xff]  ;;  %v9121_v0 = vld [vmem:[#allocation12 + $0x3d8] sm:$0xff] }
 0x236   :  { %v420_v20 = vmul.f32 0.03125, %v419_v15  ;;  %v421_v21 = vmul.f32 %v8910_v14, %v8910_v14  ;;  %10925 = vst [vmem:[#allocation61_spill] sm:$0xff] %v8957_v12  ;;  %v8970_v15 = vsel %vm480_vm1, %v587_v47, %v10737_v56  ;;  %v8987_v47 = vld [vmem:[#allocation12 + $0x210] sm:$0xff]  ;;  %v9009_v56 = vld [vmem:[#allocation12 + $0x2a8] sm:$0xff]  ;;  %10952 = vst [vmem:[#allocation86_spill] sm:$0xff] %v9061_v32  ;;  %v10973_v19 = vsub.f32 %v8885_v50, %v8910_v14 }
 0x237   :  { %10928 = vst [vmem:[#allocation64_spill] sm:$0xff] %v8970_v15  ;;  %10934 = vst [vmem:[#allocation70_spill] sm:$0xff] %v8987_v47  ;;  %v9074_v12 = vld [vmem:[#allocation12 + $0x3c8] sm:$0xff]  ;;  %v9076_v8 = vld [vmem:[#allocation12 + $0x2c0] sm:$0xff]  ;;  %v10961_v47 = vrot.slane %v8853_v33, 6  ;;  %v9163_v18 = vpop.permute.xlu0 %690 }
 0x238   :  { %v422_v52 = vsub.f32 %v420_v20, %v421_v21  ;;  %v8978_v20 = vld [vmem:[#allocation12 + $0x310] sm:$0xff]  ;;  %v8980_v21 = vld [vmem:[#allocation12 + $0x318] sm:$0xff]  ;;  %10955 = vst [vmem:[#allocation88_spill] sm:$0xff] %v9080_v28  ;;  %10964 = vst [vmem:[#allocation96_spill] sm:$0xff] %v9121_v0  ;;  %v10783_v0 = vrot.slane %v9163_v18, 2 }
 0x239   :  { %10931 = vst [vmem:[#allocation67_spill] sm:$0xff] %v8978_v20  ;;  %10932 = vst [vmem:[#allocation68_spill] sm:$0xff] %v8980_v21  ;;  %v9090_v20 = vld [vmem:[#allocation12 + $0x348] sm:$0xff]  ;;  %v9094_v21 = vsel %vm480_vm1, %v590_v4, %v9026_v54  ;;  %v9125_v53 = vld [vmem:[#allocation12 + $0x2d8] sm:$0xff] }
 0x23a   :  { %v423_v61 = vmax.f32 %v422_v52, 0.0  ;;  %v8989_v52 = vld [vmem:[#allocation12 + $0x218] sm:$0xff]  ;;  %10957 = vst [vmem:[#allocation90_spill] sm:$0xff] %v9094_v21  ;;  %10966 = vst [vmem:[#allocation98_spill] sm:$0xff] %v9125_v53  ;;  %v737_v53 = vmul.f32 0.0, %v732_v62 }
 0x23b   :  { %10935 = vst [vmem:[#allocation71_spill] sm:$0xff] %v8989_v52  ;;  %v9113_v52 = vpop.permute.xlu1 %757  ;;  %10974 = vst [vmem:[#allocation102_spill] sm:$0xff] %v9163_v18  ;;  %v10988_v18 = vld [vmem:[#allocation46_spill] sm:$0xff] }
 0x23c   :  { %v428_v5 = vadd.f32 1e-05, %v423_v61  ;;  %v8991_v61 = vld [vmem:[#allocation12 + $0x3a0] sm:$0xff]  ;;  %10963 = vst [vmem:[#allocation95_spill] sm:$0xff] %v9113_v52  ;;  %10976 = vst [vmem:[#allocation104_spill] sm:$0xff] %v9167_v29 }
 0x23d   :  { %10936 = vst [vmem:[#allocation72_spill] sm:$0xff] %v8991_v61  ;;  %v9104_v61 = vld [vmem:[#allocation12 + $0x248] sm:$0xff] }
 0x23e   :  { %7977 = vrsqrt.f32 %v428_v5  ;;  %v8999_v5 = vsel %vm480_vm1, %v484_v55, %v8941_v1  ;;  %v10944_v55 = vrot.slane %v8853_v33, 6  ;;  %v9033_v1 = vsel %vm548_vm2, %v1011_v30, %v8936_v60  ;;  %v9056_v60 = vld [vmem:[#allocation12 + $0x238] sm:$0xff]  ;;  %v9088_v30 = vld [vmem:[#allocation12 + $0x340] sm:$0xff]  ;;  %10959 = vst [vmem:[#allocation92_spill] sm:$0xff] %v9104_v61 }
 0x23f   :  { %10939 = vst [vmem:[#allocation75_spill] sm:$0xff] %v8999_v5  ;;  %10947 = vst [vmem:[#allocation82_spill] sm:$0xff] %v9033_v1  ;;  %v9035_v5 = vld [vmem:[#allocation12 + $0x3b0] sm:$0xff]  ;;  %v9052_v1 = vld [vmem:[#allocation12 + $0x338] sm:$0xff]  ;;  %v9128_v33 = vsel %vm548_vm2, %v657_v39, %v659_v37 }
 0x240   :  { %v9023_v40 = vsel %vm548_vm2, %v8944_v3, %v10944_v55  ;;  %v9043_v55 = vld [vmem:[#allocation12 + $0x330] sm:$0xff]  ;;  %10950 = vst [vmem:[#allocation85_spill] sm:$0xff] %v9052_v1  ;;  %10956 = vst [vmem:[#allocation89_spill] sm:$0xff] %v9088_v30  ;;  %v9102_v3 = vld [vmem:[#allocation12 + $0x240] sm:$0xff] }
 0x241   :  { %10945 = vst [vmem:[#allocation80_spill] sm:$0xff] %v9023_v40  ;;  %10949 = vst [vmem:[#allocation84_spill] sm:$0xff] %v9043_v55  ;;  %v9066_v40 = vsel %vm480_vm1, %v10953_v45, %v590_v4  ;;  %v9111_v4 = vsel %vm548_vm2, %v10961_v47, %v657_v39  ;;  %v9139_v45 = vrot.slane %v8897_v58, 2  ;;  %v6453_v1 = vld [vmem:[#allocation9] ss:$0 sm:$0xff]  ;;  %v762_v47 = vrot.slane %v9005_v43, 6 }
 0x242   :  { %10954 = vst [vmem:[#allocation87_spill] sm:$0xff] %v9066_v40  ;;  %10958 = vst [vmem:[#allocation91_spill] sm:$0xff] %v9102_v3  ;;  %v10970_v58 = vsub.f32 %v8875_v44, %v8910_v14  ;;  %v10971_v55 = vsub.f32 %v8871_v42, %v8910_v14  ;;  %v10972_v3 = vsub.f32 %v8887_v51, %v8910_v14  ;;  %v6454_v44 = vld [vmem:[#allocation10] ss:$0 sm:$0xff]  ;;  %v695_v42 = vrot.slane %v8908_v13, 2 }
 0x243   :  { %10962 = vst [vmem:[#allocation94_spill] sm:$0xff] %v9111_v4  ;;  %10967 = vst [vmem:[#allocation99_spill] sm:$0xff] %v9128_v33  ;;  %v760_v51 = vrot.slane %v8931_v57, 6 }
 0x244   :  { %10969 = vst [vmem:[#allocation101_spill] sm:$0xff] %v9139_v45 }
 0x248   :  { %v7978_v39 = vpop.eup %7977 }
 0x249   :  { %v430_v59 = vmul.f32 %v7978_v39, %v10970_v58  ;;  %v431_v37 = vmul.f32 %v7978_v39, %v10971_v55  ;;  %v432_v43 = vmul.f32 %v7978_v39, %v10972_v3  ;;  %v433_v61 = vmul.f32 %v7978_v39, %v10973_v19  ;;  %v9175_v19 = vld [vmem:[#allocation12 + $0x250] sm:$0xff]  ;;  %v9177_v39 = vld [vmem:[#allocation12 + $0x258] sm:$0xff] }
 0x24a   :  { %v693_v58 = vrot.slane %v8905_v9, 2  ;;  %v9172_v55 = vrot.slane %v8972_v16, 6  ;;  %10978 = vst [vmem:[#allocation106_spill] sm:$0xff] %v9175_v19  ;;  %10979 = vst [vmem:[#allocation107_spill] sm:$0xff] %v9177_v39  ;;  %v10980_v9 = vrot.slane %v9113_v52, 6  ;;  %v10989_v19 = vld [vmem:[#allocation74_spill] sm:$0xff] }
 0x24b   :  { %v441_v3 = vmul.f32 %v6453_v1, %v430_v59  ;;  %v442_v35 = vmul.f32 %v6453_v1, %v431_v37  ;;  %v443_v50 = vmul.f32 %v6453_v1, %v432_v43  ;;  %v444_v14 = vmul.f32 %v6453_v1, %v433_v61  ;;  %v10990_v39 = vld [vmem:[#allocation54_spill] sm:$0xff] }
 0x24c   :  { %10977 = vst [vmem:[#allocation105_spill] sm:$0xff] %v9172_v55  ;;  %v765_v13 = vsel %vm548_vm2, %v762_v47, %v10980_v9  ;;  %v9187_v1 = vsel %vm480_vm1, %v9139_v45, %v693_v58  ;;  %v9190_v61 = vsel %vm480_vm1, %v693_v58, %v695_v42  ;;  %v9194_v62 = vsel %vm548_vm2, %v9172_v55, %v760_v51 }
 0x24d   :  { %v452_v30 = vadd.f32 %v6454_v44, %v441_v3  ;;  %v453_v57 = vadd.f32 %v6454_v44, %v442_v35  ;;  %v454_v59 = vadd.f32 %v6454_v44, %v443_v50  ;;  %v455_v37 = vadd.f32 %v6454_v44, %v444_v14  ;;  %10981 = vst [vmem:[#allocation108_spill] sm:$0xff] %v9187_v1 }
 0x24e   :  { %10982 = vst [vmem:[#allocation109_spill] sm:$0xff] %v9190_v61  ;;  %10983 = vst [vmem:[#allocation110_spill] sm:$0xff] %v9194_v62  ;;  %v9206_v50 = vrot.slane %v737_v53, 2  ;;  %v9209_v58 = vsel %vm548_vm2, %v760_v51, %v762_v47  ;;  %v9214_v14 = vsel %vm480_vm1, %v695_v42, %v10783_v0  ;;  %v9216_v16 = vmul.f32 0.0, %v765_v13 }
 0x24f   :  { %v9198_v9 = vmax.f32 %v452_v30, 0.0  ;;  %v9200_v3 = vmax.f32 %v453_v57, 0.0  ;;  %v9202_v35 = vmax.f32 %v454_v59, 0.0  ;;  %v9204_v44 = vmax.f32 %v455_v37, 0.0  ;;  %10985 = vst [vmem:[#allocation112_spill] sm:$0xff] %v9209_v58  ;;  %10986 = vst [vmem:[#allocation113_spill] sm:$0xff] %v9214_v14 }
 0x250   :  { %10984 = vst [vmem:[#allocation111_spill] sm:$0xff] %v9206_v50 }
 0x251   :  { %v9220_v30 = vmul.f32 %v9061_v32, %v9200_v3  ;;  %v9224_v57 = vmul.f32 %v9080_v28, %v9202_v35  ;;  %v9228_v53 = vmul.f32 %v9002_v38, %v9204_v44  ;;  %v9232_v47 = vmul.f32 %v9111_v4, %v9202_v35 }
 0x252   :  { %v9236_v42 = vmul.f32 %v8869_v41, %v9202_v35  ;;  %v9240_v51 = vmul.f32 %v9128_v33, %v9204_v44  ;;  %v9244_v13 = vmul.f32 %v8883_v48, %v9200_v3  ;;  %v9248_v59 = vmul.f32 %v8899_v63, %v9202_v35 }
 0x253   :  { %v9255_v41 = vmul.f32 %v9139_v45, %v9198_v9  ;;  %v9264_v0 = vmul.f32 %v9187_v1, %v9200_v3  ;;  %v9268_v43 = vmul.f32 %v8901_v2, %v9204_v44  ;;  %v9272_v33 = vmul.f32 %v8926_v25, %v9204_v44 }
 0x254   :  { %v10802_v48 = vrot.slane %v9244_v13, 2  ;;  %v9280_v38 = vmul.f32 %v9172_v55, %v9200_v3  ;;  %v9284_v63 = vmul.f32 %v9194_v62, %v9202_v35  ;;  %v9288_v37 = vmul.f32 %v9209_v58, %v9204_v44 }
 0x255   :  { %v10821_v25 = vrot.slane %v9268_v43, 2  ;;  %v600_v62 = vmul.f32 %v8970_v15, %v9198_v9  ;;  %v524_v58 = vmul.f32 %v8835_v24, %v9198_v9  ;;  %v562_v1 = vmul.f32 %v8962_v31, %v9198_v9 }
 0x256   :  { %v9276_v4 = vrot.slane %v10802_v48, 6  ;;  %10987 = vst [vmem:[#allocation114_spill] sm:$0xff] %v9288_v37  ;;  %v9295_v48 = vmul.f32 %v9214_v14, %v9204_v44  ;;  %v601_v14 = vmul.f32 %v9066_v40, %v9200_v3  ;;  %v525_v55 = vmul.f32 %v8839_v26, %v9200_v3  ;;  %v10993_v37 = vld [vmem:[#allocation55_spill] sm:$0xff] }
 0x257   :  { %v9305_v2 = vrot.slane %v10821_v25, 6  ;;  %v1021_v45 = vrot.slane %v600_v62, 6  ;;  %v781_v28 = vrot.slane %v524_v58, 2  ;;  %v495_v32 = vmul.f32 %v8965_v34, %v9198_v9  ;;  %v10991_v34 = vld [vmem:[#allocation56_spill] sm:$0xff] }
 0x258   :  { %v602_v24 = vmul.f32 %v9094_v21, %v9202_v35  ;;  %v794_v15 = vrot.slane %v562_v1, 4  ;;  %v1044_v25 = vrot.slane %v601_v14, 6  ;;  %v783_v52 = vrot.slane %v525_v55, 2 }
 0x259   :  { %v526_v31 = vmul.f32 %v10988_v18, %v9202_v35  ;;  %v1022_v40 = vsel %vm548_vm2, %v10989_v19, %v1021_v45  ;;  %v782_v26 = vsel %vm480_vm1, %v10990_v39, %v781_v28  ;;  %v1038_v62 = vrot.slane %v495_v32, 6  ;;  %v10994_v32 = vld [vmem:[#allocation69_spill] sm:$0xff] }
 0x25a   :  { %v1062_v58 = vrot.slane %v602_v24, 6  ;;  %1277 = vmatprep.mubr.f32.mxu0 %v1022_v40  ;;  %v1015_v49 = vrot.slane %v782_v26, 6  ;;  %v795_v29 = vsel %vm792_vm3, %v10991_v34, %v794_v15  ;;  %v1045_v1 = vsel %vm548_vm2, %v1021_v45, %v1044_v25  ;;  %v10995_v45 = vld [vmem:[#allocation81_spill] sm:$0xff] }
 0x25b   :  { %v784_v55 = vsel %vm480_vm1, %v781_v28, %v783_v52  ;;  %v1018_v14 = vrot.slane %v795_v29, 6  ;;  %v10992_v18 = vrot.slane %v9220_v30, 4  ;;  %v1039_v39 = vsel %vm548_vm2, %v10993_v37, %v1038_v62  ;;  %v10997_v37 = vld [vmem:[#allocation82_spill] sm:$0xff] }
 0x25c   :  { %v1040_v21 = vrot.slane %v784_v55, 6  ;;  %v1016_v24 = vsel %vm548_vm2, %v10994_v32, %v1015_v49  ;;  %v1063_v40 = vsel %vm548_vm2, %v1044_v25, %v1062_v58  ;;  %v785_v34 = vrot.slane %v526_v31, 2 }
 0x25d   :  { %v797_v19 = vsel %vm792_vm3, %v794_v15, %v10992_v18  ;;  %1192 = vmatprep.mubr.f32.mxu1 %v1016_v24  ;;  %v1019_v28 = vsel %vm548_vm2, %v10995_v45, %v1018_v14  ;;  %v798_v55 = vrot.slane %v9224_v57, 4  ;;  %v10996_v15 = vld [vmem:[#allocation75_spill] sm:$0xff]  ;;  %v603_v25 = vmul.f32 %v9026_v54, %v9204_v44 }
 0x25e   :  { %v1042_v26 = vrot.slane %v797_v19, 6  ;;  %v1041_v29 = vsel %vm548_vm2, %v1015_v49, %v1040_v21  ;;  %v496_v18 = vmul.f32 %v10996_v15, %v9200_v3  ;;  %1278 = vmatmul.mubr.f32.vlgmr.msra.gmra.mrb[4].mxu0 %v1019_v28  ;;  %1193 = vmatmul.mubr.f32.vlgmr.msra.gmra.mrb[0].mxu1 %v10997_v37  ;;  %v786_v19 = vsel %vm480_vm1, %v783_v52, %v785_v34  ;;  %v11001_v52 = vld [vmem:[#allocation59_spill] sm:$0xff] }
 0x25f   :  { %v1076_v31 = vrot.slane %v785_v34, 6  ;;  %v10998_v24 = vpack.c.bf16 %v8949_v7, %v8947_v6  ;;  %1282 = vmatprep.mubr.f32.mxu0 %v1045_v1  ;;  %v1058_v49 = vrot.slane %v786_v19, 6  ;;  %v10999_v57 = vrot.slane %v9220_v30, 4  ;;  %1197 = vmatprep.mubr.f32.mxu1 %v1041_v29  ;;  %v11003_v7 = vld [vmem:[#allocation57_spill] sm:$0xff]  ;;  %v11005_v30 = vld [vmem:[#allocation60_spill] sm:$0xff] }
 0x260   :  { %v1043_v32 = vsel %vm548_vm2, %v1018_v14, %v1042_v26  ;;  %v1056_v15 = vrot.slane %v496_v18, 6  ;;  %v11000_v37 = vrot.slane %v9228_v53, 4  ;;  %v11002_v45 = vpack.c.bf16 %v8953_v10, %v11001_v52  ;;  %v11004_v19 = vld [vmem:[#allocation61_spill] sm:$0xff]  ;;  %v11007_v18 = vld [vmem:[#allocation66_spill] sm:$0xff]  ;;  %v11010_v52 = vld [vmem:[#allocation68_spill] sm:$0xff] }
 0x261   :  { %7446 = vmatpush3.bf16.msra.mxu0 %v10998_v24  ;;  %v799_v28 = vsel %vm792_vm3, %v10999_v57, %v798_v55  ;;  %v1080_v44 = vrot.slane %v603_v25, 6  ;;  %v497_v1 = vmul.f32 %v11003_v7, %v9202_v35  ;;  %v11006_v24 = vpack.c.bf16 %v11004_v19, %v11005_v30  ;;  %v11008_v57 = vld [vmem:[#allocation65_spill] sm:$0xff]  ;;  %v11011_v19 = vld [vmem:[#allocation67_spill] sm:$0xff] }
 0x262   :  { %v801_v14 = vsel %vm792_vm3, %v798_v55, %v11000_v37  ;;  %7414 = vmatpush3.bf16.msra.mxu1 %v11002_v45  ;;  %v1060_v34 = vrot.slane %v799_v28, 6  ;;  %v11009_v53 = vpack.c.bf16 %v11007_v18, %v11008_v57  ;;  %v1059_v37 = vsel %vm548_vm2, %v1040_v21, %v1058_v49  ;;  %1283 = vmatmul.mubr.f32.gmra.mrb[6].mxu0 %v1043_v32  ;;  %v11022_v57 = vld [vmem:[#allocation48_spill] sm:$0xff] }
 0x263   :  { %v1078_v6 = vrot.slane %v801_v14, 6  ;;  %7448 = vmatprep.subr.bf16.mxu0 %v11006_v24  ;;  %v1057_v10 = vsel %vm548_vm2, %v1038_v62, %v1056_v15  ;;  %v1077_v45 = vsel %vm548_vm2, %v1058_v49, %v1076_v31  ;;  %v1068_v29 = vrot.slane %v9295_v48, 6  ;;  %1198 = vmatmul.mubr.f32.gmra.mrb[2].mxu1 %v1039_v39  ;;  %v11015_v39 = vld [vmem:[#allocation58_spill] sm:$0xff]  ;;  %v994_v48 = vld [vmem:[#allocation12 + $0x470] sm:$0xff] }
 0x264   :  { %7416 = vmatprep.subr.bf16.mxu1 %v11009_v53  ;;  %v1061_v55 = vsel %vm548_vm2, %v1042_v26, %v1060_v34  ;;  %v1081_v25 = vsel %vm548_vm2, %v1062_v58, %v1080_v44  ;;  %v1074_v14 = vrot.slane %v497_v1, 6  ;;  %v11012_v30 = vpack.c.bf16 %v11010_v52, %v11011_v19  ;;  %1287 = vmatprep.mubr.f32.mxu0 %v1063_v40  ;;  %v11016_v26 = vld [vmem:[#allocation80_spill] sm:$0xff]  ;;  %v11018_v44 = vld [vmem:[#allocation70_spill] sm:$0xff]  ;;  %v11023_v52 = vld [vmem:[#allocation73_spill] sm:$0xff] }
 0x265   :  { %v1079_v28 = vsel %vm548_vm2, %v1060_v34, %v1078_v6  ;;  %v11013_v21 = vrot.slane %v9248_v59, 2  ;;  %v11014_v62 = vrot.slane %v9244_v13, 2  ;;  %v666_v32 = vmul.f32 %v11015_v39, %v9198_v9  ;;  %v11017_v34 = vld [vmem:[#allocation71_spill] sm:$0xff]  ;;  %1202 = vmatprep.mubr.f32.mxu1 %v1059_v37  ;;  %v11024_v19 = vld [vmem:[#allocation72_spill] sm:$0xff] }
 0x266   :  { %7450 = vmatpush3.bf16.msra.mxu0 %v11012_v30  ;;  %v667_v58 = vmul.f32 %v11016_v26, %v9200_v3  ;;  %v843_v49 = vrot.slane %v9280_v38, 4  ;;  %v11019_v6 = vpack.c.bf16 %v11017_v34, %v11018_v44  ;;  %v1075_v40 = vsel %vm548_vm2, %v1056_v15, %v1074_v14 }
 0x267   :  { %v833_v31 = vsel %vm480_vm1, %v11014_v62, %v11013_v21  ;;  %v11020_v13 = vrot.slane %v9264_v0, 6  ;;  %v11021_v24 = vrot.slane %v9255_v41, 6  ;;  %v629_v53 = vmul.f32 %v11022_v57, %v9198_v9  ;;  %v11027_v21 = vld [vmem:[#allocation47_spill] sm:$0xff]  ;;  %1288 = vmatmul.mubr.f32.gmra.mrb[8].mxu0 %v1061_v55  ;;  %1203 = vmatmul.mubr.f32.gmra.mrb[4].mxu1 %v1057_v10 }
 0x268   :  { %7418 = vmatpush3.bf16.msra.mxu1 %v11019_v6  ;;  %v1033_v1 = vrot.slane %v833_v31, 6  ;;  %v11025_v30 = vpack.c.bf16 %v11023_v52, %v11024_v19  ;;  %v11026_v37 = vpack.c.bf16 %v9009_v56, %v9007_v23  ;;  %v818_v15 = vrot.slane %v666_v32, 4  ;;  %v11030_v56 = vld [vmem:[#allocation77_spill] sm:$0xff]  ;;  %1292 = vmatprep.mubr.f32.mxu0 %v1081_v25  ;;  %v11037_v19 = vld [vmem:[#allocation83_spill] sm:$0xff] }
 0x269   :  { %v9395_v18 = vsel %vm548_vm2, %v11021_v24, %v11020_v13  ;;  %v819_v14 = vrot.slane %v667_v58, 4  ;;  %v630_v62 = vmul.f32 %v11027_v21, %v9200_v3  ;;  %v11028_v41 = vrot.slane %v9272_v33, 2  ;;  %v11033_v13 = vld [vmem:[#allocation79_spill] sm:$0xff]  ;;  %1207 = vmatprep.mubr.f32.mxu1 %v1077_v45 }
 0x26a   :  { %7452 = vmatprep.subr.bf16.mxu0 %v11025_v30  ;;  %7420 = vmatprep.subr.bf16.mxu1 %v11026_v37  ;;  %v11029_v31 = vrot.slane %v9248_v59, 2  ;;  %v1034_v9 = vsel %vm548_vm2, %v9276_v4, %v1033_v1  ;;  %v806_v44 = vrot.slane %v629_v53, 2  ;;  %v706_v23 = vmul.f32 %v9190_v61, %v9202_v35  ;;  %v11034_v4 = vld [vmem:[#allocation78_spill] sm:$0xff] }
 0x26b   :  { %v11031_v32 = vpack.c.bf16 %v9013_v27, %v11030_v56  ;;  %v820_v3 = vsel %vm792_vm3, %v818_v15, %v819_v14  ;;  %v1026_v59 = vrot.slane %v818_v15, 6  ;;  %v807_v58 = vrot.slane %v630_v62, 2  ;;  %1293 = vmatmul.mubr.f32.gmra.mrb[10].mxu0 %v1079_v28  ;;  %1208 = vmatmul.mubr.f32.gmra.mrb[6].mxu1 %v1075_v40  ;;  %v9752_v61 = vld [vmem:[#allocation16 + $0x3e0] sm:$0xff] }
 0x26c   :  { %v835_v34 = vsel %vm480_vm1, %v11029_v31, %v11028_v41  ;;  %v11032_v55 = vrot.slane %v9232_v47, 4  ;;  %v11035_v24 = vpack.c.bf16 %v11033_v13, %v11034_v4  ;;  %v1027_v53 = vrot.slane %v820_v3, 6  ;;  %1447 = vmatprep.mubr.f32.mxu0 %v1034_v9 }
 0x26d   :  { %v1052_v6 = vrot.slane %v835_v34, 6  ;;  %7454 = vmatpush3.bf16.msra.mxu0 %v11031_v32  ;;  %v1023_v35 = vrot.slane %v806_v44, 6  ;;  %v11036_v25 = vpack.c.bf16 %v9037_v46, %v9035_v5  ;;  %v11038_v30 = vpack.c.bf16 %v9041_v22, %v11037_v19  ;;  %v976_v5 = vld [vmem:[#allocation12 + $0x3e0] sm:$0xff]  ;;  %v977_v22 = vld [vmem:[#allocation12 + $0x3e8] sm:$0xff] }
 0x26e   :  { %v822_v10 = vsel %vm792_vm3, %v819_v14, %v11032_v55  ;;  %7422 = vmatpush3.bf16.msra.mxu1 %v11035_v24  ;;  %v808_v37 = vsel %vm480_vm1, %v806_v44, %v807_v58  ;;  %v1050_v15 = vrot.slane %v706_v23, 6  ;;  %v11039_v14 = vrot.slane %v9236_v42, 2  ;;  %v11041_v44 = vld [vmem:[#allocation85_spill] sm:$0xff]  ;;  %v11042_v23 = vld [vmem:[#allocation84_spill] sm:$0xff] }
 0x26f   :  { %v9427_v52 = vsel %vm548_vm2, %v1033_v1, %v1052_v6  ;;  %v1048_v27 = vrot.slane %v822_v10, 6  ;;  %7456 = vmatprep.subr.bf16.mxu0 %v11036_v25  ;;  %7424 = vmatprep.subr.bf16.mxu1 %v11038_v30  ;;  %v11040_v1 = vmov %v11028_v41  ;;  %v1028_v46 = vsel %vm548_vm2, %v1026_v59, %v1027_v53  ;;  %11098 = vst [vmem:[#allocation85_spill] sm:$0xff] %v9752_v61 }
 0x270   :  { %v810_v45 = vsel %vm480_vm1, %v807_v58, %v11039_v14  ;;  %v9443_v62 = vsel %vm480_vm1, %v11040_v1, %v9206_v50  ;;  %v1024_v41 = vrot.slane %v808_v37, 6  ;;  %v11043_v56 = vpack.c.bf16 %v11041_v44, %v11042_v23  ;;  %1362 = vmatprep.mubr.f32.mxu1 %v1028_v46  ;;  %v11056_v37 = vld [vmem:[#allocation89_spill] sm:$0xff]  ;;  %v11059_v1 = vld [vmem:[#allocation91_spill] sm:$0xff]  ;;  %v961_v44 = vld [vmem:[#allocation12 + $0x368] sm:$0xff] }
 0x271   :  { %v9447_v31 = vsel %vm548_vm2, %v1027_v53, %v1048_v27  ;;  %v1046_v34 = vrot.slane %v810_v45, 6  ;;  %v11044_v33 = vrot.slane %v9264_v0, 6  ;;  %v1070_v28 = vrot.slane %v9443_v62, 6  ;;  %v11058_v45 = vld [vmem:[#allocation92_spill] sm:$0xff]  ;;  %v990_v62 = vld [vmem:[#allocation12 + $0x450] sm:$0xff] }
 0x272   :  { %7458 = vmatpush3.bf16.msra.mxu0 %v11043_v56  ;;  %v11045_v40 = vrot.slane %v9240_v51, 4  ;;  %v11046_v3 = vmov %v11032_v55  ;;  %v9466_v58 = vsel %vm548_vm2, %v1050_v15, %v1068_v29  ;;  %v11047_v9 = vpack.c.bf16 %v9056_v60, %v9054_v36 }
 0x273   :  { %v9455_v32 = vsel %vm548_vm2, %v11044_v33, %v1050_v15  ;;  %v9472_v0 = vsel %vm548_vm2, %v1023_v35, %v1024_v41  ;;  %v9475_v55 = vsel %vm548_vm2, %v1024_v41, %v1046_v34  ;;  %v11048_v47 = vrot.slane %v9268_v43, 2  ;;  %v11052_v43 = vld [vmem:[#allocation100_spill] sm:$0xff] }
 0x274   :  { %v824_v59 = vsel %vm792_vm3, %v11046_v3, %v11045_v40  ;;  %7426 = vmatpush3.bf16.msra.mxu1 %v11047_v9  ;;  %v11049_v13 = vmov %v11039_v14  ;;  %v11050_v24 = vpack.c.bf16 %v9074_v12, %v9072_v11  ;;  %v11051_v36 = vpack.c.bf16 %v9086_v17, %v9076_v8  ;;  %v944_v11 = vld [vmem:[#allocation12 + $0x2e0] sm:$0xff]  ;;  %v945_v12 = vld [vmem:[#allocation12 + $0x2e8] sm:$0xff] }
 0x275   :  { %v1066_v10 = vrot.slane %v824_v59, 6  ;;  %v812_v4 = vsel %vm480_vm1, %v11049_v13, %v11048_v47  ;;  %v7467_v60 = vpack.c.bf16 %v977_v22, %v976_v5  ;;  %v9491_v53 = vsel %vm548_vm2, %v1052_v6, %v1070_v28  ;;  %v11061_v5 = vld [vmem:[#allocation96_spill] sm:$0xff]  ;;  %v11062_v22 = vld [vmem:[#allocation93_spill] sm:$0xff]  ;;  %v11068_v3 = vld [vmem:[#allocation98_spill] sm:$0xff] }
 0x276   :  { %7460 = vmatprep.subr.bf16.mxu0 %v11050_v24  ;;  %7428 = vmatprep.subr.bf16.mxu1 %v11051_v36  ;;  %v1064_v35 = vrot.slane %v812_v4, 6  ;;  %v11053_v42 = vmov %v11045_v40  ;;  %v9498_v19 = vrot.slane %v9216_v16, 4  ;;  %v11055_v30 = vrot.slane %v9284_v63, 4  ;;  %v11069_v59 = vld [vmem:[#allocation97_spill] sm:$0xff]  ;;  %v929_v13 = vld [vmem:[#allocation12 + $0x268] sm:$0xff]  ;;  %v979_v4 = vld [vmem:[#allocation12 + $0x3f8] sm:$0xff] }
 0x277   :  { %v826_v25 = vsel %vm792_vm3, %v11053_v42, %v11052_v43  ;;  %v9501_v8 = vsel %vm548_vm2, %v1048_v27, %v1066_v10  ;;  %v11057_v51 = vpack.c.bf16 %v9090_v20, %v11056_v37  ;;  %v1035_v27 = vrot.slane %v843_v49, 6  ;;  %v960_v20 = vld [vmem:[#allocation12 + $0x360] sm:$0xff]  ;;  %v947_v42 = vld [vmem:[#allocation12 + $0x2f8] sm:$0xff] }
 0x278   :  { %11054 = vst [vmem:[#allocation59_spill] sm:$0xff] %v9498_v19  ;;  %v1084_v17 = vrot.slane %v826_v25, 6  ;;  %v845_v6 = vsel %vm792_vm3, %v843_v49, %v11055_v30  ;;  %v9512_v15 = vsel %vm548_vm2, %v1046_v34, %v1064_v35  ;;  %v9516_v16 = vsel %vm548_vm2, %v1064_v35, %v9305_v2  ;;  %v928_v34 = vld [vmem:[#allocation12 + $0x260] sm:$0xff]  ;;  %v11064_v2 = vld [vmem:[#allocation114_spill] sm:$0xff]  ;;  %v946_v35 = vld [vmem:[#allocation12 + $0x2f0] sm:$0xff] }
 0x279   :  { %7462 = vmatpush3.bf16.msra.mxu0 %v11057_v51  ;;  %v1036_v14 = vrot.slane %v845_v6, 6  ;;  %v11060_v46 = vpack.c.bf16 %v11058_v45, %v11059_v1  ;;  %v11063_v41 = vpack.c.bf16 %v11061_v5, %v11062_v22  ;;  %v11065_v56 = vrot.slane %v11064_v2, 4  ;;  %v11071_v25 = vld [vmem:[#allocation104_spill] sm:$0xff]  ;;  %v11075_v51 = vld [vmem:[#allocation106_spill] sm:$0xff] }
 0x27a   :  { %v9527_v23 = vsel %vm548_vm2, %v1066_v10, %v1084_v17  ;;  %v11066_v38 = vmov %v11055_v30  ;;  %v11070_v9 = vpack.c.bf16 %v11068_v3, %v11069_v59  ;;  %v7435_v47 = vpack.c.bf16 %v945_v12, %v944_v11  ;;  %v978_v10 = vld [vmem:[#allocation12 + $0x3f0] sm:$0xff]  ;;  %v963_v5 = vld [vmem:[#allocation12 + $0x378] sm:$0xff]  ;;  %v985_v3 = vld [vmem:[#allocation12 + $0x428] sm:$0xff] }
 0x27b   :  { %7430 = vmatpush3.bf16.msra.mxu1 %v11060_v46  ;;  %7464 = vmatprep.subr.bf16.mxu0 %v11063_v41  ;;  %v847_v49 = vsel %vm792_vm3, %v11066_v38, %v11065_v56  ;;  %v11067_v33 = vmov %v11065_v56  ;;  %v9544_v24 = vsel %vm548_vm2, %v1035_v27, %v1036_v14  ;;  %v11072_v17 = vld [vmem:[#allocation103_spill] sm:$0xff]  ;;  %v7469_v6 = vpack.c.bf16 %v961_v44, %v960_v20  ;;  %v931_v20 = vld [vmem:[#allocation12 + $0x278] sm:$0xff]  ;;  %v981_v44 = vld [vmem:[#allocation12 + $0x408] sm:$0xff] }
 0x27c   :  { %v9538_v40 = vsel %vm792_vm3, %v11067_v33, %v9498_v19  ;;  %7432 = vmatprep.subr.bf16.mxu1 %v11070_v9  ;;  %v1054_v63 = vrot.slane %v847_v49, 6  ;;  %v11073_v30 = vpack.c.bf16 %v11071_v25, %v11072_v17  ;;  %v11074_v12 = vld [vmem:[#allocation107_spill] sm:$0xff]  ;;  %v7437_v45 = vpack.c.bf16 %v929_v13, %v928_v34  ;;  %v983_v33 = vld [vmem:[#allocation12 + $0x418] sm:$0xff]  ;;  %v984_v34 = vld [vmem:[#allocation12 + $0x420] sm:$0xff] }
 0x27d   :  { %v1072_v36 = vrot.slane %v9538_v40, 6  ;;  %v11076_v27 = vpack.c.bf16 %v11074_v12, %v11075_v51  ;;  %v7471_v1 = vpack.c.bf16 %v979_v4, %v978_v10  ;;  %v962_v46 = vld [vmem:[#allocation12 + $0x370] sm:$0xff]  ;;  %v7439_v22 = vpack.c.bf16 %v947_v42, %v946_v35  ;;  %v11077_v13 = vld [vmem:[#allocation102_spill] sm:$0xff]  ;;  %v995_v35 = vld [vmem:[#allocation12 + $0x478] sm:$0xff] }
 0x27e   :  { %7466 = vmatpush3.bf16.msra.mxu0 %v11073_v30  ;;  %v9551_v37 = vsel %vm548_vm2, %v1036_v14, %v1054_v63  ;;  %v930_v41 = vld [vmem:[#allocation12 + $0x270] sm:$0xff]  ;;  %v980_v14 = vld [vmem:[#allocation12 + $0x400] sm:$0xff]  ;;  %v7473_v2 = vpack.c.bf16 %v963_v5, %v962_v46  ;;  %v7483_v59 = vpack.c.bf16 %v985_v3, %v984_v34  ;;  %v11078_v10 = vrot.slane %v11077_v13, 2 }
 0x27f   :  { %v9556_v11 = vsel %vm548_vm2, %v1054_v63, %v1072_v36  ;;  %7434 = vmatpush3.bf16.msra.mxu1 %v11076_v27  ;;  %7468 = vmatprep.subr.bf16.mxu0 %v7467_v60  ;;  %v7441_v56 = vpack.c.bf16 %v931_v20, %v930_v41  ;;  %v7475_v38 = vpack.c.bf16 %v981_v44, %v980_v14  ;;  %v982_v49 = vld [vmem:[#allocation12 + $0x410] sm:$0xff]  ;;  %v1758_v12 = vld [vmem:[#allocation16 + $0x180] sm:$0xff]  ;;  %v1761_v44 = vld [vmem:[#allocation16 + $0x198] sm:$0xff] }
 0x280   :  { %7436 = vmatprep.subr.bf16.mxu1 %v7435_v47  ;;  %v7479_v60 = vpack.c.bf16 %v983_v33, %v982_v49  ;;  %v986_v9 = vld [vmem:[#allocation12 + $0x430] sm:$0xff]  ;;  %v987_v47 = vld [vmem:[#allocation12 + $0x438] sm:$0xff]  ;;  %v708_v4 = vmul.f32 0.0, %v11078_v10  ;;  %v7503_v17 = vpack.c.bf16 %v995_v35, %v994_v48  ;;  %v1742_v5 = vld [vmem:[#allocation16 + $0x100] sm:$0xff] }
 0x281   :  { %v1759_v51 = vld [vmem:[#allocation16 + $0x188] sm:$0xff]  ;;  %v1710_v41 = vld [vmem:[#allocation16] sm:$0xff]  ;;  %v1760_v14 = vld [vmem:[#allocation16 + $0x190] sm:$0xff] }
 0x282   :  { %7470 = vmatpush3.bf16.msra.mxu0 %v7469_v6  ;;  %v7539_v27 = vpack.c.bf16 %v1759_v51, %v1758_v12  ;;  %v7543_v40 = vpack.c.bf16 %v1761_v44, %v1760_v14  ;;  %v1745_v49 = vld [vmem:[#allocation16 + $0x118] sm:$0xff]  ;;  %v1712_v33 = vld [vmem:[#allocation16 + $0x10] sm:$0xff]  ;;  %v1731_v10 = vld [vmem:[#allocation16 + $0xa8] sm:$0xff] }
 0x283   :  { %7438 = vmatpush3.bf16.msra.mxu1 %v7437_v45  ;;  %7472 = vmatprep.subr.bf16.mxu0 %v7471_v1  ;;  %v1726_v45 = vld [vmem:[#allocation16 + $0x80] sm:$0xff]  ;;  %v1727_v1 = vld [vmem:[#allocation16 + $0x88] sm:$0xff]  ;;  %v1748_v48 = vld [vmem:[#allocation16 + $0x130] sm:$0xff] }
 0x284   :  { %7440 = vmatprep.subr.bf16.mxu1 %v7439_v22  ;;  %v7507_v46 = vpack.c.bf16 %v1727_v1, %v1726_v45  ;;  %v1743_v22 = vld [vmem:[#allocation16 + $0x108] sm:$0xff]  ;;  %v1749_v35 = vld [vmem:[#allocation16 + $0x138] sm:$0xff]  ;;  %v1718_v1 = vld [vmem:[#allocation16 + $0x40] sm:$0xff] }
 0x285   :  { %v1751_v45 = vld [vmem:[#allocation16 + $0x148] sm:$0xff] }
 0x286   :  { %7474 = vmatpush3.bf16.msra.mxu0 %v7473_v2  ;;  %v1729_v2 = vld [vmem:[#allocation16 + $0x98] sm:$0xff] }
 0x287   :  { %7442 = vmatpush3.bf16.msra.mxu1 %v7441_v56  ;;  %7508 = vmatprep.subr.bf16.mxu0 %v7507_v46  ;;  %v1744_v56 = vld [vmem:[#allocation16 + $0x110] sm:$0xff] }
 0x288   :  { %7476 = vmatprep.subr.bf16.mxu1 %v7475_v38  ;;  %v7545_v34 = vpack.c.bf16 %v1745_v49, %v1744_v56  ;;  %v1753_v49 = vld [vmem:[#allocation16 + $0x158] sm:$0xff] }
 0x289   :  { %1448 = vmatmul.mubr.f32.vlgmr.msra.gmra.mrb[12].mxu0 %v9395_v18  ;;  %v9572_v18 = vrot.slane %v9206_v50, 6 }
 0x28a   :  { %1363 = vmatmul.mubr.f32.vlgmr.msra.gmra.mrb[8].mxu1 %v9472_v0  ;;  %1452 = vmatprep.mubr.f32.mxu0 %v9427_v52  ;;  %v7487_v52 = vpack.c.bf16 %v987_v47, %v986_v9  ;;  %v989_v0 = vld [vmem:[#allocation12 + $0x448] sm:$0xff] }
 0x28b   :  { %1367 = vmatprep.mubr.f32.mxu1 %v9447_v31  ;;  %7478 = vmatpush3.bf16.msra.mxu1 %v7475_v38  ;;  %11079 = vst [vmem:[#allocation61_spill] sm:$0xff] %v9572_v18  ;;  %v1089_v31 = vsel %vm548_vm2, %v1070_v28, %v9572_v18  ;;  %v991_v28 = vld [vmem:[#allocation12 + $0x458] sm:$0xff]  ;;  %v1763_v9 = vld [vmem:[#allocation16 + $0x1a8] sm:$0xff]  ;;  %v1730_v47 = vld [vmem:[#allocation16 + $0xa0] sm:$0xff] }
 0x28c   :  { %7480 = vmatprep.subr.bf16.mxu1 %v7479_v60 }
 0x28d   :  { %1453 = vmatmul.mubr.f32.gmra.mrb[14].mxu0 %v9455_v32  ;;  %v988_v32 = vld [vmem:[#allocation12 + $0x440] sm:$0xff] }
 0x28e   :  { %1368 = vmatmul.mubr.f32.gmra.mrb[10].mxu1 %v9475_v55  ;;  %1457 = vmatprep.mubr.f32.mxu0 %v9491_v53  ;;  %v9579_v55 = vrot.slane %v708_v4, 6  ;;  %v7491_v53 = vpack.c.bf16 %v989_v0, %v988_v32  ;;  %v1746_v4 = vld [vmem:[#allocation16 + $0x120] sm:$0xff] }
 0x28f   :  { %1372 = vmatprep.mubr.f32.mxu1 %v9501_v8  ;;  %7482 = vmatpush3.bf16.msra.mxu1 %v7479_v60  ;;  %v7495_v8 = vpack.c.bf16 %v991_v28, %v990_v62  ;;  %v1713_v60 = vld [vmem:[#allocation16 + $0x18] sm:$0xff]  ;;  %v1714_v0 = vld [vmem:[#allocation16 + $0x20] sm:$0xff] }
 0x290   :  { %7484 = vmatprep.subr.bf16.mxu1 %v7483_v59  ;;  %11080 = vst [vmem:[#allocation60_spill] sm:$0xff] %v9579_v55  ;;  %v7513_v3 = vpack.c.bf16 %v1713_v60, %v1712_v33  ;;  %v1765_v28 = vld [vmem:[#allocation16 + $0x1b8] sm:$0xff]  ;;  %v1720_v33 = vld [vmem:[#allocation16 + $0x50] sm:$0xff] }
 0x291   :  { %1458 = vmatmul.mubr.f32.gmra.mrb[16].mxu0 %v9466_v58  ;;  %v1087_v58 = vsel %vm548_vm2, %v1068_v29, %v9579_v55  ;;  %v11081_v29 = vld [vmem:[#allocation95_spill] sm:$0xff] }
 0x292   :  { %1373 = vmatmul.mubr.f32.gmra.mrb[12].mxu1 %v9512_v15  ;;  %1462 = vmatprep.mubr.f32.mxu0 %v1089_v31  ;;  %v992_v15 = vld [vmem:[#allocation12 + $0x460] sm:$0xff]  ;;  %v11082_v42 = vrot.slane %v11081_v29, 6  ;;  %v7515_v31 = vpack.c.bf16 %v1731_v10, %v1730_v47  ;;  %v1716_v29 = vld [vmem:[#allocation16 + $0x30] sm:$0xff]  ;;  %v1771_v47 = vld [vmem:[#allocation16 + $0x1e8] sm:$0xff] }
 0x293   :  { %1377 = vmatprep.mubr.f32.mxu1 %v9527_v23  ;;  %7486 = vmatpush3.bf16.msra.mxu1 %v7483_v59  ;;  %v993_v23 = vld [vmem:[#allocation12 + $0x468] sm:$0xff] }
 0x294   :  { %7488 = vmatprep.subr.bf16.mxu1 %v7487_v52  ;;  %v7499_v63 = vpack.c.bf16 %v993_v23, %v992_v15  ;;  %v775_v25 = vmul.f32 0.0, %v11082_v42  ;;  %v1762_v59 = vld [vmem:[#allocation16 + $0x1a0] sm:$0xff]  ;;  %v1733_v15 = vld [vmem:[#allocation16 + $0xb8] sm:$0xff]  ;;  %v1739_v10 = vld [vmem:[#allocation16 + $0xe8] sm:$0xff] }
 0x295   :  { %1463 = vmatmul.mubr.f32.gmra.mrb[18].mxu0 %v1087_v58  ;;  %v7547_v13 = vpack.c.bf16 %v1763_v9, %v1762_v59  ;;  %v1715_v58 = vld [vmem:[#allocation16 + $0x28] sm:$0xff]  ;;  %v1717_v42 = vld [vmem:[#allocation16 + $0x38] sm:$0xff]  ;;  %v1770_v9 = vld [vmem:[#allocation16 + $0x1e0] sm:$0xff] }
 0x296   :  { %1378 = vmatmul.mubr.f32.gmra.mrb[14].mxu1 %v9516_v16  ;;  %v850_v16 = vrot.slane %v775_v25, 4  ;;  %v7517_v62 = vpack.c.bf16 %v1715_v58, %v1714_v0  ;;  %v1766_v25 = vld [vmem:[#allocation16 + $0x1c0] sm:$0xff]  ;;  %v7521_v12 = vpack.c.bf16 %v1717_v42, %v1716_v29  ;;  %v1721_v59 = vld [vmem:[#allocation16 + $0x58] sm:$0xff]  ;;  %v1772_v29 = vld [vmem:[#allocation16 + $0x1f0] sm:$0xff] }
 0x297   :  { %7490 = vmatpush3.bf16.msra.mxu1 %v7487_v52  ;;  %7257 = vmatprep.mubr.f32.mxu1 %v9544_v24  ;;  %v1747_v52 = vld [vmem:[#allocation16 + $0x128] sm:$0xff]  ;;  %v1773_v42 = vld [vmem:[#allocation16 + $0x1f8] sm:$0xff] }
 0x298   :  { %7492 = vmatprep.subr.bf16.mxu1 %v7491_v53  ;;  %v851_v24 = vsel %vm792_vm3, %v9498_v19, %v850_v16  ;;  %v7549_v32 = vpack.c.bf16 %v1747_v52, %v1746_v4  ;;  %v7553_v16 = vpack.c.bf16 %v1749_v35, %v1748_v48  ;;  %v1723_v35 = vld [vmem:[#allocation16 + $0x68] sm:$0xff] }
 0x299   :  { %v9595_v30 = vrot.slane %v851_v24, 6  ;;  %v1734_v24 = vld [vmem:[#allocation16 + $0xc0] sm:$0xff]  ;;  %v9754_v55 = vld [vmem:[#allocation16 + $0x3e8] sm:$0xff] }
 0x29a   :  { %11099 = vst [vmem:[#allocation84_spill] sm:$0xff] %v9754_v55  ;;  %v11110_v55 = vld [vmem:[#allocation45_spill] sm:$0xff] }
 0x29b   :  { %7494 = vmatpush3.bf16.msra.mxu1 %v7491_v53  ;;  %11083 = vst [vmem:[#allocation66_spill] sm:$0xff] %v9595_v30  ;;  %v1091_v6 = vsel %vm548_vm2, %v1072_v36, %v9595_v30  ;;  %v1728_v36 = vld [vmem:[#allocation16 + $0x90] sm:$0xff]  ;;  %v9730_v30 = vld [vmem:[#allocation16 + $0x3d8] sm:$0xff] }
 0x29c   :  { %7496 = vmatprep.subr.bf16.mxu1 %v7495_v8  ;;  %v7511_v38 = vpack.c.bf16 %v1729_v2, %v1728_v36  ;;  %v1764_v53 = vld [vmem:[#allocation16 + $0x1b0] sm:$0xff] }
 0x29d   :  { %v7551_v23 = vpack.c.bf16 %v1765_v28, %v1764_v53  ;;  %v7529_v53 = vpack.c.bf16 %v1721_v59, %v1720_v33  ;;  %v1754_v28 = vld [vmem:[#allocation16 + $0x160] sm:$0xff] }
 0x29f   :  { %7498 = vmatpush3.bf16.msra.mxu1 %v7495_v8  ;;  %v1732_v8 = vld [vmem:[#allocation16 + $0xb0] sm:$0xff] }
 0x2a0   :  { %7500 = vmatprep.subr.bf16.mxu1 %v7499_v63 }
 0x2a3   :  { %7502 = vmatpush3.bf16.msra.mxu1 %v7499_v63  ;;  %v7519_v63 = vpack.c.bf16 %v1733_v15, %v1732_v8  ;;  %v1755_v8 = vld [vmem:[#allocation16 + $0x168] sm:$0xff]  ;;  %v1722_v15 = vld [vmem:[#allocation16 + $0x60] sm:$0xff] }
 0x2a4   :  { %7504 = vmatprep.subr.bf16.mxu1 %v7503_v17 }
 0x2a7   :  { %7506 = vmatpush3.bf16.msra.mxu1 %v7503_v17  ;;  %v1767_v17 = vld [vmem:[#allocation16 + $0x1c8] sm:$0xff] }
 0x2a8   :  { %7540 = vmatprep.subr.bf16.mxu1 %v7539_v27  ;;  %v7555_v51 = vpack.c.bf16 %v1767_v17, %v1766_v25  ;;  %v1750_v27 = vld [vmem:[#allocation16 + $0x140] sm:$0xff]  ;;  %v1740_v25 = vld [vmem:[#allocation16 + $0xf0] sm:$0xff]  ;;  %v1741_v17 = vld [vmem:[#allocation16 + $0xf8] sm:$0xff] }
 0x2a9   :  { %v7557_v44 = vpack.c.bf16 %v1751_v45, %v1750_v27  ;;  %v7533_v45 = vpack.c.bf16 %v1723_v35, %v1722_v15 }
 0x2aa   :  { %7258 = vmatmul.mubr.f32.vlgmr.msra.gmra.mrb[16].mxu1 %v9551_v37  ;;  %v7541_v37 = vpack.c.bf16 %v1743_v22, %v1742_v5  ;;  %v1719_v5 = vld [vmem:[#allocation16 + $0x48] sm:$0xff]  ;;  %v1768_v22 = vld [vmem:[#allocation16 + $0x1d0] sm:$0xff] }
 0x2ab   :  { %7260 = vmatprep.mubr.f32.mxu1 %v9556_v11  ;;  %v1711_v11 = vld [vmem:[#allocation16 + $0x8] sm:$0xff]  ;;  %v7525_v2 = vpack.c.bf16 %v1719_v5, %v1718_v1  ;;  %v7567_v1 = vpack.c.bf16 %v1773_v42, %v1772_v29  ;;  %v1757_v5 = vld [vmem:[#allocation16 + $0x178] sm:$0xff] }
 0x2ac   :  { %v7509_v20 = vpack.c.bf16 %v1711_v11, %v1710_v41  ;;  %7542 = vmatpush3.bf16.msra.mxu1 %v7541_v37  ;;  %v1769_v41 = vld [vmem:[#allocation16 + $0x1d8] sm:$0xff]  ;;  %v1736_v37 = vld [vmem:[#allocation16 + $0xd0] sm:$0xff] }
 0x2ad   :  { %7544 = vmatprep.subr.bf16.mxu1 %v7543_v40  ;;  %v1737_v11 = vld [vmem:[#allocation16 + $0xd8] sm:$0xff]  ;;  %v7559_v56 = vpack.c.bf16 %v1769_v41, %v1768_v22  ;;  %v1724_v22 = vld [vmem:[#allocation16 + $0x70] sm:$0xff] }
 0x2ae   :  { %7261 = vmatmul.mubr.f32.gmra.mrb[18].mxu1 %v1091_v6  ;;  %7510 = vmatpush3.bf16.msra.mxu0 %v7509_v20  ;;  %v1735_v6 = vld [vmem:[#allocation16 + $0xc8] sm:$0xff] }
 0x2af   :  { %7512 = vmatprep.subr.bf16.mxu0 %v7511_v38  ;;  %v7523_v46 = vpack.c.bf16 %v1735_v6, %v1734_v24  ;;  %v1752_v38 = vld [vmem:[#allocation16 + $0x150] sm:$0xff] }
 0x2b0   :  { %7546 = vmatpush3.bf16.msra.mxu1 %v7545_v34 }
 0x2b1   :  { %7548 = vmatprep.subr.bf16.mxu1 %v7547_v13  ;;  %v1738_v13 = vld [vmem:[#allocation16 + $0xe0] sm:$0xff] }
 0x2b2   :  { %7514 = vmatpush3.bf16.msra.mxu0 %v7513_v3  ;;  %v7527_v3 = vpack.c.bf16 %v1737_v11, %v1736_v37  ;;  %v7531_v48 = vpack.c.bf16 %v1739_v10, %v1738_v13  ;;  %v7535_v11 = vpack.c.bf16 %v1741_v17, %v1740_v25 }
 0x2b3   :  { %7516 = vmatprep.subr.bf16.mxu0 %v7515_v31 }
 0x2b4   :  { %7550 = vmatpush3.bf16.msra.mxu1 %v7549_v32  ;;  %v7561_v32 = vpack.c.bf16 %v1753_v49, %v1752_v38 }
 0x2b5   :  { %7552 = vmatprep.subr.bf16.mxu1 %v7551_v23 }
 0x2b6   :  { %7518 = vmatpush3.bf16.msra.mxu0 %v7517_v62  ;;  %v7563_v62 = vpack.c.bf16 %v1771_v47, %v1770_v9 }
 0x2b7   :  { %7520 = vmatprep.subr.bf16.mxu0 %v7519_v63 }
 0x2b8   :  { %7554 = vmatpush3.bf16.msra.mxu1 %v7553_v16 }
 0x2b9   :  { %7556 = vmatprep.subr.bf16.mxu1 %v7555_v51 }
 0x2ba   :  { %7522 = vmatpush3.bf16.msra.mxu0 %v7521_v12  ;;  %v7565_v12 = vpack.c.bf16 %v1755_v8, %v1754_v28 }
 0x2bb   :  { %7524 = vmatprep.subr.bf16.mxu0 %v7523_v46  ;;  %v1756_v46 = vld [vmem:[#allocation16 + $0x170] sm:$0xff] }
 0x2bc   :  { %7558 = vmatpush3.bf16.msra.mxu1 %v7557_v44  ;;  %v1823_v44 = vld [vmem:[#allocation16 + $0x388] sm:$0xff]  ;;  %v7569_v49 = vpack.c.bf16 %v1757_v5, %v1756_v46 }
 0x2bd   :  { %7560 = vmatprep.subr.bf16.mxu1 %v7559_v56 }
 0x2be   :  { %7526 = vmatpush3.bf16.msra.mxu0 %v7525_v2 }
 0x2bf   :  { %7528 = vmatprep.subr.bf16.mxu0 %v7527_v3 }
 0x2c0   :  { %7562 = vmatpush3.bf16.msra.mxu1 %v7561_v32 }
 0x2c1   :  { %7564 = vmatprep.subr.bf16.mxu1 %v7563_v62 }
 0x2c2   :  { %7530 = vmatpush3.bf16.msra.mxu0 %v7529_v53 }
 0x2c3   :  { %7532 = vmatprep.subr.bf16.mxu0 %v7531_v48 }
 0x2c4   :  { %7566 = vmatpush3.bf16.msra.mxu1 %v7565_v12 }
 0x2c5   :  { %7568 = vmatprep.subr.bf16.mxu1 %v7567_v1 }
 0x2c6   :  { %7534 = vmatpush3.bf16.msra.mxu0 %v7533_v45 }
 0x2c7   :  { %7536 = vmatprep.subr.bf16.mxu0 %v7535_v11 }
 0x2c8   :  { %7570 = vmatpush3.bf16.msra.mxu1 %v7569_v49 }
 0x331   :  { %v6611_v20 = vpop.f32.mrb[4].mxu0  ;;  %v6567_v14 = vpop.f32.mrb[0].mxu1 }
 0x332   :  { %v6612_v40 = vpop.f32.mrb[5].mxu0  ;;  %v6568_v36 = vpop.f32.mrb[1].mxu1 }
 0x333   :  { %v6613_v60 = vadd.f32 %v6612_v40, %v6611_v20  ;;  %v6569_v34 = vadd.f32 %v6568_v36, %v6567_v14  ;;  %v1725_v20 = vld [vmem:[#allocation16 + $0x78] sm:$0xff]  ;;  %v1822_v14 = vld [vmem:[#allocation16 + $0x380] sm:$0xff]  ;;  %v1791_v36 = vld [vmem:[#allocation16 + $0x288] sm:$0xff] }
 0x334   :  { %v1790_v40 = vld [vmem:[#allocation16 + $0x280] sm:$0xff]  ;;  %v7603_v3 = vpack.c.bf16 %v1823_v44, %v1822_v14 }
 0x335   :  { %v9601_v4 = vadd.f32 %v6613_v60, %v6569_v34  ;;  %v6614_v52 = vpop.f32.mrb[6].mxu0  ;;  %v7537_v34 = vpack.c.bf16 %v1725_v20, %v1724_v22  ;;  %v7571_v47 = vpack.c.bf16 %v1791_v36, %v1790_v40 }
 0x336   :  { %v6570_v31 = vpop.f32.mrb[2].mxu1  ;;  %v6615_v0 = vpop.f32.mrb[7].mxu0  ;;  %7604 = vmatprep.subr.bf16.mxu1 %v7603_v3 }
 0x337   :  { %v6571_v58 = vpop.f32.mrb[3].mxu1  ;;  %v6616_v23 = vadd.f32 %v6615_v0, %v6614_v52  ;;  %7538 = vmatpush3.bf16.msra.mxu0 %v7537_v34 }
 0x338   :  { %v6572_v63 = vadd.f32 %v6571_v58, %v6570_v31  ;;  %7572 = vmatprep.subr.bf16.mxu0 %v7571_v47 }
 0x33a   :  { %v1285_v16 = vadd.f32 %v6616_v23, %v6572_v63  ;;  %v6617_v24 = vpop.f32.mrb[8].mxu0  ;;  %v6573_v6 = vpop.f32.mrb[4].mxu1 }
 0x33b   :  { %v6618_v51 = vpop.f32.mrb[9].mxu0  ;;  %v6574_v27 = vpop.f32.mrb[5].mxu1 }
 0x33c   :  { %v6619_v41 = vadd.f32 %v6618_v51, %v6617_v24  ;;  %v6575_v37 = vadd.f32 %v6574_v27, %v6573_v6 }
 0x33e   :  { %v1290_v2 = vadd.f32 %v6619_v41, %v6575_v37  ;;  %v6620_v56 = vpop.f32.mrb[10].mxu0  ;;  %v6576_v38 = vpop.f32.mrb[6].mxu1 }
 0x33f   :  { %v6621_v33 = vpop.f32.mrb[11].mxu0  ;;  %v6577_v60 = vpop.f32.mrb[7].mxu1 }
 0x340   :  { %v6622_v59 = vadd.f32 %v6621_v33, %v6620_v56  ;;  %v6578_v9 = vadd.f32 %v6577_v60, %v6576_v38 }
 0x342   :  { %v1295_v13 = vadd.f32 %v6622_v59, %v6578_v9 }
 0x35c   :  { %v6699_v10 = vpop.f32.mrb[12].mxu0 }
 0x35d   :  { %v6655_v52 = vpop.f32.mrb[8].mxu1  ;;  %v6700_v31 = vpop.f32.mrb[13].mxu0 }
 0x35e   :  { %v6701_v32 = vadd.f32 %v6700_v31, %v6699_v10  ;;  %v6656_v0 = vpop.f32.mrb[9].mxu1 }
 0x35f   :  { %v6657_v58 = vadd.f32 %v6656_v0, %v6655_v52 }
 0x360   :  { %v6702_v53 = vpop.f32.mrb[14].mxu0 }
 0x361   :  { %v1365_v62 = vadd.f32 %v6657_v58, %v9601_v4  ;;  %v6658_v28 = vpop.f32.mrb[10].mxu1  ;;  %v6703_v8 = vpop.f32.mrb[15].mxu0 }
 0x362   :  { %v6704_v15 = vadd.f32 %v6703_v8, %v6702_v53  ;;  %v6659_v23 = vpop.f32.mrb[11].mxu1 }
 0x363   :  { %v6660_v63 = vadd.f32 %v6659_v23, %v6658_v28  ;;  %v1450_v48 = vadd.f32 %v6701_v32, %v1365_v62 }
 0x364   :  { %v6705_v35 = vpop.f32.mrb[16].mxu0 }
 0x365   :  { %v1370_v29 = vadd.f32 %v6660_v63, %v1285_v16  ;;  %v6661_v42 = vpop.f32.mrb[12].mxu1  ;;  %v6706_v25 = vpop.f32.mrb[17].mxu0 }
 0x366   :  { %v6707_v17 = vadd.f32 %v6706_v25, %v6705_v35  ;;  %v6662_v24 = vpop.f32.mrb[13].mxu1 }
 0x367   :  { %v6663_v6 = vadd.f32 %v6662_v24, %v6661_v42  ;;  %v1455_v12 = vadd.f32 %v6704_v15, %v1370_v29 }
 0x368   :  { %v6708_v51 = vpop.f32.mrb[18].mxu0 }
 0x369   :  { %v1375_v27 = vadd.f32 %v6663_v6, %v1290_v2  ;;  %v6664_v45 = vpop.f32.mrb[14].mxu1  ;;  %v6709_v1 = vpop.f32.mrb[19].mxu0 }
 0x36a   :  { %v6710_v46 = vadd.f32 %v6709_v1, %v6708_v51  ;;  %v6665_v4 = vpop.f32.mrb[15].mxu1  ;;  %v9638_v51 = vld [vmem:[#allocation16 + $0x308] sm:$0xff]  ;;  %v9644_v1 = vld [vmem:[#allocation16 + $0x390] sm:$0xff] }
 0x36b   :  { %v6666_v5 = vadd.f32 %v6665_v4, %v6664_v45  ;;  %v1460_v22 = vadd.f32 %v6707_v17, %v1375_v27  ;;  %v9640_v27 = vld [vmem:[#allocation16 + $0x200] sm:$0xff]  ;;  %v9642_v45 = vld [vmem:[#allocation16 + $0x208] sm:$0xff]  ;;  %v9648_v4 = vld [vmem:[#allocation16 + $0x290] sm:$0xff] }
 0x36d   :  { %v1380_v41 = vadd.f32 %v6666_v5, %v1295_v13  ;;  %v9650_v5 = vld [vmem:[#allocation16 + $0x298] sm:$0xff] }
 0x36f   :  { %v1465_v37 = vadd.f32 %v6710_v46, %v1380_v41  ;;  %v9646_v46 = vld [vmem:[#allocation16 + $0x398] sm:$0xff] }
 0x370   :  { %v9654_v41 = vld [vmem:[#allocation16 + $0x318] sm:$0xff] }
 0x37d   :  { %v7259_v11 = vpop.f32.mrb[16].mxu1 }
 0x37e   :  { %v9604_v20 = vadd.f32 %v7259_v11, %v1455_v12  ;;  %v1534_v16 = vpop.f32.mrb[17].mxu1  ;;  %v9636_v12 = vld [vmem:[#allocation16 + $0x300] sm:$0xff]  ;;  %v9658_v11 = vld [vmem:[#allocation16 + $0x218] sm:$0xff] }
 0x37f   :  { %v9606_v14 = vadd.f32 %v1534_v16, %v1450_v48  ;;  %v9662_v16 = vld [vmem:[#allocation16 + $0x3a8] sm:$0xff] }
 0x380   :  { %v1564_v44 = vmul.f32 %v9604_v20, %v9604_v20 }
 0x381   :  { %v1553_v40 = vadd.f32 %v9604_v20, %v9606_v14  ;;  %v1563_v36 = vmul.f32 %v9606_v14, %v9606_v14  ;;  %v7262_v2 = vpop.f32.mrb[18].mxu1 }
 0x382   :  { %v9614_v56 = vadd.f32 %v7262_v2, %v1465_v37  ;;  %v1544_v38 = vpop.f32.mrb[19].mxu1  ;;  %v9656_v37 = vld [vmem:[#allocation16 + $0x210] sm:$0xff]  ;;  %v9672_v2 = vld [vmem:[#allocation16 + $0x220] sm:$0xff] }
 0x383   :  { %v1567_v49 = vadd.f32 %v1564_v44, %v1563_v36  ;;  %v9616_v33 = vadd.f32 %v1544_v38, %v1460_v22  ;;  %v9652_v22 = vld [vmem:[#allocation16 + $0x310] sm:$0xff]  ;;  %v9666_v44 = vld [vmem:[#allocation16 + $0x2a8] sm:$0xff] }
 0x384   :  { %v1566_v3 = vmul.f32 %v9614_v56, %v9614_v56  ;;  %v9670_v36 = vld [vmem:[#allocation16 + $0x328] sm:$0xff]  ;;  %v9676_v38 = vld [vmem:[#allocation16 + $0x3b0] sm:$0xff] }
 0x385   :  { %v1554_v60 = vadd.f32 %v1553_v40, %v9616_v33  ;;  %v1565_v34 = vmul.f32 %v9616_v33, %v9616_v33  ;;  %v9668_v40 = vld [vmem:[#allocation16 + $0x320] sm:$0xff] }
 0x387   :  { %v1555_v59 = vadd.f32 %v1554_v60, %v9614_v56  ;;  %v1568_v9 = vadd.f32 %v1567_v49, %v1565_v34  ;;  %v9678_v49 = vld [vmem:[#allocation16 + $0x3b8] sm:$0xff]  ;;  %v9684_v34 = vld [vmem:[#allocation16 + $0x330] sm:$0xff] }
 0x388   :  { %v9682_v60 = vld [vmem:[#allocation16 + $0x2b8] sm:$0xff]  ;;  %11084 = vst [vmem:[#allocation65_spill] sm:$0xff] %v9684_v34 }
 0x389   :  { %v1556_v47 = vrot.slane %v1555_v59, 4  ;;  %v1569_v13 = vadd.f32 %v1568_v9, %v1566_v3  ;;  %v6455_v3 = vld [vmem:[#allocation13] ss:$0 sm:$0xff] }
 0x38b   :  { %v1557_v10 = vadd.f32 %v1556_v47, %v1555_v59  ;;  %v1570_v52 = vrot.slane %v1569_v13, 4  ;;  %v9690_v47 = vld [vmem:[#allocation16 + $0x338] sm:$0xff] }
 0x38c   :  { %11085 = vst [vmem:[#allocation68_spill] sm:$0xff] %v9690_v47 }
 0x38d   :  { %v1558_v31 = vrot.slane %v1557_v10, 2  ;;  %v1571_v32 = vadd.f32 %v1570_v52, %v1569_v13  ;;  %v9692_v13 = vld [vmem:[#allocation16 + $0x230] sm:$0xff] }
 0x38e   :  { %11086 = vst [vmem:[#allocation67_spill] sm:$0xff] %v9692_v13  ;;  %v11107_v13 = vld [vmem:[#allocation44_spill] sm:$0xff] }
 0x38f   :  { %v1559_v0 = vadd.f32 %v1558_v31, %v1557_v10  ;;  %v1572_v58 = vrot.slane %v1571_v32, 2  ;;  %v9694_v10 = vld [vmem:[#allocation16 + $0x238] sm:$0xff] }
 0x390   :  { %11087 = vst [vmem:[#allocation58_spill] sm:$0xff] %v9694_v10 }
 0x391   :  { %v1560_v53 = vrot.slane %v1559_v0, 1  ;;  %v1573_v62 = vadd.f32 %v1572_v58, %v1571_v32  ;;  %v9704_v58 = vld [vmem:[#allocation16 + $0x3c0] sm:$0xff]  ;;  %v9726_v32 = vld [vmem:[#allocation16 + $0x248] sm:$0xff] }
 0x392   :  { %11088 = vst [vmem:[#allocation80_spill] sm:$0xff] %v9704_v58  ;;  %11090 = vst [vmem:[#allocation70_spill] sm:$0xff] %v9726_v32  ;;  %v9772_v58 = vld [vmem:[#allocation16 + $0x260] sm:$0xff] }
 0x393   :  { %v1561_v28 = vadd.f32 %v1560_v53, %v1559_v0  ;;  %v1574_v8 = vrot.slane %v1573_v62, 1  ;;  %v9706_v53 = vld [vmem:[#allocation16 + $0x3c8] sm:$0xff]  ;;  %v9724_v0 = vld [vmem:[#allocation16 + $0x240] sm:$0xff]  ;;  %11104 = vst [vmem:[#allocation93_spill] sm:$0xff] %v9772_v58 }
 0x394   :  { %11089 = vst [vmem:[#allocation71_spill] sm:$0xff] %v9724_v0  ;;  %v11113_v58 = vld [vmem:[#allocation90_spill] sm:$0xff] }
 0x395   :  { %v9624_v15 = vmul.f32 0.03125, %v1561_v28  ;;  %v1575_v23 = vadd.f32 %v1574_v8, %v1573_v62  ;;  %v9708_v62 = vld [vmem:[#allocation16 + $0x2c0] sm:$0xff]  ;;  %v9710_v28 = vld [vmem:[#allocation16 + $0x2c8] sm:$0xff] }
 0x396   :  { %v9712_v8 = vld [vmem:[#allocation16 + $0x340] sm:$0xff] }
 0x397   :  { %v1576_v63 = vmul.f32 0.03125, %v1575_v23  ;;  %v1577_v48 = vmul.f32 %v9624_v15, %v9624_v15  ;;  %v1580_v35 = vsub.f32 %v9606_v14, %v9624_v15  ;;  %v1581_v29 = vsub.f32 %v9604_v20, %v9624_v15  ;;  %v9660_v20 = vld [vmem:[#allocation16 + $0x3a0] sm:$0xff]  ;;  %v6456_v23 = vld [vmem:[#allocation15] ss:$0 sm:$0xff] }
 0x398   :  { %v1582_v42 = vsub.f32 %v9616_v33, %v9624_v15  ;;  %v1583_v25 = vsub.f32 %v9614_v56, %v9624_v15  ;;  %v9664_v14 = vld [vmem:[#allocation16 + $0x2a0] sm:$0xff]  ;;  %v9674_v56 = vld [vmem:[#allocation16 + $0x228] sm:$0xff]  ;;  %v9680_v33 = vld [vmem:[#allocation16 + $0x2b0] sm:$0xff] }
 0x399   :  { %v1578_v17 = vsub.f32 %v1576_v63, %v1577_v48  ;;  %v9728_v63 = vld [vmem:[#allocation16 + $0x3d0] sm:$0xff] }
 0x39a   :  { %11091 = vst [vmem:[#allocation48_spill] sm:$0xff] %v9728_v63  ;;  %v9732_v48 = vld [vmem:[#allocation16 + $0x2d0] sm:$0xff] }
 0x39b   :  { %v1579_v24 = vmax.f32 %v1578_v17, 0.0  ;;  %11092 = vst [vmem:[#allocation73_spill] sm:$0xff] %v9732_v48  ;;  %v9734_v17 = vld [vmem:[#allocation16 + $0x2d8] sm:$0xff]  ;;  %v11115_v48 = vld [vmem:[#allocation54_spill] sm:$0xff] }
 0x39c   :  { %11093 = vst [vmem:[#allocation72_spill] sm:$0xff] %v9734_v17  ;;  %v11116_v17 = vld [vmem:[#allocation56_spill] sm:$0xff] }
 0x39d   :  { %v1584_v6 = vadd.f32 1e-05, %v1579_v24  ;;  %v9750_v24 = vld [vmem:[#allocation16 + $0x258] sm:$0xff] }
 0x39e   :  { %11097 = vst [vmem:[#allocation83_spill] sm:$0xff] %v9750_v24 }
 0x39f   :  { %7979 = vrsqrt.f32 %v1584_v6  ;;  %v9722_v6 = vld [vmem:[#allocation16 + $0x348] sm:$0xff] }
 0x3a9   :  { %v7980_v15 = vpop.eup %7979 }
 0x3aa   :  { %v1586_v31 = vmul.f32 %v7980_v15, %v1580_v35  ;;  %v1587_v52 = vmul.f32 %v7980_v15, %v1581_v29  ;;  %v1588_v9 = vmul.f32 %v7980_v15, %v1582_v42  ;;  %v1589_v59 = vmul.f32 %v7980_v15, %v1583_v25  ;;  %v9744_v42 = vld [vmem:[#allocation16 + $0x350] sm:$0xff]  ;;  %v9746_v25 = vld [vmem:[#allocation16 + $0x358] sm:$0xff]  ;;  %v9770_v35 = vld [vmem:[#allocation16 + $0x368] sm:$0xff] }
 0x3ab   :  { %11094 = vst [vmem:[#allocation77_spill] sm:$0xff] %v9744_v42  ;;  %11095 = vst [vmem:[#allocation79_spill] sm:$0xff] %v9746_v25  ;;  %v9748_v15 = vld [vmem:[#allocation16 + $0x250] sm:$0xff]  ;;  %v9774_v29 = vld [vmem:[#allocation16 + $0x268] sm:$0xff] }
 0x3ac   :  { %11096 = vst [vmem:[#allocation78_spill] sm:$0xff] %v9748_v15  ;;  %v1597_v18 = vmul.f32 %v6455_v3, %v1586_v31  ;;  %v1598_v19 = vmul.f32 %v6455_v3, %v1587_v52  ;;  %v1599_v43 = vmul.f32 %v6455_v3, %v1588_v9  ;;  %v1600_v50 = vmul.f32 %v6455_v3, %v1589_v59  ;;  %v9764_v9 = vld [vmem:[#allocation16 + $0x2e0] sm:$0xff]  ;;  %v9766_v3 = vld [vmem:[#allocation16 + $0x2e8] sm:$0xff] }
 0x3ad   :  { %11100 = vst [vmem:[#allocation89_spill] sm:$0xff] %v9764_v9  ;;  %11101 = vst [vmem:[#allocation92_spill] sm:$0xff] %v9766_v3  ;;  %v9768_v59 = vld [vmem:[#allocation16 + $0x360] sm:$0xff] }
 0x3ae   :  { %11102 = vst [vmem:[#allocation91_spill] sm:$0xff] %v9768_v59  ;;  %v1608_v31 = vadd.f32 %v6456_v23, %v1597_v18  ;;  %v1609_v10 = vadd.f32 %v6456_v23, %v1598_v19  ;;  %v1610_v34 = vadd.f32 %v6456_v23, %v1599_v43  ;;  %v1611_v47 = vadd.f32 %v6456_v23, %v1600_v50  ;;  %v11108_v15 = vld [vmem:[#allocation62_spill] sm:$0xff]  ;;  %v11112_v59 = vld [vmem:[#allocation63_spill] sm:$0xff] }
 0x3af   :  { %11103 = vst [vmem:[#allocation96_spill] sm:$0xff] %v9770_v35  ;;  %11105 = vst [vmem:[#allocation114_spill] sm:$0xff] %v9774_v29  ;;  %v11111_v9 = vld [vmem:[#allocation86_spill] sm:$0xff] }
 0x3b0   :  { %v9784_v43 = vmax.f32 %v1608_v31, 0.0  ;;  %v9786_v50 = vmax.f32 %v1609_v10, 0.0  ;;  %v9788_v18 = vmax.f32 %v1610_v34, 0.0  ;;  %v9792_v32 = vmax.f32 %v1611_v47, 0.0  ;;  %v11106_v31 = vld [vmem:[#allocation64_spill] sm:$0xff]  ;;  %v11109_v47 = vld [vmem:[#allocation87_spill] sm:$0xff] }
 0x3b1   :  { %v11114_v25 = vld [vmem:[#allocation74_spill] sm:$0xff] }
 0x3b2   :  { %v1626_v10 = vmul.f32 %v9784_v43, %v11106_v31  ;;  %v1619_v34 = vmul.f32 %v9784_v43, %v11107_v13  ;;  %v1622_v23 = vmul.f32 %v9784_v43, %v11108_v15  ;;  %v1627_v61 = vmul.f32 %v9786_v50, %v11109_v47 }
 0x3b3   :  { %v1620_v52 = vmul.f32 %v9786_v50, %v11110_v55  ;;  %v1623_v0 = vmul.f32 %v9786_v50, %v11111_v9  ;;  %v1616_v19 = vmul.f32 %v9784_v43, %v11112_v59  ;;  %v1628_v31 = vmul.f32 %v9788_v18, %v11113_v58 }
 0x3b4   :  { %v1869_v29 = vrot.slane %v1626_v10, 6  ;;  %v1651_v13 = vrot.slane %v1619_v34, 2  ;;  %v1661_v35 = vrot.slane %v1622_v23, 4  ;;  %v1892_v3 = vrot.slane %v1627_v61, 6  ;;  %v11117_v23 = vld [vmem:[#allocation55_spill] sm:$0xff] }
 0x3b5   :  { %v1653_v15 = vrot.slane %v1620_v52, 2  ;;  %v1663_v24 = vrot.slane %v1623_v0, 4  ;;  %v1886_v42 = vrot.slane %v1616_v19, 6  ;;  %v1910_v47 = vrot.slane %v1628_v31, 6 }
 0x3b6   :  { %v1870_v55 = vsel %vm548_vm2, %v11114_v25, %v1869_v29  ;;  %v1652_v9 = vsel %vm480_vm1, %v11115_v48, %v1651_v13  ;;  %v1662_v59 = vsel %vm792_vm3, %v11116_v17, %v1661_v35  ;;  %v1893_v63 = vsel %vm548_vm2, %v1869_v29, %v1892_v3  ;;  %v11118_v48 = vld [vmem:[#allocation69_spill] sm:$0xff] }
 0x3b7   :  { %2121 = vmatprep.mubr.f32.mxu1 %v1870_v55  ;;  %v1865_v10 = vrot.slane %v1652_v9, 6  ;;  %v1867_v34 = vrot.slane %v1662_v59, 6  ;;  %v1654_v61 = vsel %vm480_vm1, %v1651_v13, %v1653_v15  ;;  %v1664_v0 = vsel %vm792_vm3, %v1661_v35, %v1663_v24  ;;  %v11119_v17 = vld [vmem:[#allocation81_spill] sm:$0xff]  ;;  %v11120_v55 = vld [vmem:[#allocation46_spill] sm:$0xff]  ;;  %v11121_v59 = vld [vmem:[#allocation88_spill] sm:$0xff] }
 0x3b8   :  { %v1888_v52 = vrot.slane %v1654_v61, 6  ;;  %v1890_v19 = vrot.slane %v1664_v0, 6  ;;  %v1887_v31 = vsel %vm548_vm2, %v11117_v23, %v1886_v42  ;;  %v1911_v25 = vsel %vm548_vm2, %v1892_v3, %v1910_v47  ;;  %v11122_v0 = vld [vmem:[#allocation75_spill] sm:$0xff] }
 0x3b9   :  { %v1866_v58 = vsel %vm548_vm2, %v11118_v48, %v1865_v10  ;;  %v1868_v29 = vsel %vm548_vm2, %v11119_v17, %v1867_v34  ;;  %v1621_v9 = vmul.f32 %v9788_v18, %v11120_v55  ;;  %v1624_v13 = vmul.f32 %v9788_v18, %v11121_v59  ;;  %v11124_v17 = vld [vmem:[#allocation82_spill] sm:$0xff] }
 0x3ba   :  { %2036 = vmatprep.mubr.f32.mxu0 %v1866_v58  ;;  %2122 = vmatmul.mubr.f32.vlgmr.msra.gmra.mrb[20].mxu1 %v1868_v29  ;;  %v1889_v35 = vsel %vm548_vm2, %v1865_v10, %v1888_v52  ;;  %v1891_v61 = vsel %vm548_vm2, %v1867_v34, %v1890_v19  ;;  %v1617_v3 = vmul.f32 %v9786_v50, %v11122_v0  ;;  %v11125_v58 = vld [vmem:[#allocation76_spill] sm:$0xff] }
 0x3bb   :  { %v11123_v48 = vpack.c.bf16 %v9638_v51, %v9636_v12  ;;  %2037 = vmatmul.mubr.f32.vlgmr.msra.gmra.mrb[20].mxu0 %v11124_v17  ;;  %v1655_v23 = vrot.slane %v1621_v9, 2  ;;  %v1665_v55 = vrot.slane %v1624_v13, 4  ;;  %v1629_v59 = vmul.f32 %v9792_v32, %v9026_v54  ;;  %2126 = vmatprep.mubr.f32.mxu1 %v1893_v63  ;;  %v11127_v51 = vld [vmem:[#allocation50_spill] sm:$0xff]  ;;  %v11128_v9 = vld [vmem:[#allocation51_spill] sm:$0xff] }
 0x3bc   :  { %v1625_v29 = vmul.f32 %v9792_v32, %v11125_v58  ;;  %v11126_v10 = vpack.c.bf16 %v9642_v45, %v9640_v27  ;;  %v1904_v34 = vrot.slane %v1617_v3, 6  ;;  %v1618_v12 = vmul.f32 %v9788_v18, %v11003_v7  ;;  %2041 = vmatprep.mubr.f32.mxu0 %v1889_v35 }
 0x3bd   :  { %7606 = vmatpush3.bf16.msra.mxu1 %v11123_v48  ;;  %v1642_v48 = vmul.f32 %v9786_v50, %v11127_v51  ;;  %v9857_v13 = vmul.f32 %v9788_v18, %v11128_v9  ;;  %v11129_v58 = vpack.c.bf16 %v9646_v46, %v9644_v1  ;;  %v1656_v63 = vsel %vm480_vm1, %v1653_v15, %v1655_v23 }
 0x3be   :  { %7574 = vmatpush3.bf16.msra.mxu0 %v11126_v10  ;;  %v1666_v27 = vsel %vm792_vm3, %v1663_v24, %v1665_v55  ;;  %v1928_v45 = vrot.slane %v1629_v59, 6  ;;  %v1924_v3 = vrot.slane %v1655_v23, 6  ;;  %2127 = vmatmul.mubr.f32.gmra.mrb[22].mxu1 %v1891_v61  ;;  %v11130_v10 = vpack.c.bf16 %v9650_v5, %v9648_v4 }
 0x3bf   :  { %7608 = vmatprep.subr.bf16.mxu1 %v11129_v58  ;;  %v1906_v51 = vrot.slane %v1656_v63, 6  ;;  %v1908_v7 = vrot.slane %v1666_v27, 6  ;;  %v1905_v9 = vsel %vm548_vm2, %v1886_v42, %v1904_v34  ;;  %v1667_v35 = vrot.slane %v1625_v29, 4  ;;  %2042 = vmatmul.mubr.f32.gmra.mrb[22].mxu0 %v1887_v31  ;;  %v11137_v58 = vld [vmem:[#allocation108_spill] sm:$0xff]  ;;  %v11141_v63 = vld [vmem:[#allocation53_spill] sm:$0xff] }
 0x3c0   :  { %7576 = vmatprep.subr.bf16.mxu0 %v11130_v10  ;;  %v11131_v1 = vpack.c.bf16 %v9654_v41, %v9652_v22  ;;  %v1929_v46 = vsel %vm548_vm2, %v1910_v47, %v1928_v45  ;;  %v1922_v24 = vrot.slane %v1618_v12, 6  ;;  %v1695_v15 = vrot.slane %v1642_v48, 2  ;;  %2131 = vmatprep.mubr.f32.mxu1 %v1911_v25  ;;  %v11142_v45 = vld [vmem:[#allocation94_spill] sm:$0xff] }
 0x3c1   :  { %v1696_v23 = vrot.slane %v9857_v13, 2  ;;  %v11132_v4 = vpack.c.bf16 %v9658_v11, %v9656_v37  ;;  %v1907_v5 = vsel %vm548_vm2, %v1888_v52, %v1906_v51  ;;  %v1909_v42 = vsel %vm548_vm2, %v1890_v19, %v1908_v7 }
 0x3c2   :  { %7610 = vmatpush3.bf16.msra.mxu1 %v11131_v1  ;;  %v1925_v59 = vsel %vm548_vm2, %v1906_v51, %v1924_v3  ;;  %2046 = vmatprep.mubr.f32.mxu0 %v1907_v5  ;;  %v11133_v22 = vpack.c.bf16 %v9662_v16, %v9660_v20  ;;  %v1668_v41 = vsel %vm792_vm3, %v1665_v55, %v1667_v35  ;;  %v1880_v37 = vrot.slane %v1695_v15, 6  ;;  %v11136_v55 = vld [vmem:[#allocation101_spill] sm:$0xff] }
 0x3c3   :  { %7578 = vmatpush3.bf16.msra.mxu0 %v11132_v4  ;;  %v1923_v47 = vsel %vm548_vm2, %v1904_v34, %v1922_v24  ;;  %v9885_v25 = vsel %vm480_vm1, %v1695_v15, %v1696_v23  ;;  %2132 = vmatmul.mubr.f32.gmra.mrb[24].mxu1 %v1909_v42  ;;  %v11134_v11 = vpack.c.bf16 %v9666_v44, %v9664_v14  ;;  %v1926_v52 = vrot.slane %v1668_v41, 6  ;;  %v11144_v3 = vld [vmem:[#allocation65_spill] sm:$0xff]  ;;  %v11147_v24 = vld [vmem:[#allocation67_spill] sm:$0xff] }
 0x3c4   :  { %7612 = vmatprep.subr.bf16.mxu1 %v11133_v22  ;;  %v1881_v19 = vrot.slane %v9885_v25, 6  ;;  %v1634_v20 = vmul.f32 %v9784_v43, %v11015_v39  ;;  %v1635_v16 = vmul.f32 %v9786_v50, %v11016_v26  ;;  %v11135_v31 = vpack.c.bf16 %v9670_v36, %v9668_v40  ;;  %2047 = vmatmul.mubr.f32.gmra.mrb[24].mxu0 %v1905_v9  ;;  %v11149_v42 = vld [vmem:[#allocation109_spill] sm:$0xff] }
 0x3c5   :  { %7580 = vmatprep.subr.bf16.mxu0 %v11134_v11  ;;  %v1638_v61 = vmul.f32 %v9784_v43, %v11136_v55  ;;  %v1639_v14 = vmul.f32 %v9786_v50, %v11137_v58  ;;  %v1630_v44 = vmul.f32 %v9784_v43, %v11022_v57  ;;  %2136 = vmatprep.mubr.f32.mxu1 %v1929_v46  ;;  %v11146_v46 = vld [vmem:[#allocation58_spill] sm:$0xff]  ;;  %v11150_v22 = vld [vmem:[#allocation49_spill] sm:$0xff] }
 0x3c6   :  { %7614 = vmatpush3.bf16.msra.mxu1 %v11135_v31  ;;  %v11138_v29 = vpack.c.bf16 %v9674_v56, %v9672_v2  ;;  %v1927_v34 = vsel %vm548_vm2, %v1908_v7, %v1926_v52  ;;  %v1882_v40 = vsel %vm548_vm2, %v1880_v37, %v1881_v19  ;;  %v1684_v36 = vrot.slane %v1634_v20, 4  ;;  %2051 = vmatprep.mubr.f32.mxu0 %v1925_v59  ;;  %v11151_v37 = vld [vmem:[#allocation80_spill] sm:$0xff] }
 0x3c7   :  { %v1685_v12 = vrot.slane %v1635_v16, 4  ;;  %v11139_v51 = vpack.c.bf16 %v9678_v49, %v9676_v38  ;;  %v1877_v48 = vrot.slane %v1638_v61, 6  ;;  %v1878_v43 = vrot.slane %v1639_v14, 6  ;;  %2137 = vmatmul.mubr.f32.gmra.mrb[26].mxu1 %v1927_v34  ;;  %v11143_v49 = vld [vmem:[#allocation68_spill] sm:$0xff]  ;;  %v11154_v16 = vld [vmem:[#allocation99_spill] sm:$0xff] }
 0x3c8   :  { %7582 = vmatpush3.bf16.msra.mxu0 %v11138_v29  ;;  %v1631_v9 = vmul.f32 %v9786_v50, %v11027_v21  ;;  %v1673_v2 = vrot.slane %v1630_v44, 2  ;;  %v11140_v7 = vpack.c.bf16 %v9682_v60, %v9680_v33  ;;  %v1874_v13 = vrot.slane %v1684_v36, 6  ;;  %2291 = vmatprep.mubr.f32.mxu1 %v1882_v40 }
 0x3c9   :  { %7616 = vmatprep.subr.bf16.mxu1 %v11139_v51  ;;  %v1686_v56 = vsel %vm792_vm3, %v1684_v36, %v1685_v12  ;;  %v1644_v27 = vmul.f32 %v9792_v32, %v11141_v63  ;;  %v1636_v38 = vmul.f32 %v9788_v18, %v11142_v45  ;;  %v11145_v10 = vpack.c.bf16 %v11143_v49, %v11144_v3  ;;  %v11157_v51 = vld [vmem:[#allocation70_spill] sm:$0xff] }
 0x3ca   :  { %7584 = vmatprep.subr.bf16.mxu0 %v11140_v7  ;;  %2052 = vmatmul.mubr.f32.gmra.mrb[26].mxu0 %v1923_v47  ;;  %v1875_v35 = vrot.slane %v1686_v56, 6  ;;  %v9928_v1 = vsel %vm548_vm2, %v1877_v48, %v1878_v43  ;;  %v1674_v33 = vrot.slane %v1631_v9, 2  ;;  %v1871_v60 = vrot.slane %v1673_v2, 6  ;;  %v11158_v48 = vld [vmem:[#allocation71_spill] sm:$0xff]  ;;  %v1837_v7 = vld [vmem:[#allocation16 + $0x3f8] sm:$0xff] }
 0x3cb   :  { %7618 = vmatpush3.bf16.msra.mxu1 %v11145_v10  ;;  %v11148_v15 = vpack.c.bf16 %v11146_v46, %v11147_v24  ;;  %v1698_v4 = vrot.slane %v1644_v27, 2  ;;  %v1687_v5 = vrot.slane %v1636_v38, 4  ;;  %v1640_v59 = vmul.f32 %v9788_v18, %v11149_v42  ;;  %v11162_v27 = vld [vmem:[#allocation72_spill] sm:$0xff]  ;;  %v11163_v38 = vld [vmem:[#allocation73_spill] sm:$0xff]  ;;  %v10211_v42 = vld [vmem:[#allocation21 + $0x3e8] sm:$0xff] }
 0x3cc   :  { %v1632_v41 = vmul.f32 %v9788_v18, %v11150_v22  ;;  %v1876_v47 = vsel %vm548_vm2, %v1874_v13, %v1875_v35  ;;  %v11152_v11 = vpack.c.bf16 %v9706_v53, %v11151_v37  ;;  %v11153_v52 = vpack.c.bf16 %v9710_v28, %v9708_v62  ;;  %v11156_v28 = vld [vmem:[#allocation111_spill] sm:$0xff]  ;;  %v1805_v24 = vld [vmem:[#allocation16 + $0x2f8] sm:$0xff]  ;;  %11211 = vst [vmem:[#allocation70_spill] sm:$0xff] %v10211_v42 }
 0x3cd   :  { %7586 = vmatpush3.bf16.msra.mxu0 %v11148_v15  ;;  %v1675_v20 = vsel %vm480_vm1, %v1673_v2, %v1674_v33  ;;  %v1637_v31 = vmul.f32 %v9792_v32, %v11154_v16  ;;  %2206 = vmatprep.mubr.f32.mxu0 %v1876_v47  ;;  %v1699_v14 = vsel %vm480_vm1, %v1696_v23, %v1698_v4  ;;  %v1898_v29 = vrot.slane %v1640_v59, 6  ;;  %v11160_v23 = vld [vmem:[#allocation48_spill] sm:$0xff]  ;;  %v11167_v59 = vld [vmem:[#allocation79_spill] sm:$0xff]  ;;  %v10187_v22 = vld [vmem:[#allocation21 + $0x3d8] sm:$0xff] }
 0x3ce   :  { %7620 = vmatprep.subr.bf16.mxu1 %v11152_v11  ;;  %7588 = vmatprep.subr.bf16.mxu0 %v11153_v52  ;;  %v1872_v61 = vrot.slane %v1675_v20, 6  ;;  %v1688_v44 = vsel %vm792_vm3, %v1685_v12, %v1687_v5  ;;  %v11155_v53 = vpack.c.bf16 %v9722_v6, %v9712_v8  ;;  %v1900_v34 = vrot.slane %v1699_v14, 6  ;;  %v1836_v12 = vld [vmem:[#allocation16 + $0x3f0] sm:$0xff]  ;;  %v11172_v14 = vld [vmem:[#allocation78_spill] sm:$0xff]  ;;  %v11222_v42 = vld [vmem:[#allocation45_spill] sm:$0xff] }
 0x3cf   :  { %v1896_v40 = vrot.slane %v1688_v44, 6  ;;  %v1676_v62 = vrot.slane %v1632_v41, 2  ;;  %v9954_v36 = vsel %vm480_vm1, %v1698_v4, %v11156_v28  ;;  %v11159_v9 = vpack.c.bf16 %v11157_v51, %v11158_v48  ;;  %v1804_v46 = vld [vmem:[#allocation16 + $0x2f0] sm:$0xff]  ;;  %v11168_v41 = vld [vmem:[#allocation77_spill] sm:$0xff] }
 0x3d0   :  { %7622 = vmatpush3.bf16.msra.mxu1 %v11155_v53  ;;  %v11161_v2 = vpack.c.bf16 %v9730_v30, %v11160_v23  ;;  %v9963_v8 = vsel %vm548_vm2, %v1871_v60, %v1872_v61  ;;  %v9966_v6 = vsel %vm548_vm2, %v1878_v43, %v1898_v29  ;;  %v1918_v56 = vrot.slane %v9954_v36, 6  ;;  %v11165_v60 = vld [vmem:[#allocation113_spill] sm:$0xff]  ;;  %v11170_v52 = vld [vmem:[#allocation100_spill] sm:$0xff] }
 0x3d1   :  { %7590 = vmatpush3.bf16.msra.mxu0 %v11159_v9  ;;  %v1689_v13 = vrot.slane %v1637_v31, 4  ;;  %v11164_v49 = vpack.c.bf16 %v11162_v27, %v11163_v38  ;;  %v9975_v30 = vsel %vm548_vm2, %v1881_v19, %v1900_v34  ;;  %v9978_v3 = vsel %vm548_vm2, %v1875_v35, %v1896_v40  ;;  %v11166_v19 = vld [vmem:[#allocation52_spill] sm:$0xff]  ;;  %v11171_v31 = vld [vmem:[#allocation83_spill] sm:$0xff] }
 0x3d2   :  { %7624 = vmatprep.subr.bf16.mxu1 %v11161_v2  ;;  %v1677_v10 = vsel %vm480_vm1, %v1674_v33, %v1676_v62  ;;  %v9983_v43 = vmul.f32 %v9792_v32, %v11165_v60  ;;  %v9988_v4 = vsel %vm548_vm2, %v1900_v34, %v1918_v56  ;;  %v1633_v35 = vmul.f32 %v9792_v32, %v11166_v19  ;;  %v11174_v53 = vld [vmem:[#allocation84_spill] sm:$0xff] }
 0x3d3   :  { %7592 = vmatprep.subr.bf16.mxu0 %v11164_v49  ;;  %v1894_v15 = vrot.slane %v1677_v10, 6  ;;  %v1690_v25 = vsel %vm792_vm3, %v1687_v5, %v1689_v13  ;;  %v11169_v33 = vpack.c.bf16 %v11167_v59, %v11168_v41  ;;  %v7631_v47 = vpack.c.bf16 %v1837_v7, %v1836_v12  ;;  %v11175_v5 = vld [vmem:[#allocation85_spill] sm:$0xff]  ;;  %v1820_v51 = vld [vmem:[#allocation16 + $0x370] sm:$0xff]  ;;  %v1839_v41 = vld [vmem:[#allocation16 + $0x408] sm:$0xff] }
 0x3d4   :  { %v1914_v37 = vrot.slane %v1690_v25, 6  ;;  %v10875_v11 = vrot.slane %v9983_v43, 6  ;;  %v1691_v20 = vsel %vm792_vm3, %v1689_v13, %v11170_v52  ;;  %v11173_v44 = vpack.c.bf16 %v11171_v31, %v11172_v14  ;;  %v1821_v48 = vld [vmem:[#allocation16 + $0x378] sm:$0xff]  ;;  %v1788_v9 = vld [vmem:[#allocation16 + $0x270] sm:$0xff]  ;;  %v1838_v59 = vld [vmem:[#allocation16 + $0x400] sm:$0xff] }
 0x3d5   :  { %7626 = vmatpush3.bf16.msra.mxu1 %v11169_v33  ;;  %v11176_v34 = vpack.c.bf16 %v11174_v53, %v11175_v5  ;;  %v1895_v23 = vsel %vm548_vm2, %v1872_v61, %v1894_v15  ;;  %v1678_v2 = vrot.slane %v1633_v35, 2  ;;  %v1932_v12 = vrot.slane %v1691_v20, 6  ;;  %v11177_v7 = vld [vmem:[#allocation105_spill] sm:$0xff]  ;;  %v11178_v38 = vld [vmem:[#allocation92_spill] sm:$0xff]  ;;  %v11181_v61 = vld [vmem:[#allocation110_spill] sm:$0xff] }
 0x3d6   :  { %7594 = vmatpush3.bf16.msra.mxu0 %v11173_v44  ;;  %v1645_v27 = vmul.f32 %v9786_v50, %v11177_v7  ;;  %v11179_v13 = vld [vmem:[#allocation89_spill] sm:$0xff]  ;;  %v7599_v10 = vpack.c.bf16 %v1805_v24, %v1804_v46  ;;  %v1915_v33 = vsel %vm548_vm2, %v1896_v40, %v1914_v37  ;;  %v1917_v31 = vsel %vm548_vm2, %v1898_v29, %v10875_v11  ;;  %v11182_v53 = vld [vmem:[#allocation96_spill] sm:$0xff]  ;;  %v11183_v46 = vld [vmem:[#allocation91_spill] sm:$0xff] }
 0x3d7   :  { %7628 = vmatprep.subr.bf16.mxu1 %v11176_v34  ;;  %v11180_v49 = vpack.c.bf16 %v11178_v38, %v11179_v13  ;;  %v1789_v25 = vld [vmem:[#allocation16 + $0x278] sm:$0xff]  ;;  %v1646_v35 = vmul.f32 %v9788_v18, %v11181_v61  ;;  %v1679_v20 = vsel %vm480_vm1, %v1676_v62, %v1678_v2  ;;  %v1933_v50 = vsel %vm548_vm2, %v1914_v37, %v1932_v12  ;;  %v11186_v29 = vld [vmem:[#allocation114_spill] sm:$0xff]  ;;  %v10179_v61 = vld [vmem:[#allocation21 + $0x348] sm:$0xff] }
 0x3d8   :  { %v1930_v14 = vrot.slane %v1678_v2, 6  ;;  %v1704_v44 = vrot.slane %v1645_v27, 4  ;;  %v11184_v24 = vpack.c.bf16 %v11182_v53, %v11183_v46  ;;  %v7633_v5 = vpack.c.bf16 %v1821_v48, %v1820_v51  ;;  %v11185_v38 = vld [vmem:[#allocation112_spill] sm:$0xff]  ;;  %v11189_v53 = vld [vmem:[#allocation59_spill] sm:$0xff]  ;;  %v10181_v7 = vld [vmem:[#allocation21 + $0x240] sm:$0xff] }
 0x3d9   :  { %7596 = vmatprep.subr.bf16.mxu0 %v11180_v49  ;;  %v1912_v34 = vrot.slane %v1679_v20, 6  ;;  %v1705_v40 = vrot.slane %v1646_v35, 4  ;;  %v1647_v13 = vmul.f32 %v9792_v32, %v11185_v38  ;;  %v11187_v49 = vld [vmem:[#allocation93_spill] sm:$0xff]  ;;  %v7601_v18 = vpack.c.bf16 %v1789_v25, %v1788_v9  ;;  %v1840_v27 = vld [vmem:[#allocation16 + $0x410] sm:$0xff]  ;;  %11201 = vst [vmem:[#allocation95_spill] sm:$0xff] %v10181_v7 }
 0x3da   :  { %7630 = vmatpush3.bf16.msra.mxu1 %v11184_v24  ;;  %v11188_v11 = vpack.c.bf16 %v11186_v29, %v11187_v49  ;;  %v7635_v62 = vpack.c.bf16 %v1839_v41, %v1838_v59  ;;  %v1883_v37 = vrot.slane %v1704_v44, 6  ;;  %v1841_v35 = vld [vmem:[#allocation16 + $0x418] sm:$0xff]  ;;  %v1842_v25 = vld [vmem:[#allocation16 + $0x420] sm:$0xff]  ;;  %v1843_v59 = vld [vmem:[#allocation16 + $0x428] sm:$0xff] }
 0x3db   :  { %7632 = vmatprep.subr.bf16.mxu1 %v7631_v47  ;;  %v1913_v2 = vsel %vm548_vm2, %v1894_v15, %v1912_v34  ;;  %v1931_v12 = vsel %vm548_vm2, %v1912_v34, %v1930_v14  ;;  %v1706_v51 = vsel %vm792_vm3, %v1704_v44, %v1705_v40  ;;  %v1707_v48 = vrot.slane %v1647_v13, 4  ;;  %v1844_v46 = vld [vmem:[#allocation16 + $0x430] sm:$0xff]  ;;  %v1845_v24 = vld [vmem:[#allocation16 + $0x438] sm:$0xff]  ;;  %v11193_v49 = vld [vmem:[#allocation66_spill] sm:$0xff] }
 0x3dc   :  { %7598 = vmatpush3.bf16.msra.mxu0 %v11188_v11  ;;  %v1884_v20 = vrot.slane %v1706_v51, 6  ;;  %v7643_v44 = vpack.c.bf16 %v1843_v59, %v1842_v25  ;;  %v1849_v34 = vld [vmem:[#allocation16 + $0x458] sm:$0xff]  ;;  %v1852_v13 = vld [vmem:[#allocation16 + $0x470] sm:$0xff] }
 0x3dd   :  { %7600 = vmatprep.subr.bf16.mxu0 %v7599_v10  ;;  %v1708_v32 = vsel %vm792_vm3, %v1705_v40, %v1707_v48  ;;  %v10033_v47 = vsel %vm792_vm3, %v1707_v48, %v11189_v53  ;;  %v7639_v10 = vpack.c.bf16 %v1841_v35, %v1840_v27  ;;  %v1851_v40 = vld [vmem:[#allocation16 + $0x468] sm:$0xff]  ;;  %v1853_v29 = vld [vmem:[#allocation16 + $0x478] sm:$0xff]  ;;  %v6458_v53 = vld [vmem:[#allocation19] ss:$0 sm:$0xff] }
 0x3de   :  { %7634 = vmatpush3.bf16.msra.mxu1 %v7633_v5  ;;  %v1885_v11 = vsel %vm548_vm2, %v1883_v37, %v1884_v20  ;;  %v1902_v9 = vrot.slane %v1708_v32, 6  ;;  %v1920_v15 = vrot.slane %v10033_v47, 6  ;;  %v1847_v5 = vld [vmem:[#allocation16 + $0x448] sm:$0xff]  ;;  %v2572_v25 = vld [vmem:[#allocation21 + $0x90] sm:$0xff]  ;;  %v2573_v59 = vld [vmem:[#allocation21 + $0x98] sm:$0xff] }
 0x3df   :  { %v2603_v37 = vld [vmem:[#allocation21 + $0x188] sm:$0xff]  ;;  %v2586_v48 = vld [vmem:[#allocation21 + $0x100] sm:$0xff]  ;;  %v10207_v38 = vld [vmem:[#allocation21 + $0x258] sm:$0xff] }
 0x3e0   :  { %7602 = vmatpush3.bf16.msra.mxu0 %v7601_v18  ;;  %v1903_v41 = vsel %vm548_vm2, %v1884_v20, %v1902_v9  ;;  %v1921_v14 = vsel %vm548_vm2, %v1902_v9, %v1920_v15  ;;  %v1936_v18 = vsel %vm548_vm2, %v1920_v15, %v11193_v49  ;;  %v2571_v51 = vld [vmem:[#allocation21 + $0x88] sm:$0xff]  ;;  %v2554_v32 = vld [vmem:[#allocation21] sm:$0xff]  ;;  %11209 = vst [vmem:[#allocation67_spill] sm:$0xff] %v10207_v38 }
 0x3e1   :  { %7636 = vmatprep.subr.bf16.mxu0 %v7635_v62  ;;  %2292 = vmatmul.mubr.f32.vlgmr.msra.gmra.mrb[28].mxu1 %v9928_v1  ;;  %v7647_v1 = vpack.c.bf16 %v1845_v24, %v1844_v46  ;;  %v2587_v27 = vld [vmem:[#allocation21 + $0x108] sm:$0xff]  ;;  %v2556_v46 = vld [vmem:[#allocation21 + $0x10] sm:$0xff]  ;;  %v10165_v49 = vld [vmem:[#allocation21 + $0x2c0] sm:$0xff] }
 0x3e2   :  { %2296 = vmatprep.mubr.f32.mxu1 %v9975_v30  ;;  %v7701_v20 = vpack.c.bf16 %v2587_v27, %v2586_v48  ;;  %v2555_v47 = vld [vmem:[#allocation21 + $0x8] sm:$0xff]  ;;  %v2560_v48 = vld [vmem:[#allocation21 + $0x30] sm:$0xff]  ;;  %v2561_v27 = vld [vmem:[#allocation21 + $0x38] sm:$0xff] }
 0x3e3   :  { %2207 = vmatmul.mubr.f32.vlgmr.msra.gmra.mrb[28].mxu0 %v9963_v8  ;;  %v11190_v8 = vld [vmem:[#allocation61_spill] sm:$0xff]  ;;  %v7669_v9 = vpack.c.bf16 %v2555_v47, %v2554_v32  ;;  %v2578_v32 = vld [vmem:[#allocation21 + $0xc0] sm:$0xff]  ;;  %v2579_v47 = vld [vmem:[#allocation21 + $0xc8] sm:$0xff] }
 0x3e4   :  { %2211 = vmatprep.mubr.f32.mxu0 %v9978_v3  ;;  %7638 = vmatpush3.bf16.msra.mxu0 %v7635_v62  ;;  %v1935_v30 = vsel %vm548_vm2, %v1918_v56, %v11190_v8  ;;  %v1846_v3 = vld [vmem:[#allocation16 + $0x440] sm:$0xff]  ;;  %v10183_v52 = vld [vmem:[#allocation21 + $0x248] sm:$0xff] }
 0x3e5   :  { %7640 = vmatprep.subr.bf16.mxu0 %v7639_v10  ;;  %2297 = vmatmul.mubr.f32.gmra.mrb[30].mxu1 %v9966_v6  ;;  %v11191_v6 = vld [vmem:[#allocation60_spill] sm:$0xff]  ;;  %v1850_v56 = vld [vmem:[#allocation16 + $0x460] sm:$0xff]  ;;  %11202 = vst [vmem:[#allocation75_spill] sm:$0xff] %v10183_v52 }
 0x3e6   :  { %2301 = vmatprep.mubr.f32.mxu1 %v9988_v4  ;;  %v2602_v62 = vld [vmem:[#allocation21 + $0x180] sm:$0xff] }
 0x3e7   :  { %2212 = vmatmul.mubr.f32.gmra.mrb[30].mxu0 %v1895_v23  ;;  %v11192_v23 = vrot.slane %v9983_v43, 6  ;;  %v7663_v43 = vpack.c.bf16 %v1853_v29, %v1852_v13  ;;  %v2608_v13 = vld [vmem:[#allocation21 + $0x1b0] sm:$0xff]  ;;  %v2609_v29 = vld [vmem:[#allocation21 + $0x1b8] sm:$0xff]  ;;  %v10169_v8 = vld [vmem:[#allocation21 + $0x340] sm:$0xff] }
 0x3e8   :  { %2216 = vmatprep.mubr.f32.mxu0 %v1915_v33  ;;  %7642 = vmatpush3.bf16.msra.mxu0 %v7639_v10  ;;  %v7651_v33 = vpack.c.bf16 %v1847_v5, %v1846_v3  ;;  %v2605_v10 = vld [vmem:[#allocation21 + $0x198] sm:$0xff]  ;;  %v2607_v3 = vld [vmem:[#allocation21 + $0x1a8] sm:$0xff] }
 0x3e9   :  { %7644 = vmatprep.subr.bf16.mxu0 %v7643_v44  ;;  %2302 = vmatmul.mubr.f32.gmra.mrb[32].mxu1 %v1917_v31  ;;  %v1934_v4 = vsel %vm548_vm2, %v11192_v23, %v11191_v6  ;;  %v1848_v31 = vld [vmem:[#allocation16 + $0x450] sm:$0xff] }
 0x3ea   :  { %2306 = vmatprep.mubr.f32.mxu1 %v1935_v30  ;;  %v7655_v36 = vpack.c.bf16 %v1849_v34, %v1848_v31  ;;  %v2606_v30 = vld [vmem:[#allocation21 + $0x1a0] sm:$0xff]  ;;  %v10167_v6 = vld [vmem:[#allocation21 + $0x2c8] sm:$0xff] }
 0x3eb   :  { %2217 = vmatmul.mubr.f32.gmra.mrb[32].mxu0 %v1913_v2  ;;  %v2570_v2 = vld [vmem:[#allocation21 + $0x80] sm:$0xff]  ;;  %v7707_v23 = vpack.c.bf16 %v2607_v3, %v2606_v30  ;;  %v2563_v30 = vld [vmem:[#allocation21 + $0x48] sm:$0xff]  ;;  %v2612_v3 = vld [vmem:[#allocation21 + $0x1d0] sm:$0xff] }
 0x3ec   :  { %2221 = vmatprep.mubr.f32.mxu0 %v1933_v50  ;;  %7646 = vmatpush3.bf16.msra.mxu0 %v7643_v44  ;;  %v7659_v50 = vpack.c.bf16 %v1851_v40, %v1850_v56  ;;  %v7667_v35 = vpack.c.bf16 %v2571_v51, %v2570_v2  ;;  %v2589_v44 = vld [vmem:[#allocation21 + $0x118] sm:$0xff]  ;;  %v2590_v31 = vld [vmem:[#allocation21 + $0x120] sm:$0xff]  ;;  %v2559_v40 = vld [vmem:[#allocation21 + $0x28] sm:$0xff] }
 0x3ed   :  { %7648 = vmatprep.subr.bf16.mxu0 %v7647_v1  ;;  %2307 = vmatmul.mubr.f32.gmra.mrb[34].mxu1 %v1934_v4  ;;  %v2574_v4 = vld [vmem:[#allocation21 + $0xa0] sm:$0xff]  ;;  %v2592_v2 = vld [vmem:[#allocation21 + $0x130] sm:$0xff] }
 0x3ee   :  { %7668 = vmatprep.subr.bf16.mxu1 %v7667_v35  ;;  %v2558_v56 = vld [vmem:[#allocation21 + $0x20] sm:$0xff] }
 0x3ef   :  { %2222 = vmatmul.mubr.f32.gmra.mrb[34].mxu0 %v1931_v12  ;;  %v7699_v12 = vpack.c.bf16 %v2603_v37, %v2602_v62  ;;  %7670 = vmatpush3.bf16.msra.mxu1 %v7669_v9  ;;  %v7711_v62 = vpack.c.bf16 %v2609_v29, %v2608_v13  ;;  %v2577_v37 = vld [vmem:[#allocation21 + $0xb8] sm:$0xff]  ;;  %v2610_v35 = vld [vmem:[#allocation21 + $0x1c0] sm:$0xff]  ;;  %v2596_v29 = vld [vmem:[#allocation21 + $0x150] sm:$0xff] }
 0x3f0   :  { %7650 = vmatpush3.bf16.msra.mxu0 %v7647_v1  ;;  %7295 = vmatprep.mubr.f32.mxu0 %v1885_v11  ;;  %v2604_v11 = vld [vmem:[#allocation21 + $0x190] sm:$0xff]  ;;  %v2557_v1 = vld [vmem:[#allocation21 + $0x18] sm:$0xff] }
 0x3f1   :  { %7652 = vmatprep.subr.bf16.mxu0 %v7651_v33  ;;  %v7703_v15 = vpack.c.bf16 %v2605_v10, %v2604_v11  ;;  %v7673_v5 = vpack.c.bf16 %v2557_v1, %v2556_v46  ;;  %v7683_v1 = vpack.c.bf16 %v2579_v47, %v2578_v32 }
 0x3f4   :  { %7654 = vmatpush3.bf16.msra.mxu0 %v7651_v33  ;;  %v2575_v33 = vld [vmem:[#allocation21 + $0xa8] sm:$0xff] }
 0x3f5   :  { %7656 = vmatprep.subr.bf16.mxu0 %v7655_v36  ;;  %v7675_v34 = vpack.c.bf16 %v2575_v33, %v2574_v4  ;;  %v2580_v4 = vld [vmem:[#allocation21 + $0xd0] sm:$0xff]  ;;  %v2581_v33 = vld [vmem:[#allocation21 + $0xd8] sm:$0xff] }
 0x3f8   :  { %7658 = vmatpush3.bf16.msra.mxu0 %v7655_v36  ;;  %v2591_v36 = vld [vmem:[#allocation21 + $0x128] sm:$0xff] }
 0x3f9   :  { %7660 = vmatprep.subr.bf16.mxu0 %v7659_v50 }
 0x3fc   :  { %7662 = vmatpush3.bf16.msra.mxu0 %v7659_v50  ;;  %v7709_v50 = vpack.c.bf16 %v2591_v36, %v2590_v31 }
 0x3fd   :  { %7664 = vmatprep.subr.bf16.mxu0 %v7663_v43 }
 0x400   :  { %7666 = vmatpush3.bf16.msra.mxu0 %v7663_v43  ;;  %v2576_v43 = vld [vmem:[#allocation21 + $0xb0] sm:$0xff] }
 0x401   :  { %7700 = vmatprep.subr.bf16.mxu0 %v7699_v12  ;;  %v2593_v12 = vld [vmem:[#allocation21 + $0x138] sm:$0xff]  ;;  %v7679_v51 = vpack.c.bf16 %v2577_v37, %v2576_v43 }
 0x402   :  { %v7713_v9 = vpack.c.bf16 %v2593_v12, %v2592_v2  ;;  %v2597_v43 = vld [vmem:[#allocation21 + $0x158] sm:$0xff]  ;;  %v7687_v2 = vpack.c.bf16 %v2581_v33, %v2580_v4 }
 0x403   :  { %7296 = vmatmul.mubr.f32.vlgmr.msra.gmra.mrb[36].mxu0 %v1903_v41  ;;  %v7671_v41 = vpack.c.bf16 %v2573_v59, %v2572_v25  ;;  %v7681_v59 = vpack.c.bf16 %v2561_v27, %v2560_v48  ;;  %v2565_v12 = vld [vmem:[#allocation21 + $0x58] sm:$0xff]  ;;  %v2615_v48 = vld [vmem:[#allocation21 + $0x1e8] sm:$0xff]  ;;  %v7721_v47 = vpack.c.bf16 %v2597_v43, %v2596_v29  ;;  %v2600_v29 = vld [vmem:[#allocation21 + $0x170] sm:$0xff] }
 0x404   :  { %7298 = vmatprep.mubr.f32.mxu0 %v1921_v14  ;;  %7702 = vmatpush3.bf16.msra.mxu0 %v7701_v20  ;;  %v2588_v14 = vld [vmem:[#allocation21 + $0x110] sm:$0xff]  ;;  %v2611_v20 = vld [vmem:[#allocation21 + $0x1c8] sm:$0xff]  ;;  %v2585_v4 = vld [vmem:[#allocation21 + $0xf8] sm:$0xff] }
 0x405   :  { %v7705_v24 = vpack.c.bf16 %v2589_v44, %v2588_v14  ;;  %7704 = vmatprep.subr.bf16.mxu0 %v7703_v15  ;;  %7672 = vmatprep.subr.bf16.mxu1 %v7671_v41  ;;  %v7715_v15 = vpack.c.bf16 %v2611_v20, %v2610_v35  ;;  %v2594_v41 = vld [vmem:[#allocation21 + $0x140] sm:$0xff]  ;;  %v2595_v14 = vld [vmem:[#allocation21 + $0x148] sm:$0xff]  ;;  %v2601_v43 = vld [vmem:[#allocation21 + $0x178] sm:$0xff] }
 0x406   :  { %7674 = vmatpush3.bf16.msra.mxu1 %v7673_v5  ;;  %v2562_v44 = vld [vmem:[#allocation21 + $0x40] sm:$0xff]  ;;  %v2613_v5 = vld [vmem:[#allocation21 + $0x1d8] sm:$0xff]  ;;  %v2583_v20 = vld [vmem:[#allocation21 + $0xe8] sm:$0xff] }
 0x407   :  { %7299 = vmatmul.mubr.f32.gmra.mrb[38].mxu0 %v1936_v18  ;;  %v7677_v18 = vpack.c.bf16 %v2559_v40, %v2558_v56  ;;  %7676 = vmatprep.subr.bf16.mxu1 %v7675_v34  ;;  %v7717_v34 = vpack.c.bf16 %v2595_v14, %v2594_v41  ;;  %v7719_v13 = vpack.c.bf16 %v2613_v5, %v2612_v3  ;;  %v2582_v35 = vld [vmem:[#allocation21 + $0xe0] sm:$0xff]  ;;  %v2599_v41 = vld [vmem:[#allocation21 + $0x168] sm:$0xff]  ;;  %v2617_v3 = vld [vmem:[#allocation21 + $0x1f8] sm:$0xff] }
 0x408   :  { %7706 = vmatpush3.bf16.msra.mxu0 %v7705_v24  ;;  %v2566_v14 = vld [vmem:[#allocation21 + $0x60] sm:$0xff] }
 0x409   :  { %7708 = vmatprep.subr.bf16.mxu0 %v7707_v23 }
 0x40a   :  { %7678 = vmatpush3.bf16.msra.mxu1 %v7677_v18  ;;  %v2564_v18 = vld [vmem:[#allocation21 + $0x50] sm:$0xff] }
 0x40b   :  { %7680 = vmatprep.subr.bf16.mxu1 %v7679_v51  ;;  %v2614_v51 = vld [vmem:[#allocation21 + $0x1e0] sm:$0xff] }
 0x40c   :  { %7710 = vmatpush3.bf16.msra.mxu0 %v7709_v50  ;;  %v7685_v50 = vpack.c.bf16 %v2563_v30, %v2562_v44  ;;  %v2616_v30 = vld [vmem:[#allocation21 + $0x1f0] sm:$0xff] }
 0x40d   :  { %7712 = vmatprep.subr.bf16.mxu0 %v7711_v62 }
 0x40e   :  { %7682 = vmatpush3.bf16.msra.mxu1 %v7681_v59  ;;  %v7723_v59 = vpack.c.bf16 %v2615_v48, %v2614_v51  ;;  %v2666_v51 = vld [vmem:[#allocation21 + $0x380] sm:$0xff]  ;;  %v2667_v48 = vld [vmem:[#allocation21 + $0x388] sm:$0xff] }
 0x40f   :  { %7684 = vmatprep.subr.bf16.mxu1 %v7683_v1  ;;  %v2567_v1 = vld [vmem:[#allocation21 + $0x68] sm:$0xff] }
 0x410   :  { %7714 = vmatpush3.bf16.msra.mxu0 %v7713_v9 }
 0x411   :  { %7716 = vmatprep.subr.bf16.mxu0 %v7715_v15  ;;  %v2598_v15 = vld [vmem:[#allocation21 + $0x160] sm:$0xff] }
 0x412   :  { %7686 = vmatpush3.bf16.msra.mxu1 %v7685_v50  ;;  %v7693_v50 = vpack.c.bf16 %v2567_v1, %v2566_v14 }
 0x413   :  { %7688 = vmatprep.subr.bf16.mxu1 %v7687_v2 }
 0x414   :  { %7718 = vmatpush3.bf16.msra.mxu0 %v7717_v34 }
 0x415   :  { %7720 = vmatprep.subr.bf16.mxu0 %v7719_v13  ;;  %v7727_v13 = vpack.c.bf16 %v2617_v3, %v2616_v30 }
 0x418   :  { %7722 = vmatpush3.bf16.msra.mxu0 %v7721_v47 }
 0x419   :  { %7724 = vmatprep.subr.bf16.mxu0 %v7723_v59 }
 0x48d   :  { %v6807_v11 = vpop.f32.mrb[20].mxu1 }
 0x48e   :  { %v6763_v10 = vpop.f32.mrb[20].mxu0  ;;  %v6808_v25 = vpop.f32.mrb[21].mxu1 }
 0x48f   :  { %v6809_v46 = vadd.f32 %v6808_v25, %v6807_v11  ;;  %v6764_v24 = vpop.f32.mrb[21].mxu0  ;;  %v7689_v25 = vpack.c.bf16 %v2565_v12, %v2564_v18  ;;  %v2568_v18 = vld [vmem:[#allocation21 + $0x70] sm:$0xff]  ;;  %v2569_v12 = vld [vmem:[#allocation21 + $0x78] sm:$0xff] }
 0x490   :  { %v6765_v23 = vadd.f32 %v6764_v24, %v6763_v10  ;;  %v7691_v24 = vpack.c.bf16 %v2583_v20, %v2582_v35  ;;  %v2634_v35 = vld [vmem:[#allocation21 + $0x280] sm:$0xff]  ;;  %v2635_v20 = vld [vmem:[#allocation21 + $0x288] sm:$0xff] }
 0x491   :  { %v6810_v31 = vpop.f32.mrb[22].mxu1  ;;  %7690 = vmatpush3.bf16.msra.mxu1 %v7689_v25  ;;  %v7731_v25 = vpack.c.bf16 %v2635_v20, %v2634_v35 }
 0x492   :  { %v10055_v36 = vadd.f32 %v6809_v46, %v6765_v23  ;;  %v6766_v56 = vpop.f32.mrb[22].mxu0  ;;  %v6811_v40 = vpop.f32.mrb[23].mxu1  ;;  %v2584_v23 = vld [vmem:[#allocation21 + $0xf0] sm:$0xff]  ;;  %7692 = vmatprep.subr.bf16.mxu1 %v7691_v24 }
 0x493   :  { %v6812_v62 = vadd.f32 %v6811_v40, %v6810_v31  ;;  %v6767_v37 = vpop.f32.mrb[23].mxu0  ;;  %v7725_v31 = vpack.c.bf16 %v2599_v41, %v2598_v15  ;;  %v7695_v2 = vpack.c.bf16 %v2585_v4, %v2584_v23 }
 0x494   :  { %v6768_v27 = vadd.f32 %v6767_v37, %v6766_v56 }
 0x495   :  { %7726 = vmatpush3.bf16.msra.mxu0 %v7725_v31  ;;  %7694 = vmatpush3.bf16.msra.mxu1 %v7693_v50 }
 0x496   :  { %v6813_v32 = vpop.f32.mrb[24].mxu1  ;;  %v10057_v11 = vadd.f32 %v6812_v62, %v6768_v27  ;;  %7728 = vmatprep.subr.bf16.mxu0 %v7727_v13  ;;  %7696 = vmatprep.subr.bf16.mxu1 %v7695_v2 }
 0x497   :  { %v6769_v9 = vpop.f32.mrb[24].mxu0  ;;  %v6814_v10 = vpop.f32.mrb[25].mxu1 }
 0x498   :  { %v6815_v44 = vadd.f32 %v6814_v10, %v6813_v32  ;;  %v6770_v46 = vpop.f32.mrb[25].mxu0  ;;  %v7729_v32 = vpack.c.bf16 %v2601_v43, %v2600_v29  ;;  %v7763_v10 = vpack.c.bf16 %v2667_v48, %v2666_v51 }
 0x499   :  { %v6771_v5 = vadd.f32 %v6770_v46, %v6769_v9  ;;  %v7697_v9 = vpack.c.bf16 %v2569_v12, %v2568_v18 }
 0x49a   :  { %v6816_v33 = vpop.f32.mrb[26].mxu1  ;;  %7730 = vmatpush3.bf16.msra.mxu0 %v7729_v32 }
 0x49b   :  { %v2134_v34 = vadd.f32 %v6815_v44, %v6771_v5  ;;  %v6817_v40 = vpop.f32.mrb[27].mxu1  ;;  %7698 = vmatpush3.bf16.msra.mxu1 %v7697_v9  ;;  %7764 = vmatprep.subr.bf16.mxu0 %v7763_v10 }
 0x49c   :  { %v6818_v62 = vadd.f32 %v6817_v40, %v6816_v33  ;;  %7732 = vmatprep.subr.bf16.mxu1 %v7731_v25 }
 0x49d   :  { %v6772_v56 = vpop.f32.mrb[26].mxu0 }
 0x49e   :  { %v6773_v37 = vpop.f32.mrb[27].mxu0 }
 0x49f   :  { %v6774_v27 = vadd.f32 %v6773_v37, %v6772_v56 }
 0x4a1   :  { %v2139_v47 = vadd.f32 %v6818_v62, %v6774_v27 }
 0x4b4   :  { %v6895_v59 = vpop.f32.mrb[28].mxu1 }
 0x4b5   :  { %v6896_v41 = vpop.f32.mrb[29].mxu1 }
 0x4b6   :  { %v6851_v15 = vpop.f32.mrb[28].mxu0  ;;  %v6897_v14 = vadd.f32 %v6896_v41, %v6895_v59 }
 0x4b7   :  { %v6852_v44 = vpop.f32.mrb[29].mxu0 }
 0x4b8   :  { %v6853_v46 = vadd.f32 %v6852_v44, %v6851_v15  ;;  %v6898_v24 = vpop.f32.mrb[30].mxu1 }
 0x4b9   :  { %v6899_v3 = vpop.f32.mrb[31].mxu1 }
 0x4ba   :  { %v2209_v1 = vadd.f32 %v6853_v46, %v10055_v36  ;;  %v6854_v30 = vpop.f32.mrb[30].mxu0  ;;  %v6900_v5 = vadd.f32 %v6899_v3, %v6898_v24 }
 0x4bb   :  { %v6855_v23 = vpop.f32.mrb[31].mxu0 }
 0x4bc   :  { %v6856_v4 = vadd.f32 %v6855_v23, %v6854_v30  ;;  %v2294_v33 = vadd.f32 %v6897_v14, %v2209_v1  ;;  %v6901_v31 = vpop.f32.mrb[32].mxu1 }
 0x4bd   :  { %v6902_v50 = vpop.f32.mrb[33].mxu1 }
 0x4be   :  { %v2214_v56 = vadd.f32 %v6856_v4, %v10057_v11  ;;  %v6857_v40 = vpop.f32.mrb[32].mxu0  ;;  %v6903_v13 = vadd.f32 %v6902_v50, %v6901_v31 }
 0x4bf   :  { %v6858_v29 = vpop.f32.mrb[33].mxu0 }
 0x4c0   :  { %v6859_v43 = vadd.f32 %v6858_v29, %v6857_v40  ;;  %v2299_v18 = vadd.f32 %v6900_v5, %v2214_v56  ;;  %v6904_v62 = vpop.f32.mrb[34].mxu1 }
 0x4c1   :  { %v6905_v12 = vpop.f32.mrb[35].mxu1 }
 0x4c2   :  { %v2219_v37 = vadd.f32 %v6859_v43, %v2134_v34  ;;  %v6860_v2 = vpop.f32.mrb[34].mxu0  ;;  %v6906_v36 = vadd.f32 %v6905_v12, %v6904_v62 }
 0x4c3   :  { %v6861_v51 = vpop.f32.mrb[35].mxu0 }
 0x4c4   :  { %v6862_v48 = vadd.f32 %v6861_v51, %v6860_v2  ;;  %v2304_v27 = vadd.f32 %v6903_v13, %v2219_v37 }
 0x4c6   :  { %v2224_v35 = vadd.f32 %v6862_v48, %v2139_v47 }
 0x4c8   :  { %v2309_v20 = vadd.f32 %v6906_v36, %v2224_v35 }
 0x4d6   :  { %v7297_v32 = vpop.f32.mrb[36].mxu0 }
 0x4d7   :  { %v10061_v9 = vadd.f32 %v7297_v32, %v2299_v18  ;;  %v2378_v11 = vpop.f32.mrb[37].mxu0 }
 0x4d8   :  { %v10063_v10 = vadd.f32 %v2378_v11, %v2294_v33  ;;  %v10093_v11 = vld [vmem:[#allocation21 + $0x300] sm:$0xff] }
 0x4d9   :  { %v2408_v25 = vmul.f32 %v10061_v9, %v10061_v9 }
 0x4da   :  { %v2397_v34 = vadd.f32 %v10061_v9, %v10063_v10  ;;  %v2407_v59 = vmul.f32 %v10063_v10, %v10063_v10  ;;  %v7300_v15 = vpop.f32.mrb[38].mxu0 }
 0x4db   :  { %v10071_v41 = vadd.f32 %v7300_v15, %v2309_v20  ;;  %v2388_v47 = vpop.f32.mrb[39].mxu0  ;;  %v10105_v15 = vld [vmem:[#allocation21 + $0x290] sm:$0xff] }
 0x4dc   :  { %v2411_v14 = vadd.f32 %v2408_v25, %v2407_v59  ;;  %v10073_v44 = vadd.f32 %v2388_v47, %v2304_v27  ;;  %v10095_v25 = vld [vmem:[#allocation21 + $0x308] sm:$0xff]  ;;  %v10101_v59 = vld [vmem:[#allocation21 + $0x390] sm:$0xff]  ;;  %v10107_v47 = vld [vmem:[#allocation21 + $0x298] sm:$0xff] }
 0x4dd   :  { %v2410_v1 = vmul.f32 %v10071_v41, %v10071_v41 }
 0x4de   :  { %v2398_v46 = vadd.f32 %v2397_v34, %v10073_v44  ;;  %v2409_v24 = vmul.f32 %v10073_v44, %v10073_v44  ;;  %v10097_v34 = vld [vmem:[#allocation21 + $0x200] sm:$0xff] }
 0x4e0   :  { %v2399_v30 = vadd.f32 %v2398_v46, %v10071_v41  ;;  %v2412_v3 = vadd.f32 %v2411_v14, %v2409_v24  ;;  %v10111_v14 = vld [vmem:[#allocation21 + $0x318] sm:$0xff]  ;;  %v10117_v24 = vld [vmem:[#allocation21 + $0x3a0] sm:$0xff] }
 0x4e1   :  { %v10115_v46 = vld [vmem:[#allocation21 + $0x218] sm:$0xff] }
 0x4e2   :  { %v2400_v5 = vrot.slane %v2399_v30, 4  ;;  %v2413_v23 = vadd.f32 %v2412_v3, %v2410_v1  ;;  %v10119_v1 = vld [vmem:[#allocation21 + $0x3a8] sm:$0xff] }
 0x4e3   :  { %v10123_v3 = vld [vmem:[#allocation21 + $0x2a8] sm:$0xff] }
 0x4e4   :  { %v2401_v4 = vadd.f32 %v2400_v5, %v2399_v30  ;;  %v2414_v33 = vrot.slane %v2413_v23, 4  ;;  %v10121_v30 = vld [vmem:[#allocation21 + $0x2a0] sm:$0xff] }
 0x4e5   :  { %v10125_v5 = vld [vmem:[#allocation21 + $0x320] sm:$0xff] }
 0x4e6   :  { %v2402_v31 = vrot.slane %v2401_v4, 2  ;;  %v2415_v56 = vadd.f32 %v2414_v33, %v2413_v23  ;;  %v10127_v23 = vld [vmem:[#allocation21 + $0x328] sm:$0xff] }
 0x4e7   :  { %v10131_v33 = vld [vmem:[#allocation21 + $0x228] sm:$0xff] }
 0x4e8   :  { %v2403_v40 = vadd.f32 %v2402_v31, %v2401_v4  ;;  %v2416_v50 = vrot.slane %v2415_v56, 2  ;;  %v10129_v4 = vld [vmem:[#allocation21 + $0x220] sm:$0xff]  ;;  %v10133_v31 = vld [vmem:[#allocation21 + $0x3b0] sm:$0xff] }
 0x4e9   :  { %11194 = vst [vmem:[#allocation98_spill] sm:$0xff] %v10129_v4  ;;  %11195 = vst [vmem:[#allocation97_spill] sm:$0xff] %v10133_v31  ;;  %v10209_v31 = vld [vmem:[#allocation21 + $0x3e0] sm:$0xff] }
 0x4ea   :  { %v2404_v13 = vrot.slane %v2403_v40, 1  ;;  %v2417_v29 = vadd.f32 %v2416_v50, %v2415_v56  ;;  %v10135_v56 = vld [vmem:[#allocation21 + $0x3b8] sm:$0xff]  ;;  %11210 = vst [vmem:[#allocation80_spill] sm:$0xff] %v10209_v31 }
 0x4eb   :  { %v10139_v50 = vld [vmem:[#allocation21 + $0x2b8] sm:$0xff] }
 0x4ec   :  { %v2405_v43 = vadd.f32 %v2404_v13, %v2403_v40  ;;  %v2418_v18 = vrot.slane %v2417_v29, 1  ;;  %v10137_v40 = vld [vmem:[#allocation21 + $0x2b0] sm:$0xff] }
 0x4ed   :  { %v10141_v13 = vld [vmem:[#allocation21 + $0x330] sm:$0xff] }
 0x4ee   :  { %v10081_v62 = vmul.f32 0.03125, %v2405_v43  ;;  %v2419_v37 = vadd.f32 %v2418_v18, %v2417_v29  ;;  %11196 = vst [vmem:[#allocation104_spill] sm:$0xff] %v10141_v13  ;;  %v6457_v29 = vld [vmem:[#allocation18] ss:$0 sm:$0xff]  ;;  %v10161_v43 = vld [vmem:[#allocation21 + $0x3c0] sm:$0xff]  ;;  %v10163_v18 = vld [vmem:[#allocation21 + $0x3c8] sm:$0xff] }
 0x4ef   :  { %11200 = vst [vmem:[#allocation102_spill] sm:$0xff] %v10161_v43  ;;  %v10229_v43 = vld [vmem:[#allocation21 + $0x260] sm:$0xff] }
 0x4f0   :  { %v2420_v2 = vmul.f32 0.03125, %v2419_v37  ;;  %v2421_v12 = vmul.f32 %v10081_v62, %v10081_v62  ;;  %v2424_v36 = vsub.f32 %v10063_v10, %v10081_v62  ;;  %v2425_v51 = vsub.f32 %v10061_v9, %v10081_v62  ;;  %v10099_v10 = vld [vmem:[#allocation21 + $0x208] sm:$0xff]  ;;  %v10103_v9 = vld [vmem:[#allocation21 + $0x398] sm:$0xff]  ;;  %v10149_v37 = vld [vmem:[#allocation21 + $0x230] sm:$0xff]  ;;  %11216 = vst [vmem:[#allocation79_spill] sm:$0xff] %v10229_v43 }
 0x4f1   :  { %v2426_v48 = vsub.f32 %v10073_v44, %v10081_v62  ;;  %v2427_v27 = vsub.f32 %v10071_v41, %v10081_v62  ;;  %v10109_v41 = vld [vmem:[#allocation21 + $0x310] sm:$0xff]  ;;  %v10147_v62 = vld [vmem:[#allocation21 + $0x338] sm:$0xff]  ;;  %11198 = vst [vmem:[#allocation107_spill] sm:$0xff] %v10149_v37  ;;  %v11225_v43 = vld [vmem:[#allocation90_spill] sm:$0xff] }
 0x4f2   :  { %v2422_v35 = vsub.f32 %v2420_v2, %v2421_v12  ;;  %v10113_v44 = vld [vmem:[#allocation21 + $0x210] sm:$0xff]  ;;  %11197 = vst [vmem:[#allocation103_spill] sm:$0xff] %v10147_v62  ;;  %v10151_v2 = vld [vmem:[#allocation21 + $0x238] sm:$0xff] }
 0x4f3   :  { %11199 = vst [vmem:[#allocation106_spill] sm:$0xff] %v10151_v2  ;;  %v11219_v37 = vld [vmem:[#allocation44_spill] sm:$0xff] }
 0x4f4   :  { %v2423_v20 = vmax.f32 %v2422_v35, 0.0  ;;  %v10185_v35 = vld [vmem:[#allocation21 + $0x3d0] sm:$0xff] }
 0x4f5   :  { %11203 = vst [vmem:[#allocation82_spill] sm:$0xff] %v10185_v35 }
 0x4f6   :  { %v2428_v32 = vadd.f32 1e-05, %v2423_v20  ;;  %v10189_v20 = vld [vmem:[#allocation21 + $0x2d0] sm:$0xff] }
 0x4f7   :  { %11204 = vst [vmem:[#allocation101_spill] sm:$0xff] %v10189_v20  ;;  %v11227_v20 = vld [vmem:[#allocation54_spill] sm:$0xff] }
 0x4f8   :  { %7981 = vrsqrt.f32 %v2428_v32  ;;  %v10191_v32 = vld [vmem:[#allocation21 + $0x2d8] sm:$0xff] }
 0x4f9   :  { %11205 = vst [vmem:[#allocation108_spill] sm:$0xff] %v10191_v32  ;;  %v11228_v32 = vld [vmem:[#allocation56_spill] sm:$0xff] }
 0x502   :  { %v7982_v12 = vpop.eup %7981 }
 0x503   :  { %v2430_v19 = vmul.f32 %v7982_v12, %v2424_v36  ;;  %v2431_v60 = vmul.f32 %v7982_v12, %v2425_v51  ;;  %v2432_v28 = vmul.f32 %v7982_v12, %v2426_v48  ;;  %v2433_v16 = vmul.f32 %v7982_v12, %v2427_v27  ;;  %v10201_v48 = vld [vmem:[#allocation21 + $0x350] sm:$0xff]  ;;  %v10203_v27 = vld [vmem:[#allocation21 + $0x358] sm:$0xff]  ;;  %v10227_v36 = vld [vmem:[#allocation21 + $0x368] sm:$0xff] }
 0x504   :  { %11206 = vst [vmem:[#allocation68_spill] sm:$0xff] %v10201_v48  ;;  %11207 = vst [vmem:[#allocation65_spill] sm:$0xff] %v10203_v27  ;;  %v10205_v12 = vld [vmem:[#allocation21 + $0x250] sm:$0xff]  ;;  %v10231_v51 = vld [vmem:[#allocation21 + $0x268] sm:$0xff] }
 0x505   :  { %11208 = vst [vmem:[#allocation58_spill] sm:$0xff] %v10205_v12  ;;  %v2441_v45 = vmul.f32 %v6457_v29, %v2430_v19  ;;  %v2442_v63 = vmul.f32 %v6457_v29, %v2431_v60  ;;  %v2443_v21 = vmul.f32 %v6457_v29, %v2432_v28  ;;  %v2444_v4 = vmul.f32 %v6457_v29, %v2433_v16  ;;  %v10221_v28 = vld [vmem:[#allocation21 + $0x2e0] sm:$0xff]  ;;  %v10223_v16 = vld [vmem:[#allocation21 + $0x2e8] sm:$0xff] }
 0x506   :  { %11212 = vst [vmem:[#allocation71_spill] sm:$0xff] %v10221_v28  ;;  %11213 = vst [vmem:[#allocation48_spill] sm:$0xff] %v10223_v16  ;;  %v10225_v19 = vld [vmem:[#allocation21 + $0x360] sm:$0xff] }
 0x507   :  { %11214 = vst [vmem:[#allocation72_spill] sm:$0xff] %v10225_v19  ;;  %v2452_v29 = vadd.f32 %v6458_v53, %v2441_v45  ;;  %v2453_v2 = vadd.f32 %v6458_v53, %v2442_v63  ;;  %v2454_v13 = vadd.f32 %v6458_v53, %v2443_v21  ;;  %v2455_v62 = vadd.f32 %v6458_v53, %v2444_v4  ;;  %v11220_v12 = vld [vmem:[#allocation62_spill] sm:$0xff]  ;;  %v11224_v19 = vld [vmem:[#allocation63_spill] sm:$0xff] }
 0x508   :  { %11215 = vst [vmem:[#allocation73_spill] sm:$0xff] %v10227_v36  ;;  %11217 = vst [vmem:[#allocation77_spill] sm:$0xff] %v10231_v51  ;;  %v11223_v28 = vld [vmem:[#allocation86_spill] sm:$0xff] }
 0x509   :  { %v10241_v21 = vmax.f32 %v2452_v29, 0.0  ;;  %v10243_v45 = vmax.f32 %v2453_v2, 0.0  ;;  %v10245_v53 = vmax.f32 %v2454_v13, 0.0  ;;  %v10249_v52 = vmax.f32 %v2455_v62, 0.0  ;;  %v11218_v29 = vld [vmem:[#allocation64_spill] sm:$0xff]  ;;  %v11221_v62 = vld [vmem:[#allocation87_spill] sm:$0xff] }
 0x50a   :  { %v11226_v27 = vld [vmem:[#allocation74_spill] sm:$0xff] }
 0x50b   :  { %v2470_v2 = vmul.f32 %v10241_v21, %v11218_v29  ;;  %v2463_v13 = vmul.f32 %v10241_v21, %v11219_v37  ;;  %v2466_v4 = vmul.f32 %v10241_v21, %v11220_v12  ;;  %v2471_v31 = vmul.f32 %v10243_v45, %v11221_v62 }
 0x50c   :  { %v2464_v60 = vmul.f32 %v10243_v45, %v11222_v42  ;;  %v2467_v7 = vmul.f32 %v10243_v45, %v11223_v28  ;;  %v2460_v63 = vmul.f32 %v10241_v21, %v11224_v19  ;;  %v2472_v29 = vmul.f32 %v10245_v53, %v11225_v43 }
 0x50d   :  { %v2713_v51 = vrot.slane %v2470_v2, 6  ;;  %v2495_v37 = vrot.slane %v2463_v13, 2  ;;  %v2505_v36 = vrot.slane %v2466_v4, 4  ;;  %v2736_v16 = vrot.slane %v2471_v31, 6  ;;  %v11229_v4 = vld [vmem:[#allocation55_spill] sm:$0xff] }
 0x50e   :  { %v2497_v12 = vrot.slane %v2464_v60, 2  ;;  %v2507_v38 = vrot.slane %v2467_v7, 4  ;;  %v2730_v48 = vrot.slane %v2460_v63, 6  ;;  %v2754_v62 = vrot.slane %v2472_v29, 6 }
 0x50f   :  { %v2714_v42 = vsel %vm548_vm2, %v11226_v27, %v2713_v51  ;;  %v2496_v28 = vsel %vm480_vm1, %v11227_v20, %v2495_v37  ;;  %v2506_v19 = vsel %vm792_vm3, %v11228_v32, %v2505_v36  ;;  %v2737_v35 = vsel %vm548_vm2, %v2713_v51, %v2736_v16  ;;  %v11230_v20 = vld [vmem:[#allocation69_spill] sm:$0xff] }
 0x510   :  { %2965 = vmatprep.mubr.f32.mxu0 %v2714_v42  ;;  %v2709_v43 = vrot.slane %v2496_v28, 6  ;;  %v2711_v2 = vrot.slane %v2506_v19, 6  ;;  %v2498_v31 = vsel %vm480_vm1, %v2495_v37, %v2497_v12  ;;  %v2508_v7 = vsel %vm792_vm3, %v2505_v36, %v2507_v38  ;;  %v11231_v32 = vld [vmem:[#allocation81_spill] sm:$0xff]  ;;  %v11232_v42 = vld [vmem:[#allocation46_spill] sm:$0xff]  ;;  %v11233_v19 = vld [vmem:[#allocation88_spill] sm:$0xff] }
 0x511   :  { %v2732_v60 = vrot.slane %v2498_v31, 6  ;;  %v2734_v63 = vrot.slane %v2508_v7, 6  ;;  %v2731_v27 = vsel %vm548_vm2, %v11229_v4, %v2730_v48  ;;  %v2755_v13 = vsel %vm548_vm2, %v2736_v16, %v2754_v62 }
 0x512   :  { %v2710_v29 = vsel %vm548_vm2, %v11230_v20, %v2709_v43  ;;  %v2712_v51 = vsel %vm548_vm2, %v11231_v32, %v2711_v2  ;;  %v2465_v28 = vmul.f32 %v10245_v53, %v11232_v42  ;;  %v2468_v37 = vmul.f32 %v10245_v53, %v11233_v19  ;;  %v11239_v42 = vld [vmem:[#allocation51_spill] sm:$0xff] }
 0x513   :  { %2880 = vmatprep.mubr.f32.mxu1 %v2710_v29  ;;  %2966 = vmatmul.mubr.f32.vlgmr.msra.gmra.mrb[40].mxu0 %v2712_v51  ;;  %v2733_v36 = vsel %vm548_vm2, %v2709_v43, %v2732_v60  ;;  %v2735_v31 = vsel %vm548_vm2, %v2711_v2, %v2734_v63  ;;  %v2461_v16 = vmul.f32 %v10243_v45, %v11122_v0  ;;  %v11235_v29 = vld [vmem:[#allocation76_spill] sm:$0xff]  ;;  %v11237_v2 = vld [vmem:[#allocation57_spill] sm:$0xff] }
 0x514   :  { %v11234_v7 = vpack.c.bf16 %v10095_v25, %v10093_v11  ;;  %2881 = vmatmul.mubr.f32.vlgmr.msra.gmra.mrb[36].mxu1 %v11124_v17  ;;  %v2499_v4 = vrot.slane %v2465_v28, 2  ;;  %v2509_v20 = vrot.slane %v2468_v37, 4  ;;  %v2473_v32 = vmul.f32 %v10249_v52, %v9026_v54  ;;  %2970 = vmatprep.mubr.f32.mxu0 %v2737_v35  ;;  %v11238_v25 = vld [vmem:[#allocation50_spill] sm:$0xff] }
 0x515   :  { %v2469_v51 = vmul.f32 %v10249_v52, %v11235_v29  ;;  %v11236_v43 = vpack.c.bf16 %v10099_v10, %v10097_v34  ;;  %v2748_v0 = vrot.slane %v2461_v16, 6  ;;  %v2462_v11 = vmul.f32 %v10245_v53, %v11237_v2  ;;  %2885 = vmatprep.mubr.f32.mxu1 %v2733_v36 }
 0x516   :  { %7766 = vmatpush3.bf16.msra.mxu0 %v11234_v7  ;;  %v2486_v17 = vmul.f32 %v10243_v45, %v11238_v25  ;;  %v10314_v28 = vmul.f32 %v10245_v53, %v11239_v42  ;;  %v11240_v54 = vpack.c.bf16 %v10103_v9, %v10101_v59  ;;  %v2500_v35 = vsel %vm480_vm1, %v2497_v12, %v2499_v4 }
 0x517   :  { %7734 = vmatpush3.bf16.msra.mxu1 %v11236_v43  ;;  %v2510_v34 = vsel %vm792_vm3, %v2507_v38, %v2509_v20  ;;  %v2772_v10 = vrot.slane %v2473_v32, 6  ;;  %v2768_v19 = vrot.slane %v2499_v4, 6  ;;  %2971 = vmatmul.mubr.f32.gmra.mrb[42].mxu0 %v2735_v31  ;;  %v11241_v37 = vpack.c.bf16 %v10107_v47, %v10105_v15 }
 0x518   :  { %7768 = vmatprep.subr.bf16.mxu0 %v11240_v54  ;;  %v2750_v16 = vrot.slane %v2500_v35, 6  ;;  %v2752_v7 = vrot.slane %v2510_v34, 6  ;;  %v2749_v29 = vsel %vm548_vm2, %v2730_v48, %v2748_v0  ;;  %v2511_v36 = vrot.slane %v2469_v51, 4  ;;  %2886 = vmatmul.mubr.f32.gmra.mrb[38].mxu1 %v2731_v27  ;;  %v11255_v54 = vld [vmem:[#allocation103_spill] sm:$0xff]  ;;  %v11256_v35 = vld [vmem:[#allocation104_spill] sm:$0xff] }
 0x519   :  { %7736 = vmatprep.subr.bf16.mxu1 %v11241_v37  ;;  %v11242_v59 = vpack.c.bf16 %v10111_v14, %v10109_v41  ;;  %v2773_v9 = vsel %vm548_vm2, %v2754_v62, %v2772_v10  ;;  %v2766_v38 = vrot.slane %v2462_v11, 6  ;;  %v2539_v12 = vrot.slane %v2486_v17, 2  ;;  %2975 = vmatprep.mubr.f32.mxu0 %v2755_v13  ;;  %v11253_v17 = vld [vmem:[#allocation53_spill] sm:$0xff]  ;;  %v11258_v37 = vld [vmem:[#allocation106_spill] sm:$0xff] }
 0x51a   :  { %v2540_v31 = vrot.slane %v10314_v28, 2  ;;  %v11243_v15 = vpack.c.bf16 %v10115_v46, %v10113_v44  ;;  %v2751_v47 = vsel %vm548_vm2, %v2732_v60, %v2750_v16  ;;  %v2753_v48 = vsel %vm548_vm2, %v2734_v63, %v2752_v7  ;;  %v11254_v28 = vld [vmem:[#allocation94_spill] sm:$0xff] }
 0x51b   :  { %7770 = vmatpush3.bf16.msra.mxu0 %v11242_v59  ;;  %v2769_v4 = vsel %vm548_vm2, %v2750_v16, %v2768_v19  ;;  %2890 = vmatprep.mubr.f32.mxu1 %v2751_v47  ;;  %v11244_v41 = vpack.c.bf16 %v10119_v1, %v10117_v24  ;;  %v2512_v14 = vsel %vm792_vm3, %v2509_v20, %v2511_v36  ;;  %v2724_v44 = vrot.slane %v2539_v12, 6  ;;  %v11259_v16 = vld [vmem:[#allocation107_spill] sm:$0xff]  ;;  %v11261_v59 = vld [vmem:[#allocation109_spill] sm:$0xff]  ;;  %v11263_v47 = vld [vmem:[#allocation102_spill] sm:$0xff] }
 0x51c   :  { %7738 = vmatpush3.bf16.msra.mxu1 %v11243_v15  ;;  %v2767_v62 = vsel %vm548_vm2, %v2748_v0, %v2766_v38  ;;  %v10342_v27 = vsel %vm480_vm1, %v2539_v12, %v2540_v31  ;;  %2976 = vmatmul.mubr.f32.gmra.mrb[44].mxu0 %v2753_v48  ;;  %v11245_v46 = vpack.c.bf16 %v10123_v3, %v10121_v30  ;;  %v2770_v60 = vrot.slane %v2512_v14, 6  ;;  %v11262_v38 = vld [vmem:[#allocation49_spill] sm:$0xff]  ;;  %v11266_v14 = vld [vmem:[#allocation99_spill] sm:$0xff] }
 0x51d   :  { %7772 = vmatprep.subr.bf16.mxu0 %v11244_v41  ;;  %v2725_v63 = vrot.slane %v10342_v27, 6  ;;  %v2478_v24 = vmul.f32 %v10241_v21, %v11015_v39  ;;  %v2479_v1 = vmul.f32 %v10243_v45, %v11016_v26  ;;  %v11246_v13 = vpack.c.bf16 %v10127_v23, %v10125_v5  ;;  %2891 = vmatmul.mubr.f32.gmra.mrb[40].mxu1 %v2749_v29  ;;  %v11247_v39 = vld [vmem:[#allocation98_spill] sm:$0xff] }
 0x51e   :  { %7740 = vmatprep.subr.bf16.mxu1 %v11245_v46  ;;  %v2482_v20 = vmul.f32 %v10241_v21, %v11136_v55  ;;  %v2483_v30 = vmul.f32 %v10243_v45, %v11137_v58  ;;  %v2474_v3 = vmul.f32 %v10241_v21, %v11022_v57  ;;  %2980 = vmatprep.mubr.f32.mxu0 %v2773_v9  ;;  %v11249_v55 = vld [vmem:[#allocation97_spill] sm:$0xff]  ;;  %v11251_v21 = vld [vmem:[#allocation47_spill] sm:$0xff] }
 0x51f   :  { %7774 = vmatpush3.bf16.msra.mxu0 %v11246_v13  ;;  %v11248_v32 = vpack.c.bf16 %v10131_v33, %v11247_v39  ;;  %v2771_v26 = vsel %vm548_vm2, %v2752_v7, %v2770_v60  ;;  %v2726_v5 = vsel %vm548_vm2, %v2724_v44, %v2725_v63  ;;  %v2528_v23 = vrot.slane %v2478_v24, 4  ;;  %2895 = vmatprep.mubr.f32.mxu1 %v2769_v4 }
 0x520   :  { %v2529_v51 = vrot.slane %v2479_v1, 4  ;;  %v11250_v58 = vpack.c.bf16 %v10135_v56, %v11249_v55  ;;  %v2721_v43 = vrot.slane %v2482_v20, 6  ;;  %v2722_v57 = vrot.slane %v2483_v30, 6  ;;  %2981 = vmatmul.mubr.f32.gmra.mrb[46].mxu0 %v2771_v26  ;;  %v11269_v30 = vld [vmem:[#allocation75_spill] sm:$0xff]  ;;  %v2680_v26 = vld [vmem:[#allocation21 + $0x3f0] sm:$0xff] }
 0x521   :  { %7742 = vmatpush3.bf16.msra.mxu1 %v11248_v32  ;;  %v2475_v0 = vmul.f32 %v10243_v45, %v11251_v21  ;;  %v2517_v33 = vrot.slane %v2474_v3, 2  ;;  %v11252_v2 = vpack.c.bf16 %v10139_v50, %v10137_v40  ;;  %v2718_v25 = vrot.slane %v2528_v23, 6  ;;  %3135 = vmatprep.mubr.f32.mxu0 %v2726_v5  ;;  %v11270_v3 = vld [vmem:[#allocation95_spill] sm:$0xff]  ;;  %v2681_v5 = vld [vmem:[#allocation21 + $0x3f8] sm:$0xff]  ;;  %v11274_v55 = vld [vmem:[#allocation108_spill] sm:$0xff] }
 0x522   :  { %7776 = vmatprep.subr.bf16.mxu0 %v11250_v58  ;;  %v2530_v11 = vsel %vm792_vm3, %v2528_v23, %v2529_v51  ;;  %v2488_v42 = vmul.f32 %v10249_v52, %v11253_v17  ;;  %v2480_v56 = vmul.f32 %v10245_v53, %v11254_v28  ;;  %v11257_v34 = vpack.c.bf16 %v11255_v54, %v11256_v35  ;;  %v11275_v58 = vld [vmem:[#allocation101_spill] sm:$0xff] }
 0x523   :  { %7744 = vmatprep.subr.bf16.mxu1 %v11252_v2  ;;  %2896 = vmatmul.mubr.f32.gmra.mrb[42].mxu1 %v2767_v62  ;;  %v2719_v10 = vrot.slane %v2530_v11, 6  ;;  %v10385_v19 = vsel %vm548_vm2, %v2721_v43, %v2722_v57  ;;  %v2518_v40 = vrot.slane %v2475_v0, 2  ;;  %v2715_v50 = vrot.slane %v2517_v33, 6  ;;  %v2648_v2 = vld [vmem:[#allocation21 + $0x2f0] sm:$0xff]  ;;  %v2649_v11 = vld [vmem:[#allocation21 + $0x2f8] sm:$0xff] }
 0x524   :  { %7778 = vmatpush3.bf16.msra.mxu0 %v11257_v34  ;;  %v11260_v7 = vpack.c.bf16 %v11258_v37, %v11259_v16  ;;  %v2542_v29 = vrot.slane %v2488_v42, 2  ;;  %v2531_v36 = vrot.slane %v2480_v56, 4  ;;  %v2484_v9 = vmul.f32 %v10245_v53, %v11261_v59  ;;  %v11279_v28 = vld [vmem:[#allocation65_spill] sm:$0xff]  ;;  %v11280_v56 = vld [vmem:[#allocation68_spill] sm:$0xff]  ;;  %v11283_v37 = vld [vmem:[#allocation67_spill] sm:$0xff] }
 0x525   :  { %v2476_v12 = vmul.f32 %v10245_v53, %v11262_v38  ;;  %v2720_v15 = vsel %vm548_vm2, %v2718_v25, %v2719_v10  ;;  %v11264_v48 = vpack.c.bf16 %v10163_v18, %v11263_v47  ;;  %v11265_v4 = vpack.c.bf16 %v10167_v6, %v10165_v49  ;;  %v11268_v49 = vld [vmem:[#allocation111_spill] sm:$0xff]  ;;  %v11284_v16 = vld [vmem:[#allocation58_spill] sm:$0xff]  ;;  %v2665_v38 = vld [vmem:[#allocation21 + $0x378] sm:$0xff] }
 0x526   :  { %7746 = vmatpush3.bf16.msra.mxu1 %v11260_v7  ;;  %v2519_v41 = vsel %vm480_vm1, %v2517_v33, %v2518_v40  ;;  %v2481_v62 = vmul.f32 %v10249_v52, %v11266_v14  ;;  %3050 = vmatprep.mubr.f32.mxu1 %v2720_v15  ;;  %v2543_v46 = vsel %vm480_vm1, %v2540_v31, %v2542_v29  ;;  %v2742_v24 = vrot.slane %v2484_v9, 6  ;;  %v11272_v31 = vld [vmem:[#allocation82_spill] sm:$0xff]  ;;  %v11277_v33 = vld [vmem:[#allocation113_spill] sm:$0xff]  ;;  %v2664_v9 = vld [vmem:[#allocation21 + $0x370] sm:$0xff] }
 0x527   :  { %7780 = vmatprep.subr.bf16.mxu0 %v11264_v48  ;;  %7748 = vmatprep.subr.bf16.mxu1 %v11265_v4  ;;  %v2716_v44 = vrot.slane %v2519_v41, 6  ;;  %v2532_v60 = vsel %vm792_vm3, %v2529_v51, %v2531_v36  ;;  %v11267_v18 = vpack.c.bf16 %v10179_v61, %v10169_v8  ;;  %v2744_v1 = vrot.slane %v2543_v46, 6  ;;  %v11289_v4 = vld [vmem:[#allocation105_spill] sm:$0xff]  ;;  %v11290_v14 = vld [vmem:[#allocation48_spill] sm:$0xff] }
 0x528   :  { %v2740_v13 = vrot.slane %v2532_v60, 6  ;;  %v2520_v6 = vrot.slane %v2476_v12, 2  ;;  %v10411_v20 = vsel %vm480_vm1, %v2542_v29, %v11268_v49  ;;  %v11271_v39 = vpack.c.bf16 %v11269_v30, %v11270_v3  ;;  %v11286_v29 = vld [vmem:[#allocation70_spill] sm:$0xff]  ;;  %v2632_v12 = vld [vmem:[#allocation21 + $0x270] sm:$0xff]  ;;  %v2683_v49 = vld [vmem:[#allocation21 + $0x408] sm:$0xff] }
 0x529   :  { %7782 = vmatpush3.bf16.msra.mxu0 %v11267_v18  ;;  %v11273_v32 = vpack.c.bf16 %v10187_v22, %v11272_v31  ;;  %v10420_v61 = vsel %vm548_vm2, %v2715_v50, %v2716_v44  ;;  %v10423_v8 = vsel %vm548_vm2, %v2722_v57, %v2742_v24  ;;  %v2762_v23 = vrot.slane %v10411_v20, 6  ;;  %v2633_v18 = vld [vmem:[#allocation21 + $0x278] sm:$0xff] }
 0x52a   :  { %7750 = vmatpush3.bf16.msra.mxu1 %v11271_v39  ;;  %v2533_v51 = vrot.slane %v2481_v62, 4  ;;  %v11276_v43 = vpack.c.bf16 %v11274_v55, %v11275_v58  ;;  %v10432_v22 = vsel %vm548_vm2, %v2725_v63, %v2744_v1  ;;  %v10435_v21 = vsel %vm548_vm2, %v2719_v10, %v2740_v13  ;;  %v11278_v63 = vld [vmem:[#allocation52_spill] sm:$0xff]  ;;  %v11291_v62 = vld [vmem:[#allocation71_spill] sm:$0xff] }
 0x52b   :  { %7784 = vmatprep.subr.bf16.mxu0 %v11273_v32  ;;  %v2521_v0 = vsel %vm480_vm1, %v2518_v40, %v2520_v6  ;;  %v10440_v57 = vmul.f32 %v10249_v52, %v11277_v33  ;;  %v10445_v17 = vsel %vm548_vm2, %v2744_v1, %v2762_v23  ;;  %v2477_v42 = vmul.f32 %v10249_v52, %v11278_v63  ;;  %v11282_v40 = vld [vmem:[#allocation100_spill] sm:$0xff]  ;;  %v2682_v1 = vld [vmem:[#allocation21 + $0x400] sm:$0xff] }
 0x52c   :  { %7752 = vmatprep.subr.bf16.mxu1 %v11276_v43  ;;  %v2738_v25 = vrot.slane %v2521_v0, 6  ;;  %v2534_v27 = vsel %vm792_vm3, %v2531_v36, %v2533_v51  ;;  %v11281_v54 = vpack.c.bf16 %v11279_v28, %v11280_v56  ;;  %v7791_v35 = vpack.c.bf16 %v2681_v5, %v2680_v26  ;;  %v11287_v36 = vld [vmem:[#allocation80_spill] sm:$0xff]  ;;  %v11294_v5 = vld [vmem:[#allocation73_spill] sm:$0xff] }
 0x52d   :  { %v2758_v34 = vrot.slane %v2534_v27, 6  ;;  %v2760_v10 = vrot.slane %v10440_v57, 6  ;;  %v2535_v50 = vsel %vm792_vm3, %v2533_v51, %v11282_v40  ;;  %v11285_v7 = vpack.c.bf16 %v11283_v37, %v11284_v16  ;;  %v11295_v51 = vld [vmem:[#allocation72_spill] sm:$0xff] }
 0x52e   :  { %7786 = vmatpush3.bf16.msra.mxu0 %v11281_v54  ;;  %v11288_v59 = vpack.c.bf16 %v11286_v29, %v11287_v36  ;;  %v2739_v15 = vsel %vm548_vm2, %v2716_v44, %v2738_v25  ;;  %v2522_v47 = vrot.slane %v2477_v42, 2  ;;  %v2776_v48 = vrot.slane %v2535_v50, 6  ;;  %v11293_v44 = vld [vmem:[#allocation110_spill] sm:$0xff]  ;;  %v11297_v0 = vld [vmem:[#allocation112_spill] sm:$0xff]  ;;  %v11301_v50 = vld [vmem:[#allocation59_spill] sm:$0xff] }
 0x52f   :  { %7754 = vmatpush3.bf16.msra.mxu1 %v11285_v7  ;;  %v2489_v41 = vmul.f32 %v10243_v45, %v11289_v4  ;;  %v11292_v46 = vpack.c.bf16 %v11290_v14, %v11291_v62  ;;  %v7759_v60 = vpack.c.bf16 %v2649_v11, %v2648_v2  ;;  %v2759_v30 = vsel %vm548_vm2, %v2740_v13, %v2758_v34  ;;  %v11299_v2 = vld [vmem:[#allocation79_spill] sm:$0xff]  ;;  %v2684_v54 = vld [vmem:[#allocation21 + $0x410] sm:$0xff]  ;;  %v2686_v29 = vld [vmem:[#allocation21 + $0x420] sm:$0xff] }
 0x530   :  { %7788 = vmatprep.subr.bf16.mxu0 %v11288_v59  ;;  %v2761_v3 = vsel %vm548_vm2, %v2742_v24, %v2760_v10  ;;  %v2490_v39 = vmul.f32 %v10245_v53, %v11293_v44  ;;  %v2523_v31 = vsel %vm480_vm1, %v2520_v6, %v2522_v47  ;;  %v2777_v45 = vsel %vm548_vm2, %v2758_v34, %v2776_v48  ;;  %v11298_v24 = vld [vmem:[#allocation77_spill] sm:$0xff]  ;;  %v2687_v36 = vld [vmem:[#allocation21 + $0x428] sm:$0xff]  ;;  %v2692_v4 = vld [vmem:[#allocation21 + $0x450] sm:$0xff] }
 0x531   :  { %7756 = vmatprep.subr.bf16.mxu1 %v11292_v46  ;;  %v2774_v32 = vrot.slane %v2522_v47, 6  ;;  %v2548_v26 = vrot.slane %v2489_v41, 4  ;;  %v11296_v55 = vpack.c.bf16 %v11294_v5, %v11295_v51  ;;  %v7793_v58 = vpack.c.bf16 %v2665_v38, %v2664_v9  ;;  %v2685_v34 = vld [vmem:[#allocation21 + $0x418] sm:$0xff]  ;;  %v2691_v48 = vld [vmem:[#allocation21 + $0x448] sm:$0xff]  ;;  %v2696_v46 = vld [vmem:[#allocation21 + $0x470] sm:$0xff] }
 0x532   :  { %v2756_v43 = vrot.slane %v2523_v31, 6  ;;  %v2549_v13 = vrot.slane %v2490_v39, 4  ;;  %v2491_v33 = vmul.f32 %v10249_v52, %v11297_v0  ;;  %v11300_v11 = vpack.c.bf16 %v11298_v24, %v11299_v2  ;;  %v2689_v47 = vld [vmem:[#allocation21 + $0x438] sm:$0xff]  ;;  %v2695_v14 = vld [vmem:[#allocation21 + $0x468] sm:$0xff] }
 0x533   :  { %7790 = vmatpush3.bf16.msra.mxu0 %v11296_v55  ;;  %v7761_v53 = vpack.c.bf16 %v2633_v18, %v2632_v12  ;;  %v7795_v6 = vpack.c.bf16 %v2683_v49, %v2682_v1  ;;  %v2727_v27 = vrot.slane %v2548_v26, 6  ;;  %v7799_v7 = vpack.c.bf16 %v2685_v34, %v2684_v54  ;;  %v2688_v12 = vld [vmem:[#allocation21 + $0x430] sm:$0xff]  ;;  %v2693_v41 = vld [vmem:[#allocation21 + $0x458] sm:$0xff] }
 0x534   :  { %7758 = vmatpush3.bf16.msra.mxu1 %v11300_v11  ;;  %7792 = vmatprep.subr.bf16.mxu0 %v7791_v35  ;;  %v2757_v63 = vsel %vm548_vm2, %v2738_v25, %v2756_v43  ;;  %v2775_v42 = vsel %vm548_vm2, %v2756_v43, %v2774_v32  ;;  %v2550_v28 = vsel %vm792_vm3, %v2548_v26, %v2549_v13  ;;  %v2551_v56 = vrot.slane %v2491_v33, 4 }
 0x535   :  { %7760 = vmatprep.subr.bf16.mxu1 %v7759_v60  ;;  %v2728_v40 = vrot.slane %v2550_v28, 6  ;;  %v7803_v38 = vpack.c.bf16 %v2687_v36, %v2686_v29  ;;  %v7815_v20 = vpack.c.bf16 %v2693_v41, %v2692_v4  ;;  %v2697_v60 = vld [vmem:[#allocation21 + $0x478] sm:$0xff] }
 0x536   :  { %v2552_v52 = vsel %vm792_vm3, %v2549_v13, %v2551_v56  ;;  %v10490_v35 = vsel %vm792_vm3, %v2551_v56, %v11301_v50  ;;  %v7823_v57 = vpack.c.bf16 %v2697_v60, %v2696_v46 }
 0x537   :  { %7794 = vmatpush3.bf16.msra.mxu0 %v7793_v58  ;;  %v2729_v37 = vsel %vm548_vm2, %v2727_v27, %v2728_v40  ;;  %v2746_v16 = vrot.slane %v2552_v52, 6  ;;  %v2764_v25 = vrot.slane %v10490_v35, 6 }
 0x538   :  { %7762 = vmatpush3.bf16.msra.mxu1 %v7761_v53 }
 0x539   :  { %7796 = vmatprep.subr.bf16.mxu1 %v7795_v6  ;;  %v2747_v59 = vsel %vm548_vm2, %v2728_v40, %v2746_v16  ;;  %v2765_v9 = vsel %vm548_vm2, %v2746_v16, %v2764_v25 }
 0x53a   :  { %3136 = vmatmul.mubr.f32.vlgmr.msra.gmra.mrb[48].mxu0 %v10385_v19  ;;  %v7807_v19 = vpack.c.bf16 %v2689_v47, %v2688_v12 }
 0x53b   :  { %3051 = vmatmul.mubr.f32.vlgmr.msra.gmra.mrb[44].mxu1 %v10420_v61  ;;  %3140 = vmatprep.mubr.f32.mxu0 %v10432_v22  ;;  %v11302_v61 = vld [vmem:[#allocation61_spill] sm:$0xff] }
 0x53c   :  { %3055 = vmatprep.mubr.f32.mxu1 %v10435_v21  ;;  %7798 = vmatpush3.bf16.msra.mxu1 %v7795_v6  ;;  %v2779_v22 = vsel %vm548_vm2, %v2762_v23, %v11302_v61  ;;  %v2690_v21 = vld [vmem:[#allocation21 + $0x440] sm:$0xff] }
 0x53d   :  { %7800 = vmatprep.subr.bf16.mxu1 %v7799_v7  ;;  %v2694_v23 = vld [vmem:[#allocation21 + $0x460] sm:$0xff] }
 0x53e   :  { %3141 = vmatmul.mubr.f32.gmra.mrb[50].mxu0 %v10423_v8  ;;  %v11303_v8 = vld [vmem:[#allocation60_spill] sm:$0xff]  ;;  %v7819_v62 = vpack.c.bf16 %v2695_v14, %v2694_v23 }
 0x53f   :  { %3056 = vmatmul.mubr.f32.gmra.mrb[46].mxu1 %v2739_v15  ;;  %3145 = vmatprep.mubr.f32.mxu0 %v10445_v17  ;;  %v2778_v17 = vsel %vm548_vm2, %v2760_v10, %v11303_v8  ;;  %v7811_v15 = vpack.c.bf16 %v2691_v48, %v2690_v21  ;;  %v11304_v10 = vld [vmem:[#allocation66_spill] sm:$0xff] }
 0x540   :  { %3060 = vmatprep.mubr.f32.mxu1 %v2759_v30  ;;  %7802 = vmatpush3.bf16.msra.mxu1 %v7799_v7  ;;  %v2780_v18 = vsel %vm548_vm2, %v2764_v25, %v11304_v10 }
 0x541   :  { %7804 = vmatprep.subr.bf16.mxu1 %v7803_v38 }
 0x542   :  { %3146 = vmatmul.mubr.f32.gmra.mrb[52].mxu0 %v2761_v3 }
 0x543   :  { %3061 = vmatmul.mubr.f32.gmra.mrb[48].mxu1 %v2757_v63  ;;  %3150 = vmatprep.mubr.f32.mxu0 %v2779_v22 }
 0x544   :  { %3065 = vmatprep.mubr.f32.mxu1 %v2777_v45  ;;  %7806 = vmatpush3.bf16.msra.mxu1 %v7803_v38 }
 0x545   :  { %7808 = vmatprep.subr.bf16.mxu1 %v7807_v19 }
 0x546   :  { %3151 = vmatmul.mubr.f32.gmra.mrb[54].mxu0 %v2778_v17 }
 0x547   :  { %3066 = vmatmul.mubr.f32.gmra.mrb[50].mxu1 %v2775_v42 }
 0x548   :  { %7810 = vmatpush3.bf16.msra.mxu1 %v7807_v19  ;;  %7333 = vmatprep.mubr.f32.mxu1 %v2729_v37 }
 0x549   :  { %7812 = vmatprep.subr.bf16.mxu1 %v7811_v15 }
 0x54c   :  { %7814 = vmatpush3.bf16.msra.mxu1 %v7811_v15 }
 0x54d   :  { %7816 = vmatprep.subr.bf16.mxu1 %v7815_v20 }
 0x550   :  { %7818 = vmatpush3.bf16.msra.mxu1 %v7815_v20 }
 0x551   :  { %7820 = vmatprep.subr.bf16.mxu1 %v7819_v62 }
 0x554   :  { %7822 = vmatpush3.bf16.msra.mxu1 %v7819_v62 }
 0x555   :  { %7824 = vmatprep.subr.bf16.mxu1 %v7823_v57 }
 0x558   :  { %7826 = vmatpush3.bf16.msra.mxu1 %v7823_v57 }
 0x55b   :  { %7334 = vmatmul.mubr.f32.vlgmr.msra.gmra.mrb[52].mxu1 %v2747_v59 }
 0x55c   :  { %7336 = vmatprep.mubr.f32.mxu1 %v2765_v9 }
 0x55f   :  { %7337 = vmatmul.mubr.f32.gmra.mrb[54].mxu1 %v2780_v18 }
 0x5e6   :  { %v7003_v1 = vpop.f32.mrb[40].mxu0 }
 0x5e7   :  { %v6959_v49 = vpop.f32.mrb[36].mxu1  ;;  %v7004_v30 = vpop.f32.mrb[41].mxu0 }
 0x5e8   :  { %v7005_v3 = vadd.f32 %v7004_v30, %v7003_v1  ;;  %v6960_v44 = vpop.f32.mrb[37].mxu1 }
 0x5e9   :  { %v6961_v39 = vadd.f32 %v6960_v44, %v6959_v49 }
 0x5ea   :  { %v7006_v31 = vpop.f32.mrb[42].mxu0 }
 0x5eb   :  { %v2968_v45 = vadd.f32 %v7005_v3, %v6961_v39  ;;  %v6962_v32 = vpop.f32.mrb[38].mxu1  ;;  %v7007_v26 = vpop.f32.mrb[43].mxu0 }
 0x5ec   :  { %v7008_v5 = vadd.f32 %v7007_v26, %v7006_v31  ;;  %v6963_v51 = vpop.f32.mrb[39].mxu1 }
 0x5ed   :  { %v6964_v55 = vadd.f32 %v6963_v51, %v6962_v32 }
 0x5ef   :  { %v7009_v58 = vpop.f32.mrb[44].mxu0  ;;  %v2973_v43 = vadd.f32 %v7008_v5, %v6964_v55 }
 0x5f0   :  { %v6965_v13 = vpop.f32.mrb[40].mxu1  ;;  %v7010_v0 = vpop.f32.mrb[45].mxu0 }
 0x5f1   :  { %v7011_v33 = vadd.f32 %v7010_v0, %v7009_v58  ;;  %v6966_v24 = vpop.f32.mrb[41].mxu1 }
 0x5f2   :  { %v6967_v2 = vadd.f32 %v6966_v24, %v6965_v13 }
 0x5f3   :  { %v7012_v11 = vpop.f32.mrb[46].mxu0 }
 0x5f4   :  { %v2978_v53 = vadd.f32 %v7011_v33, %v6967_v2  ;;  %v7013_v27 = vpop.f32.mrb[47].mxu0 }
 0x5f5   :  { %v7014_v63 = vadd.f32 %v7013_v27, %v7012_v11 }
 0x5f6   :  { %v6968_v6 = vpop.f32.mrb[42].mxu1 }
 0x5f7   :  { %v6969_v42 = vpop.f32.mrb[43].mxu1 }
 0x5f8   :  { %v6970_v28 = vadd.f32 %v6969_v42, %v6968_v6 }
 0x5fa   :  { %v2983_v56 = vadd.f32 %v7014_v63, %v6970_v28 }
 0x60d   :  { %v7091_v54 = vpop.f32.mrb[48].mxu0 }
 0x60e   :  { %v7047_v34 = vpop.f32.mrb[44].mxu1  ;;  %v7092_v40 = vpop.f32.mrb[49].mxu0 }
 0x60f   :  { %v7093_v52 = vadd.f32 %v7092_v40, %v7091_v54  ;;  %v7048_v50 = vpop.f32.mrb[45].mxu1 }
 0x610   :  { %v7049_v35 = vadd.f32 %v7048_v50, %v7047_v34 }
 0x611   :  { %v7094_v37 = vpop.f32.mrb[50].mxu0 }
 0x612   :  { %v3053_v16 = vadd.f32 %v7049_v35, %v2968_v45  ;;  %v7050_v25 = vpop.f32.mrb[46].mxu1  ;;  %v7095_v7 = vpop.f32.mrb[51].mxu0 }
 0x613   :  { %v7096_v29 = vadd.f32 %v7095_v7, %v7094_v37  ;;  %v7051_v36 = vpop.f32.mrb[47].mxu1  ;;  %v6459_v7 = vld [vmem:[#allocation22] ss:$0 sm:$0xff] }
 0x614   :  { %v7052_v59 = vadd.f32 %v7051_v36, %v7050_v25  ;;  %v3138_v9 = vadd.f32 %v7093_v52, %v3053_v16 }
 0x615   :  { %v7097_v38 = vpop.f32.mrb[52].mxu0 }
 0x616   :  { %v3058_v12 = vadd.f32 %v7052_v59, %v2973_v43  ;;  %v7053_v47 = vpop.f32.mrb[48].mxu1  ;;  %v7098_v19 = vpop.f32.mrb[53].mxu0 }
 0x617   :  { %v7099_v61 = vadd.f32 %v7098_v19, %v7097_v38  ;;  %v7054_v22 = vpop.f32.mrb[49].mxu1  ;;  %v6460_v38 = vld [vmem:[#allocation24] ss:$0 sm:$0xff] }
 0x618   :  { %v7055_v21 = vadd.f32 %v7054_v22, %v7053_v47  ;;  %v3143_v48 = vadd.f32 %v7096_v29, %v3058_v12 }
 0x619   :  { %v7100_v8 = vpop.f32.mrb[54].mxu0 }
 0x61a   :  { %v3063_v17 = vadd.f32 %v7055_v21, %v2978_v53  ;;  %v7056_v15 = vpop.f32.mrb[50].mxu1  ;;  %v7101_v4 = vpop.f32.mrb[55].mxu0 }
 0x61b   :  { %v7102_v41 = vadd.f32 %v7101_v4, %v7100_v8  ;;  %v7057_v20 = vpop.f32.mrb[51].mxu1 }
 0x61c   :  { %v7058_v23 = vadd.f32 %v7057_v20, %v7056_v15  ;;  %v3148_v14 = vadd.f32 %v7099_v61, %v3063_v17 }
 0x61e   :  { %v3068_v62 = vadd.f32 %v7058_v23, %v2983_v56 }
 0x620   :  { %v3153_v46 = vadd.f32 %v7102_v41, %v3068_v62 }
 0x62e   :  { %v7335_v60 = vpop.f32.mrb[52].mxu1 }
 0x62f   :  { %v3228_v57 = vadd.f32 %v7335_v60, %v3143_v48  ;;  %v3222_v10 = vpop.f32.mrb[53].mxu1 }
 0x630   :  { %v3223_v18 = vadd.f32 %v3222_v10, %v3138_v9 }
 0x631   :  { %v3252_v1 = vmul.f32 %v3228_v57, %v3228_v57 }
 0x632   :  { %v3241_v49 = vadd.f32 %v3228_v57, %v3223_v18  ;;  %v3251_v30 = vmul.f32 %v3223_v18, %v3223_v18  ;;  %v7338_v3 = vpop.f32.mrb[54].mxu1 }
 0x633   :  { %v3238_v44 = vadd.f32 %v7338_v3, %v3153_v46  ;;  %v3232_v39 = vpop.f32.mrb[55].mxu1 }
 0x634   :  { %v3255_v31 = vadd.f32 %v3252_v1, %v3251_v30  ;;  %v3233_v45 = vadd.f32 %v3232_v39, %v3148_v14 }
 0x635   :  { %v3254_v5 = vmul.f32 %v3238_v44, %v3238_v44 }
 0x636   :  { %v3242_v32 = vadd.f32 %v3241_v49, %v3233_v45  ;;  %v3253_v26 = vmul.f32 %v3233_v45, %v3233_v45 }
 0x638   :  { %v3243_v51 = vadd.f32 %v3242_v32, %v3238_v44  ;;  %v3256_v55 = vadd.f32 %v3255_v31, %v3253_v26 }
 0x63a   :  { %v3244_v58 = vrot.slane %v3243_v51, 4  ;;  %v3257_v43 = vadd.f32 %v3256_v55, %v3254_v5 }
 0x63c   :  { %v3245_v13 = vadd.f32 %v3244_v58, %v3243_v51  ;;  %v3258_v0 = vrot.slane %v3257_v43, 4 }
 0x63e   :  { %v3246_v33 = vrot.slane %v3245_v13, 2  ;;  %v3259_v24 = vadd.f32 %v3258_v0, %v3257_v43 }
 0x640   :  { %v3247_v2 = vadd.f32 %v3246_v33, %v3245_v13  ;;  %v3260_v11 = vrot.slane %v3259_v24, 2 }
 0x642   :  { %v3248_v53 = vrot.slane %v3247_v2, 1  ;;  %v3261_v6 = vadd.f32 %v3260_v11, %v3259_v24 }
 0x644   :  { %v3249_v27 = vadd.f32 %v3248_v53, %v3247_v2  ;;  %v3262_v63 = vrot.slane %v3261_v6, 1 }
 0x646   :  { %v3250_v42 = vmul.f32 0.03125, %v3249_v27  ;;  %v3263_v28 = vadd.f32 %v3262_v63, %v3261_v6 }
 0x648   :  { %v3264_v56 = vmul.f32 0.03125, %v3263_v28  ;;  %v3265_v54 = vmul.f32 %v3250_v42, %v3250_v42  ;;  %v3268_v34 = vsub.f32 %v3223_v18, %v3250_v42  ;;  %v3269_v40 = vsub.f32 %v3228_v57, %v3250_v42 }
 0x649   :  { %v3270_v52 = vsub.f32 %v3233_v45, %v3250_v42  ;;  %v3271_v50 = vsub.f32 %v3238_v44, %v3250_v42 }
 0x64a   :  { %v3266_v35 = vsub.f32 %v3264_v56, %v3265_v54 }
 0x64c   :  { %v3267_v37 = vmax.f32 %v3266_v35, 0.0 }
 0x64e   :  { %v3272_v16 = vadd.f32 1e-05, %v3267_v37 }
 0x650   :  { %7983 = vrsqrt.f32 %v3272_v16 }
 0x65a   :  { %v7984_v25 = vpop.eup %7983 }
 0x65b   :  { %v3274_v29 = vmul.f32 %v7984_v25, %v3268_v34  ;;  %v3275_v36 = vmul.f32 %v7984_v25, %v3269_v40  ;;  %v3276_v59 = vmul.f32 %v7984_v25, %v3270_v52  ;;  %v3277_v9 = vmul.f32 %v7984_v25, %v3271_v50 }
 0x65d   :  { %v3285_v12 = vmul.f32 %v6459_v7, %v3274_v29  ;;  %v3286_v47 = vmul.f32 %v6459_v7, %v3275_v36  ;;  %v3287_v19 = vmul.f32 %v6459_v7, %v3276_v59  ;;  %v3288_v61 = vmul.f32 %v6459_v7, %v3277_v9 }
 0x65f   :  { %v3296_v22 = vadd.f32 %v6460_v38, %v3285_v12  ;;  %v3297_v21 = vadd.f32 %v6460_v38, %v3286_v47  ;;  %v3298_v48 = vadd.f32 %v6460_v38, %v3287_v19  ;;  %v3299_v8 = vadd.f32 %v6460_v38, %v3288_v61 }
 0x661   :  { %v10512_v17 = vmax.f32 %v3296_v22, 0.0  ;;  %v10514_v15 = vmax.f32 %v3297_v21, 0.0  ;;  %v10516_v4 = vmax.f32 %v3298_v48, 0.0  ;;  %v10518_v41 = vmax.f32 %v3299_v8, 0.0 }
 0x663   :  { %v3305_v20 = vrot.slane %v10512_v17, 2  ;;  %v3307_v23 = vrot.slane %v10512_v17, 4  ;;  %v3309_v14 = vrot.slane %v10512_v17, 6  ;;  %v3312_v62 = vrot.slane %v10514_v15, 2 }
 0x664   :  { %v3314_v46 = vrot.slane %v10514_v15, 4  ;;  %v3316_v60 = vrot.slane %v10514_v15, 6  ;;  %v3319_v57 = vrot.slane %v10516_v4, 2  ;;  %v3321_v10 = vrot.slane %v10516_v4, 4 }
 0x665   :  { %v3323_v18 = vrot.slane %v10516_v4, 6  ;;  %v3326_v1 = vrot.slane %v10518_v41, 2  ;;  %v3328_v49 = vrot.slane %v10518_v41, 4  ;;  %v3330_v30 = vrot.slane %v10518_v41, 6 }
 0x666   :  { %8441 = dma.done.wait [#allocation3], 131072 }
 0x667   :  { %8442 = vsyncadd [#allocation3], 4294836224  ;;  %v10532_v3 = vpack.c.bf16 %v3305_v20, %v3305_v20  ;;  %v3353_v44 = vld [vmem:[#allocation2 + $0x8] sm:$0xff]  ;;  %v3355_v39 = vld [vmem:[#allocation2 + $0x18] sm:$0xff]  ;;  %s8472_s25 = smov [#allocation30]  }
 0x668   :  { %v3352_v31 = vld [vmem:[#allocation2] sm:$0xff]  ;;  %4418 = vmatprep.subr.bf16.mxu0 %v3353_v44  ;;  %4746 = vmatprep.subr.bf16.mxu1 %v3355_v39  ;;  %v3354_v45 = vld [vmem:[#allocation2 + $0x10] sm:$0xff]  ;;  %v3361_v32 = vld [vmem:[#allocation2 + $0x48] sm:$0xff]  ;;  %s6424_s2 = sshll.u32 %s8472_s25, 4  ;;  %s6425_s2 = int_to_ptr.vmem [resolvable:$true] %s6424_s2 }
 0x669   :  { %4450 = vmatprep.mubr.bf16.mxu0 %v10532_v3  ;;  %4778 = vmatprep.mubr.bf16.mxu1 %v10532_v3  ;;  %v3363_v26 = vld [vmem:[#allocation2 + $0x58] sm:$0xff]  ;;  %v3360_v5 = vld [vmem:[#allocation2 + $0x40] sm:$0xff]  ;;  %v3362_v51 = vld [vmem:[#allocation2 + $0x50] sm:$0xff]  ;;  %s8401_s23 = scalar_lea.vmem %s6425_s2, 32  ;;  %p8406_p3 = scmp.lt.s32.totalorder %s6425_s2, %s6425_s2 }
 0x66a   :  { %4419 = vmatpush1.bf16.msra.mxu0 %v3352_v31  ;;  %4747 = vmatpush1.bf16.msra.mxu1 %v3354_v45  ;;  %v3369_v55 = vld [vmem:[#allocation2 + $0x88] sm:$0xff]  ;;  %v3371_v58 = vld [vmem:[#allocation2 + $0x98] sm:$0xff]  ;;  %v3368_v43 = vld [vmem:[#allocation2 + $0x80] sm:$0xff]  ;;  %p8402_p2 = scmp.ne.s32.totalorder %s6425_s2, %s8401_s23  ;;  %p8407_p4 = scmp.lt.s32.totalorder %s8401_s23, %s8401_s23 }
 0x66b   :  { %4420 = vmatprep.subr.bf16.mxu0 %v3361_v32  ;;  %4748 = vmatprep.subr.bf16.mxu1 %v3363_v26  ;;  %v3370_v13 = vld [vmem:[#allocation2 + $0x90] sm:$0xff]  ;;  %v3377_v0 = vld [vmem:[#allocation2 + $0xc8] sm:$0xff]  ;;  %v3379_v33 = vld [vmem:[#allocation2 + $0xd8] sm:$0xff] }
 0x66c   :  { %v3376_v24 = vld [vmem:[#allocation2 + $0xc0] sm:$0xff]  ;;  %v3378_v2 = vld [vmem:[#allocation2 + $0xd0] sm:$0xff]  ;;  %v3385_v11 = vld [vmem:[#allocation2 + $0x108] sm:$0xff]  ;;  %p8408_p5 = por %p8407_p4, %p8406_p3 }
 0x66d   :  { %v3387_v53 = vld [vmem:[#allocation2 + $0x118] sm:$0xff]  ;;  %v3384_v6 = vld [vmem:[#allocation2 + $0x100] sm:$0xff]  ;;  %v3386_v27 = vld [vmem:[#allocation2 + $0x110] sm:$0xff] }
 0x66e   :  { %4421 = vmatpush1.bf16.msra.mxu0 %v3360_v5  ;;  %4749 = vmatpush1.bf16.msra.mxu1 %v3362_v51  ;;  %v3393_v63 = vld [vmem:[#allocation2 + $0x148] sm:$0xff]  ;;  %v3395_v42 = vld [vmem:[#allocation2 + $0x158] sm:$0xff]  ;;  %v3392_v28 = vld [vmem:[#allocation2 + $0x140] sm:$0xff]  ;;  %p8409_p6 = pnand %p8408_p5, %p8402_p2 }
 0x66f   :  { %4422 = vmatprep.subr.bf16.mxu0 %v3369_v55  ;;  %4750 = vmatprep.subr.bf16.mxu1 %v3371_v58  ;;  %v3394_v56 = vld [vmem:[#allocation2 + $0x150] sm:$0xff]  ;;  %v3401_v54 = vld [vmem:[#allocation2 + $0x188] sm:$0xff]  ;;  %v3403_v34 = vld [vmem:[#allocation2 + $0x198] sm:$0xff] }
 0x670   :  { %v3400_v40 = vld [vmem:[#allocation2 + $0x180] sm:$0xff]  ;;  %v3402_v52 = vld [vmem:[#allocation2 + $0x190] sm:$0xff]  ;;  %v3409_v50 = vld [vmem:[#allocation2 + $0x1c8] sm:$0xff] }
 0x671   :  { %v3411_v35 = vld [vmem:[#allocation2 + $0x1d8] sm:$0xff]  ;;  %v3408_v37 = vld [vmem:[#allocation2 + $0x1c0] sm:$0xff]  ;;  %v3410_v16 = vld [vmem:[#allocation2 + $0x1d0] sm:$0xff] }
 0x672   :  { %4423 = vmatpush1.bf16.msra.mxu0 %v3368_v43  ;;  %4751 = vmatpush1.bf16.msra.mxu1 %v3370_v13  ;;  %v3417_v25 = vld [vmem:[#allocation2 + $0x208] sm:$0xff]  ;;  %v3419_v7 = vld [vmem:[#allocation2 + $0x218] sm:$0xff]  ;;  %v3416_v29 = vld [vmem:[#allocation2 + $0x200] sm:$0xff] }
 0x673   :  { %4424 = vmatprep.subr.bf16.mxu0 %v3377_v0  ;;  %4752 = vmatprep.subr.bf16.mxu1 %v3379_v33  ;;  %v3418_v36 = vld [vmem:[#allocation2 + $0x210] sm:$0xff]  ;;  %v3425_v59 = vld [vmem:[#allocation2 + $0x248] sm:$0xff]  ;;  %v3427_v9 = vld [vmem:[#allocation2 + $0x258] sm:$0xff] }
 0x674   :  { %v3424_v38 = vld [vmem:[#allocation2 + $0x240] sm:$0xff]  ;;  %v3426_v12 = vld [vmem:[#allocation2 + $0x250] sm:$0xff]  ;;  %v3433_v47 = vld [vmem:[#allocation2 + $0x288] sm:$0xff] }
 0x675   :  { %v3435_v19 = vld [vmem:[#allocation2 + $0x298] sm:$0xff]  ;;  %v3432_v61 = vld [vmem:[#allocation2 + $0x280] sm:$0xff]  ;;  %v3434_v22 = vld [vmem:[#allocation2 + $0x290] sm:$0xff] }
 0x676   :  { %4425 = vmatpush1.bf16.msra.mxu0 %v3376_v24  ;;  %4753 = vmatpush1.bf16.msra.mxu1 %v3378_v2  ;;  %v3441_v21 = vld [vmem:[#allocation2 + $0x2c8] sm:$0xff]  ;;  %v3443_v48 = vld [vmem:[#allocation2 + $0x2d8] sm:$0xff]  ;;  %v3440_v8 = vld [vmem:[#allocation2 + $0x2c0] sm:$0xff] }
 0x677   :  { %4426 = vmatprep.subr.bf16.mxu0 %v3385_v11  ;;  %4754 = vmatprep.subr.bf16.mxu1 %v3387_v53  ;;  %v3442_v20 = vld [vmem:[#allocation2 + $0x2d0] sm:$0xff]  ;;  %v3449_v44 = vld [vmem:[#allocation2 + $0x308] sm:$0xff]  ;;  %v3451_v39 = vld [vmem:[#allocation2 + $0x318] sm:$0xff] }
 0x678   :  { %v3448_v31 = vld [vmem:[#allocation2 + $0x300] sm:$0xff]  ;;  %v3450_v45 = vld [vmem:[#allocation2 + $0x310] sm:$0xff]  ;;  %v3457_v32 = vld [vmem:[#allocation2 + $0x348] sm:$0xff] }
 0x679   :  { %v3459_v26 = vld [vmem:[#allocation2 + $0x358] sm:$0xff]  ;;  %v3456_v5 = vld [vmem:[#allocation2 + $0x340] sm:$0xff]  ;;  %v3458_v51 = vld [vmem:[#allocation2 + $0x350] sm:$0xff] }
 0x67a   :  { %4427 = vmatpush1.bf16.msra.mxu0 %v3384_v6  ;;  %4755 = vmatpush1.bf16.msra.mxu1 %v3386_v27  ;;  %v3465_v55 = vld [vmem:[#allocation2 + $0x388] sm:$0xff]  ;;  %v3467_v58 = vld [vmem:[#allocation2 + $0x398] sm:$0xff]  ;;  %v3464_v43 = vld [vmem:[#allocation2 + $0x380] sm:$0xff]  ;;  %v10538_v6 = vpack.c.bf16 %v10512_v17, %v10512_v17 }
 0x67b   :  { %4428 = vmatprep.subr.bf16.mxu0 %v3393_v63  ;;  %4756 = vmatprep.subr.bf16.mxu1 %v3395_v42  ;;  %v3466_v13 = vld [vmem:[#allocation2 + $0x390] sm:$0xff]  ;;  %v3473_v0 = vld [vmem:[#allocation2 + $0x3c8] sm:$0xff]  ;;  %v3475_v33 = vld [vmem:[#allocation2 + $0x3d8] sm:$0xff] }
 0x67c   :  { %v3472_v24 = vld [vmem:[#allocation2 + $0x3c0] sm:$0xff]  ;;  %v3474_v2 = vld [vmem:[#allocation2 + $0x3d0] sm:$0xff]  ;;  %v3481_v11 = vld [vmem:[#allocation2 + $0x408] sm:$0xff] }
 0x67d   :  { %v3483_v53 = vld [vmem:[#allocation2 + $0x418] sm:$0xff]  ;;  %v3480_v27 = vld [vmem:[#allocation2 + $0x400] sm:$0xff]  ;;  %v3482_v63 = vld [vmem:[#allocation2 + $0x410] sm:$0xff] }
 0x67e   :  { %4429 = vmatpush1.bf16.msra.mxu0 %v3392_v28  ;;  %4757 = vmatpush1.bf16.msra.mxu1 %v3394_v56  ;;  %v3489_v42 = vld [vmem:[#allocation2 + $0x448] sm:$0xff]  ;;  %v3491_v28 = vld [vmem:[#allocation2 + $0x458] sm:$0xff]  ;;  %v10543_v56 = vpack.c.bf16 %v3309_v14, %v3309_v14  ;;  %v3498_v14 = vld [vmem:[#allocation2 + $0x490] sm:$0xff] }
 0x67f   :  { %4430 = vmatprep.subr.bf16.mxu0 %v3401_v54  ;;  %4758 = vmatprep.subr.bf16.mxu1 %v3403_v34  ;;  %v3488_v54 = vld [vmem:[#allocation2 + $0x440] sm:$0xff]  ;;  %v3490_v34 = vld [vmem:[#allocation2 + $0x450] sm:$0xff] }
 0x680   :  { %v3616_v17 = vld [vmem:[#allocation2 + $0x840] sm:$0xff] }
 0x682   :  { %4431 = vmatpush1.bf16.msra.mxu0 %v3400_v40  ;;  %4759 = vmatpush1.bf16.msra.mxu1 %v3402_v52  ;;  %v3497_v40 = vld [vmem:[#allocation2 + $0x488] sm:$0xff]  ;;  %v3499_v52 = vld [vmem:[#allocation2 + $0x498] sm:$0xff] }
 0x683   :  { %4432 = vmatprep.subr.bf16.mxu0 %v3409_v50  ;;  %4760 = vmatprep.subr.bf16.mxu1 %v3411_v35  ;;  %v3496_v50 = vld [vmem:[#allocation2 + $0x480] sm:$0xff]  ;;  %v3505_v35 = vld [vmem:[#allocation2 + $0x4c8] sm:$0xff] }
 0x686   :  { %4433 = vmatpush1.bf16.msra.mxu0 %v3408_v37  ;;  %4761 = vmatpush1.bf16.msra.mxu1 %v3410_v16  ;;  %v3507_v37 = vld [vmem:[#allocation2 + $0x4d8] sm:$0xff]  ;;  %v3504_v16 = vld [vmem:[#allocation2 + $0x4c0] sm:$0xff] }
 0x687   :  { %4434 = vmatprep.subr.bf16.mxu0 %v3417_v25  ;;  %4762 = vmatprep.subr.bf16.mxu1 %v3419_v7  ;;  %v3506_v25 = vld [vmem:[#allocation2 + $0x4d0] sm:$0xff]  ;;  %v3513_v7 = vld [vmem:[#allocation2 + $0x508] sm:$0xff] }
 0x68a   :  { %4435 = vmatpush1.bf16.msra.mxu0 %v3416_v29  ;;  %4763 = vmatpush1.bf16.msra.mxu1 %v3418_v36  ;;  %v3515_v29 = vld [vmem:[#allocation2 + $0x518] sm:$0xff]  ;;  %v3512_v36 = vld [vmem:[#allocation2 + $0x500] sm:$0xff] }
 0x68b   :  { %4436 = vmatprep.subr.bf16.mxu0 %v3425_v59  ;;  %4764 = vmatprep.subr.bf16.mxu1 %v3427_v9  ;;  %v3514_v59 = vld [vmem:[#allocation2 + $0x510] sm:$0xff]  ;;  %v3521_v9 = vld [vmem:[#allocation2 + $0x548] sm:$0xff] }
 0x68e   :  { %4437 = vmatpush1.bf16.msra.mxu0 %v3424_v38  ;;  %4765 = vmatpush1.bf16.msra.mxu1 %v3426_v12  ;;  %v3523_v38 = vld [vmem:[#allocation2 + $0x558] sm:$0xff]  ;;  %v3520_v12 = vld [vmem:[#allocation2 + $0x540] sm:$0xff] }
 0x68f   :  { %4438 = vmatprep.subr.bf16.mxu0 %v3433_v47  ;;  %4766 = vmatprep.subr.bf16.mxu1 %v3435_v19  ;;  %v3522_v47 = vld [vmem:[#allocation2 + $0x550] sm:$0xff]  ;;  %v3529_v19 = vld [vmem:[#allocation2 + $0x588] sm:$0xff] }
 0x692   :  { %4439 = vmatpush1.bf16.msra.mxu0 %v3432_v61  ;;  %4767 = vmatpush1.bf16.msra.mxu1 %v3434_v22  ;;  %v3531_v61 = vld [vmem:[#allocation2 + $0x598] sm:$0xff]  ;;  %v3528_v22 = vld [vmem:[#allocation2 + $0x580] sm:$0xff] }
 0x693   :  { %4440 = vmatprep.subr.bf16.mxu0 %v3441_v21  ;;  %4768 = vmatprep.subr.bf16.mxu1 %v3443_v48  ;;  %v3530_v21 = vld [vmem:[#allocation2 + $0x590] sm:$0xff]  ;;  %v3537_v48 = vld [vmem:[#allocation2 + $0x5c8] sm:$0xff] }
 0x696   :  { %4441 = vmatpush1.bf16.msra.mxu0 %v3440_v8  ;;  %4769 = vmatpush1.bf16.msra.mxu1 %v3442_v20  ;;  %v3539_v8 = vld [vmem:[#allocation2 + $0x5d8] sm:$0xff]  ;;  %v3536_v20 = vld [vmem:[#allocation2 + $0x5c0] sm:$0xff] }
 0x697   :  { %4442 = vmatprep.subr.bf16.mxu0 %v3449_v44  ;;  %4770 = vmatprep.subr.bf16.mxu1 %v3451_v39  ;;  %v3538_v44 = vld [vmem:[#allocation2 + $0x5d0] sm:$0xff]  ;;  %v3545_v39 = vld [vmem:[#allocation2 + $0x608] sm:$0xff] }
 0x69a   :  { %4443 = vmatpush1.bf16.msra.mxu0 %v3448_v31  ;;  %4771 = vmatpush1.bf16.msra.mxu1 %v3450_v45  ;;  %v3547_v31 = vld [vmem:[#allocation2 + $0x618] sm:$0xff]  ;;  %v3544_v45 = vld [vmem:[#allocation2 + $0x600] sm:$0xff] }
 0x69b   :  { %4444 = vmatprep.subr.bf16.mxu0 %v3457_v32  ;;  %4772 = vmatprep.subr.bf16.mxu1 %v3459_v26  ;;  %v3546_v32 = vld [vmem:[#allocation2 + $0x610] sm:$0xff]  ;;  %v3553_v26 = vld [vmem:[#allocation2 + $0x648] sm:$0xff] }
 0x69e   :  { %4445 = vmatpush1.bf16.msra.mxu0 %v3456_v5  ;;  %4773 = vmatpush1.bf16.msra.mxu1 %v3458_v51  ;;  %v3555_v5 = vld [vmem:[#allocation2 + $0x658] sm:$0xff]  ;;  %v3552_v51 = vld [vmem:[#allocation2 + $0x640] sm:$0xff] }
 0x69f   :  { %4446 = vmatprep.subr.bf16.mxu0 %v3465_v55  ;;  %4774 = vmatprep.subr.bf16.mxu1 %v3467_v58  ;;  %v3554_v55 = vld [vmem:[#allocation2 + $0x650] sm:$0xff]  ;;  %v3561_v58 = vld [vmem:[#allocation2 + $0x688] sm:$0xff] }
 0x6a2   :  { %4447 = vmatpush1.bf16.msra.mxu0 %v3464_v43  ;;  %4775 = vmatpush1.bf16.msra.mxu1 %v3466_v13  ;;  %v3563_v43 = vld [vmem:[#allocation2 + $0x698] sm:$0xff]  ;;  %v3560_v13 = vld [vmem:[#allocation2 + $0x680] sm:$0xff] }
 0x6a3   :  { %4448 = vmatprep.subr.bf16.mxu0 %v3473_v0  ;;  %4776 = vmatprep.subr.bf16.mxu1 %v3475_v33  ;;  %v3562_v0 = vld [vmem:[#allocation2 + $0x690] sm:$0xff]  ;;  %v3569_v33 = vld [vmem:[#allocation2 + $0x6c8] sm:$0xff] }
 0x6a6   :  { %4449 = vmatpush1.bf16.msra.mxu0 %v3472_v24  ;;  %4777 = vmatpush1.bf16.msra.mxu1 %v3474_v2  ;;  %v3571_v24 = vld [vmem:[#allocation2 + $0x6d8] sm:$0xff]  ;;  %v3568_v2 = vld [vmem:[#allocation2 + $0x6c0] sm:$0xff] }
 0x6a7   :  { %4459 = vmatprep.subr.bf16.mxu0 %v3481_v11  ;;  %4787 = vmatprep.subr.bf16.mxu1 %v3483_v53  ;;  %v3570_v11 = vld [vmem:[#allocation2 + $0x6d0] sm:$0xff]  ;;  %v3577_v53 = vld [vmem:[#allocation2 + $0x708] sm:$0xff] }
 0x6a9   :  { %4451 = vmatmul.mubr.bf16.vlgmr.msra.gmra.mrb[56].mxu0 %v10538_v6  ;;  %4779 = vmatmul.mubr.bf16.vlgmr.msra.gmra.mrb[56].mxu1 %v10538_v6 }
 0x6aa   :  { %4460 = vmatpush1.bf16.msra.mxu0 %v3480_v27  ;;  %4788 = vmatpush1.bf16.msra.mxu1 %v3482_v63  ;;  %v3579_v27 = vld [vmem:[#allocation2 + $0x718] sm:$0xff]  ;;  %v3576_v63 = vld [vmem:[#allocation2 + $0x700] sm:$0xff] }
 0x6ab   :  { %4461 = vmatprep.subr.bf16.mxu0 %v3489_v42  ;;  %4789 = vmatprep.subr.bf16.mxu1 %v3491_v28  ;;  %v3578_v42 = vld [vmem:[#allocation2 + $0x710] sm:$0xff]  ;;  %v3585_v28 = vld [vmem:[#allocation2 + $0x748] sm:$0xff] }
 0x6ac   :  { %4491 = vmatprep.mubr.bf16.mxu0 %v10543_v56  ;;  %4819 = vmatprep.mubr.bf16.mxu1 %v10543_v56 }
 0x6ae   :  { %4462 = vmatpush1.bf16.msra.mxu0 %v3488_v54  ;;  %4790 = vmatpush1.bf16.msra.mxu1 %v3490_v34  ;;  %v3587_v54 = vld [vmem:[#allocation2 + $0x758] sm:$0xff]  ;;  %v3584_v34 = vld [vmem:[#allocation2 + $0x740] sm:$0xff] }
 0x6af   :  { %4463 = vmatprep.subr.bf16.mxu0 %v3497_v40  ;;  %4791 = vmatprep.subr.bf16.mxu1 %v3499_v52  ;;  %v3586_v40 = vld [vmem:[#allocation2 + $0x750] sm:$0xff]  ;;  %v3593_v52 = vld [vmem:[#allocation2 + $0x788] sm:$0xff] }
 0x6b2   :  { %4464 = vmatpush1.bf16.msra.mxu0 %v3496_v50  ;;  %4792 = vmatpush1.bf16.msra.mxu1 %v3498_v14  ;;  %v3595_v50 = vld [vmem:[#allocation2 + $0x798] sm:$0xff]  ;;  %v3592_v14 = vld [vmem:[#allocation2 + $0x780] sm:$0xff] }
 0x6b3   :  { %4465 = vmatprep.subr.bf16.mxu0 %v3505_v35  ;;  %4793 = vmatprep.subr.bf16.mxu1 %v3507_v37  ;;  %v3594_v35 = vld [vmem:[#allocation2 + $0x790] sm:$0xff]  ;;  %v3601_v37 = vld [vmem:[#allocation2 + $0x7c8] sm:$0xff] }
 0x6b6   :  { %4466 = vmatpush1.bf16.msra.mxu0 %v3504_v16  ;;  %4794 = vmatpush1.bf16.msra.mxu1 %v3506_v25  ;;  %v3603_v16 = vld [vmem:[#allocation2 + $0x7d8] sm:$0xff]  ;;  %v3600_v25 = vld [vmem:[#allocation2 + $0x7c0] sm:$0xff] }
 0x6b7   :  { %4467 = vmatprep.subr.bf16.mxu0 %v3513_v7  ;;  %4795 = vmatprep.subr.bf16.mxu1 %v3515_v29  ;;  %v3602_v7 = vld [vmem:[#allocation2 + $0x7d0] sm:$0xff]  ;;  %v3609_v29 = vld [vmem:[#allocation2 + $0x808] sm:$0xff] }
 0x6ba   :  { %4468 = vmatpush1.bf16.msra.mxu0 %v3512_v36  ;;  %4796 = vmatpush1.bf16.msra.mxu1 %v3514_v59  ;;  %v3611_v36 = vld [vmem:[#allocation2 + $0x818] sm:$0xff]  ;;  %v10552_v59 = vpack.c.bf16 %v3307_v23, %v3307_v23  ;;  %v3618_v23 = vld [vmem:[#allocation2 + $0x850] sm:$0xff] }
 0x6bb   :  { %4469 = vmatprep.subr.bf16.mxu0 %v3521_v9  ;;  %4797 = vmatprep.subr.bf16.mxu1 %v3523_v38  ;;  %v3608_v9 = vld [vmem:[#allocation2 + $0x800] sm:$0xff]  ;;  %v3610_v38 = vld [vmem:[#allocation2 + $0x810] sm:$0xff] }
 0x6be   :  { %4470 = vmatpush1.bf16.msra.mxu0 %v3520_v12  ;;  %4798 = vmatpush1.bf16.msra.mxu1 %v3522_v47  ;;  %v3617_v12 = vld [vmem:[#allocation2 + $0x848] sm:$0xff]  ;;  %v3619_v47 = vld [vmem:[#allocation2 + $0x858] sm:$0xff] }
 0x6bf   :  { %4471 = vmatprep.subr.bf16.mxu0 %v3529_v19  ;;  %4799 = vmatprep.subr.bf16.mxu1 %v3531_v61  ;;  %v10557_v19 = vpack.c.bf16 %v3312_v62, %v3312_v62  ;;  %v3625_v61 = vld [vmem:[#allocation2 + $0x888] sm:$0xff]  ;;  %v3624_v62 = vld [vmem:[#allocation2 + $0x880] sm:$0xff] }
 0x6c2   :  { %4472 = vmatpush1.bf16.msra.mxu0 %v3528_v22  ;;  %4800 = vmatpush1.bf16.msra.mxu1 %v3530_v21  ;;  %v3627_v22 = vld [vmem:[#allocation2 + $0x898] sm:$0xff]  ;;  %v3626_v21 = vld [vmem:[#allocation2 + $0x890] sm:$0xff] }
 0x6c3   :  { %4473 = vmatprep.subr.bf16.mxu0 %v3537_v48  ;;  %4801 = vmatprep.subr.bf16.mxu1 %v3539_v8  ;;  %v3633_v48 = vld [vmem:[#allocation2 + $0x8c8] sm:$0xff]  ;;  %v3635_v8 = vld [vmem:[#allocation2 + $0x8d8] sm:$0xff] }
 0x6c6   :  { %4474 = vmatpush1.bf16.msra.mxu0 %v3536_v20  ;;  %4802 = vmatpush1.bf16.msra.mxu1 %v3538_v44  ;;  %v3632_v20 = vld [vmem:[#allocation2 + $0x8c0] sm:$0xff]  ;;  %v3634_v44 = vld [vmem:[#allocation2 + $0x8d0] sm:$0xff] }
 0x6c7   :  { %4475 = vmatprep.subr.bf16.mxu0 %v3545_v39  ;;  %4803 = vmatprep.subr.bf16.mxu1 %v3547_v31  ;;  %v3641_v39 = vld [vmem:[#allocation2 + $0x908] sm:$0xff]  ;;  %v3643_v31 = vld [vmem:[#allocation2 + $0x918] sm:$0xff] }
 0x6ca   :  { %4476 = vmatpush1.bf16.msra.mxu0 %v3544_v45  ;;  %4804 = vmatpush1.bf16.msra.mxu1 %v3546_v32  ;;  %v3640_v45 = vld [vmem:[#allocation2 + $0x900] sm:$0xff]  ;;  %v3642_v32 = vld [vmem:[#allocation2 + $0x910] sm:$0xff] }
 0x6cb   :  { %4477 = vmatprep.subr.bf16.mxu0 %v3553_v26  ;;  %4805 = vmatprep.subr.bf16.mxu1 %v3555_v5  ;;  %v3649_v26 = vld [vmem:[#allocation2 + $0x948] sm:$0xff]  ;;  %v3651_v5 = vld [vmem:[#allocation2 + $0x958] sm:$0xff] }
 0x6ce   :  { %4478 = vmatpush1.bf16.msra.mxu0 %v3552_v51  ;;  %4806 = vmatpush1.bf16.msra.mxu1 %v3554_v55  ;;  %v3648_v51 = vld [vmem:[#allocation2 + $0x940] sm:$0xff]  ;;  %v3650_v55 = vld [vmem:[#allocation2 + $0x950] sm:$0xff] }
 0x6cf   :  { %4479 = vmatprep.subr.bf16.mxu0 %v3561_v58  ;;  %4807 = vmatprep.subr.bf16.mxu1 %v3563_v43  ;;  %v3657_v58 = vld [vmem:[#allocation2 + $0x988] sm:$0xff]  ;;  %v3659_v43 = vld [vmem:[#allocation2 + $0x998] sm:$0xff] }
 0x6d2   :  { %4480 = vmatpush1.bf16.msra.mxu0 %v3560_v13  ;;  %4808 = vmatpush1.bf16.msra.mxu1 %v3562_v0  ;;  %v3656_v13 = vld [vmem:[#allocation2 + $0x980] sm:$0xff]  ;;  %v3658_v0 = vld [vmem:[#allocation2 + $0x990] sm:$0xff] }
 0x6d3   :  { %4481 = vmatprep.subr.bf16.mxu0 %v3569_v33  ;;  %4809 = vmatprep.subr.bf16.mxu1 %v3571_v24  ;;  %v3665_v33 = vld [vmem:[#allocation2 + $0x9c8] sm:$0xff]  ;;  %v3667_v24 = vld [vmem:[#allocation2 + $0x9d8] sm:$0xff] }
 0x6d6   :  { %4482 = vmatpush1.bf16.msra.mxu0 %v3568_v2  ;;  %4810 = vmatpush1.bf16.msra.mxu1 %v3570_v11  ;;  %v3664_v2 = vld [vmem:[#allocation2 + $0x9c0] sm:$0xff]  ;;  %v3666_v11 = vld [vmem:[#allocation2 + $0x9d0] sm:$0xff] }
 0x6d7   :  { %4483 = vmatprep.subr.bf16.mxu0 %v3577_v53  ;;  %4811 = vmatprep.subr.bf16.mxu1 %v3579_v27  ;;  %v3673_v53 = vld [vmem:[#allocation2 + $0xa08] sm:$0xff]  ;;  %v3675_v27 = vld [vmem:[#allocation2 + $0xa18] sm:$0xff] }
 0x6da   :  { %4484 = vmatpush1.bf16.msra.mxu0 %v3576_v63  ;;  %4812 = vmatpush1.bf16.msra.mxu1 %v3578_v42  ;;  %v3672_v63 = vld [vmem:[#allocation2 + $0xa00] sm:$0xff]  ;;  %v3674_v42 = vld [vmem:[#allocation2 + $0xa10] sm:$0xff] }
 0x6db   :  { %4485 = vmatprep.subr.bf16.mxu0 %v3585_v28  ;;  %4813 = vmatprep.subr.bf16.mxu1 %v3587_v54  ;;  %v3681_v28 = vld [vmem:[#allocation2 + $0xa48] sm:$0xff]  ;;  %v3683_v54 = vld [vmem:[#allocation2 + $0xa58] sm:$0xff] }
 0x6de   :  { %4486 = vmatpush1.bf16.msra.mxu0 %v3584_v34  ;;  %4814 = vmatpush1.bf16.msra.mxu1 %v3586_v40  ;;  %v3680_v34 = vld [vmem:[#allocation2 + $0xa40] sm:$0xff]  ;;  %v3682_v40 = vld [vmem:[#allocation2 + $0xa50] sm:$0xff] }
 0x6df   :  { %4487 = vmatprep.subr.bf16.mxu0 %v3593_v52  ;;  %4815 = vmatprep.subr.bf16.mxu1 %v3595_v50  ;;  %v3689_v52 = vld [vmem:[#allocation2 + $0xa88] sm:$0xff]  ;;  %v3691_v50 = vld [vmem:[#allocation2 + $0xa98] sm:$0xff] }
 0x6e2   :  { %4488 = vmatpush1.bf16.msra.mxu0 %v3592_v14  ;;  %4816 = vmatpush1.bf16.msra.mxu1 %v3594_v35  ;;  %v3688_v14 = vld [vmem:[#allocation2 + $0xa80] sm:$0xff]  ;;  %v3690_v35 = vld [vmem:[#allocation2 + $0xa90] sm:$0xff] }
 0x6e3   :  { %4489 = vmatprep.subr.bf16.mxu0 %v3601_v37  ;;  %4817 = vmatprep.subr.bf16.mxu1 %v3603_v16  ;;  %v3697_v37 = vld [vmem:[#allocation2 + $0xac8] sm:$0xff]  ;;  %v3699_v16 = vld [vmem:[#allocation2 + $0xad8] sm:$0xff] }
 0x6e6   :  { %4490 = vmatpush1.bf16.msra.mxu0 %v3600_v25  ;;  %4818 = vmatpush1.bf16.msra.mxu1 %v3602_v7  ;;  %v3696_v25 = vld [vmem:[#allocation2 + $0xac0] sm:$0xff]  ;;  %v3698_v7 = vld [vmem:[#allocation2 + $0xad0] sm:$0xff] }
 0x6e7   :  { %4500 = vmatprep.subr.bf16.mxu0 %v3609_v29  ;;  %4828 = vmatprep.subr.bf16.mxu1 %v3611_v36  ;;  %v3705_v29 = vld [vmem:[#allocation2 + $0xb08] sm:$0xff]  ;;  %v3707_v36 = vld [vmem:[#allocation2 + $0xb18] sm:$0xff] }
 0x6e9   :  { %4492 = vmatmul.mubr.bf16.vlgmr.msra.gmra.mrb[56].mxu0 %v10552_v59  ;;  %4820 = vmatmul.mubr.bf16.vlgmr.msra.gmra.mrb[56].mxu1 %v10552_v59 }
 0x6ea   :  { %4501 = vmatpush1.bf16.msra.mxu0 %v3608_v9  ;;  %4829 = vmatpush1.bf16.msra.mxu1 %v3610_v38  ;;  %v3704_v9 = vld [vmem:[#allocation2 + $0xb00] sm:$0xff]  ;;  %v3706_v38 = vld [vmem:[#allocation2 + $0xb10] sm:$0xff] }
 0x6eb   :  { %4502 = vmatprep.subr.bf16.mxu0 %v3617_v12  ;;  %4830 = vmatprep.subr.bf16.mxu1 %v3619_v47  ;;  %v3713_v12 = vld [vmem:[#allocation2 + $0xb48] sm:$0xff]  ;;  %v3715_v47 = vld [vmem:[#allocation2 + $0xb58] sm:$0xff] }
 0x6ec   :  { %4532 = vmatprep.mubr.bf16.mxu0 %v10557_v19  ;;  %4860 = vmatprep.mubr.bf16.mxu1 %v10557_v19 }
 0x6ee   :  { %4503 = vmatpush1.bf16.msra.mxu0 %v3616_v17  ;;  %4831 = vmatpush1.bf16.msra.mxu1 %v3618_v23  ;;  %v3712_v17 = vld [vmem:[#allocation2 + $0xb40] sm:$0xff]  ;;  %v3714_v23 = vld [vmem:[#allocation2 + $0xb50] sm:$0xff] }
 0x6ef   :  { %4504 = vmatprep.subr.bf16.mxu0 %v3625_v61  ;;  %4832 = vmatprep.subr.bf16.mxu1 %v3627_v22  ;;  %v3721_v61 = vld [vmem:[#allocation2 + $0xb88] sm:$0xff]  ;;  %v3723_v22 = vld [vmem:[#allocation2 + $0xb98] sm:$0xff] }
 0x6f2   :  { %4505 = vmatpush1.bf16.msra.mxu0 %v3624_v62  ;;  %4833 = vmatpush1.bf16.msra.mxu1 %v3626_v21  ;;  %v3720_v62 = vld [vmem:[#allocation2 + $0xb80] sm:$0xff]  ;;  %v3722_v21 = vld [vmem:[#allocation2 + $0xb90] sm:$0xff] }
 0x6f3   :  { %4506 = vmatprep.subr.bf16.mxu0 %v3633_v48  ;;  %4834 = vmatprep.subr.bf16.mxu1 %v3635_v8  ;;  %v3729_v48 = vld [vmem:[#allocation2 + $0xbc8] sm:$0xff]  ;;  %v3731_v8 = vld [vmem:[#allocation2 + $0xbd8] sm:$0xff] }
 0x6f6   :  { %4507 = vmatpush1.bf16.msra.mxu0 %v3632_v20  ;;  %4835 = vmatpush1.bf16.msra.mxu1 %v3634_v44  ;;  %v3728_v20 = vld [vmem:[#allocation2 + $0xbc0] sm:$0xff]  ;;  %v3730_v44 = vld [vmem:[#allocation2 + $0xbd0] sm:$0xff] }
 0x6f7   :  { %4508 = vmatprep.subr.bf16.mxu0 %v3641_v39  ;;  %4836 = vmatprep.subr.bf16.mxu1 %v3643_v31  ;;  %v3737_v39 = vld [vmem:[#allocation2 + $0xc08] sm:$0xff]  ;;  %v3739_v31 = vld [vmem:[#allocation2 + $0xc18] sm:$0xff] }
 0x6fa   :  { %4509 = vmatpush1.bf16.msra.mxu0 %v3640_v45  ;;  %4837 = vmatpush1.bf16.msra.mxu1 %v3642_v32  ;;  %v10565_v45 = vpack.c.bf16 %v10514_v15, %v10514_v15  ;;  %v3736_v32 = vld [vmem:[#allocation2 + $0xc00] sm:$0xff] }
 0x6fb   :  { %4510 = vmatprep.subr.bf16.mxu0 %v3649_v26  ;;  %4838 = vmatprep.subr.bf16.mxu1 %v3651_v5  ;;  %v3738_v26 = vld [vmem:[#allocation2 + $0xc10] sm:$0xff]  ;;  %v3745_v5 = vld [vmem:[#allocation2 + $0xc48] sm:$0xff]  ;;  %v3872_v15 = vld [vmem:[#allocation2 + $0x1040] sm:$0xff] }
 0x6fe   :  { %4511 = vmatpush1.bf16.msra.mxu0 %v3648_v51  ;;  %4839 = vmatpush1.bf16.msra.mxu1 %v3650_v55  ;;  %v3747_v51 = vld [vmem:[#allocation2 + $0xc58] sm:$0xff]  ;;  %v10570_v55 = vpack.c.bf16 %v3316_v60, %v3316_v60  ;;  %v3752_v60 = vld [vmem:[#allocation2 + $0xc80] sm:$0xff] }
 0x6ff   :  { %4512 = vmatprep.subr.bf16.mxu0 %v3657_v58  ;;  %4840 = vmatprep.subr.bf16.mxu1 %v3659_v43  ;;  %v3744_v58 = vld [vmem:[#allocation2 + $0xc40] sm:$0xff]  ;;  %v3746_v43 = vld [vmem:[#allocation2 + $0xc50] sm:$0xff] }
 0x702   :  { %4513 = vmatpush1.bf16.msra.mxu0 %v3656_v13  ;;  %4841 = vmatpush1.bf16.msra.mxu1 %v3658_v0  ;;  %v3753_v13 = vld [vmem:[#allocation2 + $0xc88] sm:$0xff]  ;;  %v3755_v0 = vld [vmem:[#allocation2 + $0xc98] sm:$0xff] }
 0x703   :  { %4514 = vmatprep.subr.bf16.mxu0 %v3665_v33  ;;  %4842 = vmatprep.subr.bf16.mxu1 %v3667_v24  ;;  %v3754_v33 = vld [vmem:[#allocation2 + $0xc90] sm:$0xff]  ;;  %v3761_v24 = vld [vmem:[#allocation2 + $0xcc8] sm:$0xff] }
 0x706   :  { %4515 = vmatpush1.bf16.msra.mxu0 %v3664_v2  ;;  %4843 = vmatpush1.bf16.msra.mxu1 %v3666_v11  ;;  %v3763_v2 = vld [vmem:[#allocation2 + $0xcd8] sm:$0xff]  ;;  %v3760_v11 = vld [vmem:[#allocation2 + $0xcc0] sm:$0xff] }
 0x707   :  { %4516 = vmatprep.subr.bf16.mxu0 %v3673_v53  ;;  %4844 = vmatprep.subr.bf16.mxu1 %v3675_v27  ;;  %v3762_v53 = vld [vmem:[#allocation2 + $0xcd0] sm:$0xff]  ;;  %v3769_v27 = vld [vmem:[#allocation2 + $0xd08] sm:$0xff] }
 0x70a   :  { %4517 = vmatpush1.bf16.msra.mxu0 %v3672_v63  ;;  %4845 = vmatpush1.bf16.msra.mxu1 %v3674_v42  ;;  %v3771_v63 = vld [vmem:[#allocation2 + $0xd18] sm:$0xff]  ;;  %v3768_v42 = vld [vmem:[#allocation2 + $0xd00] sm:$0xff] }
 0x70b   :  { %4518 = vmatprep.subr.bf16.mxu0 %v3681_v28  ;;  %4846 = vmatprep.subr.bf16.mxu1 %v3683_v54  ;;  %v3770_v28 = vld [vmem:[#allocation2 + $0xd10] sm:$0xff]  ;;  %v3777_v54 = vld [vmem:[#allocation2 + $0xd48] sm:$0xff] }
 0x70e   :  { %4519 = vmatpush1.bf16.msra.mxu0 %v3680_v34  ;;  %4847 = vmatpush1.bf16.msra.mxu1 %v3682_v40  ;;  %v3779_v34 = vld [vmem:[#allocation2 + $0xd58] sm:$0xff]  ;;  %v3776_v40 = vld [vmem:[#allocation2 + $0xd40] sm:$0xff] }
 0x70f   :  { %4520 = vmatprep.subr.bf16.mxu0 %v3689_v52  ;;  %4848 = vmatprep.subr.bf16.mxu1 %v3691_v50  ;;  %v3778_v52 = vld [vmem:[#allocation2 + $0xd50] sm:$0xff]  ;;  %v3785_v50 = vld [vmem:[#allocation2 + $0xd88] sm:$0xff] }
 0x712   :  { %4521 = vmatpush1.bf16.msra.mxu0 %v3688_v14  ;;  %4849 = vmatpush1.bf16.msra.mxu1 %v3690_v35  ;;  %v3787_v14 = vld [vmem:[#allocation2 + $0xd98] sm:$0xff]  ;;  %v3784_v35 = vld [vmem:[#allocation2 + $0xd80] sm:$0xff] }
 0x713   :  { %4522 = vmatprep.subr.bf16.mxu0 %v3697_v37  ;;  %4850 = vmatprep.subr.bf16.mxu1 %v3699_v16  ;;  %v3786_v37 = vld [vmem:[#allocation2 + $0xd90] sm:$0xff]  ;;  %v3793_v16 = vld [vmem:[#allocation2 + $0xdc8] sm:$0xff] }
 0x716   :  { %4523 = vmatpush1.bf16.msra.mxu0 %v3696_v25  ;;  %4851 = vmatpush1.bf16.msra.mxu1 %v3698_v7  ;;  %v3795_v25 = vld [vmem:[#allocation2 + $0xdd8] sm:$0xff]  ;;  %v3792_v7 = vld [vmem:[#allocation2 + $0xdc0] sm:$0xff] }
 0x717   :  { %4524 = vmatprep.subr.bf16.mxu0 %v3705_v29  ;;  %4852 = vmatprep.subr.bf16.mxu1 %v3707_v36  ;;  %v3794_v29 = vld [vmem:[#allocation2 + $0xdd0] sm:$0xff]  ;;  %v3801_v36 = vld [vmem:[#allocation2 + $0xe08] sm:$0xff] }
 0x71a   :  { %4525 = vmatpush1.bf16.msra.mxu0 %v3704_v9  ;;  %4853 = vmatpush1.bf16.msra.mxu1 %v3706_v38  ;;  %v3803_v9 = vld [vmem:[#allocation2 + $0xe18] sm:$0xff]  ;;  %v3800_v38 = vld [vmem:[#allocation2 + $0xe00] sm:$0xff] }
 0x71b   :  { %4526 = vmatprep.subr.bf16.mxu0 %v3713_v12  ;;  %4854 = vmatprep.subr.bf16.mxu1 %v3715_v47  ;;  %v3802_v12 = vld [vmem:[#allocation2 + $0xe10] sm:$0xff]  ;;  %v3809_v47 = vld [vmem:[#allocation2 + $0xe48] sm:$0xff] }
 0x71e   :  { %4527 = vmatpush1.bf16.msra.mxu0 %v3712_v17  ;;  %4855 = vmatpush1.bf16.msra.mxu1 %v3714_v23  ;;  %v3811_v17 = vld [vmem:[#allocation2 + $0xe58] sm:$0xff]  ;;  %v3808_v23 = vld [vmem:[#allocation2 + $0xe40] sm:$0xff] }
 0x71f   :  { %4528 = vmatprep.subr.bf16.mxu0 %v3721_v61  ;;  %4856 = vmatprep.subr.bf16.mxu1 %v3723_v22  ;;  %v3810_v61 = vld [vmem:[#allocation2 + $0xe50] sm:$0xff]  ;;  %v3817_v22 = vld [vmem:[#allocation2 + $0xe88] sm:$0xff] }
 0x722   :  { %4529 = vmatpush1.bf16.msra.mxu0 %v3720_v62  ;;  %4857 = vmatpush1.bf16.msra.mxu1 %v3722_v21  ;;  %v3819_v62 = vld [vmem:[#allocation2 + $0xe98] sm:$0xff]  ;;  %v3816_v21 = vld [vmem:[#allocation2 + $0xe80] sm:$0xff] }
 0x723   :  { %4530 = vmatprep.subr.bf16.mxu0 %v3729_v48  ;;  %4858 = vmatprep.subr.bf16.mxu1 %v3731_v8  ;;  %v3818_v48 = vld [vmem:[#allocation2 + $0xe90] sm:$0xff]  ;;  %v3825_v8 = vld [vmem:[#allocation2 + $0xec8] sm:$0xff] }
 0x726   :  { %4531 = vmatpush1.bf16.msra.mxu0 %v3728_v20  ;;  %4859 = vmatpush1.bf16.msra.mxu1 %v3730_v44  ;;  %v3827_v20 = vld [vmem:[#allocation2 + $0xed8] sm:$0xff]  ;;  %v3824_v44 = vld [vmem:[#allocation2 + $0xec0] sm:$0xff] }
 0x727   :  { %4541 = vmatprep.subr.bf16.mxu0 %v3737_v39  ;;  %4869 = vmatprep.subr.bf16.mxu1 %v3739_v31  ;;  %v3826_v39 = vld [vmem:[#allocation2 + $0xed0] sm:$0xff]  ;;  %v3833_v31 = vld [vmem:[#allocation2 + $0xf08] sm:$0xff] }
 0x729   :  { %4533 = vmatmul.mubr.bf16.vlgmr.msra.gmra.mrb[56].mxu0 %v10565_v45  ;;  %4861 = vmatmul.mubr.bf16.vlgmr.msra.gmra.mrb[56].mxu1 %v10565_v45 }
 0x72a   :  { %4542 = vmatpush1.bf16.msra.mxu0 %v3736_v32  ;;  %4870 = vmatpush1.bf16.msra.mxu1 %v3738_v26  ;;  %v3835_v32 = vld [vmem:[#allocation2 + $0xf18] sm:$0xff]  ;;  %v3832_v26 = vld [vmem:[#allocation2 + $0xf00] sm:$0xff] }
 0x72b   :  { %4543 = vmatprep.subr.bf16.mxu0 %v3745_v5  ;;  %4871 = vmatprep.subr.bf16.mxu1 %v3747_v51  ;;  %v3834_v5 = vld [vmem:[#allocation2 + $0xf10] sm:$0xff]  ;;  %v3841_v51 = vld [vmem:[#allocation2 + $0xf48] sm:$0xff] }
 0x72c   :  { %4573 = vmatprep.mubr.bf16.mxu0 %v10570_v55  ;;  %4901 = vmatprep.mubr.bf16.mxu1 %v10570_v55 }
 0x72e   :  { %4544 = vmatpush1.bf16.msra.mxu0 %v3744_v58  ;;  %4872 = vmatpush1.bf16.msra.mxu1 %v3746_v43  ;;  %v3843_v58 = vld [vmem:[#allocation2 + $0xf58] sm:$0xff]  ;;  %v3840_v43 = vld [vmem:[#allocation2 + $0xf40] sm:$0xff] }
 0x72f   :  { %4545 = vmatprep.subr.bf16.mxu0 %v3753_v13  ;;  %4873 = vmatprep.subr.bf16.mxu1 %v3755_v0  ;;  %v3842_v13 = vld [vmem:[#allocation2 + $0xf50] sm:$0xff]  ;;  %v3849_v0 = vld [vmem:[#allocation2 + $0xf88] sm:$0xff] }
 0x732   :  { %4546 = vmatpush1.bf16.msra.mxu0 %v3752_v60  ;;  %4874 = vmatpush1.bf16.msra.mxu1 %v3754_v33  ;;  %v3851_v60 = vld [vmem:[#allocation2 + $0xf98] sm:$0xff]  ;;  %v3848_v33 = vld [vmem:[#allocation2 + $0xf80] sm:$0xff] }
 0x733   :  { %4547 = vmatprep.subr.bf16.mxu0 %v3761_v24  ;;  %4875 = vmatprep.subr.bf16.mxu1 %v3763_v2  ;;  %v3850_v24 = vld [vmem:[#allocation2 + $0xf90] sm:$0xff]  ;;  %v3857_v2 = vld [vmem:[#allocation2 + $0xfc8] sm:$0xff] }
 0x736   :  { %4548 = vmatpush1.bf16.msra.mxu0 %v3760_v11  ;;  %4876 = vmatpush1.bf16.msra.mxu1 %v3762_v53  ;;  %v3859_v11 = vld [vmem:[#allocation2 + $0xfd8] sm:$0xff]  ;;  %v3856_v53 = vld [vmem:[#allocation2 + $0xfc0] sm:$0xff] }
 0x737   :  { %4549 = vmatprep.subr.bf16.mxu0 %v3769_v27  ;;  %4877 = vmatprep.subr.bf16.mxu1 %v3771_v63  ;;  %v3858_v27 = vld [vmem:[#allocation2 + $0xfd0] sm:$0xff]  ;;  %v3865_v63 = vld [vmem:[#allocation2 + $0x1008] sm:$0xff] }
 0x73a   :  { %4550 = vmatpush1.bf16.msra.mxu0 %v3768_v42  ;;  %4878 = vmatpush1.bf16.msra.mxu1 %v3770_v28  ;;  %v3867_v42 = vld [vmem:[#allocation2 + $0x1018] sm:$0xff]  ;;  %v10579_v28 = vpack.c.bf16 %v3314_v46, %v3314_v46  ;;  %v3874_v46 = vld [vmem:[#allocation2 + $0x1050] sm:$0xff] }
 0x73b   :  { %4551 = vmatprep.subr.bf16.mxu0 %v3777_v54  ;;  %4879 = vmatprep.subr.bf16.mxu1 %v3779_v34  ;;  %v3864_v54 = vld [vmem:[#allocation2 + $0x1000] sm:$0xff]  ;;  %v3866_v34 = vld [vmem:[#allocation2 + $0x1010] sm:$0xff] }
 0x73e   :  { %4552 = vmatpush1.bf16.msra.mxu0 %v3776_v40  ;;  %4880 = vmatpush1.bf16.msra.mxu1 %v3778_v52  ;;  %v3873_v40 = vld [vmem:[#allocation2 + $0x1048] sm:$0xff]  ;;  %v3875_v52 = vld [vmem:[#allocation2 + $0x1058] sm:$0xff] }
 0x73f   :  { %4553 = vmatprep.subr.bf16.mxu0 %v3785_v50  ;;  %4881 = vmatprep.subr.bf16.mxu1 %v3787_v14  ;;  %v10584_v50 = vpack.c.bf16 %v3319_v57, %v3319_v57  ;;  %v3881_v14 = vld [vmem:[#allocation2 + $0x1088] sm:$0xff]  ;;  %v3880_v57 = vld [vmem:[#allocation2 + $0x1080] sm:$0xff] }
 0x742   :  { %4554 = vmatpush1.bf16.msra.mxu0 %v3784_v35  ;;  %4882 = vmatpush1.bf16.msra.mxu1 %v3786_v37  ;;  %v3883_v35 = vld [vmem:[#allocation2 + $0x1098] sm:$0xff]  ;;  %v3882_v37 = vld [vmem:[#allocation2 + $0x1090] sm:$0xff] }
 0x743   :  { %4555 = vmatprep.subr.bf16.mxu0 %v3793_v16  ;;  %4883 = vmatprep.subr.bf16.mxu1 %v3795_v25  ;;  %v3889_v16 = vld [vmem:[#allocation2 + $0x10c8] sm:$0xff]  ;;  %v3891_v25 = vld [vmem:[#allocation2 + $0x10d8] sm:$0xff] }
 0x746   :  { %4556 = vmatpush1.bf16.msra.mxu0 %v3792_v7  ;;  %4884 = vmatpush1.bf16.msra.mxu1 %v3794_v29  ;;  %v3888_v7 = vld [vmem:[#allocation2 + $0x10c0] sm:$0xff]  ;;  %v3890_v29 = vld [vmem:[#allocation2 + $0x10d0] sm:$0xff] }
 0x747   :  { %4557 = vmatprep.subr.bf16.mxu0 %v3801_v36  ;;  %4885 = vmatprep.subr.bf16.mxu1 %v3803_v9  ;;  %v3897_v36 = vld [vmem:[#allocation2 + $0x1108] sm:$0xff]  ;;  %v3899_v9 = vld [vmem:[#allocation2 + $0x1118] sm:$0xff] }
 0x74a   :  { %4558 = vmatpush1.bf16.msra.mxu0 %v3800_v38  ;;  %4886 = vmatpush1.bf16.msra.mxu1 %v3802_v12  ;;  %v3896_v38 = vld [vmem:[#allocation2 + $0x1100] sm:$0xff]  ;;  %v3898_v12 = vld [vmem:[#allocation2 + $0x1110] sm:$0xff] }
 0x74b   :  { %4559 = vmatprep.subr.bf16.mxu0 %v3809_v47  ;;  %4887 = vmatprep.subr.bf16.mxu1 %v3811_v17  ;;  %v3905_v47 = vld [vmem:[#allocation2 + $0x1148] sm:$0xff]  ;;  %v3907_v17 = vld [vmem:[#allocation2 + $0x1158] sm:$0xff] }
 0x74e   :  { %4560 = vmatpush1.bf16.msra.mxu0 %v3808_v23  ;;  %4888 = vmatpush1.bf16.msra.mxu1 %v3810_v61  ;;  %v3904_v23 = vld [vmem:[#allocation2 + $0x1140] sm:$0xff]  ;;  %v3906_v61 = vld [vmem:[#allocation2 + $0x1150] sm:$0xff] }
 0x74f   :  { %4561 = vmatprep.subr.bf16.mxu0 %v3817_v22  ;;  %4889 = vmatprep.subr.bf16.mxu1 %v3819_v62  ;;  %v3913_v22 = vld [vmem:[#allocation2 + $0x1188] sm:$0xff]  ;;  %v3915_v62 = vld [vmem:[#allocation2 + $0x1198] sm:$0xff] }
 0x752   :  { %4562 = vmatpush1.bf16.msra.mxu0 %v3816_v21  ;;  %4890 = vmatpush1.bf16.msra.mxu1 %v3818_v48  ;;  %v3912_v21 = vld [vmem:[#allocation2 + $0x1180] sm:$0xff]  ;;  %v3914_v48 = vld [vmem:[#allocation2 + $0x1190] sm:$0xff] }
 0x753   :  { %4563 = vmatprep.subr.bf16.mxu0 %v3825_v8  ;;  %4891 = vmatprep.subr.bf16.mxu1 %v3827_v20  ;;  %v3921_v8 = vld [vmem:[#allocation2 + $0x11c8] sm:$0xff]  ;;  %v3923_v20 = vld [vmem:[#allocation2 + $0x11d8] sm:$0xff] }
 0x756   :  { %4564 = vmatpush1.bf16.msra.mxu0 %v3824_v44  ;;  %4892 = vmatpush1.bf16.msra.mxu1 %v3826_v39  ;;  %v3920_v44 = vld [vmem:[#allocation2 + $0x11c0] sm:$0xff]  ;;  %v3922_v39 = vld [vmem:[#allocation2 + $0x11d0] sm:$0xff] }
 0x757   :  { %4565 = vmatprep.subr.bf16.mxu0 %v3833_v31  ;;  %4893 = vmatprep.subr.bf16.mxu1 %v3835_v32  ;;  %v3929_v31 = vld [vmem:[#allocation2 + $0x1208] sm:$0xff]  ;;  %v3931_v32 = vld [vmem:[#allocation2 + $0x1218] sm:$0xff] }
 0x75a   :  { %4566 = vmatpush1.bf16.msra.mxu0 %v3832_v26  ;;  %4894 = vmatpush1.bf16.msra.mxu1 %v3834_v5  ;;  %v3928_v26 = vld [vmem:[#allocation2 + $0x1200] sm:$0xff]  ;;  %v3930_v5 = vld [vmem:[#allocation2 + $0x1210] sm:$0xff] }
 0x75b   :  { %4567 = vmatprep.subr.bf16.mxu0 %v3841_v51  ;;  %4895 = vmatprep.subr.bf16.mxu1 %v3843_v58  ;;  %v3937_v51 = vld [vmem:[#allocation2 + $0x1248] sm:$0xff]  ;;  %v3939_v58 = vld [vmem:[#allocation2 + $0x1258] sm:$0xff] }
 0x75e   :  { %4568 = vmatpush1.bf16.msra.mxu0 %v3840_v43  ;;  %4896 = vmatpush1.bf16.msra.mxu1 %v3842_v13  ;;  %v3936_v43 = vld [vmem:[#allocation2 + $0x1240] sm:$0xff]  ;;  %v3938_v13 = vld [vmem:[#allocation2 + $0x1250] sm:$0xff] }
 0x75f   :  { %4569 = vmatprep.subr.bf16.mxu0 %v3849_v0  ;;  %4897 = vmatprep.subr.bf16.mxu1 %v3851_v60  ;;  %v3945_v0 = vld [vmem:[#allocation2 + $0x1288] sm:$0xff]  ;;  %v3947_v60 = vld [vmem:[#allocation2 + $0x1298] sm:$0xff] }
 0x762   :  { %4570 = vmatpush1.bf16.msra.mxu0 %v3848_v33  ;;  %4898 = vmatpush1.bf16.msra.mxu1 %v3850_v24  ;;  %v3944_v33 = vld [vmem:[#allocation2 + $0x1280] sm:$0xff]  ;;  %v3946_v24 = vld [vmem:[#allocation2 + $0x1290] sm:$0xff] }
 0x763   :  { %4571 = vmatprep.subr.bf16.mxu0 %v3857_v2  ;;  %4899 = vmatprep.subr.bf16.mxu1 %v3859_v11  ;;  %v3953_v2 = vld [vmem:[#allocation2 + $0x12c8] sm:$0xff]  ;;  %v3955_v11 = vld [vmem:[#allocation2 + $0x12d8] sm:$0xff] }
 0x766   :  { %4572 = vmatpush1.bf16.msra.mxu0 %v3856_v53  ;;  %4900 = vmatpush1.bf16.msra.mxu1 %v3858_v27  ;;  %v3952_v53 = vld [vmem:[#allocation2 + $0x12c0] sm:$0xff]  ;;  %v3954_v27 = vld [vmem:[#allocation2 + $0x12d0] sm:$0xff] }
 0x767   :  { %4582 = vmatprep.subr.bf16.mxu0 %v3865_v63  ;;  %4910 = vmatprep.subr.bf16.mxu1 %v3867_v42  ;;  %v3961_v63 = vld [vmem:[#allocation2 + $0x1308] sm:$0xff]  ;;  %v3963_v42 = vld [vmem:[#allocation2 + $0x1318] sm:$0xff] }
 0x769   :  { %4574 = vmatmul.mubr.bf16.vlgmr.msra.gmra.mrb[56].mxu0 %v10579_v28  ;;  %4902 = vmatmul.mubr.bf16.vlgmr.msra.gmra.mrb[56].mxu1 %v10579_v28 }
 0x76a   :  { %4583 = vmatpush1.bf16.msra.mxu0 %v3864_v54  ;;  %4911 = vmatpush1.bf16.msra.mxu1 %v3866_v34  ;;  %v3960_v54 = vld [vmem:[#allocation2 + $0x1300] sm:$0xff]  ;;  %v3962_v34 = vld [vmem:[#allocation2 + $0x1310] sm:$0xff] }
 0x76b   :  { %4584 = vmatprep.subr.bf16.mxu0 %v3873_v40  ;;  %4912 = vmatprep.subr.bf16.mxu1 %v3875_v52  ;;  %v3969_v40 = vld [vmem:[#allocation2 + $0x1348] sm:$0xff]  ;;  %v3971_v52 = vld [vmem:[#allocation2 + $0x1358] sm:$0xff] }
 0x76c   :  { %4614 = vmatprep.mubr.bf16.mxu0 %v10584_v50  ;;  %4942 = vmatprep.mubr.bf16.mxu1 %v10584_v50 }
 0x76e   :  { %4585 = vmatpush1.bf16.msra.mxu0 %v3872_v15  ;;  %4913 = vmatpush1.bf16.msra.mxu1 %v3874_v46  ;;  %v3968_v15 = vld [vmem:[#allocation2 + $0x1340] sm:$0xff]  ;;  %v3970_v46 = vld [vmem:[#allocation2 + $0x1350] sm:$0xff] }
 0x76f   :  { %4586 = vmatprep.subr.bf16.mxu0 %v3881_v14  ;;  %4914 = vmatprep.subr.bf16.mxu1 %v3883_v35  ;;  %v3977_v14 = vld [vmem:[#allocation2 + $0x1388] sm:$0xff]  ;;  %v3979_v35 = vld [vmem:[#allocation2 + $0x1398] sm:$0xff] }
 0x772   :  { %4587 = vmatpush1.bf16.msra.mxu0 %v3880_v57  ;;  %4915 = vmatpush1.bf16.msra.mxu1 %v3882_v37  ;;  %v3976_v57 = vld [vmem:[#allocation2 + $0x1380] sm:$0xff]  ;;  %v3978_v37 = vld [vmem:[#allocation2 + $0x1390] sm:$0xff] }
 0x773   :  { %4588 = vmatprep.subr.bf16.mxu0 %v3889_v16  ;;  %4916 = vmatprep.subr.bf16.mxu1 %v3891_v25  ;;  %v3985_v16 = vld [vmem:[#allocation2 + $0x13c8] sm:$0xff]  ;;  %v3987_v25 = vld [vmem:[#allocation2 + $0x13d8] sm:$0xff] }
 0x776   :  { %4589 = vmatpush1.bf16.msra.mxu0 %v3888_v7  ;;  %4917 = vmatpush1.bf16.msra.mxu1 %v3890_v29  ;;  %v3984_v7 = vld [vmem:[#allocation2 + $0x13c0] sm:$0xff]  ;;  %v3986_v29 = vld [vmem:[#allocation2 + $0x13d0] sm:$0xff] }
 0x777   :  { %4590 = vmatprep.subr.bf16.mxu0 %v3897_v36  ;;  %4918 = vmatprep.subr.bf16.mxu1 %v3899_v9  ;;  %v3993_v36 = vld [vmem:[#allocation2 + $0x1408] sm:$0xff]  ;;  %v3995_v9 = vld [vmem:[#allocation2 + $0x1418] sm:$0xff] }
 0x77a   :  { %4591 = vmatpush1.bf16.msra.mxu0 %v3896_v38  ;;  %4919 = vmatpush1.bf16.msra.mxu1 %v3898_v12  ;;  %v10592_v38 = vpack.c.bf16 %v10516_v4, %v10516_v4  ;;  %v3992_v12 = vld [vmem:[#allocation2 + $0x1400] sm:$0xff] }
 0x77b   :  { %4592 = vmatprep.subr.bf16.mxu0 %v3905_v47  ;;  %4920 = vmatprep.subr.bf16.mxu1 %v3907_v17  ;;  %v3994_v47 = vld [vmem:[#allocation2 + $0x1410] sm:$0xff]  ;;  %v4001_v17 = vld [vmem:[#allocation2 + $0x1448] sm:$0xff]  ;;  %v4128_v4 = vld [vmem:[#allocation2 + $0x1840] sm:$0xff] }
 0x77e   :  { %4593 = vmatpush1.bf16.msra.mxu0 %v3904_v23  ;;  %4921 = vmatpush1.bf16.msra.mxu1 %v3906_v61  ;;  %v4003_v23 = vld [vmem:[#allocation2 + $0x1458] sm:$0xff]  ;;  %v10597_v61 = vpack.c.bf16 %v3323_v18, %v3323_v18  ;;  %v4008_v18 = vld [vmem:[#allocation2 + $0x1480] sm:$0xff] }
 0x77f   :  { %4594 = vmatprep.subr.bf16.mxu0 %v3913_v22  ;;  %4922 = vmatprep.subr.bf16.mxu1 %v3915_v62  ;;  %v4000_v22 = vld [vmem:[#allocation2 + $0x1440] sm:$0xff]  ;;  %v4002_v62 = vld [vmem:[#allocation2 + $0x1450] sm:$0xff] }
 0x782   :  { %4595 = vmatpush1.bf16.msra.mxu0 %v3912_v21  ;;  %4923 = vmatpush1.bf16.msra.mxu1 %v3914_v48  ;;  %v4009_v21 = vld [vmem:[#allocation2 + $0x1488] sm:$0xff]  ;;  %v4011_v48 = vld [vmem:[#allocation2 + $0x1498] sm:$0xff] }
 0x783   :  { %4596 = vmatprep.subr.bf16.mxu0 %v3921_v8  ;;  %4924 = vmatprep.subr.bf16.mxu1 %v3923_v20  ;;  %v4010_v8 = vld [vmem:[#allocation2 + $0x1490] sm:$0xff]  ;;  %v4017_v20 = vld [vmem:[#allocation2 + $0x14c8] sm:$0xff] }
 0x786   :  { %4597 = vmatpush1.bf16.msra.mxu0 %v3920_v44  ;;  %4925 = vmatpush1.bf16.msra.mxu1 %v3922_v39  ;;  %v4019_v44 = vld [vmem:[#allocation2 + $0x14d8] sm:$0xff]  ;;  %v4016_v39 = vld [vmem:[#allocation2 + $0x14c0] sm:$0xff] }
 0x787   :  { %4598 = vmatprep.subr.bf16.mxu0 %v3929_v31  ;;  %4926 = vmatprep.subr.bf16.mxu1 %v3931_v32  ;;  %v4018_v31 = vld [vmem:[#allocation2 + $0x14d0] sm:$0xff]  ;;  %v4025_v32 = vld [vmem:[#allocation2 + $0x1508] sm:$0xff] }
 0x78a   :  { %4599 = vmatpush1.bf16.msra.mxu0 %v3928_v26  ;;  %4927 = vmatpush1.bf16.msra.mxu1 %v3930_v5  ;;  %v4027_v26 = vld [vmem:[#allocation2 + $0x1518] sm:$0xff]  ;;  %v4024_v5 = vld [vmem:[#allocation2 + $0x1500] sm:$0xff] }
 0x78b   :  { %4600 = vmatprep.subr.bf16.mxu0 %v3937_v51  ;;  %4928 = vmatprep.subr.bf16.mxu1 %v3939_v58  ;;  %v4026_v51 = vld [vmem:[#allocation2 + $0x1510] sm:$0xff]  ;;  %v4033_v58 = vld [vmem:[#allocation2 + $0x1548] sm:$0xff] }
 0x78e   :  { %4601 = vmatpush1.bf16.msra.mxu0 %v3936_v43  ;;  %4929 = vmatpush1.bf16.msra.mxu1 %v3938_v13  ;;  %v4035_v43 = vld [vmem:[#allocation2 + $0x1558] sm:$0xff]  ;;  %v4032_v13 = vld [vmem:[#allocation2 + $0x1540] sm:$0xff] }
 0x78f   :  { %4602 = vmatprep.subr.bf16.mxu0 %v3945_v0  ;;  %4930 = vmatprep.subr.bf16.mxu1 %v3947_v60  ;;  %v4034_v0 = vld [vmem:[#allocation2 + $0x1550] sm:$0xff]  ;;  %v4041_v60 = vld [vmem:[#allocation2 + $0x1588] sm:$0xff] }
 0x792   :  { %4603 = vmatpush1.bf16.msra.mxu0 %v3944_v33  ;;  %4931 = vmatpush1.bf16.msra.mxu1 %v3946_v24  ;;  %v4043_v33 = vld [vmem:[#allocation2 + $0x1598] sm:$0xff]  ;;  %v4040_v24 = vld [vmem:[#allocation2 + $0x1580] sm:$0xff] }
 0x793   :  { %4604 = vmatprep.subr.bf16.mxu0 %v3953_v2  ;;  %4932 = vmatprep.subr.bf16.mxu1 %v3955_v11  ;;  %v4042_v2 = vld [vmem:[#allocation2 + $0x1590] sm:$0xff]  ;;  %v4049_v11 = vld [vmem:[#allocation2 + $0x15c8] sm:$0xff] }
 0x796   :  { %4605 = vmatpush1.bf16.msra.mxu0 %v3952_v53  ;;  %4933 = vmatpush1.bf16.msra.mxu1 %v3954_v27  ;;  %v4051_v53 = vld [vmem:[#allocation2 + $0x15d8] sm:$0xff]  ;;  %v4048_v27 = vld [vmem:[#allocation2 + $0x15c0] sm:$0xff] }
 0x797   :  { %4606 = vmatprep.subr.bf16.mxu0 %v3961_v63  ;;  %4934 = vmatprep.subr.bf16.mxu1 %v3963_v42  ;;  %v4050_v63 = vld [vmem:[#allocation2 + $0x15d0] sm:$0xff]  ;;  %v4057_v42 = vld [vmem:[#allocation2 + $0x1608] sm:$0xff] }
 0x79a   :  { %4607 = vmatpush1.bf16.msra.mxu0 %v3960_v54  ;;  %4935 = vmatpush1.bf16.msra.mxu1 %v3962_v34  ;;  %v4059_v54 = vld [vmem:[#allocation2 + $0x1618] sm:$0xff]  ;;  %v4056_v34 = vld [vmem:[#allocation2 + $0x1600] sm:$0xff] }
 0x79b   :  { %4608 = vmatprep.subr.bf16.mxu0 %v3969_v40  ;;  %4936 = vmatprep.subr.bf16.mxu1 %v3971_v52  ;;  %v4058_v40 = vld [vmem:[#allocation2 + $0x1610] sm:$0xff]  ;;  %v4065_v52 = vld [vmem:[#allocation2 + $0x1648] sm:$0xff] }
 0x79e   :  { %4609 = vmatpush1.bf16.msra.mxu0 %v3968_v15  ;;  %4937 = vmatpush1.bf16.msra.mxu1 %v3970_v46  ;;  %v4067_v15 = vld [vmem:[#allocation2 + $0x1658] sm:$0xff]  ;;  %v4064_v46 = vld [vmem:[#allocation2 + $0x1640] sm:$0xff] }
 0x79f   :  { %4610 = vmatprep.subr.bf16.mxu0 %v3977_v14  ;;  %4938 = vmatprep.subr.bf16.mxu1 %v3979_v35  ;;  %v4066_v14 = vld [vmem:[#allocation2 + $0x1650] sm:$0xff]  ;;  %v4073_v35 = vld [vmem:[#allocation2 + $0x1688] sm:$0xff] }
 0x7a2   :  { %4611 = vmatpush1.bf16.msra.mxu0 %v3976_v57  ;;  %4939 = vmatpush1.bf16.msra.mxu1 %v3978_v37  ;;  %v4075_v57 = vld [vmem:[#allocation2 + $0x1698] sm:$0xff]  ;;  %v4072_v37 = vld [vmem:[#allocation2 + $0x1680] sm:$0xff] }
 0x7a3   :  { %4612 = vmatprep.subr.bf16.mxu0 %v3985_v16  ;;  %4940 = vmatprep.subr.bf16.mxu1 %v3987_v25  ;;  %v4074_v16 = vld [vmem:[#allocation2 + $0x1690] sm:$0xff]  ;;  %v4081_v25 = vld [vmem:[#allocation2 + $0x16c8] sm:$0xff] }
 0x7a6   :  { %4613 = vmatpush1.bf16.msra.mxu0 %v3984_v7  ;;  %4941 = vmatpush1.bf16.msra.mxu1 %v3986_v29  ;;  %v4083_v7 = vld [vmem:[#allocation2 + $0x16d8] sm:$0xff]  ;;  %v4080_v29 = vld [vmem:[#allocation2 + $0x16c0] sm:$0xff] }
 0x7a7   :  { %4623 = vmatprep.subr.bf16.mxu0 %v3993_v36  ;;  %4951 = vmatprep.subr.bf16.mxu1 %v3995_v9  ;;  %v4082_v36 = vld [vmem:[#allocation2 + $0x16d0] sm:$0xff]  ;;  %v4089_v9 = vld [vmem:[#allocation2 + $0x1708] sm:$0xff] }
 0x7a9   :  { %4615 = vmatmul.mubr.bf16.vlgmr.msra.gmra.mrb[56].mxu0 %v10592_v38  ;;  %4943 = vmatmul.mubr.bf16.vlgmr.msra.gmra.mrb[56].mxu1 %v10592_v38 }
 0x7aa   :  { %4624 = vmatpush1.bf16.msra.mxu0 %v3992_v12  ;;  %4952 = vmatpush1.bf16.msra.mxu1 %v3994_v47  ;;  %v4091_v12 = vld [vmem:[#allocation2 + $0x1718] sm:$0xff]  ;;  %v4088_v47 = vld [vmem:[#allocation2 + $0x1700] sm:$0xff] }
 0x7ab   :  { %4625 = vmatprep.subr.bf16.mxu0 %v4001_v17  ;;  %4953 = vmatprep.subr.bf16.mxu1 %v4003_v23  ;;  %v4090_v17 = vld [vmem:[#allocation2 + $0x1710] sm:$0xff]  ;;  %v4097_v23 = vld [vmem:[#allocation2 + $0x1748] sm:$0xff] }
 0x7ac   :  { %4655 = vmatprep.mubr.bf16.mxu0 %v10597_v61  ;;  %4983 = vmatprep.mubr.bf16.mxu1 %v10597_v61 }
 0x7ae   :  { %4626 = vmatpush1.bf16.msra.mxu0 %v4000_v22  ;;  %4954 = vmatpush1.bf16.msra.mxu1 %v4002_v62  ;;  %v4099_v22 = vld [vmem:[#allocation2 + $0x1758] sm:$0xff]  ;;  %v4096_v62 = vld [vmem:[#allocation2 + $0x1740] sm:$0xff] }
 0x7af   :  { %4627 = vmatprep.subr.bf16.mxu0 %v4009_v21  ;;  %4955 = vmatprep.subr.bf16.mxu1 %v4011_v48  ;;  %v4098_v21 = vld [vmem:[#allocation2 + $0x1750] sm:$0xff]  ;;  %v4105_v48 = vld [vmem:[#allocation2 + $0x1788] sm:$0xff] }
 0x7b2   :  { %4628 = vmatpush1.bf16.msra.mxu0 %v4008_v18  ;;  %4956 = vmatpush1.bf16.msra.mxu1 %v4010_v8  ;;  %v4107_v18 = vld [vmem:[#allocation2 + $0x1798] sm:$0xff]  ;;  %v4104_v8 = vld [vmem:[#allocation2 + $0x1780] sm:$0xff] }
 0x7b3   :  { %4629 = vmatprep.subr.bf16.mxu0 %v4017_v20  ;;  %4957 = vmatprep.subr.bf16.mxu1 %v4019_v44  ;;  %v4106_v20 = vld [vmem:[#allocation2 + $0x1790] sm:$0xff]  ;;  %v4113_v44 = vld [vmem:[#allocation2 + $0x17c8] sm:$0xff] }
 0x7b6   :  { %4630 = vmatpush1.bf16.msra.mxu0 %v4016_v39  ;;  %4958 = vmatpush1.bf16.msra.mxu1 %v4018_v31  ;;  %v4115_v39 = vld [vmem:[#allocation2 + $0x17d8] sm:$0xff]  ;;  %v4112_v31 = vld [vmem:[#allocation2 + $0x17c0] sm:$0xff] }
 0x7b7   :  { %4631 = vmatprep.subr.bf16.mxu0 %v4025_v32  ;;  %4959 = vmatprep.subr.bf16.mxu1 %v4027_v26  ;;  %v4114_v32 = vld [vmem:[#allocation2 + $0x17d0] sm:$0xff]  ;;  %v4121_v26 = vld [vmem:[#allocation2 + $0x1808] sm:$0xff] }
 0x7ba   :  { %4632 = vmatpush1.bf16.msra.mxu0 %v4024_v5  ;;  %4960 = vmatpush1.bf16.msra.mxu1 %v4026_v51  ;;  %v4123_v5 = vld [vmem:[#allocation2 + $0x1818] sm:$0xff]  ;;  %v10606_v51 = vpack.c.bf16 %v3321_v10, %v3321_v10  ;;  %v4130_v10 = vld [vmem:[#allocation2 + $0x1850] sm:$0xff] }
 0x7bb   :  { %4633 = vmatprep.subr.bf16.mxu0 %v4033_v58  ;;  %4961 = vmatprep.subr.bf16.mxu1 %v4035_v43  ;;  %v4120_v58 = vld [vmem:[#allocation2 + $0x1800] sm:$0xff]  ;;  %v4122_v43 = vld [vmem:[#allocation2 + $0x1810] sm:$0xff] }
 0x7be   :  { %4634 = vmatpush1.bf16.msra.mxu0 %v4032_v13  ;;  %4962 = vmatpush1.bf16.msra.mxu1 %v4034_v0  ;;  %v4129_v13 = vld [vmem:[#allocation2 + $0x1848] sm:$0xff]  ;;  %v4131_v0 = vld [vmem:[#allocation2 + $0x1858] sm:$0xff] }
 0x7bf   :  { %4635 = vmatprep.subr.bf16.mxu0 %v4041_v60  ;;  %4963 = vmatprep.subr.bf16.mxu1 %v4043_v33  ;;  %v10611_v60 = vpack.c.bf16 %v3326_v1, %v3326_v1  ;;  %v4137_v33 = vld [vmem:[#allocation2 + $0x1888] sm:$0xff]  ;;  %v4136_v1 = vld [vmem:[#allocation2 + $0x1880] sm:$0xff] }
 0x7c2   :  { %4636 = vmatpush1.bf16.msra.mxu0 %v4040_v24  ;;  %4964 = vmatpush1.bf16.msra.mxu1 %v4042_v2  ;;  %v4139_v24 = vld [vmem:[#allocation2 + $0x1898] sm:$0xff]  ;;  %v4138_v2 = vld [vmem:[#allocation2 + $0x1890] sm:$0xff] }
 0x7c3   :  { %4637 = vmatprep.subr.bf16.mxu0 %v4049_v11  ;;  %4965 = vmatprep.subr.bf16.mxu1 %v4051_v53  ;;  %v4145_v11 = vld [vmem:[#allocation2 + $0x18c8] sm:$0xff]  ;;  %v4147_v53 = vld [vmem:[#allocation2 + $0x18d8] sm:$0xff] }
 0x7c6   :  { %4638 = vmatpush1.bf16.msra.mxu0 %v4048_v27  ;;  %4966 = vmatpush1.bf16.msra.mxu1 %v4050_v63  ;;  %v4144_v27 = vld [vmem:[#allocation2 + $0x18c0] sm:$0xff]  ;;  %v4146_v63 = vld [vmem:[#allocation2 + $0x18d0] sm:$0xff] }
 0x7c7   :  { %4639 = vmatprep.subr.bf16.mxu0 %v4057_v42  ;;  %4967 = vmatprep.subr.bf16.mxu1 %v4059_v54  ;;  %v4153_v42 = vld [vmem:[#allocation2 + $0x1908] sm:$0xff]  ;;  %v4155_v54 = vld [vmem:[#allocation2 + $0x1918] sm:$0xff] }
 0x7ca   :  { %4640 = vmatpush1.bf16.msra.mxu0 %v4056_v34  ;;  %4968 = vmatpush1.bf16.msra.mxu1 %v4058_v40  ;;  %v4152_v34 = vld [vmem:[#allocation2 + $0x1900] sm:$0xff]  ;;  %v4154_v40 = vld [vmem:[#allocation2 + $0x1910] sm:$0xff] }
 0x7cb   :  { %4641 = vmatprep.subr.bf16.mxu0 %v4065_v52  ;;  %4969 = vmatprep.subr.bf16.mxu1 %v4067_v15  ;;  %v4161_v52 = vld [vmem:[#allocation2 + $0x1948] sm:$0xff]  ;;  %v4163_v15 = vld [vmem:[#allocation2 + $0x1958] sm:$0xff] }
 0x7ce   :  { %4642 = vmatpush1.bf16.msra.mxu0 %v4064_v46  ;;  %4970 = vmatpush1.bf16.msra.mxu1 %v4066_v14  ;;  %v4160_v46 = vld [vmem:[#allocation2 + $0x1940] sm:$0xff]  ;;  %v4162_v14 = vld [vmem:[#allocation2 + $0x1950] sm:$0xff] }
 0x7cf   :  { %4643 = vmatprep.subr.bf16.mxu0 %v4073_v35  ;;  %4971 = vmatprep.subr.bf16.mxu1 %v4075_v57  ;;  %v4169_v35 = vld [vmem:[#allocation2 + $0x1988] sm:$0xff]  ;;  %v4171_v57 = vld [vmem:[#allocation2 + $0x1998] sm:$0xff] }
 0x7d2   :  { %4644 = vmatpush1.bf16.msra.mxu0 %v4072_v37  ;;  %4972 = vmatpush1.bf16.msra.mxu1 %v4074_v16  ;;  %v4168_v37 = vld [vmem:[#allocation2 + $0x1980] sm:$0xff]  ;;  %v4170_v16 = vld [vmem:[#allocation2 + $0x1990] sm:$0xff] }
 0x7d3   :  { %4645 = vmatprep.subr.bf16.mxu0 %v4081_v25  ;;  %4973 = vmatprep.subr.bf16.mxu1 %v4083_v7  ;;  %v4177_v25 = vld [vmem:[#allocation2 + $0x19c8] sm:$0xff]  ;;  %v4179_v7 = vld [vmem:[#allocation2 + $0x19d8] sm:$0xff] }
 0x7d6   :  { %4646 = vmatpush1.bf16.msra.mxu0 %v4080_v29  ;;  %4974 = vmatpush1.bf16.msra.mxu1 %v4082_v36  ;;  %v4176_v29 = vld [vmem:[#allocation2 + $0x19c0] sm:$0xff]  ;;  %v4178_v36 = vld [vmem:[#allocation2 + $0x19d0] sm:$0xff] }
 0x7d7   :  { %4647 = vmatprep.subr.bf16.mxu0 %v4089_v9  ;;  %4975 = vmatprep.subr.bf16.mxu1 %v4091_v12  ;;  %v4185_v9 = vld [vmem:[#allocation2 + $0x1a08] sm:$0xff]  ;;  %v4187_v12 = vld [vmem:[#allocation2 + $0x1a18] sm:$0xff] }
 0x7da   :  { %4648 = vmatpush1.bf16.msra.mxu0 %v4088_v47  ;;  %4976 = vmatpush1.bf16.msra.mxu1 %v4090_v17  ;;  %v4184_v47 = vld [vmem:[#allocation2 + $0x1a00] sm:$0xff]  ;;  %v4186_v17 = vld [vmem:[#allocation2 + $0x1a10] sm:$0xff] }
 0x7db   :  { %4649 = vmatprep.subr.bf16.mxu0 %v4097_v23  ;;  %4977 = vmatprep.subr.bf16.mxu1 %v4099_v22  ;;  %v4193_v23 = vld [vmem:[#allocation2 + $0x1a48] sm:$0xff]  ;;  %v4195_v22 = vld [vmem:[#allocation2 + $0x1a58] sm:$0xff] }
 0x7de   :  { %4650 = vmatpush1.bf16.msra.mxu0 %v4096_v62  ;;  %4978 = vmatpush1.bf16.msra.mxu1 %v4098_v21  ;;  %v4192_v62 = vld [vmem:[#allocation2 + $0x1a40] sm:$0xff]  ;;  %v4194_v21 = vld [vmem:[#allocation2 + $0x1a50] sm:$0xff] }
 0x7df   :  { %4651 = vmatprep.subr.bf16.mxu0 %v4105_v48  ;;  %4979 = vmatprep.subr.bf16.mxu1 %v4107_v18  ;;  %v4201_v48 = vld [vmem:[#allocation2 + $0x1a88] sm:$0xff]  ;;  %v4203_v18 = vld [vmem:[#allocation2 + $0x1a98] sm:$0xff] }
 0x7e2   :  { %4652 = vmatpush1.bf16.msra.mxu0 %v4104_v8  ;;  %4980 = vmatpush1.bf16.msra.mxu1 %v4106_v20  ;;  %v4200_v8 = vld [vmem:[#allocation2 + $0x1a80] sm:$0xff]  ;;  %v4202_v20 = vld [vmem:[#allocation2 + $0x1a90] sm:$0xff] }
 0x7e3   :  { %4653 = vmatprep.subr.bf16.mxu0 %v4113_v44  ;;  %4981 = vmatprep.subr.bf16.mxu1 %v4115_v39  ;;  %v4209_v44 = vld [vmem:[#allocation2 + $0x1ac8] sm:$0xff]  ;;  %v4211_v39 = vld [vmem:[#allocation2 + $0x1ad8] sm:$0xff] }
 0x7e6   :  { %4654 = vmatpush1.bf16.msra.mxu0 %v4112_v31  ;;  %4982 = vmatpush1.bf16.msra.mxu1 %v4114_v32  ;;  %v4208_v31 = vld [vmem:[#allocation2 + $0x1ac0] sm:$0xff]  ;;  %v4210_v32 = vld [vmem:[#allocation2 + $0x1ad0] sm:$0xff] }
 0x7e7   :  { %4664 = vmatprep.subr.bf16.mxu0 %v4121_v26  ;;  %4992 = vmatprep.subr.bf16.mxu1 %v4123_v5  ;;  %v4217_v26 = vld [vmem:[#allocation2 + $0x1b08] sm:$0xff]  ;;  %v4219_v5 = vld [vmem:[#allocation2 + $0x1b18] sm:$0xff] }
 0x7e9   :  { %4656 = vmatmul.mubr.bf16.vlgmr.msra.gmra.mrb[56].mxu0 %v10606_v51  ;;  %4984 = vmatmul.mubr.bf16.vlgmr.msra.gmra.mrb[56].mxu1 %v10606_v51 }
 0x7ea   :  { %4665 = vmatpush1.bf16.msra.mxu0 %v4120_v58  ;;  %4993 = vmatpush1.bf16.msra.mxu1 %v4122_v43  ;;  %v4216_v58 = vld [vmem:[#allocation2 + $0x1b00] sm:$0xff]  ;;  %v4218_v43 = vld [vmem:[#allocation2 + $0x1b10] sm:$0xff] }
 0x7eb   :  { %4666 = vmatprep.subr.bf16.mxu0 %v4129_v13  ;;  %4994 = vmatprep.subr.bf16.mxu1 %v4131_v0  ;;  %v4225_v13 = vld [vmem:[#allocation2 + $0x1b48] sm:$0xff]  ;;  %v4227_v0 = vld [vmem:[#allocation2 + $0x1b58] sm:$0xff] }
 0x7ec   :  { %4696 = vmatprep.mubr.bf16.mxu0 %v10611_v60  ;;  %5024 = vmatprep.mubr.bf16.mxu1 %v10611_v60 }
 0x7ee   :  { %4667 = vmatpush1.bf16.msra.mxu0 %v4128_v4  ;;  %4995 = vmatpush1.bf16.msra.mxu1 %v4130_v10  ;;  %v4224_v4 = vld [vmem:[#allocation2 + $0x1b40] sm:$0xff]  ;;  %v4226_v10 = vld [vmem:[#allocation2 + $0x1b50] sm:$0xff] }
 0x7ef   :  { %4668 = vmatprep.subr.bf16.mxu0 %v4137_v33  ;;  %4996 = vmatprep.subr.bf16.mxu1 %v4139_v24  ;;  %v4233_v33 = vld [vmem:[#allocation2 + $0x1b88] sm:$0xff]  ;;  %v4235_v24 = vld [vmem:[#allocation2 + $0x1b98] sm:$0xff] }
 0x7f2   :  { %4669 = vmatpush1.bf16.msra.mxu0 %v4136_v1  ;;  %4997 = vmatpush1.bf16.msra.mxu1 %v4138_v2  ;;  %v4232_v1 = vld [vmem:[#allocation2 + $0x1b80] sm:$0xff]  ;;  %v4234_v2 = vld [vmem:[#allocation2 + $0x1b90] sm:$0xff] }
 0x7f3   :  { %4670 = vmatprep.subr.bf16.mxu0 %v4145_v11  ;;  %4998 = vmatprep.subr.bf16.mxu1 %v4147_v53  ;;  %v4241_v11 = vld [vmem:[#allocation2 + $0x1bc8] sm:$0xff]  ;;  %v4243_v53 = vld [vmem:[#allocation2 + $0x1bd8] sm:$0xff] }
 0x7f6   :  { %4671 = vmatpush1.bf16.msra.mxu0 %v4144_v27  ;;  %4999 = vmatpush1.bf16.msra.mxu1 %v4146_v63  ;;  %v4240_v27 = vld [vmem:[#allocation2 + $0x1bc0] sm:$0xff]  ;;  %v4242_v63 = vld [vmem:[#allocation2 + $0x1bd0] sm:$0xff] }
 0x7f7   :  { %4672 = vmatprep.subr.bf16.mxu0 %v4153_v42  ;;  %5000 = vmatprep.subr.bf16.mxu1 %v4155_v54  ;;  %v4249_v42 = vld [vmem:[#allocation2 + $0x1c08] sm:$0xff]  ;;  %v4251_v54 = vld [vmem:[#allocation2 + $0x1c18] sm:$0xff] }
 0x7fa   :  { %4673 = vmatpush1.bf16.msra.mxu0 %v4152_v34  ;;  %5001 = vmatpush1.bf16.msra.mxu1 %v4154_v40  ;;  %v10619_v34 = vpack.c.bf16 %v10518_v41, %v10518_v41  ;;  %v4248_v40 = vld [vmem:[#allocation2 + $0x1c00] sm:$0xff] }
 0x7fb   :  { %4674 = vmatprep.subr.bf16.mxu0 %v4161_v52  ;;  %5002 = vmatprep.subr.bf16.mxu1 %v4163_v15  ;;  %v4250_v52 = vld [vmem:[#allocation2 + $0x1c10] sm:$0xff]  ;;  %v4257_v15 = vld [vmem:[#allocation2 + $0x1c48] sm:$0xff]  ;;  %v3364_v41 = vld [vmem:[#allocation2 + $0x60] sm:$0xff] }
 0x7fe   :  { %4675 = vmatpush1.bf16.msra.mxu0 %v4160_v46  ;;  %5003 = vmatpush1.bf16.msra.mxu1 %v4162_v14  ;;  %v4259_v46 = vld [vmem:[#allocation2 + $0x1c58] sm:$0xff]  ;;  %v10624_v14 = vpack.c.bf16 %v3330_v30, %v3330_v30  ;;  %v4264_v30 = vld [vmem:[#allocation2 + $0x1c80] sm:$0xff] }
 0x7ff   :  { %4676 = vmatprep.subr.bf16.mxu0 %v4169_v35  ;;  %5004 = vmatprep.subr.bf16.mxu1 %v4171_v57  ;;  %v4256_v35 = vld [vmem:[#allocation2 + $0x1c40] sm:$0xff]  ;;  %v4258_v57 = vld [vmem:[#allocation2 + $0x1c50] sm:$0xff] }
 0x802   :  { %4677 = vmatpush1.bf16.msra.mxu0 %v4168_v37  ;;  %5005 = vmatpush1.bf16.msra.mxu1 %v4170_v16  ;;  %v4265_v37 = vld [vmem:[#allocation2 + $0x1c88] sm:$0xff]  ;;  %v4267_v16 = vld [vmem:[#allocation2 + $0x1c98] sm:$0xff] }
 0x803   :  { %4678 = vmatprep.subr.bf16.mxu0 %v4177_v25  ;;  %5006 = vmatprep.subr.bf16.mxu1 %v4179_v7  ;;  %v4266_v25 = vld [vmem:[#allocation2 + $0x1c90] sm:$0xff]  ;;  %v4273_v7 = vld [vmem:[#allocation2 + $0x1cc8] sm:$0xff] }
 0x806   :  { %4679 = vmatpush1.bf16.msra.mxu0 %v4176_v29  ;;  %5007 = vmatpush1.bf16.msra.mxu1 %v4178_v36  ;;  %v4275_v29 = vld [vmem:[#allocation2 + $0x1cd8] sm:$0xff]  ;;  %v4272_v36 = vld [vmem:[#allocation2 + $0x1cc0] sm:$0xff] }
 0x807   :  { %4680 = vmatprep.subr.bf16.mxu0 %v4185_v9  ;;  %5008 = vmatprep.subr.bf16.mxu1 %v4187_v12  ;;  %v4274_v9 = vld [vmem:[#allocation2 + $0x1cd0] sm:$0xff]  ;;  %v4281_v12 = vld [vmem:[#allocation2 + $0x1d08] sm:$0xff] }
 0x80a   :  { %4681 = vmatpush1.bf16.msra.mxu0 %v4184_v47  ;;  %5009 = vmatpush1.bf16.msra.mxu1 %v4186_v17  ;;  %v4283_v47 = vld [vmem:[#allocation2 + $0x1d18] sm:$0xff]  ;;  %v4280_v17 = vld [vmem:[#allocation2 + $0x1d00] sm:$0xff] }
 0x80b   :  { %4682 = vmatprep.subr.bf16.mxu0 %v4193_v23  ;;  %5010 = vmatprep.subr.bf16.mxu1 %v4195_v22  ;;  %v4282_v23 = vld [vmem:[#allocation2 + $0x1d10] sm:$0xff]  ;;  %v4289_v22 = vld [vmem:[#allocation2 + $0x1d48] sm:$0xff] }
 0x80e   :  { %4683 = vmatpush1.bf16.msra.mxu0 %v4192_v62  ;;  %5011 = vmatpush1.bf16.msra.mxu1 %v4194_v21  ;;  %v4291_v62 = vld [vmem:[#allocation2 + $0x1d58] sm:$0xff]  ;;  %v4288_v21 = vld [vmem:[#allocation2 + $0x1d40] sm:$0xff] }
 0x80f   :  { %4684 = vmatprep.subr.bf16.mxu0 %v4201_v48  ;;  %5012 = vmatprep.subr.bf16.mxu1 %v4203_v18  ;;  %v4290_v48 = vld [vmem:[#allocation2 + $0x1d50] sm:$0xff]  ;;  %v4297_v18 = vld [vmem:[#allocation2 + $0x1d88] sm:$0xff] }
 0x812   :  { %4685 = vmatpush1.bf16.msra.mxu0 %v4200_v8  ;;  %5013 = vmatpush1.bf16.msra.mxu1 %v4202_v20  ;;  %v4299_v8 = vld [vmem:[#allocation2 + $0x1d98] sm:$0xff]  ;;  %v4296_v20 = vld [vmem:[#allocation2 + $0x1d80] sm:$0xff] }
 0x813   :  { %4686 = vmatprep.subr.bf16.mxu0 %v4209_v44  ;;  %5014 = vmatprep.subr.bf16.mxu1 %v4211_v39  ;;  %v4298_v44 = vld [vmem:[#allocation2 + $0x1d90] sm:$0xff]  ;;  %v4305_v39 = vld [vmem:[#allocation2 + $0x1dc8] sm:$0xff] }
 0x816   :  { %4687 = vmatpush1.bf16.msra.mxu0 %v4208_v31  ;;  %5015 = vmatpush1.bf16.msra.mxu1 %v4210_v32  ;;  %v4307_v31 = vld [vmem:[#allocation2 + $0x1dd8] sm:$0xff]  ;;  %v4304_v32 = vld [vmem:[#allocation2 + $0x1dc0] sm:$0xff] }
 0x817   :  { %4688 = vmatprep.subr.bf16.mxu0 %v4217_v26  ;;  %5016 = vmatprep.subr.bf16.mxu1 %v4219_v5  ;;  %v4306_v26 = vld [vmem:[#allocation2 + $0x1dd0] sm:$0xff]  ;;  %v4313_v5 = vld [vmem:[#allocation2 + $0x1e08] sm:$0xff] }
 0x81a   :  { %4689 = vmatpush1.bf16.msra.mxu0 %v4216_v58  ;;  %5017 = vmatpush1.bf16.msra.mxu1 %v4218_v43  ;;  %v4315_v58 = vld [vmem:[#allocation2 + $0x1e18] sm:$0xff]  ;;  %v4312_v43 = vld [vmem:[#allocation2 + $0x1e00] sm:$0xff] }
 0x81b   :  { %4690 = vmatprep.subr.bf16.mxu0 %v4225_v13  ;;  %5018 = vmatprep.subr.bf16.mxu1 %v4227_v0  ;;  %v4314_v13 = vld [vmem:[#allocation2 + $0x1e10] sm:$0xff]  ;;  %v4321_v0 = vld [vmem:[#allocation2 + $0x1e48] sm:$0xff] }
 0x81e   :  { %4691 = vmatpush1.bf16.msra.mxu0 %v4224_v4  ;;  %5019 = vmatpush1.bf16.msra.mxu1 %v4226_v10  ;;  %v4323_v4 = vld [vmem:[#allocation2 + $0x1e58] sm:$0xff]  ;;  %v4320_v10 = vld [vmem:[#allocation2 + $0x1e40] sm:$0xff] }
 0x81f   :  { %4692 = vmatprep.subr.bf16.mxu0 %v4233_v33  ;;  %5020 = vmatprep.subr.bf16.mxu1 %v4235_v24  ;;  %v4322_v33 = vld [vmem:[#allocation2 + $0x1e50] sm:$0xff]  ;;  %v4329_v24 = vld [vmem:[#allocation2 + $0x1e88] sm:$0xff] }
 0x822   :  { %4693 = vmatpush1.bf16.msra.mxu0 %v4232_v1  ;;  %5021 = vmatpush1.bf16.msra.mxu1 %v4234_v2  ;;  %v4331_v1 = vld [vmem:[#allocation2 + $0x1e98] sm:$0xff]  ;;  %v4328_v2 = vld [vmem:[#allocation2 + $0x1e80] sm:$0xff] }
 0x823   :  { %4694 = vmatprep.subr.bf16.mxu0 %v4241_v11  ;;  %5022 = vmatprep.subr.bf16.mxu1 %v4243_v53  ;;  %v4330_v11 = vld [vmem:[#allocation2 + $0x1e90] sm:$0xff]  ;;  %v4337_v53 = vld [vmem:[#allocation2 + $0x1ec8] sm:$0xff] }
 0x826   :  { %4695 = vmatpush1.bf16.msra.mxu0 %v4240_v27  ;;  %5023 = vmatpush1.bf16.msra.mxu1 %v4242_v63  ;;  %v4339_v27 = vld [vmem:[#allocation2 + $0x1ed8] sm:$0xff]  ;;  %v4336_v63 = vld [vmem:[#allocation2 + $0x1ec0] sm:$0xff] }
 0x827   :  { %4705 = vmatprep.subr.bf16.mxu0 %v4249_v42  ;;  %5033 = vmatprep.subr.bf16.mxu1 %v4251_v54  ;;  %v4338_v42 = vld [vmem:[#allocation2 + $0x1ed0] sm:$0xff]  ;;  %v4345_v54 = vld [vmem:[#allocation2 + $0x1f08] sm:$0xff] }
 0x829   :  { %4697 = vmatmul.mubr.bf16.vlgmr.msra.gmra.mrb[56].mxu0 %v10619_v34  ;;  %5025 = vmatmul.mubr.bf16.vlgmr.msra.gmra.mrb[56].mxu1 %v10619_v34 }
 0x82a   :  { %4706 = vmatpush1.bf16.msra.mxu0 %v4248_v40  ;;  %5034 = vmatpush1.bf16.msra.mxu1 %v4250_v52  ;;  %v4347_v40 = vld [vmem:[#allocation2 + $0x1f18] sm:$0xff]  ;;  %v4344_v52 = vld [vmem:[#allocation2 + $0x1f00] sm:$0xff] }
 0x82b   :  { %4707 = vmatprep.subr.bf16.mxu0 %v4257_v15  ;;  %5035 = vmatprep.subr.bf16.mxu1 %v4259_v46  ;;  %v4346_v15 = vld [vmem:[#allocation2 + $0x1f10] sm:$0xff]  ;;  %v4353_v46 = vld [vmem:[#allocation2 + $0x1f48] sm:$0xff] }
 0x82c   :  { %4737 = vmatprep.mubr.bf16.mxu0 %v10624_v14  ;;  %5065 = vmatprep.mubr.bf16.mxu1 %v10624_v14 }
 0x82e   :  { %4708 = vmatpush1.bf16.msra.mxu0 %v4256_v35  ;;  %5036 = vmatpush1.bf16.msra.mxu1 %v4258_v57  ;;  %v4355_v35 = vld [vmem:[#allocation2 + $0x1f58] sm:$0xff]  ;;  %v4352_v57 = vld [vmem:[#allocation2 + $0x1f40] sm:$0xff] }
 0x82f   :  { %4709 = vmatprep.subr.bf16.mxu0 %v4265_v37  ;;  %5037 = vmatprep.subr.bf16.mxu1 %v4267_v16  ;;  %v4354_v37 = vld [vmem:[#allocation2 + $0x1f50] sm:$0xff]  ;;  %v4361_v16 = vld [vmem:[#allocation2 + $0x1f88] sm:$0xff] }
 0x832   :  { %4710 = vmatpush1.bf16.msra.mxu0 %v4264_v30  ;;  %5038 = vmatpush1.bf16.msra.mxu1 %v4266_v25  ;;  %v4363_v30 = vld [vmem:[#allocation2 + $0x1f98] sm:$0xff]  ;;  %v4360_v25 = vld [vmem:[#allocation2 + $0x1f80] sm:$0xff] }
 0x833   :  { %4711 = vmatprep.subr.bf16.mxu0 %v4273_v7  ;;  %5039 = vmatprep.subr.bf16.mxu1 %v4275_v29  ;;  %v4362_v7 = vld [vmem:[#allocation2 + $0x1f90] sm:$0xff]  ;;  %v4369_v29 = vld [vmem:[#allocation2 + $0x1fc8] sm:$0xff] }
 0x836   :  { %4712 = vmatpush1.bf16.msra.mxu0 %v4272_v36  ;;  %5040 = vmatpush1.bf16.msra.mxu1 %v4274_v9  ;;  %v4371_v36 = vld [vmem:[#allocation2 + $0x1fd8] sm:$0xff]  ;;  %v4368_v9 = vld [vmem:[#allocation2 + $0x1fc0] sm:$0xff] }
 0x837   :  { %4713 = vmatprep.subr.bf16.mxu0 %v4281_v12  ;;  %5041 = vmatprep.subr.bf16.mxu1 %v4283_v47  ;;  %v4370_v12 = vld [vmem:[#allocation2 + $0x1fd0] sm:$0xff]  ;;  %v3357_v47 = vld [vmem:[#allocation2 + $0x28] sm:$0xff] }
 0x83a   :  { %4714 = vmatpush1.bf16.msra.mxu0 %v4280_v17  ;;  %5042 = vmatpush1.bf16.msra.mxu1 %v4282_v23  ;;  %v3359_v17 = vld [vmem:[#allocation2 + $0x38] sm:$0xff]  ;;  %v10633_v23 = vpack.c.bf16 %v3328_v49, %v3328_v49  ;;  %v3373_v49 = vld [vmem:[#allocation2 + $0xa8] sm:$0xff] }
 0x83b   :  { %4715 = vmatprep.subr.bf16.mxu0 %v4289_v22  ;;  %5043 = vmatprep.subr.bf16.mxu1 %v4291_v62  ;;  %v3356_v22 = vld [vmem:[#allocation2 + $0x20] sm:$0xff]  ;;  %v3358_v62 = vld [vmem:[#allocation2 + $0x30] sm:$0xff] }
 0x83e   :  { %4716 = vmatpush1.bf16.msra.mxu0 %v4288_v21  ;;  %5044 = vmatpush1.bf16.msra.mxu1 %v4290_v48  ;;  %v3365_v21 = vld [vmem:[#allocation2 + $0x68] sm:$0xff]  ;;  %v3367_v48 = vld [vmem:[#allocation2 + $0x78] sm:$0xff] }
 0x83f   :  { %4717 = vmatprep.subr.bf16.mxu0 %v4297_v18  ;;  %5045 = vmatprep.subr.bf16.mxu1 %v4299_v8  ;;  %v3366_v18 = vld [vmem:[#allocation2 + $0x70] sm:$0xff]  ;;  %v3375_v8 = vld [vmem:[#allocation2 + $0xb8] sm:$0xff] }
 0x842   :  { %4718 = vmatpush1.bf16.msra.mxu0 %v4296_v20  ;;  %5046 = vmatpush1.bf16.msra.mxu1 %v4298_v44  ;;  %v3372_v20 = vld [vmem:[#allocation2 + $0xa0] sm:$0xff]  ;;  %v3374_v44 = vld [vmem:[#allocation2 + $0xb0] sm:$0xff] }
 0x843   :  { %4719 = vmatprep.subr.bf16.mxu0 %v4305_v39  ;;  %5047 = vmatprep.subr.bf16.mxu1 %v4307_v31  ;;  %v3381_v39 = vld [vmem:[#allocation2 + $0xe8] sm:$0xff]  ;;  %v3383_v31 = vld [vmem:[#allocation2 + $0xf8] sm:$0xff] }
 0x846   :  { %4720 = vmatpush1.bf16.msra.mxu0 %v4304_v32  ;;  %5048 = vmatpush1.bf16.msra.mxu1 %v4306_v26  ;;  %v3380_v32 = vld [vmem:[#allocation2 + $0xe0] sm:$0xff]  ;;  %v3382_v26 = vld [vmem:[#allocation2 + $0xf0] sm:$0xff] }
 0x847   :  { %4721 = vmatprep.subr.bf16.mxu0 %v4313_v5  ;;  %5049 = vmatprep.subr.bf16.mxu1 %v4315_v58  ;;  %v3389_v5 = vld [vmem:[#allocation2 + $0x128] sm:$0xff]  ;;  %v3391_v58 = vld [vmem:[#allocation2 + $0x138] sm:$0xff] }
 0x84a   :  { %4722 = vmatpush1.bf16.msra.mxu0 %v4312_v43  ;;  %5050 = vmatpush1.bf16.msra.mxu1 %v4314_v13  ;;  %v3390_v43 = vld [vmem:[#allocation2 + $0x130] sm:$0xff]  ;;  %v3397_v13 = vld [vmem:[#allocation2 + $0x168] sm:$0xff] }
 0x84b   :  { %4723 = vmatprep.subr.bf16.mxu0 %v4321_v0  ;;  %5051 = vmatprep.subr.bf16.mxu1 %v4323_v4  ;;  %v3399_v0 = vld [vmem:[#allocation2 + $0x178] sm:$0xff]  ;;  %v3396_v4 = vld [vmem:[#allocation2 + $0x160] sm:$0xff] }
 0x84e   :  { %4724 = vmatpush1.bf16.msra.mxu0 %v4320_v10  ;;  %5052 = vmatpush1.bf16.msra.mxu1 %v4322_v33  ;;  %v3398_v10 = vld [vmem:[#allocation2 + $0x170] sm:$0xff]  ;;  %v3405_v33 = vld [vmem:[#allocation2 + $0x1a8] sm:$0xff] }
 0x84f   :  { %4725 = vmatprep.subr.bf16.mxu0 %v4329_v24  ;;  %5053 = vmatprep.subr.bf16.mxu1 %v4331_v1  ;;  %v3407_v24 = vld [vmem:[#allocation2 + $0x1b8] sm:$0xff]  ;;  %v3404_v1 = vld [vmem:[#allocation2 + $0x1a0] sm:$0xff] }
 0x852   :  { %4726 = vmatpush1.bf16.msra.mxu0 %v4328_v2  ;;  %5054 = vmatpush1.bf16.msra.mxu1 %v4330_v11  ;;  %v3406_v2 = vld [vmem:[#allocation2 + $0x1b0] sm:$0xff]  ;;  %v3413_v11 = vld [vmem:[#allocation2 + $0x1e8] sm:$0xff] }
 0x853   :  { %4727 = vmatprep.subr.bf16.mxu0 %v4337_v53  ;;  %5055 = vmatprep.subr.bf16.mxu1 %v4339_v27  ;;  %v3415_v53 = vld [vmem:[#allocation2 + $0x1f8] sm:$0xff]  ;;  %v3412_v27 = vld [vmem:[#allocation2 + $0x1e0] sm:$0xff] }
 0x856   :  { %4728 = vmatpush1.bf16.msra.mxu0 %v4336_v63  ;;  %5056 = vmatpush1.bf16.msra.mxu1 %v4338_v42  ;;  %v3414_v63 = vld [vmem:[#allocation2 + $0x1f0] sm:$0xff]  ;;  %v3421_v42 = vld [vmem:[#allocation2 + $0x228] sm:$0xff] }
 0x857   :  { %4729 = vmatprep.subr.bf16.mxu0 %v4345_v54  ;;  %5057 = vmatprep.subr.bf16.mxu1 %v4347_v40  ;;  %v3423_v54 = vld [vmem:[#allocation2 + $0x238] sm:$0xff]  ;;  %v3420_v40 = vld [vmem:[#allocation2 + $0x220] sm:$0xff] }
 0x85a   :  { %4730 = vmatpush1.bf16.msra.mxu0 %v4344_v52  ;;  %5058 = vmatpush1.bf16.msra.mxu1 %v4346_v15  ;;  %v3422_v52 = vld [vmem:[#allocation2 + $0x230] sm:$0xff]  ;;  %v3429_v15 = vld [vmem:[#allocation2 + $0x268] sm:$0xff] }
 0x85b   :  { %4731 = vmatprep.subr.bf16.mxu0 %v4353_v46  ;;  %5059 = vmatprep.subr.bf16.mxu1 %v4355_v35  ;;  %v3431_v46 = vld [vmem:[#allocation2 + $0x278] sm:$0xff]  ;;  %v3428_v35 = vld [vmem:[#allocation2 + $0x260] sm:$0xff] }
 0x85e   :  { %4732 = vmatpush1.bf16.msra.mxu0 %v4352_v57  ;;  %5060 = vmatpush1.bf16.msra.mxu1 %v4354_v37  ;;  %v3430_v57 = vld [vmem:[#allocation2 + $0x270] sm:$0xff]  ;;  %v3437_v37 = vld [vmem:[#allocation2 + $0x2a8] sm:$0xff] }
 0x85f   :  { %4733 = vmatprep.subr.bf16.mxu0 %v4361_v16  ;;  %5061 = vmatprep.subr.bf16.mxu1 %v4363_v30  ;;  %v3439_v16 = vld [vmem:[#allocation2 + $0x2b8] sm:$0xff]  ;;  %v3436_v30 = vld [vmem:[#allocation2 + $0x2a0] sm:$0xff] }
 0x862   :  { %4734 = vmatpush1.bf16.msra.mxu0 %v4360_v25  ;;  %5062 = vmatpush1.bf16.msra.mxu1 %v4362_v7  ;;  %v3438_v25 = vld [vmem:[#allocation2 + $0x2b0] sm:$0xff]  ;;  %v3445_v7 = vld [vmem:[#allocation2 + $0x2e8] sm:$0xff] }
 0x863   :  { %4735 = vmatprep.subr.bf16.mxu0 %v4369_v29  ;;  %5063 = vmatprep.subr.bf16.mxu1 %v4371_v36  ;;  %v3447_v29 = vld [vmem:[#allocation2 + $0x2f8] sm:$0xff]  ;;  %v3444_v36 = vld [vmem:[#allocation2 + $0x2e0] sm:$0xff] }
 0x866   :  { %4736 = vmatpush1.bf16.msra.mxu0 %v4368_v9  ;;  %5064 = vmatpush1.bf16.msra.mxu1 %v4370_v12  ;;  %v3446_v9 = vld [vmem:[#allocation2 + $0x2f0] sm:$0xff]  ;;  %v3453_v12 = vld [vmem:[#allocation2 + $0x328] sm:$0xff] }
 0x867   :  { %5074 = vmatprep.subr.bf16.mxu0 %v3357_v47  ;;  %5402 = vmatprep.subr.bf16.mxu1 %v3359_v17  ;;  %v3455_v47 = vld [vmem:[#allocation2 + $0x338] sm:$0xff]  ;;  %v3452_v17 = vld [vmem:[#allocation2 + $0x320] sm:$0xff] }
 0x869   :  { %4738 = vmatmul.mubr.bf16.vlgmr.msra.gmra.mrb[56].mxu0 %v10633_v23  ;;  %5066 = vmatmul.mubr.bf16.vlgmr.msra.gmra.mrb[56].mxu1 %v10633_v23 }
 0x86a   :  { %5075 = vmatpush1.bf16.msra.mxu0 %v3356_v22  ;;  %5403 = vmatpush1.bf16.msra.mxu1 %v3358_v62  ;;  %v3454_v22 = vld [vmem:[#allocation2 + $0x330] sm:$0xff]  ;;  %v3461_v62 = vld [vmem:[#allocation2 + $0x368] sm:$0xff] }
 0x86b   :  { %5076 = vmatprep.subr.bf16.mxu0 %v3365_v21  ;;  %5404 = vmatprep.subr.bf16.mxu1 %v3367_v48  ;;  %v3463_v21 = vld [vmem:[#allocation2 + $0x378] sm:$0xff]  ;;  %v3460_v48 = vld [vmem:[#allocation2 + $0x360] sm:$0xff] }
 0x86c   :  { %5106 = vmatprep.mubr.bf16.mxu0 %v10532_v3  ;;  %5434 = vmatprep.mubr.bf16.mxu1 %v10532_v3  ;;  %v3388_v3 = vld [vmem:[#allocation2 + $0x120] sm:$0xff] }
 0x86e   :  { %5077 = vmatpush1.bf16.msra.mxu0 %v3364_v41  ;;  %5405 = vmatpush1.bf16.msra.mxu1 %v3366_v18  ;;  %v3462_v41 = vld [vmem:[#allocation2 + $0x370] sm:$0xff]  ;;  %v3469_v18 = vld [vmem:[#allocation2 + $0x3a8] sm:$0xff] }
 0x86f   :  { %5078 = vmatprep.subr.bf16.mxu0 %v3373_v49  ;;  %5406 = vmatprep.subr.bf16.mxu1 %v3375_v8  ;;  %v3471_v49 = vld [vmem:[#allocation2 + $0x3b8] sm:$0xff]  ;;  %v3468_v8 = vld [vmem:[#allocation2 + $0x3a0] sm:$0xff] }
 0x872   :  { %5079 = vmatpush1.bf16.msra.mxu0 %v3372_v20  ;;  %5407 = vmatpush1.bf16.msra.mxu1 %v3374_v44  ;;  %v3470_v20 = vld [vmem:[#allocation2 + $0x3b0] sm:$0xff]  ;;  %v3477_v44 = vld [vmem:[#allocation2 + $0x3e8] sm:$0xff] }
 0x873   :  { %5080 = vmatprep.subr.bf16.mxu0 %v3381_v39  ;;  %5408 = vmatprep.subr.bf16.mxu1 %v3383_v31  ;;  %v3479_v39 = vld [vmem:[#allocation2 + $0x3f8] sm:$0xff]  ;;  %v3476_v31 = vld [vmem:[#allocation2 + $0x3e0] sm:$0xff] }
 0x876   :  { %5081 = vmatpush1.bf16.msra.mxu0 %v3380_v32  ;;  %5409 = vmatpush1.bf16.msra.mxu1 %v3382_v26  ;;  %v3478_v32 = vld [vmem:[#allocation2 + $0x3f0] sm:$0xff]  ;;  %v3485_v26 = vld [vmem:[#allocation2 + $0x428] sm:$0xff] }
 0x877   :  { %5082 = vmatprep.subr.bf16.mxu0 %v3389_v5  ;;  %5410 = vmatprep.subr.bf16.mxu1 %v3391_v58  ;;  %v3487_v5 = vld [vmem:[#allocation2 + $0x438] sm:$0xff]  ;;  %v3484_v58 = vld [vmem:[#allocation2 + $0x420] sm:$0xff] }
 0x87a   :  { %5083 = vmatpush1.bf16.msra.mxu0 %v3388_v3  ;;  %5411 = vmatpush1.bf16.msra.mxu1 %v3390_v43  ;;  %v3486_v3 = vld [vmem:[#allocation2 + $0x430] sm:$0xff]  ;;  %v3493_v43 = vld [vmem:[#allocation2 + $0x468] sm:$0xff] }
 0x87b   :  { %5084 = vmatprep.subr.bf16.mxu0 %v3397_v13  ;;  %5412 = vmatprep.subr.bf16.mxu1 %v3399_v0  ;;  %v3495_v13 = vld [vmem:[#allocation2 + $0x478] sm:$0xff]  ;;  %v3492_v0 = vld [vmem:[#allocation2 + $0x460] sm:$0xff] }
 0x87e   :  { %5085 = vmatpush1.bf16.msra.mxu0 %v3396_v4  ;;  %5413 = vmatpush1.bf16.msra.mxu1 %v3398_v10  ;;  %v3494_v4 = vld [vmem:[#allocation2 + $0x470] sm:$0xff]  ;;  %v3501_v10 = vld [vmem:[#allocation2 + $0x4a8] sm:$0xff] }
 0x87f   :  { %5086 = vmatprep.subr.bf16.mxu0 %v3405_v33  ;;  %5414 = vmatprep.subr.bf16.mxu1 %v3407_v24  ;;  %v3503_v33 = vld [vmem:[#allocation2 + $0x4b8] sm:$0xff]  ;;  %v3500_v24 = vld [vmem:[#allocation2 + $0x4a0] sm:$0xff] }
 0x882   :  { %5087 = vmatpush1.bf16.msra.mxu0 %v3404_v1  ;;  %5415 = vmatpush1.bf16.msra.mxu1 %v3406_v2  ;;  %v3502_v1 = vld [vmem:[#allocation2 + $0x4b0] sm:$0xff]  ;;  %v3509_v2 = vld [vmem:[#allocation2 + $0x4e8] sm:$0xff] }
 0x883   :  { %5088 = vmatprep.subr.bf16.mxu0 %v3413_v11  ;;  %5416 = vmatprep.subr.bf16.mxu1 %v3415_v53  ;;  %v3508_v11 = vld [vmem:[#allocation2 + $0x4e0] sm:$0xff]  ;;  %v3510_v53 = vld [vmem:[#allocation2 + $0x4f0] sm:$0xff] }
 0x886   :  { %5089 = vmatpush1.bf16.msra.mxu0 %v3412_v27  ;;  %5417 = vmatpush1.bf16.msra.mxu1 %v3414_v63  ;;  %v3517_v27 = vld [vmem:[#allocation2 + $0x528] sm:$0xff]  ;;  %v3519_v63 = vld [vmem:[#allocation2 + $0x538] sm:$0xff] }
 0x887   :  { %5090 = vmatprep.subr.bf16.mxu0 %v3421_v42  ;;  %5418 = vmatprep.subr.bf16.mxu1 %v3423_v54  ;;  %v3518_v42 = vld [vmem:[#allocation2 + $0x530] sm:$0xff]  ;;  %v3525_v54 = vld [vmem:[#allocation2 + $0x568] sm:$0xff] }
 0x88a   :  { %5091 = vmatpush1.bf16.msra.mxu0 %v3420_v40  ;;  %5419 = vmatpush1.bf16.msra.mxu1 %v3422_v52  ;;  %v3527_v40 = vld [vmem:[#allocation2 + $0x578] sm:$0xff]  ;;  %v3524_v52 = vld [vmem:[#allocation2 + $0x560] sm:$0xff] }
 0x88b   :  { %5092 = vmatprep.subr.bf16.mxu0 %v3429_v15  ;;  %5420 = vmatprep.subr.bf16.mxu1 %v3431_v46  ;;  %v3526_v15 = vld [vmem:[#allocation2 + $0x570] sm:$0xff]  ;;  %v3533_v46 = vld [vmem:[#allocation2 + $0x5a8] sm:$0xff] }
 0x88e   :  { %5093 = vmatpush1.bf16.msra.mxu0 %v3428_v35  ;;  %5421 = vmatpush1.bf16.msra.mxu1 %v3430_v57  ;;  %v3535_v35 = vld [vmem:[#allocation2 + $0x5b8] sm:$0xff]  ;;  %v3532_v57 = vld [vmem:[#allocation2 + $0x5a0] sm:$0xff] }
 0x88f   :  { %5094 = vmatprep.subr.bf16.mxu0 %v3437_v37  ;;  %5422 = vmatprep.subr.bf16.mxu1 %v3439_v16  ;;  %v3534_v37 = vld [vmem:[#allocation2 + $0x5b0] sm:$0xff]  ;;  %v3541_v16 = vld [vmem:[#allocation2 + $0x5e8] sm:$0xff] }
 0x892   :  { %5095 = vmatpush1.bf16.msra.mxu0 %v3436_v30  ;;  %5423 = vmatpush1.bf16.msra.mxu1 %v3438_v25  ;;  %v3543_v30 = vld [vmem:[#allocation2 + $0x5f8] sm:$0xff]  ;;  %v3540_v25 = vld [vmem:[#allocation2 + $0x5e0] sm:$0xff] }
 0x893   :  { %5096 = vmatprep.subr.bf16.mxu0 %v3445_v7  ;;  %5424 = vmatprep.subr.bf16.mxu1 %v3447_v29  ;;  %v3542_v7 = vld [vmem:[#allocation2 + $0x5f0] sm:$0xff]  ;;  %v3549_v29 = vld [vmem:[#allocation2 + $0x628] sm:$0xff] }
 0x896   :  { %5097 = vmatpush1.bf16.msra.mxu0 %v3444_v36  ;;  %5425 = vmatpush1.bf16.msra.mxu1 %v3446_v9  ;;  %v3551_v36 = vld [vmem:[#allocation2 + $0x638] sm:$0xff]  ;;  %v3548_v9 = vld [vmem:[#allocation2 + $0x620] sm:$0xff] }
 0x897   :  { %5098 = vmatprep.subr.bf16.mxu0 %v3453_v12  ;;  %5426 = vmatprep.subr.bf16.mxu1 %v3455_v47  ;;  %v3550_v12 = vld [vmem:[#allocation2 + $0x630] sm:$0xff]  ;;  %v3557_v47 = vld [vmem:[#allocation2 + $0x668] sm:$0xff] }
 0x89a   :  { %5099 = vmatpush1.bf16.msra.mxu0 %v3452_v17  ;;  %5427 = vmatpush1.bf16.msra.mxu1 %v3454_v22  ;;  %v3559_v17 = vld [vmem:[#allocation2 + $0x678] sm:$0xff]  ;;  %v3556_v22 = vld [vmem:[#allocation2 + $0x660] sm:$0xff] }
 0x89b   :  { %5100 = vmatprep.subr.bf16.mxu0 %v3461_v62  ;;  %5428 = vmatprep.subr.bf16.mxu1 %v3463_v21  ;;  %v3558_v62 = vld [vmem:[#allocation2 + $0x670] sm:$0xff]  ;;  %v3565_v21 = vld [vmem:[#allocation2 + $0x6a8] sm:$0xff] }
 0x89e   :  { %5101 = vmatpush1.bf16.msra.mxu0 %v3460_v48  ;;  %5429 = vmatpush1.bf16.msra.mxu1 %v3462_v41  ;;  %v3567_v48 = vld [vmem:[#allocation2 + $0x6b8] sm:$0xff]  ;;  %v3564_v41 = vld [vmem:[#allocation2 + $0x6a0] sm:$0xff] }
 0x89f   :  { %5102 = vmatprep.subr.bf16.mxu0 %v3469_v18  ;;  %5430 = vmatprep.subr.bf16.mxu1 %v3471_v49  ;;  %v3566_v18 = vld [vmem:[#allocation2 + $0x6b0] sm:$0xff]  ;;  %v3573_v49 = vld [vmem:[#allocation2 + $0x6e8] sm:$0xff] }
 0x8a2   :  { %5103 = vmatpush1.bf16.msra.mxu0 %v3468_v8  ;;  %5431 = vmatpush1.bf16.msra.mxu1 %v3470_v20  ;;  %v3575_v8 = vld [vmem:[#allocation2 + $0x6f8] sm:$0xff]  ;;  %v3572_v20 = vld [vmem:[#allocation2 + $0x6e0] sm:$0xff] }
 0x8a3   :  { %5104 = vmatprep.subr.bf16.mxu0 %v3477_v44  ;;  %5432 = vmatprep.subr.bf16.mxu1 %v3479_v39  ;;  %v3574_v44 = vld [vmem:[#allocation2 + $0x6f0] sm:$0xff]  ;;  %v3581_v39 = vld [vmem:[#allocation2 + $0x728] sm:$0xff] }
 0x8a6   :  { %5105 = vmatpush1.bf16.msra.mxu0 %v3476_v31  ;;  %5433 = vmatpush1.bf16.msra.mxu1 %v3478_v32  ;;  %v3583_v31 = vld [vmem:[#allocation2 + $0x738] sm:$0xff]  ;;  %v3580_v32 = vld [vmem:[#allocation2 + $0x720] sm:$0xff] }
 0x8a7   :  { %5115 = vmatprep.subr.bf16.mxu0 %v3485_v26  ;;  %5443 = vmatprep.subr.bf16.mxu1 %v3487_v5  ;;  %v3582_v26 = vld [vmem:[#allocation2 + $0x730] sm:$0xff]  ;;  %v3589_v5 = vld [vmem:[#allocation2 + $0x768] sm:$0xff] }
 0x8a9   :  { %5107 = vmatmul.mubr.bf16.vlgmr.msra.gmra.mrb[60].mxu0 %v10538_v6  ;;  %5435 = vmatmul.mubr.bf16.vlgmr.msra.gmra.mrb[60].mxu1 %v10538_v6  ;;  %v3511_v6 = vld [vmem:[#allocation2 + $0x4f8] sm:$0xff] }
 0x8aa   :  { %5116 = vmatpush1.bf16.msra.mxu0 %v3484_v58  ;;  %5444 = vmatpush1.bf16.msra.mxu1 %v3486_v3  ;;  %v3591_v58 = vld [vmem:[#allocation2 + $0x778] sm:$0xff]  ;;  %v3588_v3 = vld [vmem:[#allocation2 + $0x760] sm:$0xff] }
 0x8ab   :  { %5117 = vmatprep.subr.bf16.mxu0 %v3493_v43  ;;  %5445 = vmatprep.subr.bf16.mxu1 %v3495_v13  ;;  %v3590_v43 = vld [vmem:[#allocation2 + $0x770] sm:$0xff]  ;;  %v3597_v13 = vld [vmem:[#allocation2 + $0x7a8] sm:$0xff] }
 0x8ac   :  { %5147 = vmatprep.mubr.bf16.mxu0 %v10543_v56  ;;  %5475 = vmatprep.mubr.bf16.mxu1 %v10543_v56  ;;  %v3516_v56 = vld [vmem:[#allocation2 + $0x520] sm:$0xff] }
 0x8ae   :  { %5118 = vmatpush1.bf16.msra.mxu0 %v3492_v0  ;;  %5446 = vmatpush1.bf16.msra.mxu1 %v3494_v4  ;;  %v3599_v0 = vld [vmem:[#allocation2 + $0x7b8] sm:$0xff]  ;;  %v3596_v4 = vld [vmem:[#allocation2 + $0x7a0] sm:$0xff] }
 0x8af   :  { %5119 = vmatprep.subr.bf16.mxu0 %v3501_v10  ;;  %5447 = vmatprep.subr.bf16.mxu1 %v3503_v33  ;;  %v3598_v10 = vld [vmem:[#allocation2 + $0x7b0] sm:$0xff]  ;;  %v3605_v33 = vld [vmem:[#allocation2 + $0x7e8] sm:$0xff] }
 0x8b2   :  { %5120 = vmatpush1.bf16.msra.mxu0 %v3500_v24  ;;  %5448 = vmatpush1.bf16.msra.mxu1 %v3502_v1  ;;  %v3607_v24 = vld [vmem:[#allocation2 + $0x7f8] sm:$0xff]  ;;  %v3604_v1 = vld [vmem:[#allocation2 + $0x7e0] sm:$0xff] }
 0x8b3   :  { %5121 = vmatprep.subr.bf16.mxu0 %v3509_v2  ;;  %5449 = vmatprep.subr.bf16.mxu1 %v3511_v6  ;;  %v3606_v2 = vld [vmem:[#allocation2 + $0x7f0] sm:$0xff]  ;;  %v3613_v6 = vld [vmem:[#allocation2 + $0x828] sm:$0xff] }
 0x8b6   :  { %5122 = vmatpush1.bf16.msra.mxu0 %v3508_v11  ;;  %5450 = vmatpush1.bf16.msra.mxu1 %v3510_v53  ;;  %v3615_v11 = vld [vmem:[#allocation2 + $0x838] sm:$0xff]  ;;  %v3612_v53 = vld [vmem:[#allocation2 + $0x820] sm:$0xff] }
 0x8b7   :  { %5123 = vmatprep.subr.bf16.mxu0 %v3517_v27  ;;  %5451 = vmatprep.subr.bf16.mxu1 %v3519_v63  ;;  %v3614_v27 = vld [vmem:[#allocation2 + $0x830] sm:$0xff]  ;;  %v3621_v63 = vld [vmem:[#allocation2 + $0x868] sm:$0xff] }
 0x8ba   :  { %5124 = vmatpush1.bf16.msra.mxu0 %v3516_v56  ;;  %5452 = vmatpush1.bf16.msra.mxu1 %v3518_v42  ;;  %v3623_v56 = vld [vmem:[#allocation2 + $0x878] sm:$0xff]  ;;  %v3620_v42 = vld [vmem:[#allocation2 + $0x860] sm:$0xff] }
 0x8bb   :  { %5125 = vmatprep.subr.bf16.mxu0 %v3525_v54  ;;  %5453 = vmatprep.subr.bf16.mxu1 %v3527_v40  ;;  %v3622_v54 = vld [vmem:[#allocation2 + $0x870] sm:$0xff]  ;;  %v3629_v40 = vld [vmem:[#allocation2 + $0x8a8] sm:$0xff] }
 0x8be   :  { %5126 = vmatpush1.bf16.msra.mxu0 %v3524_v52  ;;  %5454 = vmatpush1.bf16.msra.mxu1 %v3526_v15  ;;  %v3631_v52 = vld [vmem:[#allocation2 + $0x8b8] sm:$0xff]  ;;  %v3628_v15 = vld [vmem:[#allocation2 + $0x8a0] sm:$0xff] }
 0x8bf   :  { %5127 = vmatprep.subr.bf16.mxu0 %v3533_v46  ;;  %5455 = vmatprep.subr.bf16.mxu1 %v3535_v35  ;;  %v3630_v46 = vld [vmem:[#allocation2 + $0x8b0] sm:$0xff]  ;;  %v3637_v35 = vld [vmem:[#allocation2 + $0x8e8] sm:$0xff] }
 0x8c2   :  { %5128 = vmatpush1.bf16.msra.mxu0 %v3532_v57  ;;  %5456 = vmatpush1.bf16.msra.mxu1 %v3534_v37  ;;  %v3636_v57 = vld [vmem:[#allocation2 + $0x8e0] sm:$0xff]  ;;  %v3638_v37 = vld [vmem:[#allocation2 + $0x8f0] sm:$0xff] }
 0x8c3   :  { %5129 = vmatprep.subr.bf16.mxu0 %v3541_v16  ;;  %5457 = vmatprep.subr.bf16.mxu1 %v3543_v30  ;;  %v3645_v16 = vld [vmem:[#allocation2 + $0x928] sm:$0xff]  ;;  %v3647_v30 = vld [vmem:[#allocation2 + $0x938] sm:$0xff] }
 0x8c6   :  { %5130 = vmatpush1.bf16.msra.mxu0 %v3540_v25  ;;  %5458 = vmatpush1.bf16.msra.mxu1 %v3542_v7  ;;  %v3646_v25 = vld [vmem:[#allocation2 + $0x930] sm:$0xff]  ;;  %v3653_v7 = vld [vmem:[#allocation2 + $0x968] sm:$0xff] }
 0x8c7   :  { %5131 = vmatprep.subr.bf16.mxu0 %v3549_v29  ;;  %5459 = vmatprep.subr.bf16.mxu1 %v3551_v36  ;;  %v3655_v29 = vld [vmem:[#allocation2 + $0x978] sm:$0xff]  ;;  %v3652_v36 = vld [vmem:[#allocation2 + $0x960] sm:$0xff] }
 0x8ca   :  { %5132 = vmatpush1.bf16.msra.mxu0 %v3548_v9  ;;  %5460 = vmatpush1.bf16.msra.mxu1 %v3550_v12  ;;  %v3654_v9 = vld [vmem:[#allocation2 + $0x970] sm:$0xff]  ;;  %v3661_v12 = vld [vmem:[#allocation2 + $0x9a8] sm:$0xff] }
 0x8cb   :  { %5133 = vmatprep.subr.bf16.mxu0 %v3557_v47  ;;  %5461 = vmatprep.subr.bf16.mxu1 %v3559_v17  ;;  %v3663_v47 = vld [vmem:[#allocation2 + $0x9b8] sm:$0xff]  ;;  %v3660_v17 = vld [vmem:[#allocation2 + $0x9a0] sm:$0xff] }
 0x8ce   :  { %5134 = vmatpush1.bf16.msra.mxu0 %v3556_v22  ;;  %5462 = vmatpush1.bf16.msra.mxu1 %v3558_v62  ;;  %v3662_v22 = vld [vmem:[#allocation2 + $0x9b0] sm:$0xff]  ;;  %v3669_v62 = vld [vmem:[#allocation2 + $0x9e8] sm:$0xff] }
 0x8cf   :  { %5135 = vmatprep.subr.bf16.mxu0 %v3565_v21  ;;  %5463 = vmatprep.subr.bf16.mxu1 %v3567_v48  ;;  %v3671_v21 = vld [vmem:[#allocation2 + $0x9f8] sm:$0xff]  ;;  %v3668_v48 = vld [vmem:[#allocation2 + $0x9e0] sm:$0xff] }
 0x8d2   :  { %5136 = vmatpush1.bf16.msra.mxu0 %v3564_v41  ;;  %5464 = vmatpush1.bf16.msra.mxu1 %v3566_v18  ;;  %v3670_v41 = vld [vmem:[#allocation2 + $0x9f0] sm:$0xff]  ;;  %v3677_v18 = vld [vmem:[#allocation2 + $0xa28] sm:$0xff] }
 0x8d3   :  { %5137 = vmatprep.subr.bf16.mxu0 %v3573_v49  ;;  %5465 = vmatprep.subr.bf16.mxu1 %v3575_v8  ;;  %v3679_v49 = vld [vmem:[#allocation2 + $0xa38] sm:$0xff]  ;;  %v3676_v8 = vld [vmem:[#allocation2 + $0xa20] sm:$0xff] }
 0x8d6   :  { %5138 = vmatpush1.bf16.msra.mxu0 %v3572_v20  ;;  %5466 = vmatpush1.bf16.msra.mxu1 %v3574_v44  ;;  %v3678_v20 = vld [vmem:[#allocation2 + $0xa30] sm:$0xff]  ;;  %v3685_v44 = vld [vmem:[#allocation2 + $0xa68] sm:$0xff] }
 0x8d7   :  { %5139 = vmatprep.subr.bf16.mxu0 %v3581_v39  ;;  %5467 = vmatprep.subr.bf16.mxu1 %v3583_v31  ;;  %v3687_v39 = vld [vmem:[#allocation2 + $0xa78] sm:$0xff]  ;;  %v3684_v31 = vld [vmem:[#allocation2 + $0xa60] sm:$0xff] }
 0x8da   :  { %5140 = vmatpush1.bf16.msra.mxu0 %v3580_v32  ;;  %5468 = vmatpush1.bf16.msra.mxu1 %v3582_v26  ;;  %v3686_v32 = vld [vmem:[#allocation2 + $0xa70] sm:$0xff]  ;;  %v3693_v26 = vld [vmem:[#allocation2 + $0xaa8] sm:$0xff] }
 0x8db   :  { %5141 = vmatprep.subr.bf16.mxu0 %v3589_v5  ;;  %5469 = vmatprep.subr.bf16.mxu1 %v3591_v58  ;;  %v3695_v5 = vld [vmem:[#allocation2 + $0xab8] sm:$0xff]  ;;  %v3692_v58 = vld [vmem:[#allocation2 + $0xaa0] sm:$0xff] }
 0x8de   :  { %5142 = vmatpush1.bf16.msra.mxu0 %v3588_v3  ;;  %5470 = vmatpush1.bf16.msra.mxu1 %v3590_v43  ;;  %v3694_v3 = vld [vmem:[#allocation2 + $0xab0] sm:$0xff]  ;;  %v3701_v43 = vld [vmem:[#allocation2 + $0xae8] sm:$0xff] }
 0x8df   :  { %5143 = vmatprep.subr.bf16.mxu0 %v3597_v13  ;;  %5471 = vmatprep.subr.bf16.mxu1 %v3599_v0  ;;  %v3703_v13 = vld [vmem:[#allocation2 + $0xaf8] sm:$0xff]  ;;  %v3700_v0 = vld [vmem:[#allocation2 + $0xae0] sm:$0xff] }
 0x8e2   :  { %5144 = vmatpush1.bf16.msra.mxu0 %v3596_v4  ;;  %5472 = vmatpush1.bf16.msra.mxu1 %v3598_v10  ;;  %v3702_v4 = vld [vmem:[#allocation2 + $0xaf0] sm:$0xff]  ;;  %v3709_v10 = vld [vmem:[#allocation2 + $0xb28] sm:$0xff] }
 0x8e3   :  { %5145 = vmatprep.subr.bf16.mxu0 %v3605_v33  ;;  %5473 = vmatprep.subr.bf16.mxu1 %v3607_v24  ;;  %v3711_v33 = vld [vmem:[#allocation2 + $0xb38] sm:$0xff]  ;;  %v3708_v24 = vld [vmem:[#allocation2 + $0xb20] sm:$0xff] }
 0x8e6   :  { %5146 = vmatpush1.bf16.msra.mxu0 %v3604_v1  ;;  %5474 = vmatpush1.bf16.msra.mxu1 %v3606_v2  ;;  %v3710_v1 = vld [vmem:[#allocation2 + $0xb30] sm:$0xff]  ;;  %v3717_v2 = vld [vmem:[#allocation2 + $0xb68] sm:$0xff] }
 0x8e7   :  { %5156 = vmatprep.subr.bf16.mxu0 %v3613_v6  ;;  %5484 = vmatprep.subr.bf16.mxu1 %v3615_v11  ;;  %v3719_v6 = vld [vmem:[#allocation2 + $0xb78] sm:$0xff]  ;;  %v3716_v11 = vld [vmem:[#allocation2 + $0xb60] sm:$0xff] }
 0x8e9   :  { %5148 = vmatmul.mubr.bf16.vlgmr.msra.gmra.mrb[60].mxu0 %v10552_v59  ;;  %5476 = vmatmul.mubr.bf16.vlgmr.msra.gmra.mrb[60].mxu1 %v10552_v59  ;;  %v3639_v59 = vld [vmem:[#allocation2 + $0x8f8] sm:$0xff] }
 0x8ea   :  { %5157 = vmatpush1.bf16.msra.mxu0 %v3612_v53  ;;  %5485 = vmatpush1.bf16.msra.mxu1 %v3614_v27  ;;  %v3718_v53 = vld [vmem:[#allocation2 + $0xb70] sm:$0xff]  ;;  %v3725_v27 = vld [vmem:[#allocation2 + $0xba8] sm:$0xff] }
 0x8eb   :  { %5158 = vmatprep.subr.bf16.mxu0 %v3621_v63  ;;  %5486 = vmatprep.subr.bf16.mxu1 %v3623_v56  ;;  %v3727_v63 = vld [vmem:[#allocation2 + $0xbb8] sm:$0xff]  ;;  %v3724_v56 = vld [vmem:[#allocation2 + $0xba0] sm:$0xff] }
 0x8ec   :  { %5188 = vmatprep.mubr.bf16.mxu0 %v10557_v19  ;;  %5516 = vmatprep.mubr.bf16.mxu1 %v10557_v19  ;;  %v3644_v19 = vld [vmem:[#allocation2 + $0x920] sm:$0xff] }
 0x8ee   :  { %5159 = vmatpush1.bf16.msra.mxu0 %v3620_v42  ;;  %5487 = vmatpush1.bf16.msra.mxu1 %v3622_v54  ;;  %v3726_v42 = vld [vmem:[#allocation2 + $0xbb0] sm:$0xff]  ;;  %v3733_v54 = vld [vmem:[#allocation2 + $0xbe8] sm:$0xff] }
 0x8ef   :  { %5160 = vmatprep.subr.bf16.mxu0 %v3629_v40  ;;  %5488 = vmatprep.subr.bf16.mxu1 %v3631_v52  ;;  %v3735_v40 = vld [vmem:[#allocation2 + $0xbf8] sm:$0xff]  ;;  %v3732_v52 = vld [vmem:[#allocation2 + $0xbe0] sm:$0xff] }
 0x8f2   :  { %5161 = vmatpush1.bf16.msra.mxu0 %v3628_v15  ;;  %5489 = vmatpush1.bf16.msra.mxu1 %v3630_v46  ;;  %v3734_v15 = vld [vmem:[#allocation2 + $0xbf0] sm:$0xff]  ;;  %v3741_v46 = vld [vmem:[#allocation2 + $0xc28] sm:$0xff] }
 0x8f3   :  { %5162 = vmatprep.subr.bf16.mxu0 %v3637_v35  ;;  %5490 = vmatprep.subr.bf16.mxu1 %v3639_v59  ;;  %v3743_v35 = vld [vmem:[#allocation2 + $0xc38] sm:$0xff]  ;;  %v3740_v59 = vld [vmem:[#allocation2 + $0xc20] sm:$0xff] }
 0x8f6   :  { %5163 = vmatpush1.bf16.msra.mxu0 %v3636_v57  ;;  %5491 = vmatpush1.bf16.msra.mxu1 %v3638_v37  ;;  %v3742_v57 = vld [vmem:[#allocation2 + $0xc30] sm:$0xff]  ;;  %v3749_v37 = vld [vmem:[#allocation2 + $0xc68] sm:$0xff] }
 0x8f7   :  { %5164 = vmatprep.subr.bf16.mxu0 %v3645_v16  ;;  %5492 = vmatprep.subr.bf16.mxu1 %v3647_v30  ;;  %v3751_v16 = vld [vmem:[#allocation2 + $0xc78] sm:$0xff]  ;;  %v3748_v30 = vld [vmem:[#allocation2 + $0xc60] sm:$0xff] }
 0x8fa   :  { %5165 = vmatpush1.bf16.msra.mxu0 %v3644_v19  ;;  %5493 = vmatpush1.bf16.msra.mxu1 %v3646_v25  ;;  %v3750_v19 = vld [vmem:[#allocation2 + $0xc70] sm:$0xff]  ;;  %v3757_v25 = vld [vmem:[#allocation2 + $0xca8] sm:$0xff] }
 0x8fb   :  { %5166 = vmatprep.subr.bf16.mxu0 %v3653_v7  ;;  %5494 = vmatprep.subr.bf16.mxu1 %v3655_v29  ;;  %v3759_v7 = vld [vmem:[#allocation2 + $0xcb8] sm:$0xff]  ;;  %v3756_v29 = vld [vmem:[#allocation2 + $0xca0] sm:$0xff] }
 0x8fe   :  { %5167 = vmatpush1.bf16.msra.mxu0 %v3652_v36  ;;  %5495 = vmatpush1.bf16.msra.mxu1 %v3654_v9  ;;  %v3758_v36 = vld [vmem:[#allocation2 + $0xcb0] sm:$0xff]  ;;  %v3765_v9 = vld [vmem:[#allocation2 + $0xce8] sm:$0xff] }
 0x8ff   :  { %5168 = vmatprep.subr.bf16.mxu0 %v3661_v12  ;;  %5496 = vmatprep.subr.bf16.mxu1 %v3663_v47  ;;  %v3764_v12 = vld [vmem:[#allocation2 + $0xce0] sm:$0xff]  ;;  %v3766_v47 = vld [vmem:[#allocation2 + $0xcf0] sm:$0xff] }
 0x902   :  { %5169 = vmatpush1.bf16.msra.mxu0 %v3660_v17  ;;  %5497 = vmatpush1.bf16.msra.mxu1 %v3662_v22  ;;  %v3773_v17 = vld [vmem:[#allocation2 + $0xd28] sm:$0xff]  ;;  %v3775_v22 = vld [vmem:[#allocation2 + $0xd38] sm:$0xff] }
 0x903   :  { %5170 = vmatprep.subr.bf16.mxu0 %v3669_v62  ;;  %5498 = vmatprep.subr.bf16.mxu1 %v3671_v21  ;;  %v3774_v62 = vld [vmem:[#allocation2 + $0xd30] sm:$0xff]  ;;  %v3781_v21 = vld [vmem:[#allocation2 + $0xd68] sm:$0xff] }
 0x906   :  { %5171 = vmatpush1.bf16.msra.mxu0 %v3668_v48  ;;  %5499 = vmatpush1.bf16.msra.mxu1 %v3670_v41  ;;  %v3783_v48 = vld [vmem:[#allocation2 + $0xd78] sm:$0xff]  ;;  %v3780_v41 = vld [vmem:[#allocation2 + $0xd60] sm:$0xff] }
 0x907   :  { %5172 = vmatprep.subr.bf16.mxu0 %v3677_v18  ;;  %5500 = vmatprep.subr.bf16.mxu1 %v3679_v49  ;;  %v3782_v18 = vld [vmem:[#allocation2 + $0xd70] sm:$0xff] }
 0x90a   :  { %5173 = vmatpush1.bf16.msra.mxu0 %v3676_v8  ;;  %5501 = vmatpush1.bf16.msra.mxu1 %v3678_v20  ;;  %v3789_v20 = vld [vmem:[#allocation2 + $0xda8] sm:$0xff] }
 0x90b   :  { %5174 = vmatprep.subr.bf16.mxu0 %v3685_v44  ;;  %5502 = vmatprep.subr.bf16.mxu1 %v3687_v39  ;;  %v3791_v44 = vld [vmem:[#allocation2 + $0xdb8] sm:$0xff] }
 0x90e   :  { %5175 = vmatpush1.bf16.msra.mxu0 %v3684_v31  ;;  %5503 = vmatpush1.bf16.msra.mxu1 %v3686_v32 }
 0x90f   :  { %5176 = vmatprep.subr.bf16.mxu0 %v3693_v26  ;;  %5504 = vmatprep.subr.bf16.mxu1 %v3695_v5 }
 0x912   :  { %5177 = vmatpush1.bf16.msra.mxu0 %v3692_v58  ;;  %5505 = vmatpush1.bf16.msra.mxu1 %v3694_v3  ;;  %v3788_v3 = vld [vmem:[#allocation2 + $0xda0] sm:$0xff] }
 0x913   :  { %5178 = vmatprep.subr.bf16.mxu0 %v3701_v43  ;;  %5506 = vmatprep.subr.bf16.mxu1 %v3703_v13  ;;  %v3790_v43 = vld [vmem:[#allocation2 + $0xdb0] sm:$0xff]  ;;  %v3797_v13 = vld [vmem:[#allocation2 + $0xde8] sm:$0xff] }
 0x916   :  { %5179 = vmatpush1.bf16.msra.mxu0 %v3700_v0  ;;  %5507 = vmatpush1.bf16.msra.mxu1 %v3702_v4  ;;  %v3799_v0 = vld [vmem:[#allocation2 + $0xdf8] sm:$0xff]  ;;  %v3796_v4 = vld [vmem:[#allocation2 + $0xde0] sm:$0xff] }
 0x917   :  { %5180 = vmatprep.subr.bf16.mxu0 %v3709_v10  ;;  %5508 = vmatprep.subr.bf16.mxu1 %v3711_v33  ;;  %v3798_v10 = vld [vmem:[#allocation2 + $0xdf0] sm:$0xff]  ;;  %v3805_v33 = vld [vmem:[#allocation2 + $0xe28] sm:$0xff] }
 0x91a   :  { %5181 = vmatpush1.bf16.msra.mxu0 %v3708_v24  ;;  %5509 = vmatpush1.bf16.msra.mxu1 %v3710_v1  ;;  %v3807_v24 = vld [vmem:[#allocation2 + $0xe38] sm:$0xff]  ;;  %v3804_v1 = vld [vmem:[#allocation2 + $0xe20] sm:$0xff] }
 0x91b   :  { %5182 = vmatprep.subr.bf16.mxu0 %v3717_v2  ;;  %5510 = vmatprep.subr.bf16.mxu1 %v3719_v6  ;;  %v3806_v2 = vld [vmem:[#allocation2 + $0xe30] sm:$0xff]  ;;  %v3813_v6 = vld [vmem:[#allocation2 + $0xe68] sm:$0xff] }
 0x91e   :  { %5183 = vmatpush1.bf16.msra.mxu0 %v3716_v11  ;;  %5511 = vmatpush1.bf16.msra.mxu1 %v3718_v53  ;;  %v3815_v11 = vld [vmem:[#allocation2 + $0xe78] sm:$0xff]  ;;  %v3812_v53 = vld [vmem:[#allocation2 + $0xe60] sm:$0xff] }
 0x91f   :  { %5184 = vmatprep.subr.bf16.mxu0 %v3725_v27  ;;  %5512 = vmatprep.subr.bf16.mxu1 %v3727_v63  ;;  %v3814_v27 = vld [vmem:[#allocation2 + $0xe70] sm:$0xff]  ;;  %v3821_v63 = vld [vmem:[#allocation2 + $0xea8] sm:$0xff] }
 0x922   :  { %5185 = vmatpush1.bf16.msra.mxu0 %v3724_v56  ;;  %5513 = vmatpush1.bf16.msra.mxu1 %v3726_v42  ;;  %v3823_v56 = vld [vmem:[#allocation2 + $0xeb8] sm:$0xff]  ;;  %v3820_v42 = vld [vmem:[#allocation2 + $0xea0] sm:$0xff] }
 0x923   :  { %5186 = vmatprep.subr.bf16.mxu0 %v3733_v54  ;;  %5514 = vmatprep.subr.bf16.mxu1 %v3735_v40  ;;  %v3822_v54 = vld [vmem:[#allocation2 + $0xeb0] sm:$0xff]  ;;  %v3829_v40 = vld [vmem:[#allocation2 + $0xee8] sm:$0xff] }
 0x926   :  { %5187 = vmatpush1.bf16.msra.mxu0 %v3732_v52  ;;  %5515 = vmatpush1.bf16.msra.mxu1 %v3734_v15  ;;  %v3831_v52 = vld [vmem:[#allocation2 + $0xef8] sm:$0xff]  ;;  %v3828_v15 = vld [vmem:[#allocation2 + $0xee0] sm:$0xff] }
 0x927   :  { %5197 = vmatprep.subr.bf16.mxu0 %v3741_v46  ;;  %5525 = vmatprep.subr.bf16.mxu1 %v3743_v35  ;;  %v3830_v46 = vld [vmem:[#allocation2 + $0xef0] sm:$0xff]  ;;  %v3837_v35 = vld [vmem:[#allocation2 + $0xf28] sm:$0xff] }
 0x929   :  { %5189 = vmatmul.mubr.bf16.vlgmr.msra.gmra.mrb[60].mxu0 %v10565_v45  ;;  %5517 = vmatmul.mubr.bf16.vlgmr.msra.gmra.mrb[60].mxu1 %v10565_v45  ;;  %v3767_v45 = vld [vmem:[#allocation2 + $0xcf8] sm:$0xff] }
 0x92a   :  { %5198 = vmatpush1.bf16.msra.mxu0 %v3740_v59  ;;  %5526 = vmatpush1.bf16.msra.mxu1 %v3742_v57  ;;  %v3839_v59 = vld [vmem:[#allocation2 + $0xf38] sm:$0xff]  ;;  %v3836_v57 = vld [vmem:[#allocation2 + $0xf20] sm:$0xff] }
 0x92b   :  { %5199 = vmatprep.subr.bf16.mxu0 %v3749_v37  ;;  %5527 = vmatprep.subr.bf16.mxu1 %v3751_v16  ;;  %v3838_v37 = vld [vmem:[#allocation2 + $0xf30] sm:$0xff]  ;;  %v3845_v16 = vld [vmem:[#allocation2 + $0xf68] sm:$0xff] }
 0x92c   :  { %5229 = vmatprep.mubr.bf16.mxu0 %v10570_v55  ;;  %5557 = vmatprep.mubr.bf16.mxu1 %v10570_v55  ;;  %v3772_v55 = vld [vmem:[#allocation2 + $0xd20] sm:$0xff] }
 0x92e   :  { %5200 = vmatpush1.bf16.msra.mxu0 %v3748_v30  ;;  %5528 = vmatpush1.bf16.msra.mxu1 %v3750_v19  ;;  %v3847_v30 = vld [vmem:[#allocation2 + $0xf78] sm:$0xff]  ;;  %v3844_v19 = vld [vmem:[#allocation2 + $0xf60] sm:$0xff] }
 0x92f   :  { %5201 = vmatprep.subr.bf16.mxu0 %v3757_v25  ;;  %5529 = vmatprep.subr.bf16.mxu1 %v3759_v7  ;;  %v3846_v25 = vld [vmem:[#allocation2 + $0xf70] sm:$0xff]  ;;  %v3853_v7 = vld [vmem:[#allocation2 + $0xfa8] sm:$0xff] }
 0x932   :  { %5202 = vmatpush1.bf16.msra.mxu0 %v3756_v29  ;;  %5530 = vmatpush1.bf16.msra.mxu1 %v3758_v36  ;;  %v3855_v29 = vld [vmem:[#allocation2 + $0xfb8] sm:$0xff]  ;;  %v3852_v36 = vld [vmem:[#allocation2 + $0xfa0] sm:$0xff] }
 0x933   :  { %5203 = vmatprep.subr.bf16.mxu0 %v3765_v9  ;;  %5531 = vmatprep.subr.bf16.mxu1 %v3767_v45  ;;  %v3854_v9 = vld [vmem:[#allocation2 + $0xfb0] sm:$0xff]  ;;  %v3861_v45 = vld [vmem:[#allocation2 + $0xfe8] sm:$0xff] }
 0x936   :  { %5204 = vmatpush1.bf16.msra.mxu0 %v3764_v12  ;;  %5532 = vmatpush1.bf16.msra.mxu1 %v3766_v47  ;;  %v3863_v12 = vld [vmem:[#allocation2 + $0xff8] sm:$0xff]  ;;  %v3860_v47 = vld [vmem:[#allocation2 + $0xfe0] sm:$0xff] }
 0x937   :  { %5205 = vmatprep.subr.bf16.mxu0 %v3773_v17  ;;  %5533 = vmatprep.subr.bf16.mxu1 %v3775_v22  ;;  %v3862_v17 = vld [vmem:[#allocation2 + $0xff0] sm:$0xff]  ;;  %v3869_v22 = vld [vmem:[#allocation2 + $0x1028] sm:$0xff] }
 0x93a   :  { %5206 = vmatpush1.bf16.msra.mxu0 %v3772_v55  ;;  %5534 = vmatpush1.bf16.msra.mxu1 %v3774_v62  ;;  %v3871_v55 = vld [vmem:[#allocation2 + $0x1038] sm:$0xff]  ;;  %v3868_v62 = vld [vmem:[#allocation2 + $0x1020] sm:$0xff] }
 0x93b   :  { %5207 = vmatprep.subr.bf16.mxu0 %v3781_v21  ;;  %5535 = vmatprep.subr.bf16.mxu1 %v3783_v48  ;;  %v3870_v21 = vld [vmem:[#allocation2 + $0x1030] sm:$0xff]  ;;  %v3877_v48 = vld [vmem:[#allocation2 + $0x1068] sm:$0xff] }
 0x93c   :  { %v10651_v49 = vpop.f32.mrb[56].mxu0  ;;  %v10653_v8 = vpop.f32.mrb[56].mxu1 }
 0x93d   :  { %v10655_v39 = vpop.f32.mrb[57].mxu0  ;;  %v10657_v31 = vpop.f32.mrb[57].mxu1 }
 0x93e   :  { %v4743_v32 = vpop.f32.mrb[58].mxu0  ;;  %v5071_v26 = vpop.f32.mrb[58].mxu1  ;;  %5208 = vmatpush1.bf16.msra.mxu0 %v3780_v41  ;;  %5536 = vmatpush1.bf16.msra.mxu1 %v3782_v18  ;;  %v3879_v41 = vld [vmem:[#allocation2 + $0x1078] sm:$0xff]  ;;  %v3876_v18 = vld [vmem:[#allocation2 + $0x1060] sm:$0xff] }
 0x93f   :  { %v4744_v5 = vpop.f32.mrb[59].mxu0  ;;  %v5072_v58 = vpop.f32.mrb[59].mxu1  ;;  %5209 = vmatprep.subr.bf16.mxu0 %v3789_v20  ;;  %5537 = vmatprep.subr.bf16.mxu1 %v3791_v44  ;;  %v3878_v20 = vld [vmem:[#allocation2 + $0x1070] sm:$0xff]  ;;  %v3885_v44 = vld [vmem:[#allocation2 + $0x10a8] sm:$0xff]  ;;  %v3887_v32 = vld [vmem:[#allocation2 + $0x10b8] sm:$0xff] }
 0x940   :  { %v3884_v26 = vld [vmem:[#allocation2 + $0x10a0] sm:$0xff]  ;;  %v3886_v5 = vld [vmem:[#allocation2 + $0x10b0] sm:$0xff]  ;;  %v3893_v58 = vld [vmem:[#allocation2 + $0x10e8] sm:$0xff] }
 0x942   :  { %5210 = vmatpush1.bf16.msra.mxu0 %v3788_v3  ;;  %5538 = vmatpush1.bf16.msra.mxu1 %v3790_v43  ;;  %v3892_v3 = vld [vmem:[#allocation2 + $0x10e0] sm:$0xff]  ;;  %v3894_v43 = vld [vmem:[#allocation2 + $0x10f0] sm:$0xff] }
 0x943   :  { %5211 = vmatprep.subr.bf16.mxu0 %v3797_v13  ;;  %5539 = vmatprep.subr.bf16.mxu1 %v3799_v0  ;;  %v3901_v13 = vld [vmem:[#allocation2 + $0x1128] sm:$0xff]  ;;  %v3903_v0 = vld [vmem:[#allocation2 + $0x1138] sm:$0xff] }
 0x946   :  { %5212 = vmatpush1.bf16.msra.mxu0 %v3796_v4  ;;  %5540 = vmatpush1.bf16.msra.mxu1 %v3798_v10  ;;  %v3902_v4 = vld [vmem:[#allocation2 + $0x1130] sm:$0xff]  ;;  %v3909_v10 = vld [vmem:[#allocation2 + $0x1168] sm:$0xff] }
 0x947   :  { %5213 = vmatprep.subr.bf16.mxu0 %v3805_v33  ;;  %5541 = vmatprep.subr.bf16.mxu1 %v3807_v24  ;;  %v3911_v33 = vld [vmem:[#allocation2 + $0x1178] sm:$0xff]  ;;  %v3908_v24 = vld [vmem:[#allocation2 + $0x1160] sm:$0xff] }
 0x94a   :  { %5214 = vmatpush1.bf16.msra.mxu0 %v3804_v1  ;;  %5542 = vmatpush1.bf16.msra.mxu1 %v3806_v2  ;;  %v3910_v1 = vld [vmem:[#allocation2 + $0x1170] sm:$0xff]  ;;  %v3917_v2 = vld [vmem:[#allocation2 + $0x11a8] sm:$0xff] }
 0x94b   :  { %5215 = vmatprep.subr.bf16.mxu0 %v3813_v6  ;;  %5543 = vmatprep.subr.bf16.mxu1 %v3815_v11  ;;  %v3919_v6 = vld [vmem:[#allocation2 + $0x11b8] sm:$0xff]  ;;  %v3916_v11 = vld [vmem:[#allocation2 + $0x11a0] sm:$0xff] }
 0x94e   :  { %5216 = vmatpush1.bf16.msra.mxu0 %v3812_v53  ;;  %5544 = vmatpush1.bf16.msra.mxu1 %v3814_v27  ;;  %v3918_v53 = vld [vmem:[#allocation2 + $0x11b0] sm:$0xff]  ;;  %v3925_v27 = vld [vmem:[#allocation2 + $0x11e8] sm:$0xff] }
 0x94f   :  { %5217 = vmatprep.subr.bf16.mxu0 %v3821_v63  ;;  %5545 = vmatprep.subr.bf16.mxu1 %v3823_v56  ;;  %v3927_v63 = vld [vmem:[#allocation2 + $0x11f8] sm:$0xff]  ;;  %v3924_v56 = vld [vmem:[#allocation2 + $0x11e0] sm:$0xff] }
 0x952   :  { %5218 = vmatpush1.bf16.msra.mxu0 %v3820_v42  ;;  %5546 = vmatpush1.bf16.msra.mxu1 %v3822_v54  ;;  %v3926_v42 = vld [vmem:[#allocation2 + $0x11f0] sm:$0xff]  ;;  %v3933_v54 = vld [vmem:[#allocation2 + $0x1228] sm:$0xff] }
 0x953   :  { %5219 = vmatprep.subr.bf16.mxu0 %v3829_v40  ;;  %5547 = vmatprep.subr.bf16.mxu1 %v3831_v52  ;;  %v3935_v40 = vld [vmem:[#allocation2 + $0x1238] sm:$0xff]  ;;  %v3932_v52 = vld [vmem:[#allocation2 + $0x1220] sm:$0xff] }
 0x956   :  { %5220 = vmatpush1.bf16.msra.mxu0 %v3828_v15  ;;  %5548 = vmatpush1.bf16.msra.mxu1 %v3830_v46  ;;  %v3934_v15 = vld [vmem:[#allocation2 + $0x1230] sm:$0xff]  ;;  %v3941_v46 = vld [vmem:[#allocation2 + $0x1268] sm:$0xff] }
 0x957   :  { %5221 = vmatprep.subr.bf16.mxu0 %v3837_v35  ;;  %5549 = vmatprep.subr.bf16.mxu1 %v3839_v59  ;;  %v3943_v35 = vld [vmem:[#allocation2 + $0x1278] sm:$0xff]  ;;  %v3940_v59 = vld [vmem:[#allocation2 + $0x1260] sm:$0xff] }
 0x95a   :  { %5222 = vmatpush1.bf16.msra.mxu0 %v3836_v57  ;;  %5550 = vmatpush1.bf16.msra.mxu1 %v3838_v37  ;;  %v3942_v57 = vld [vmem:[#allocation2 + $0x1270] sm:$0xff]  ;;  %v3949_v37 = vld [vmem:[#allocation2 + $0x12a8] sm:$0xff] }
 0x95b   :  { %5223 = vmatprep.subr.bf16.mxu0 %v3845_v16  ;;  %5551 = vmatprep.subr.bf16.mxu1 %v3847_v30  ;;  %v3951_v16 = vld [vmem:[#allocation2 + $0x12b8] sm:$0xff]  ;;  %v3948_v30 = vld [vmem:[#allocation2 + $0x12a0] sm:$0xff] }
 0x95e   :  { %5224 = vmatpush1.bf16.msra.mxu0 %v3844_v19  ;;  %5552 = vmatpush1.bf16.msra.mxu1 %v3846_v25  ;;  %v3950_v19 = vld [vmem:[#allocation2 + $0x12b0] sm:$0xff]  ;;  %v3957_v25 = vld [vmem:[#allocation2 + $0x12e8] sm:$0xff] }
 0x95f   :  { %5225 = vmatprep.subr.bf16.mxu0 %v3853_v7  ;;  %5553 = vmatprep.subr.bf16.mxu1 %v3855_v29  ;;  %v3959_v7 = vld [vmem:[#allocation2 + $0x12f8] sm:$0xff]  ;;  %v3956_v29 = vld [vmem:[#allocation2 + $0x12e0] sm:$0xff] }
 0x962   :  { %5226 = vmatpush1.bf16.msra.mxu0 %v3852_v36  ;;  %5554 = vmatpush1.bf16.msra.mxu1 %v3854_v9  ;;  %v3958_v36 = vld [vmem:[#allocation2 + $0x12f0] sm:$0xff]  ;;  %v3965_v9 = vld [vmem:[#allocation2 + $0x1328] sm:$0xff] }
 0x963   :  { %5227 = vmatprep.subr.bf16.mxu0 %v3861_v45  ;;  %5555 = vmatprep.subr.bf16.mxu1 %v3863_v12  ;;  %v3967_v45 = vld [vmem:[#allocation2 + $0x1338] sm:$0xff]  ;;  %v3964_v12 = vld [vmem:[#allocation2 + $0x1320] sm:$0xff] }
 0x966   :  { %5228 = vmatpush1.bf16.msra.mxu0 %v3860_v47  ;;  %5556 = vmatpush1.bf16.msra.mxu1 %v3862_v17  ;;  %v3966_v47 = vld [vmem:[#allocation2 + $0x1330] sm:$0xff]  ;;  %v3973_v17 = vld [vmem:[#allocation2 + $0x1368] sm:$0xff] }
 0x967   :  { %5238 = vmatprep.subr.bf16.mxu0 %v3869_v22  ;;  %5566 = vmatprep.subr.bf16.mxu1 %v3871_v55  ;;  %v3975_v22 = vld [vmem:[#allocation2 + $0x1378] sm:$0xff]  ;;  %v3972_v55 = vld [vmem:[#allocation2 + $0x1360] sm:$0xff] }
 0x969   :  { %5230 = vmatmul.mubr.bf16.vlgmr.msra.gmra.mrb[60].mxu0 %v10579_v28  ;;  %5558 = vmatmul.mubr.bf16.vlgmr.msra.gmra.mrb[60].mxu1 %v10579_v28  ;;  %v3895_v28 = vld [vmem:[#allocation2 + $0x10f8] sm:$0xff] }
 0x96a   :  { %5239 = vmatpush1.bf16.msra.mxu0 %v3868_v62  ;;  %5567 = vmatpush1.bf16.msra.mxu1 %v3870_v21  ;;  %v3974_v62 = vld [vmem:[#allocation2 + $0x1370] sm:$0xff]  ;;  %v3981_v21 = vld [vmem:[#allocation2 + $0x13a8] sm:$0xff] }
 0x96b   :  { %5240 = vmatprep.subr.bf16.mxu0 %v3877_v48  ;;  %5568 = vmatprep.subr.bf16.mxu1 %v3879_v41  ;;  %v3983_v48 = vld [vmem:[#allocation2 + $0x13b8] sm:$0xff]  ;;  %v3980_v41 = vld [vmem:[#allocation2 + $0x13a0] sm:$0xff] }
 0x96c   :  { %5270 = vmatprep.mubr.bf16.mxu0 %v10584_v50  ;;  %5598 = vmatprep.mubr.bf16.mxu1 %v10584_v50  ;;  %v3900_v50 = vld [vmem:[#allocation2 + $0x1120] sm:$0xff] }
 0x96e   :  { %5241 = vmatpush1.bf16.msra.mxu0 %v3876_v18  ;;  %5569 = vmatpush1.bf16.msra.mxu1 %v3878_v20  ;;  %v3982_v18 = vld [vmem:[#allocation2 + $0x13b0] sm:$0xff]  ;;  %v3989_v20 = vld [vmem:[#allocation2 + $0x13e8] sm:$0xff] }
 0x96f   :  { %5242 = vmatprep.subr.bf16.mxu0 %v3885_v44  ;;  %5570 = vmatprep.subr.bf16.mxu1 %v3887_v32  ;;  %v3991_v44 = vld [vmem:[#allocation2 + $0x13f8] sm:$0xff]  ;;  %v3988_v32 = vld [vmem:[#allocation2 + $0x13e0] sm:$0xff] }
 0x972   :  { %5243 = vmatpush1.bf16.msra.mxu0 %v3884_v26  ;;  %5571 = vmatpush1.bf16.msra.mxu1 %v3886_v5  ;;  %v3990_v26 = vld [vmem:[#allocation2 + $0x13f0] sm:$0xff]  ;;  %v3997_v5 = vld [vmem:[#allocation2 + $0x1428] sm:$0xff] }
 0x973   :  { %5244 = vmatprep.subr.bf16.mxu0 %v3893_v58  ;;  %5572 = vmatprep.subr.bf16.mxu1 %v3895_v28  ;;  %v3999_v58 = vld [vmem:[#allocation2 + $0x1438] sm:$0xff]  ;;  %v3996_v28 = vld [vmem:[#allocation2 + $0x1420] sm:$0xff] }
 0x976   :  { %5245 = vmatpush1.bf16.msra.mxu0 %v3892_v3  ;;  %5573 = vmatpush1.bf16.msra.mxu1 %v3894_v43  ;;  %v3998_v3 = vld [vmem:[#allocation2 + $0x1430] sm:$0xff]  ;;  %v4005_v43 = vld [vmem:[#allocation2 + $0x1468] sm:$0xff] }
 0x977   :  { %5246 = vmatprep.subr.bf16.mxu0 %v3901_v13  ;;  %5574 = vmatprep.subr.bf16.mxu1 %v3903_v0  ;;  %v4007_v13 = vld [vmem:[#allocation2 + $0x1478] sm:$0xff]  ;;  %v4004_v0 = vld [vmem:[#allocation2 + $0x1460] sm:$0xff] }
 0x97a   :  { %5247 = vmatpush1.bf16.msra.mxu0 %v3900_v50  ;;  %5575 = vmatpush1.bf16.msra.mxu1 %v3902_v4  ;;  %v4006_v50 = vld [vmem:[#allocation2 + $0x1470] sm:$0xff]  ;;  %v4013_v4 = vld [vmem:[#allocation2 + $0x14a8] sm:$0xff] }
 0x97b   :  { %5248 = vmatprep.subr.bf16.mxu0 %v3909_v10  ;;  %5576 = vmatprep.subr.bf16.mxu1 %v3911_v33  ;;  %v4015_v10 = vld [vmem:[#allocation2 + $0x14b8] sm:$0xff]  ;;  %v4012_v33 = vld [vmem:[#allocation2 + $0x14a0] sm:$0xff] }
 0x97e   :  { %5249 = vmatpush1.bf16.msra.mxu0 %v3908_v24  ;;  %5577 = vmatpush1.bf16.msra.mxu1 %v3910_v1  ;;  %v4014_v24 = vld [vmem:[#allocation2 + $0x14b0] sm:$0xff]  ;;  %v4021_v1 = vld [vmem:[#allocation2 + $0x14e8] sm:$0xff] }
 0x97f   :  { %5250 = vmatprep.subr.bf16.mxu0 %v3917_v2  ;;  %5578 = vmatprep.subr.bf16.mxu1 %v3919_v6  ;;  %v4020_v2 = vld [vmem:[#allocation2 + $0x14e0] sm:$0xff]  ;;  %v4022_v6 = vld [vmem:[#allocation2 + $0x14f0] sm:$0xff] }
 0x982   :  { %5251 = vmatpush1.bf16.msra.mxu0 %v3916_v11  ;;  %5579 = vmatpush1.bf16.msra.mxu1 %v3918_v53  ;;  %v4029_v11 = vld [vmem:[#allocation2 + $0x1528] sm:$0xff]  ;;  %v4031_v53 = vld [vmem:[#allocation2 + $0x1538] sm:$0xff] }
 0x983   :  { %5252 = vmatprep.subr.bf16.mxu0 %v3925_v27  ;;  %5580 = vmatprep.subr.bf16.mxu1 %v3927_v63  ;;  %v4030_v27 = vld [vmem:[#allocation2 + $0x1530] sm:$0xff]  ;;  %v4037_v63 = vld [vmem:[#allocation2 + $0x1568] sm:$0xff] }
 0x986   :  { %5253 = vmatpush1.bf16.msra.mxu0 %v3924_v56  ;;  %5581 = vmatpush1.bf16.msra.mxu1 %v3926_v42  ;;  %v4039_v56 = vld [vmem:[#allocation2 + $0x1578] sm:$0xff]  ;;  %v4036_v42 = vld [vmem:[#allocation2 + $0x1560] sm:$0xff] }
 0x987   :  { %5254 = vmatprep.subr.bf16.mxu0 %v3933_v54  ;;  %5582 = vmatprep.subr.bf16.mxu1 %v3935_v40  ;;  %v4038_v54 = vld [vmem:[#allocation2 + $0x1570] sm:$0xff]  ;;  %v4045_v40 = vld [vmem:[#allocation2 + $0x15a8] sm:$0xff] }
 0x98a   :  { %5255 = vmatpush1.bf16.msra.mxu0 %v3932_v52  ;;  %5583 = vmatpush1.bf16.msra.mxu1 %v3934_v15  ;;  %v4047_v52 = vld [vmem:[#allocation2 + $0x15b8] sm:$0xff]  ;;  %v4044_v15 = vld [vmem:[#allocation2 + $0x15a0] sm:$0xff] }
 0x98b   :  { %5256 = vmatprep.subr.bf16.mxu0 %v3941_v46  ;;  %5584 = vmatprep.subr.bf16.mxu1 %v3943_v35  ;;  %v4046_v46 = vld [vmem:[#allocation2 + $0x15b0] sm:$0xff]  ;;  %v4053_v35 = vld [vmem:[#allocation2 + $0x15e8] sm:$0xff] }
 0x98e   :  { %5257 = vmatpush1.bf16.msra.mxu0 %v3940_v59  ;;  %5585 = vmatpush1.bf16.msra.mxu1 %v3942_v57  ;;  %v4055_v59 = vld [vmem:[#allocation2 + $0x15f8] sm:$0xff]  ;;  %v4052_v57 = vld [vmem:[#allocation2 + $0x15e0] sm:$0xff] }
 0x98f   :  { %5258 = vmatprep.subr.bf16.mxu0 %v3949_v37  ;;  %5586 = vmatprep.subr.bf16.mxu1 %v3951_v16  ;;  %v4054_v37 = vld [vmem:[#allocation2 + $0x15f0] sm:$0xff]  ;;  %v4061_v16 = vld [vmem:[#allocation2 + $0x1628] sm:$0xff] }
 0x992   :  { %5259 = vmatpush1.bf16.msra.mxu0 %v3948_v30  ;;  %5587 = vmatpush1.bf16.msra.mxu1 %v3950_v19  ;;  %v4063_v30 = vld [vmem:[#allocation2 + $0x1638] sm:$0xff]  ;;  %v4060_v19 = vld [vmem:[#allocation2 + $0x1620] sm:$0xff] }
 0x993   :  { %5260 = vmatprep.subr.bf16.mxu0 %v3957_v25  ;;  %5588 = vmatprep.subr.bf16.mxu1 %v3959_v7  ;;  %v4062_v25 = vld [vmem:[#allocation2 + $0x1630] sm:$0xff]  ;;  %v4069_v7 = vld [vmem:[#allocation2 + $0x1668] sm:$0xff] }
 0x996   :  { %5261 = vmatpush1.bf16.msra.mxu0 %v3956_v29  ;;  %5589 = vmatpush1.bf16.msra.mxu1 %v3958_v36  ;;  %v4071_v29 = vld [vmem:[#allocation2 + $0x1678] sm:$0xff]  ;;  %v4068_v36 = vld [vmem:[#allocation2 + $0x1660] sm:$0xff] }
 0x997   :  { %5262 = vmatprep.subr.bf16.mxu0 %v3965_v9  ;;  %5590 = vmatprep.subr.bf16.mxu1 %v3967_v45  ;;  %v4070_v9 = vld [vmem:[#allocation2 + $0x1670] sm:$0xff]  ;;  %v4077_v45 = vld [vmem:[#allocation2 + $0x16a8] sm:$0xff] }
 0x99a   :  { %5263 = vmatpush1.bf16.msra.mxu0 %v3964_v12  ;;  %5591 = vmatpush1.bf16.msra.mxu1 %v3966_v47  ;;  %v4079_v12 = vld [vmem:[#allocation2 + $0x16b8] sm:$0xff]  ;;  %v4076_v47 = vld [vmem:[#allocation2 + $0x16a0] sm:$0xff] }
 0x99b   :  { %5264 = vmatprep.subr.bf16.mxu0 %v3973_v17  ;;  %5592 = vmatprep.subr.bf16.mxu1 %v3975_v22  ;;  %v4078_v17 = vld [vmem:[#allocation2 + $0x16b0] sm:$0xff]  ;;  %v4085_v22 = vld [vmem:[#allocation2 + $0x16e8] sm:$0xff] }
 0x99e   :  { %5265 = vmatpush1.bf16.msra.mxu0 %v3972_v55  ;;  %5593 = vmatpush1.bf16.msra.mxu1 %v3974_v62  ;;  %v4087_v55 = vld [vmem:[#allocation2 + $0x16f8] sm:$0xff]  ;;  %v4084_v62 = vld [vmem:[#allocation2 + $0x16e0] sm:$0xff] }
 0x99f   :  { %5266 = vmatprep.subr.bf16.mxu0 %v3981_v21  ;;  %5594 = vmatprep.subr.bf16.mxu1 %v3983_v48  ;;  %v4086_v21 = vld [vmem:[#allocation2 + $0x16f0] sm:$0xff]  ;;  %v4093_v48 = vld [vmem:[#allocation2 + $0x1728] sm:$0xff] }
 0x9a2   :  { %5267 = vmatpush1.bf16.msra.mxu0 %v3980_v41  ;;  %5595 = vmatpush1.bf16.msra.mxu1 %v3982_v18  ;;  %v4095_v41 = vld [vmem:[#allocation2 + $0x1738] sm:$0xff]  ;;  %v4092_v18 = vld [vmem:[#allocation2 + $0x1720] sm:$0xff] }
 0x9a3   :  { %5268 = vmatprep.subr.bf16.mxu0 %v3989_v20  ;;  %5596 = vmatprep.subr.bf16.mxu1 %v3991_v44  ;;  %v4094_v20 = vld [vmem:[#allocation2 + $0x1730] sm:$0xff]  ;;  %v4101_v44 = vld [vmem:[#allocation2 + $0x1768] sm:$0xff] }
 0x9a6   :  { %5269 = vmatpush1.bf16.msra.mxu0 %v3988_v32  ;;  %5597 = vmatpush1.bf16.msra.mxu1 %v3990_v26  ;;  %v4103_v32 = vld [vmem:[#allocation2 + $0x1778] sm:$0xff]  ;;  %v4100_v26 = vld [vmem:[#allocation2 + $0x1760] sm:$0xff] }
 0x9a7   :  { %5279 = vmatprep.subr.bf16.mxu0 %v3997_v5  ;;  %5607 = vmatprep.subr.bf16.mxu1 %v3999_v58  ;;  %v4102_v5 = vld [vmem:[#allocation2 + $0x1770] sm:$0xff]  ;;  %v4109_v58 = vld [vmem:[#allocation2 + $0x17a8] sm:$0xff] }
 0x9a9   :  { %5271 = vmatmul.mubr.bf16.vlgmr.msra.gmra.mrb[60].mxu0 %v10592_v38  ;;  %5599 = vmatmul.mubr.bf16.vlgmr.msra.gmra.mrb[60].mxu1 %v10592_v38  ;;  %v4023_v38 = vld [vmem:[#allocation2 + $0x14f8] sm:$0xff] }
 0x9aa   :  { %5280 = vmatpush1.bf16.msra.mxu0 %v3996_v28  ;;  %5608 = vmatpush1.bf16.msra.mxu1 %v3998_v3  ;;  %v4111_v28 = vld [vmem:[#allocation2 + $0x17b8] sm:$0xff]  ;;  %v4108_v3 = vld [vmem:[#allocation2 + $0x17a0] sm:$0xff] }
 0x9ab   :  { %5281 = vmatprep.subr.bf16.mxu0 %v4005_v43  ;;  %5609 = vmatprep.subr.bf16.mxu1 %v4007_v13  ;;  %v4110_v43 = vld [vmem:[#allocation2 + $0x17b0] sm:$0xff]  ;;  %v4117_v13 = vld [vmem:[#allocation2 + $0x17e8] sm:$0xff] }
 0x9ac   :  { %5311 = vmatprep.mubr.bf16.mxu0 %v10597_v61  ;;  %5639 = vmatprep.mubr.bf16.mxu1 %v10597_v61  ;;  %v4028_v61 = vld [vmem:[#allocation2 + $0x1520] sm:$0xff] }
 0x9ae   :  { %5282 = vmatpush1.bf16.msra.mxu0 %v4004_v0  ;;  %5610 = vmatpush1.bf16.msra.mxu1 %v4006_v50  ;;  %v4119_v0 = vld [vmem:[#allocation2 + $0x17f8] sm:$0xff]  ;;  %v4116_v50 = vld [vmem:[#allocation2 + $0x17e0] sm:$0xff] }
 0x9af   :  { %5283 = vmatprep.subr.bf16.mxu0 %v4013_v4  ;;  %5611 = vmatprep.subr.bf16.mxu1 %v4015_v10  ;;  %v4118_v4 = vld [vmem:[#allocation2 + $0x17f0] sm:$0xff]  ;;  %v4125_v10 = vld [vmem:[#allocation2 + $0x1828] sm:$0xff] }
 0x9b2   :  { %5284 = vmatpush1.bf16.msra.mxu0 %v4012_v33  ;;  %5612 = vmatpush1.bf16.msra.mxu1 %v4014_v24  ;;  %v4127_v33 = vld [vmem:[#allocation2 + $0x1838] sm:$0xff]  ;;  %v4124_v24 = vld [vmem:[#allocation2 + $0x1820] sm:$0xff] }
 0x9b3   :  { %5285 = vmatprep.subr.bf16.mxu0 %v4021_v1  ;;  %5613 = vmatprep.subr.bf16.mxu1 %v4023_v38  ;;  %v4126_v1 = vld [vmem:[#allocation2 + $0x1830] sm:$0xff]  ;;  %v4133_v38 = vld [vmem:[#allocation2 + $0x1868] sm:$0xff] }
 0x9b6   :  { %5286 = vmatpush1.bf16.msra.mxu0 %v4020_v2  ;;  %5614 = vmatpush1.bf16.msra.mxu1 %v4022_v6  ;;  %v4135_v2 = vld [vmem:[#allocation2 + $0x1878] sm:$0xff]  ;;  %v4132_v6 = vld [vmem:[#allocation2 + $0x1860] sm:$0xff] }
 0x9b7   :  { %5287 = vmatprep.subr.bf16.mxu0 %v4029_v11  ;;  %5615 = vmatprep.subr.bf16.mxu1 %v4031_v53  ;;  %v4134_v11 = vld [vmem:[#allocation2 + $0x1870] sm:$0xff]  ;;  %v4141_v53 = vld [vmem:[#allocation2 + $0x18a8] sm:$0xff] }
 0x9ba   :  { %5288 = vmatpush1.bf16.msra.mxu0 %v4028_v61  ;;  %5616 = vmatpush1.bf16.msra.mxu1 %v4030_v27  ;;  %v4143_v61 = vld [vmem:[#allocation2 + $0x18b8] sm:$0xff]  ;;  %v4140_v27 = vld [vmem:[#allocation2 + $0x18a0] sm:$0xff] }
 0x9bb   :  { %5289 = vmatprep.subr.bf16.mxu0 %v4037_v63  ;;  %5617 = vmatprep.subr.bf16.mxu1 %v4039_v56  ;;  %v4142_v63 = vld [vmem:[#allocation2 + $0x18b0] sm:$0xff]  ;;  %v4149_v56 = vld [vmem:[#allocation2 + $0x18e8] sm:$0xff] }
 0x9be   :  { %5290 = vmatpush1.bf16.msra.mxu0 %v4036_v42  ;;  %5618 = vmatpush1.bf16.msra.mxu1 %v4038_v54  ;;  %v4148_v42 = vld [vmem:[#allocation2 + $0x18e0] sm:$0xff]  ;;  %v4150_v54 = vld [vmem:[#allocation2 + $0x18f0] sm:$0xff] }
 0x9bf   :  { %5291 = vmatprep.subr.bf16.mxu0 %v4045_v40  ;;  %5619 = vmatprep.subr.bf16.mxu1 %v4047_v52  ;;  %v4157_v40 = vld [vmem:[#allocation2 + $0x1928] sm:$0xff]  ;;  %v4159_v52 = vld [vmem:[#allocation2 + $0x1938] sm:$0xff] }
 0x9c2   :  { %5292 = vmatpush1.bf16.msra.mxu0 %v4044_v15  ;;  %5620 = vmatpush1.bf16.msra.mxu1 %v4046_v46  ;;  %v4158_v15 = vld [vmem:[#allocation2 + $0x1930] sm:$0xff]  ;;  %v4165_v46 = vld [vmem:[#allocation2 + $0x1968] sm:$0xff] }
 0x9c3   :  { %5293 = vmatprep.subr.bf16.mxu0 %v4053_v35  ;;  %5621 = vmatprep.subr.bf16.mxu1 %v4055_v59  ;;  %v4167_v35 = vld [vmem:[#allocation2 + $0x1978] sm:$0xff]  ;;  %v4164_v59 = vld [vmem:[#allocation2 + $0x1960] sm:$0xff] }
 0x9c6   :  { %5294 = vmatpush1.bf16.msra.mxu0 %v4052_v57  ;;  %5622 = vmatpush1.bf16.msra.mxu1 %v4054_v37  ;;  %v4166_v57 = vld [vmem:[#allocation2 + $0x1970] sm:$0xff]  ;;  %v4173_v37 = vld [vmem:[#allocation2 + $0x19a8] sm:$0xff] }
 0x9c7   :  { %5295 = vmatprep.subr.bf16.mxu0 %v4061_v16  ;;  %5623 = vmatprep.subr.bf16.mxu1 %v4063_v30  ;;  %v4175_v16 = vld [vmem:[#allocation2 + $0x19b8] sm:$0xff]  ;;  %v4172_v30 = vld [vmem:[#allocation2 + $0x19a0] sm:$0xff] }
 0x9ca   :  { %5296 = vmatpush1.bf16.msra.mxu0 %v4060_v19  ;;  %5624 = vmatpush1.bf16.msra.mxu1 %v4062_v25  ;;  %v4174_v19 = vld [vmem:[#allocation2 + $0x19b0] sm:$0xff]  ;;  %v4181_v25 = vld [vmem:[#allocation2 + $0x19e8] sm:$0xff] }
 0x9cb   :  { %5297 = vmatprep.subr.bf16.mxu0 %v4069_v7  ;;  %5625 = vmatprep.subr.bf16.mxu1 %v4071_v29  ;;  %v4183_v7 = vld [vmem:[#allocation2 + $0x19f8] sm:$0xff]  ;;  %v4180_v29 = vld [vmem:[#allocation2 + $0x19e0] sm:$0xff] }
 0x9ce   :  { %5298 = vmatpush1.bf16.msra.mxu0 %v4068_v36  ;;  %5626 = vmatpush1.bf16.msra.mxu1 %v4070_v9  ;;  %v4182_v36 = vld [vmem:[#allocation2 + $0x19f0] sm:$0xff]  ;;  %v4189_v9 = vld [vmem:[#allocation2 + $0x1a28] sm:$0xff] }
 0x9cf   :  { %5299 = vmatprep.subr.bf16.mxu0 %v4077_v45  ;;  %5627 = vmatprep.subr.bf16.mxu1 %v4079_v12  ;;  %v4191_v45 = vld [vmem:[#allocation2 + $0x1a38] sm:$0xff]  ;;  %v4188_v12 = vld [vmem:[#allocation2 + $0x1a20] sm:$0xff] }
 0x9d2   :  { %5300 = vmatpush1.bf16.msra.mxu0 %v4076_v47  ;;  %5628 = vmatpush1.bf16.msra.mxu1 %v4078_v17  ;;  %v4190_v47 = vld [vmem:[#allocation2 + $0x1a30] sm:$0xff]  ;;  %v4197_v17 = vld [vmem:[#allocation2 + $0x1a68] sm:$0xff] }
 0x9d3   :  { %5301 = vmatprep.subr.bf16.mxu0 %v4085_v22  ;;  %5629 = vmatprep.subr.bf16.mxu1 %v4087_v55  ;;  %v4199_v22 = vld [vmem:[#allocation2 + $0x1a78] sm:$0xff]  ;;  %v4196_v55 = vld [vmem:[#allocation2 + $0x1a60] sm:$0xff] }
 0x9d6   :  { %5302 = vmatpush1.bf16.msra.mxu0 %v4084_v62  ;;  %5630 = vmatpush1.bf16.msra.mxu1 %v4086_v21  ;;  %v4198_v62 = vld [vmem:[#allocation2 + $0x1a70] sm:$0xff]  ;;  %v4205_v21 = vld [vmem:[#allocation2 + $0x1aa8] sm:$0xff] }
 0x9d7   :  { %5303 = vmatprep.subr.bf16.mxu0 %v4093_v48  ;;  %5631 = vmatprep.subr.bf16.mxu1 %v4095_v41  ;;  %v4207_v48 = vld [vmem:[#allocation2 + $0x1ab8] sm:$0xff]  ;;  %v4204_v41 = vld [vmem:[#allocation2 + $0x1aa0] sm:$0xff] }
 0x9da   :  { %5304 = vmatpush1.bf16.msra.mxu0 %v4092_v18  ;;  %5632 = vmatpush1.bf16.msra.mxu1 %v4094_v20  ;;  %v4206_v18 = vld [vmem:[#allocation2 + $0x1ab0] sm:$0xff]  ;;  %v4213_v20 = vld [vmem:[#allocation2 + $0x1ae8] sm:$0xff] }
 0x9db   :  { %5305 = vmatprep.subr.bf16.mxu0 %v4101_v44  ;;  %5633 = vmatprep.subr.bf16.mxu1 %v4103_v32  ;;  %v4215_v44 = vld [vmem:[#allocation2 + $0x1af8] sm:$0xff]  ;;  %v4212_v32 = vld [vmem:[#allocation2 + $0x1ae0] sm:$0xff] }
 0x9de   :  { %5306 = vmatpush1.bf16.msra.mxu0 %v4100_v26  ;;  %5634 = vmatpush1.bf16.msra.mxu1 %v4102_v5  ;;  %v4214_v26 = vld [vmem:[#allocation2 + $0x1af0] sm:$0xff]  ;;  %v4221_v5 = vld [vmem:[#allocation2 + $0x1b28] sm:$0xff] }
 0x9df   :  { %5307 = vmatprep.subr.bf16.mxu0 %v4109_v58  ;;  %5635 = vmatprep.subr.bf16.mxu1 %v4111_v28  ;;  %v4223_v58 = vld [vmem:[#allocation2 + $0x1b38] sm:$0xff]  ;;  %v4220_v28 = vld [vmem:[#allocation2 + $0x1b20] sm:$0xff] }
 0x9e2   :  { %5308 = vmatpush1.bf16.msra.mxu0 %v4108_v3  ;;  %5636 = vmatpush1.bf16.msra.mxu1 %v4110_v43  ;;  %v4222_v3 = vld [vmem:[#allocation2 + $0x1b30] sm:$0xff]  ;;  %v4229_v43 = vld [vmem:[#allocation2 + $0x1b68] sm:$0xff] }
 0x9e3   :  { %5309 = vmatprep.subr.bf16.mxu0 %v4117_v13  ;;  %5637 = vmatprep.subr.bf16.mxu1 %v4119_v0  ;;  %v4231_v13 = vld [vmem:[#allocation2 + $0x1b78] sm:$0xff]  ;;  %v4228_v0 = vld [vmem:[#allocation2 + $0x1b60] sm:$0xff] }
 0x9e6   :  { %5310 = vmatpush1.bf16.msra.mxu0 %v4116_v50  ;;  %5638 = vmatpush1.bf16.msra.mxu1 %v4118_v4  ;;  %v4230_v50 = vld [vmem:[#allocation2 + $0x1b70] sm:$0xff]  ;;  %v4237_v4 = vld [vmem:[#allocation2 + $0x1ba8] sm:$0xff] }
 0x9e7   :  { %5320 = vmatprep.subr.bf16.mxu0 %v4125_v10  ;;  %5648 = vmatprep.subr.bf16.mxu1 %v4127_v33  ;;  %v4239_v10 = vld [vmem:[#allocation2 + $0x1bb8] sm:$0xff]  ;;  %v4236_v33 = vld [vmem:[#allocation2 + $0x1ba0] sm:$0xff] }
 0x9e9   :  { %5312 = vmatmul.mubr.bf16.vlgmr.msra.gmra.mrb[60].mxu0 %v10606_v51  ;;  %5640 = vmatmul.mubr.bf16.vlgmr.msra.gmra.mrb[60].mxu1 %v10606_v51  ;;  %v4151_v51 = vld [vmem:[#allocation2 + $0x18f8] sm:$0xff] }
 0x9ea   :  { %5321 = vmatpush1.bf16.msra.mxu0 %v4124_v24  ;;  %5649 = vmatpush1.bf16.msra.mxu1 %v4126_v1  ;;  %v4238_v24 = vld [vmem:[#allocation2 + $0x1bb0] sm:$0xff]  ;;  %v4245_v1 = vld [vmem:[#allocation2 + $0x1be8] sm:$0xff] }
 0x9eb   :  { %5322 = vmatprep.subr.bf16.mxu0 %v4133_v38  ;;  %5650 = vmatprep.subr.bf16.mxu1 %v4135_v2  ;;  %v4247_v38 = vld [vmem:[#allocation2 + $0x1bf8] sm:$0xff]  ;;  %v4244_v2 = vld [vmem:[#allocation2 + $0x1be0] sm:$0xff] }
 0x9ec   :  { %5352 = vmatprep.mubr.bf16.mxu0 %v10611_v60  ;;  %5680 = vmatprep.mubr.bf16.mxu1 %v10611_v60  ;;  %v4156_v60 = vld [vmem:[#allocation2 + $0x1920] sm:$0xff] }
 0x9ee   :  { %5323 = vmatpush1.bf16.msra.mxu0 %v4132_v6  ;;  %5651 = vmatpush1.bf16.msra.mxu1 %v4134_v11  ;;  %v4246_v6 = vld [vmem:[#allocation2 + $0x1bf0] sm:$0xff]  ;;  %v4253_v11 = vld [vmem:[#allocation2 + $0x1c28] sm:$0xff] }
 0x9ef   :  { %5324 = vmatprep.subr.bf16.mxu0 %v4141_v53  ;;  %5652 = vmatprep.subr.bf16.mxu1 %v4143_v61  ;;  %v4255_v53 = vld [vmem:[#allocation2 + $0x1c38] sm:$0xff]  ;;  %v4252_v61 = vld [vmem:[#allocation2 + $0x1c20] sm:$0xff] }
 0x9f2   :  { %5325 = vmatpush1.bf16.msra.mxu0 %v4140_v27  ;;  %5653 = vmatpush1.bf16.msra.mxu1 %v4142_v63  ;;  %v4254_v27 = vld [vmem:[#allocation2 + $0x1c30] sm:$0xff]  ;;  %v4261_v63 = vld [vmem:[#allocation2 + $0x1c68] sm:$0xff] }
 0x9f3   :  { %5326 = vmatprep.subr.bf16.mxu0 %v4149_v56  ;;  %5654 = vmatprep.subr.bf16.mxu1 %v4151_v51  ;;  %v4263_v56 = vld [vmem:[#allocation2 + $0x1c78] sm:$0xff]  ;;  %v4260_v51 = vld [vmem:[#allocation2 + $0x1c60] sm:$0xff] }
 0x9f6   :  { %5327 = vmatpush1.bf16.msra.mxu0 %v4148_v42  ;;  %5655 = vmatpush1.bf16.msra.mxu1 %v4150_v54  ;;  %v4262_v42 = vld [vmem:[#allocation2 + $0x1c70] sm:$0xff]  ;;  %v4269_v54 = vld [vmem:[#allocation2 + $0x1ca8] sm:$0xff] }
 0x9f7   :  { %5328 = vmatprep.subr.bf16.mxu0 %v4157_v40  ;;  %5656 = vmatprep.subr.bf16.mxu1 %v4159_v52  ;;  %v4271_v40 = vld [vmem:[#allocation2 + $0x1cb8] sm:$0xff]  ;;  %v4268_v52 = vld [vmem:[#allocation2 + $0x1ca0] sm:$0xff] }
 0x9fa   :  { %5329 = vmatpush1.bf16.msra.mxu0 %v4156_v60  ;;  %5657 = vmatpush1.bf16.msra.mxu1 %v4158_v15  ;;  %v4270_v60 = vld [vmem:[#allocation2 + $0x1cb0] sm:$0xff]  ;;  %v4277_v15 = vld [vmem:[#allocation2 + $0x1ce8] sm:$0xff] }
 0x9fb   :  { %5330 = vmatprep.subr.bf16.mxu0 %v4165_v46  ;;  %5658 = vmatprep.subr.bf16.mxu1 %v4167_v35  ;;  %v4276_v46 = vld [vmem:[#allocation2 + $0x1ce0] sm:$0xff]  ;;  %v4278_v35 = vld [vmem:[#allocation2 + $0x1cf0] sm:$0xff] }
 0x9fe   :  { %5331 = vmatpush1.bf16.msra.mxu0 %v4164_v59  ;;  %5659 = vmatpush1.bf16.msra.mxu1 %v4166_v57  ;;  %v4285_v59 = vld [vmem:[#allocation2 + $0x1d28] sm:$0xff]  ;;  %v4287_v57 = vld [vmem:[#allocation2 + $0x1d38] sm:$0xff] }
 0x9ff   :  { %5332 = vmatprep.subr.bf16.mxu0 %v4173_v37  ;;  %5660 = vmatprep.subr.bf16.mxu1 %v4175_v16  ;;  %v4286_v37 = vld [vmem:[#allocation2 + $0x1d30] sm:$0xff]  ;;  %v4293_v16 = vld [vmem:[#allocation2 + $0x1d68] sm:$0xff] }
 0xa02   :  { %5333 = vmatpush1.bf16.msra.mxu0 %v4172_v30  ;;  %5661 = vmatpush1.bf16.msra.mxu1 %v4174_v19  ;;  %v4295_v30 = vld [vmem:[#allocation2 + $0x1d78] sm:$0xff]  ;;  %v4292_v19 = vld [vmem:[#allocation2 + $0x1d60] sm:$0xff] }
 0xa03   :  { %5334 = vmatprep.subr.bf16.mxu0 %v4181_v25  ;;  %5662 = vmatprep.subr.bf16.mxu1 %v4183_v7  ;;  %v4294_v25 = vld [vmem:[#allocation2 + $0x1d70] sm:$0xff]  ;;  %v4301_v7 = vld [vmem:[#allocation2 + $0x1da8] sm:$0xff] }
 0xa06   :  { %5335 = vmatpush1.bf16.msra.mxu0 %v4180_v29  ;;  %5663 = vmatpush1.bf16.msra.mxu1 %v4182_v36  ;;  %v4303_v29 = vld [vmem:[#allocation2 + $0x1db8] sm:$0xff]  ;;  %v4300_v36 = vld [vmem:[#allocation2 + $0x1da0] sm:$0xff] }
 0xa07   :  { %5336 = vmatprep.subr.bf16.mxu0 %v4189_v9  ;;  %5664 = vmatprep.subr.bf16.mxu1 %v4191_v45  ;;  %v4302_v9 = vld [vmem:[#allocation2 + $0x1db0] sm:$0xff]  ;;  %v4309_v45 = vld [vmem:[#allocation2 + $0x1de8] sm:$0xff] }
 0xa0a   :  { %5337 = vmatpush1.bf16.msra.mxu0 %v4188_v12  ;;  %5665 = vmatpush1.bf16.msra.mxu1 %v4190_v47  ;;  %v4311_v12 = vld [vmem:[#allocation2 + $0x1df8] sm:$0xff]  ;;  %v4308_v47 = vld [vmem:[#allocation2 + $0x1de0] sm:$0xff] }
 0xa0b   :  { %5338 = vmatprep.subr.bf16.mxu0 %v4197_v17  ;;  %5666 = vmatprep.subr.bf16.mxu1 %v4199_v22  ;;  %v4310_v17 = vld [vmem:[#allocation2 + $0x1df0] sm:$0xff]  ;;  %v4317_v22 = vld [vmem:[#allocation2 + $0x1e28] sm:$0xff] }
 0xa0e   :  { %5339 = vmatpush1.bf16.msra.mxu0 %v4196_v55  ;;  %5667 = vmatpush1.bf16.msra.mxu1 %v4198_v62  ;;  %v4319_v55 = vld [vmem:[#allocation2 + $0x1e38] sm:$0xff]  ;;  %v4316_v62 = vld [vmem:[#allocation2 + $0x1e20] sm:$0xff] }
 0xa0f   :  { %5340 = vmatprep.subr.bf16.mxu0 %v4205_v21  ;;  %5668 = vmatprep.subr.bf16.mxu1 %v4207_v48  ;;  %v4318_v21 = vld [vmem:[#allocation2 + $0x1e30] sm:$0xff]  ;;  %v4325_v48 = vld [vmem:[#allocation2 + $0x1e68] sm:$0xff] }
 0xa12   :  { %5341 = vmatpush1.bf16.msra.mxu0 %v4204_v41  ;;  %5669 = vmatpush1.bf16.msra.mxu1 %v4206_v18  ;;  %v4327_v41 = vld [vmem:[#allocation2 + $0x1e78] sm:$0xff]  ;;  %v4324_v18 = vld [vmem:[#allocation2 + $0x1e60] sm:$0xff] }
 0xa13   :  { %5342 = vmatprep.subr.bf16.mxu0 %v4213_v20  ;;  %5670 = vmatprep.subr.bf16.mxu1 %v4215_v44  ;;  %v4326_v20 = vld [vmem:[#allocation2 + $0x1e70] sm:$0xff]  ;;  %v4333_v44 = vld [vmem:[#allocation2 + $0x1ea8] sm:$0xff] }
 0xa16   :  { %5343 = vmatpush1.bf16.msra.mxu0 %v4212_v32  ;;  %5671 = vmatpush1.bf16.msra.mxu1 %v4214_v26  ;;  %v4335_v32 = vld [vmem:[#allocation2 + $0x1eb8] sm:$0xff]  ;;  %v4332_v26 = vld [vmem:[#allocation2 + $0x1ea0] sm:$0xff] }
 0xa17   :  { %5344 = vmatprep.subr.bf16.mxu0 %v4221_v5  ;;  %5672 = vmatprep.subr.bf16.mxu1 %v4223_v58  ;;  %v4334_v5 = vld [vmem:[#allocation2 + $0x1eb0] sm:$0xff]  ;;  %v4341_v58 = vld [vmem:[#allocation2 + $0x1ee8] sm:$0xff] }
 0xa1a   :  { %5345 = vmatpush1.bf16.msra.mxu0 %v4220_v28  ;;  %5673 = vmatpush1.bf16.msra.mxu1 %v4222_v3  ;;  %v4343_v28 = vld [vmem:[#allocation2 + $0x1ef8] sm:$0xff]  ;;  %v4340_v3 = vld [vmem:[#allocation2 + $0x1ee0] sm:$0xff] }
 0xa1b   :  { %5346 = vmatprep.subr.bf16.mxu0 %v4229_v43  ;;  %5674 = vmatprep.subr.bf16.mxu1 %v4231_v13  ;;  %v4342_v43 = vld [vmem:[#allocation2 + $0x1ef0] sm:$0xff]  ;;  %v4378_v13 = vlaneseq }
 0xa1e   :  { %5347 = vmatpush1.bf16.msra.mxu0 %v4228_v0  ;;  %5675 = vmatpush1.bf16.msra.mxu1 %v4230_v50  ;;  %v4349_v0 = vld [vmem:[#allocation2 + $0x1f28] sm:$0xff]  ;;  %v4351_v50 = vld [vmem:[#allocation2 + $0x1f38] sm:$0xff] }
 0xa1f   :  { %5348 = vmatprep.subr.bf16.mxu0 %v4237_v4  ;;  %5676 = vmatprep.subr.bf16.mxu1 %v4239_v10  ;;  %v4348_v4 = vld [vmem:[#allocation2 + $0x1f20] sm:$0xff]  ;;  %v4350_v10 = vld [vmem:[#allocation2 + $0x1f30] sm:$0xff] }
 0xa22   :  { %5349 = vmatpush1.bf16.msra.mxu0 %v4236_v33  ;;  %5677 = vmatpush1.bf16.msra.mxu1 %v4238_v24  ;;  %v10675_v33 = vshrl.u32 %v4378_v13, 7  ;;  %v4357_v24 = vld [vmem:[#allocation2 + $0x1f68] sm:$0xff] }
 0xa23   :  { %5350 = vmatprep.subr.bf16.mxu0 %v4245_v1  ;;  %5678 = vmatprep.subr.bf16.mxu1 %v4247_v38  ;;  %v4359_v1 = vld [vmem:[#allocation2 + $0x1f78] sm:$0xff]  ;;  %v4356_v38 = vld [vmem:[#allocation2 + $0x1f60] sm:$0xff] }
 0xa26   :  { %5351 = vmatpush1.bf16.msra.mxu0 %v4244_v2  ;;  %5679 = vmatpush1.bf16.msra.mxu1 %v4246_v6  ;;  %v4358_v2 = vld [vmem:[#allocation2 + $0x1f70] sm:$0xff]  ;;  %v4384_v6 = vsub.s32 1, %v10675_v33 }
 0xa27   :  { %5361 = vmatprep.subr.bf16.mxu0 %v4253_v11  ;;  %5689 = vmatprep.subr.bf16.mxu1 %v4255_v53  ;;  %v4365_v11 = vld [vmem:[#allocation2 + $0x1fa8] sm:$0xff]  ;;  %v4367_v53 = vld [vmem:[#allocation2 + $0x1fb8] sm:$0xff] }
 0xa29   :  { %5353 = vmatmul.mubr.bf16.vlgmr.msra.gmra.mrb[60].mxu0 %v10619_v34  ;;  %5681 = vmatmul.mubr.bf16.vlgmr.msra.gmra.mrb[60].mxu1 %v10619_v34  ;;  %v4279_v34 = vld [vmem:[#allocation2 + $0x1cf8] sm:$0xff] }
 0xa2a   :  { %5362 = vmatpush1.bf16.msra.mxu0 %v4252_v61  ;;  %5690 = vmatpush1.bf16.msra.mxu1 %v4254_v27  ;;  %v10678_v61 = vld [vmem:[#allocation25] sm:$0xff]  ;;  %v4392_v27 = vsub.s32 3, %v10675_v33 }
 0xa2b   :  { %5363 = vmatprep.subr.bf16.mxu0 %v4261_v63  ;;  %5691 = vmatprep.subr.bf16.mxu1 %v4263_v56  ;;  %v4364_v63 = vld [vmem:[#allocation2 + $0x1fa0] sm:$0xff]  ;;  %v4366_v56 = vld [vmem:[#allocation2 + $0x1fb0] sm:$0xff] }
 0xa2c   :  { %5393 = vmatprep.mubr.bf16.mxu0 %v10624_v14  ;;  %5721 = vmatprep.mubr.bf16.mxu1 %v10624_v14  ;;  %v4284_v14 = vld [vmem:[#allocation2 + $0x1d20] sm:$0xff] }
 0xa2e   :  { %5364 = vmatpush1.bf16.msra.mxu0 %v4260_v51  ;;  %5692 = vmatpush1.bf16.msra.mxu1 %v4262_v42  ;;  %v4385_v51 = vrot.slane %v10678_v61, %v4384_v6  ;;  %v4373_v42 = vld [vmem:[#allocation2 + $0x1fe8] sm:$0xff] }
 0xa2f   :  { %5365 = vmatprep.subr.bf16.mxu0 %v4269_v54  ;;  %5693 = vmatprep.subr.bf16.mxu1 %v4271_v40  ;;  %v4375_v54 = vld [vmem:[#allocation2 + $0x1ff8] sm:$0xff]  ;;  %v4393_v40 = vrot.slane %v10678_v61, %v4392_v27  ;;  %v8026_v27 = vld [vmem:[#allocation27 + $0x1d0] sm:$0xff]  }
 0xa32   :  { %5366 = vmatpush1.bf16.msra.mxu0 %v4268_v52  ;;  %5694 = vmatpush1.bf16.msra.mxu1 %v4270_v60  ;;  %v4372_v52 = vld [vmem:[#allocation2 + $0x1fe0] sm:$0xff]  ;;  %v4374_v60 = vld [vmem:[#allocation2 + $0x1ff0] sm:$0xff] }
 0xa33   :  { %5367 = vmatprep.subr.bf16.mxu0 %v4277_v15  ;;  %5695 = vmatprep.subr.bf16.mxu1 %v4279_v34  ;;  %v7985_v15 = vld [vmem:[#allocation27 + $0x40] sm:$0xff]  }
 0xa34   :  { %v7986_v34 = vld [vmem:[#allocation27 + $0xc0] sm:$0xff]  }
 0xa36   :  { %5368 = vmatpush1.bf16.msra.mxu0 %v4276_v46  ;;  %5696 = vmatpush1.bf16.msra.mxu1 %v4278_v35  ;;  %v7828_v46 = vadd.f32 %v10655_v39, %v4385_v51  ;;  %v7830_v35 = vadd.f32 %v10657_v31, %v4393_v40  ;;  %v7992_v39 = vld [vmem:[#allocation27 + $0x88] sm:$0xff]   ;;  %v7993_v31 = vld [vmem:[#allocation27 + $0x50] sm:$0xff]   ;;  %v8029_v51 = vld [vmem:[#allocation27 + $0x158] sm:$0xff]  }
 0xa37   :  { %5369 = vmatprep.subr.bf16.mxu0 %v4285_v59  ;;  %5697 = vmatprep.subr.bf16.mxu1 %v4287_v57  ;;  %v7987_v59 = vld [vmem:[#allocation27] sm:$0xff]   ;;  %v8032_v40 = vld [vmem:[#allocation27 + $0x198] sm:$0xff]  }
 0xa38   :  { %v7988_v57 = vld [vmem:[#allocation27 + $0x80] sm:$0xff]  }
 0xa3a   :  { %5370 = vmatpush1.bf16.msra.mxu0 %v4284_v14  ;;  %5698 = vmatpush1.bf16.msra.mxu1 %v4286_v37  ;;  %v5731_v14 = vpack.c.bf16 %v7828_v46, %v7828_v46  ;;  %v7989_v37 = vld [vmem:[#allocation27 + $0x48] sm:$0xff]  }
 0xa3b   :  { %5371 = vmatprep.subr.bf16.mxu0 %v4293_v16  ;;  %5699 = vmatprep.subr.bf16.mxu1 %v4295_v30  ;;  %v7990_v16 = vld [vmem:[#allocation27 + $0xc8] sm:$0xff]   ;;  %v5733_v30 = vpack.c.bf16 %v7830_v35, %v7830_v35 }
 0xa3c   :  { %v8037_v46 = vld [vmem:[#allocation27 + $0x168] sm:$0xff]  }
 0xa3d   :  { %v8038_v35 = vld [vmem:[#allocation27 + $0x1e8] sm:$0xff]  }
 0xa3e   :  { %5372 = vmatpush1.bf16.msra.mxu0 %v4292_v19  ;;  %5700 = vmatpush1.bf16.msra.mxu1 %v4294_v25  ;;  %v7991_v19 = vld [vmem:[#allocation27 + $0x8] sm:$0xff]   ;;  %v7994_v25 = vld [vmem:[#allocation27 + $0xd0] sm:$0xff]  }
 0xa3f   :  { %5373 = vmatprep.subr.bf16.mxu0 %v4301_v7  ;;  %5701 = vmatprep.subr.bf16.mxu1 %v4303_v29  ;;  %v7995_v7 = vld [vmem:[#allocation27 + $0x10] sm:$0xff]  }
 0xa40   :  { %v7996_v29 = vld [vmem:[#allocation27 + $0x90] sm:$0xff]  }
 0xa42   :  { %5374 = vmatpush1.bf16.msra.mxu0 %v4300_v36  ;;  %5702 = vmatpush1.bf16.msra.mxu1 %v4302_v9  ;;  %v7997_v36 = vld [vmem:[#allocation27 + $0x58] sm:$0xff]  }
 0xa43   :  { %5375 = vmatprep.subr.bf16.mxu0 %v4309_v45  ;;  %5703 = vmatprep.subr.bf16.mxu1 %v4311_v12  ;;  %v7998_v9 = vld [vmem:[#allocation27 + $0xd8] sm:$0xff]   ;;  %v8001_v12 = vld [vmem:[#allocation27 + $0x60] sm:$0xff]  }
 0xa44   :  { %v8000_v45 = vld [vmem:[#allocation27 + $0x98] sm:$0xff]  }
 0xa46   :  { %5376 = vmatpush1.bf16.msra.mxu0 %v4308_v47  ;;  %5704 = vmatpush1.bf16.msra.mxu1 %v4310_v17  ;;  %v8002_v47 = vld [vmem:[#allocation27 + $0xe0] sm:$0xff]  }
 0xa47   :  { %5377 = vmatprep.subr.bf16.mxu0 %v4317_v22  ;;  %5705 = vmatprep.subr.bf16.mxu1 %v4319_v55  ;;  %v8003_v17 = vld [vmem:[#allocation27 + $0x20] sm:$0xff]   ;;  %v8005_v55 = vld [vmem:[#allocation27 + $0x68] sm:$0xff]  }
 0xa48   :  { %v8004_v22 = vld [vmem:[#allocation27 + $0xa0] sm:$0xff]  }
 0xa4a   :  { %5378 = vmatpush1.bf16.msra.mxu0 %v4316_v62  ;;  %5706 = vmatpush1.bf16.msra.mxu1 %v4318_v21  ;;  %v8006_v62 = vld [vmem:[#allocation27 + $0xe8] sm:$0xff]  }
 0xa4b   :  { %5379 = vmatprep.subr.bf16.mxu0 %v4325_v48  ;;  %5707 = vmatprep.subr.bf16.mxu1 %v4327_v41  ;;  %v8007_v21 = vld [vmem:[#allocation27 + $0x28] sm:$0xff]   ;;  %v4380_v48 = vsub.s32 0, %v10675_v33 }
 0xa4c   :  { %v8008_v41 = vld [vmem:[#allocation27 + $0xa8] sm:$0xff]  }
 0xa4e   :  { %5380 = vmatpush1.bf16.msra.mxu0 %v4324_v18  ;;  %5708 = vmatpush1.bf16.msra.mxu1 %v4326_v20  ;;  %v8009_v18 = vld [vmem:[#allocation27 + $0x70] sm:$0xff]   ;;  %v4388_v20 = vsub.s32 2, %v10675_v33 }
 0xa4f   :  { %5381 = vmatprep.subr.bf16.mxu0 %v4333_v44  ;;  %5709 = vmatprep.subr.bf16.mxu1 %v4335_v32  ;;  %v8010_v44 = vld [vmem:[#allocation27 + $0xf0] sm:$0xff]  }
 0xa50   :  { %v8011_v32 = vld [vmem:[#allocation27 + $0x30] sm:$0xff]  }
 0xa52   :  { %5382 = vmatpush1.bf16.msra.mxu0 %v4332_v26  ;;  %5710 = vmatpush1.bf16.msra.mxu1 %v4334_v5  ;;  %v4381_v26 = vrot.slane %v10678_v61, %v4380_v48  ;;  %v8012_v5 = vld [vmem:[#allocation27 + $0xb0] sm:$0xff]  }
 0xa53   :  { %5383 = vmatprep.subr.bf16.mxu0 %v4341_v58  ;;  %5711 = vmatprep.subr.bf16.mxu1 %v4343_v28  ;;  %v8013_v58 = vld [vmem:[#allocation27 + $0x78] sm:$0xff]   ;;  %v4389_v28 = vrot.slane %v10678_v61, %v4388_v20 }
 0xa54   :  { %v7827_v13 = vadd.f32 %v10651_v49, %v4381_v26  ;;  %v8023_v49 = vld [vmem:[#allocation27 + $0x108] sm:$0xff]  }
 0xa56   :  { %5384 = vmatpush1.bf16.msra.mxu0 %v4340_v3  ;;  %5712 = vmatpush1.bf16.msra.mxu1 %v4342_v43  ;;  %v8014_v3 = vld [vmem:[#allocation27 + $0xf8] sm:$0xff]  }
 0xa57   :  { %5385 = vmatprep.subr.bf16.mxu0 %v4349_v0  ;;  %5713 = vmatprep.subr.bf16.mxu1 %v4351_v50  ;;  %v8015_v43 = vld [vmem:[#allocation27 + $0x38] sm:$0xff]   ;;  %v8017_v50 = vld [vmem:[#allocation27 + $0x140] sm:$0xff]  }
 0xa58   :  { %v8016_v0 = vld [vmem:[#allocation27 + $0xb8] sm:$0xff]  }
 0xa5a   :  { %5386 = vmatpush1.bf16.msra.mxu0 %v4348_v4  ;;  %5714 = vmatpush1.bf16.msra.mxu1 %v4350_v10  ;;  %v7829_v4 = vadd.f32 %v10653_v8, %v4389_v28  ;;  %v8018_v10 = vld [vmem:[#allocation27 + $0x1c0] sm:$0xff]   ;;  %v8025_v8 = vld [vmem:[#allocation27 + $0x150] sm:$0xff]  }
 0xa5b   :  { %5387 = vmatprep.subr.bf16.mxu0 %v4357_v24  ;;  %5715 = vmatprep.subr.bf16.mxu1 %v4359_v1  ;;  %v8019_v24 = vld [vmem:[#allocation27 + $0x100] sm:$0xff]   ;;  %v5730_v1 = vpack.c.bf16 %v7827_v13, %v7827_v13 }
 0xa5c   :  { %v5732_v6 = vpack.c.bf16 %v7829_v4, %v7829_v4 }
 0xa5e   :  { %5388 = vmatpush1.bf16.msra.mxu0 %v4356_v38  ;;  %5716 = vmatpush1.bf16.msra.mxu1 %v4358_v2  ;;  %v8020_v38 = vld [vmem:[#allocation27 + $0x180] sm:$0xff]   ;;  %v8021_v2 = vld [vmem:[#allocation27 + $0x148] sm:$0xff]  }
 0xa5f   :  { %5389 = vmatprep.subr.bf16.mxu0 %v4365_v11  ;;  %5717 = vmatprep.subr.bf16.mxu1 %v4367_v53  ;;  %v8022_v11 = vld [vmem:[#allocation27 + $0x1c8] sm:$0xff]  }
 0xa60   :  { %v8024_v53 = vld [vmem:[#allocation27 + $0x188] sm:$0xff]  }
 0xa62   :  { %5390 = vmatpush1.bf16.msra.mxu0 %v4364_v63  ;;  %5718 = vmatpush1.bf16.msra.mxu1 %v4366_v56  ;;  %v8027_v63 = vld [vmem:[#allocation27 + $0x110] sm:$0xff]  }
 0xa63   :  { %5391 = vmatprep.subr.bf16.mxu0 %v4373_v42  ;;  %5719 = vmatprep.subr.bf16.mxu1 %v4375_v54  ;;  %v8028_v56 = vld [vmem:[#allocation27 + $0x190] sm:$0xff]   ;;  %v8030_v42 = vld [vmem:[#allocation27 + $0x1d8] sm:$0xff]  }
 0xa64   :  { %v8031_v54 = vld [vmem:[#allocation27 + $0x118] sm:$0xff]  }
 0xa66   :  { %5392 = vmatpush1.bf16.msra.mxu0 %v4372_v52  ;;  %5720 = vmatpush1.bf16.msra.mxu1 %v4374_v60  ;;  %v8033_v52 = vld [vmem:[#allocation27 + $0x160] sm:$0xff]  }
 0xa67   :  { %7123 = vmatprep.subr.bf16.mxu0 %v7985_v15  ;;  %7145 = vmatprep.subr.bf16.mxu1 %v7986_v34  ;;  %v8034_v60 = vld [vmem:[#allocation27 + $0x1e0] sm:$0xff]  }
 0xa68   :  { %v8035_v15 = vld [vmem:[#allocation27 + $0x120] sm:$0xff]  }
 0xa69   :  { %5394 = vmatmul.mubr.bf16.vlgmr.msra.gmra.mrb[60].mxu0 %v10633_v23  ;;  %5722 = vmatmul.mubr.bf16.vlgmr.msra.gmra.mrb[60].mxu1 %v10633_v23  ;;  %v7999_v23 = vld [vmem:[#allocation27 + $0x18] sm:$0xff]   ;;  %v8036_v34 = vld [vmem:[#allocation27 + $0x1a0] sm:$0xff]  }
 0xa6a   :  { %7124 = vmatpush3.bf16.msra.mxu0 %v7987_v59  ;;  %6289 = vmatprep.mubr.bf16.mxu0 %v5731_v14  ;;  %v8039_v59 = vld [vmem:[#allocation27 + $0x128] sm:$0xff]   ;;  %v8041_v14 = vld [vmem:[#allocation27 + $0x170] sm:$0xff]  }
 0xa6b   :  { %7146 = vmatpush3.bf16.msra.mxu1 %v7988_v57  ;;  %6329 = vmatprep.mubr.bf16.mxu1 %v5733_v30  ;;  %v8040_v57 = vld [vmem:[#allocation27 + $0x1a8] sm:$0xff]   ;;  %v8044_v30 = vld [vmem:[#allocation27 + $0x1b0] sm:$0xff]  }
 0xa6c   :  { %7125 = vmatprep.subr.bf16.mxu0 %v7989_v37  ;;  %7147 = vmatprep.subr.bf16.mxu1 %v7990_v16  ;;  %v8042_v37 = vld [vmem:[#allocation27 + $0x1f0] sm:$0xff]  }
 0xa6d   :  { %v8043_v16 = vld [vmem:[#allocation27 + $0x130] sm:$0xff]  }
 0xa6e   :  { %7126 = vmatpush3.bf16.msra.mxu0 %v7991_v19  ;;  %v8045_v19 = vld [vmem:[#allocation27 + $0x178] sm:$0xff]  }
 0xa6f   :  { %7148 = vmatpush3.bf16.msra.mxu1 %v7992_v39  ;;  %7127 = vmatprep.subr.bf16.mxu0 %v7993_v31  ;;  %v8046_v39 = vld [vmem:[#allocation27 + $0x1f8] sm:$0xff]  }
 0xa70   :  { %7149 = vmatprep.subr.bf16.mxu1 %v7994_v25  ;;  %v8047_v31 = vld [vmem:[#allocation27 + $0x138] sm:$0xff]  }
 0xa71   :  { %v8048_v25 = vld [vmem:[#allocation27 + $0x1b8] sm:$0xff]  }
 0xa72   :  { %7128 = vmatpush3.bf16.msra.mxu0 %v7995_v7  ;;  %v4396_v7 = vsub.s32 4, %v10675_v33 }
 0xa73   :  { %7150 = vmatpush3.bf16.msra.mxu1 %v7996_v29  ;;  %7129 = vmatprep.subr.bf16.mxu0 %v7997_v36  ;;  %v4404_v29 = vsub.s32 6, %v10675_v33  ;;  %v4400_v36 = vsub.s32 5, %v10675_v33 }
 0xa74   :  { %7151 = vmatprep.subr.bf16.mxu1 %v7998_v9  ;;  %v4408_v9 = vsub.s32 7, %v10675_v33 }
 0xa76   :  { %7130 = vmatpush3.bf16.msra.mxu0 %v7999_v23  ;;  %v4397_v23 = vrot.slane %v10678_v61, %v4396_v7 }
 0xa77   :  { %7152 = vmatpush3.bf16.msra.mxu1 %v8000_v45  ;;  %7131 = vmatprep.subr.bf16.mxu0 %v8001_v12  ;;  %v4405_v45 = vrot.slane %v10678_v61, %v4404_v29  ;;  %v4401_v12 = vrot.slane %v10678_v61, %v4400_v36 }
 0xa78   :  { %7153 = vmatprep.subr.bf16.mxu1 %v8002_v47  ;;  %v4409_v47 = vrot.slane %v10678_v61, %v4408_v9 }
 0xa7a   :  { %7132 = vmatpush3.bf16.msra.mxu0 %v8003_v17 }
 0xa7b   :  { %7154 = vmatpush3.bf16.msra.mxu1 %v8004_v22  ;;  %7133 = vmatprep.subr.bf16.mxu0 %v8005_v55 }
 0xa7c   :  { %7155 = vmatprep.subr.bf16.mxu1 %v8006_v62 }
 0xa7e   :  { %7134 = vmatpush3.bf16.msra.mxu0 %v8007_v21 }
 0xa7f   :  { %7156 = vmatpush3.bf16.msra.mxu1 %v8008_v41  ;;  %7135 = vmatprep.subr.bf16.mxu0 %v8009_v18 }
 0xa80   :  { %7157 = vmatprep.subr.bf16.mxu1 %v8010_v44 }
 0xa82   :  { %7136 = vmatpush3.bf16.msra.mxu0 %v8011_v32 }
 0xa83   :  { %7158 = vmatpush3.bf16.msra.mxu1 %v8012_v5  ;;  %7137 = vmatprep.subr.bf16.mxu0 %v8013_v58 }
 0xa84   :  { %7159 = vmatprep.subr.bf16.mxu1 %v8014_v3 }
 0xa86   :  { %7138 = vmatpush3.bf16.msra.mxu0 %v8015_v43  ;;  %v6461_v43 = vld [vmem:[#allocation28] ss:$0 sm:$0xff] }
 0xa87   :  { %7160 = vmatpush3.bf16.msra.mxu1 %v8016_v0  ;;  %7167 = vmatprep.subr.bf16.mxu0 %v8017_v50 }
 0xa88   :  { %7189 = vmatprep.subr.bf16.mxu1 %v8018_v10 }
 0xa89   :  { %6290 = vmatmul.mubr.bf16.vlgmr.msra.gmra.mrb[64].mxu0 %v5730_v1 }
 0xa8a   :  { %6330 = vmatmul.mubr.bf16.vlgmr.msra.gmra.mrb[64].mxu1 %v5732_v6  ;;  %7168 = vmatpush3.bf16.msra.mxu0 %v8019_v24 }
 0xa8b   :  { %7190 = vmatpush3.bf16.msra.mxu1 %v8020_v38  ;;  %7169 = vmatprep.subr.bf16.mxu0 %v8021_v2 }
 0xa8c   :  { %7191 = vmatprep.subr.bf16.mxu1 %v8022_v11 }
 0xa8e   :  { %7170 = vmatpush3.bf16.msra.mxu0 %v8023_v49 }
 0xa8f   :  { %7192 = vmatpush3.bf16.msra.mxu1 %v8024_v53  ;;  %7171 = vmatprep.subr.bf16.mxu0 %v8025_v8 }
 0xa90   :  { %7193 = vmatprep.subr.bf16.mxu1 %v8026_v27 }
 0xa92   :  { %7172 = vmatpush3.bf16.msra.mxu0 %v8027_v63 }
 0xa93   :  { %7194 = vmatpush3.bf16.msra.mxu1 %v8028_v56  ;;  %7173 = vmatprep.subr.bf16.mxu0 %v8029_v51 }
 0xa94   :  { %7195 = vmatprep.subr.bf16.mxu1 %v8030_v42 }
 0xa96   :  { %7174 = vmatpush3.bf16.msra.mxu0 %v8031_v54 }
 0xa97   :  { %7196 = vmatpush3.bf16.msra.mxu1 %v8032_v40  ;;  %7175 = vmatprep.subr.bf16.mxu0 %v8033_v52 }
 0xa98   :  { %7197 = vmatprep.subr.bf16.mxu1 %v8034_v60 }
 0xa9a   :  { %7176 = vmatpush3.bf16.msra.mxu0 %v8035_v15 }
 0xa9b   :  { %7198 = vmatpush3.bf16.msra.mxu1 %v8036_v34  ;;  %7177 = vmatprep.subr.bf16.mxu0 %v8037_v46 }
 0xa9c   :  { %7199 = vmatprep.subr.bf16.mxu1 %v8038_v35 }
 0xa9e   :  { %7178 = vmatpush3.bf16.msra.mxu0 %v8039_v59 }
 0xa9f   :  { %7200 = vmatpush3.bf16.msra.mxu1 %v8040_v57  ;;  %7179 = vmatprep.subr.bf16.mxu0 %v8041_v14 }
 0xaa0   :  { %7201 = vmatprep.subr.bf16.mxu1 %v8042_v37 }
 0xaa2   :  { %7180 = vmatpush3.bf16.msra.mxu0 %v8043_v16 }
 0xaa3   :  { %7202 = vmatpush3.bf16.msra.mxu1 %v8044_v30  ;;  %7181 = vmatprep.subr.bf16.mxu0 %v8045_v19 }
 0xaa4   :  { %7203 = vmatprep.subr.bf16.mxu1 %v8046_v39 }
 0xaa6   :  { %7182 = vmatpush3.bf16.msra.mxu0 %v8047_v31 }
 0xaa7   :  { %7204 = vmatpush3.bf16.msra.mxu1 %v8048_v25 }
 0xb3c   :  { %v5395_v17 = vpop.f32.mrb[60].mxu0  ;;  %v5723_v22 = vpop.f32.mrb[60].mxu1 }
 0xb3d   :  { %v7831_v55 = vadd.f32 %v5395_v17, %v4397_v23  ;;  %v7833_v62 = vadd.f32 %v5723_v22, %v4405_v45  ;;  %v5397_v21 = vpop.f32.mrb[61].mxu0  ;;  %v5725_v48 = vpop.f32.mrb[61].mxu1 }
 0xb3e   :  { %v7832_v41 = vadd.f32 %v5397_v21, %v4401_v12  ;;  %v7834_v18 = vadd.f32 %v5725_v48, %v4409_v47  ;;  %v5399_v20 = vpop.f32.mrb[62].mxu0  ;;  %v5727_v44 = vpop.f32.mrb[62].mxu1 }
 0xb3f   :  { %v5400_v32 = vpop.f32.mrb[63].mxu0  ;;  %v5728_v33 = vpop.f32.mrb[63].mxu1  ;;  %v5734_v58 = vpack.c.bf16 %v7831_v55, %v7831_v55  ;;  %v5736_v28 = vpack.c.bf16 %v7833_v62, %v7833_v62 }
 0xb40   :  { %v5735_v26 = vpack.c.bf16 %v7832_v41, %v7832_v41  ;;  %v5737_v5 = vpack.c.bf16 %v7834_v18, %v7834_v18 }
 0xb42   :  { %6369 = vmatprep.mubr.bf16.mxu0 %v5735_v26  ;;  %6409 = vmatprep.mubr.bf16.mxu1 %v5737_v5 }
 0xb43   :  { %6370 = vmatmul.mubr.bf16.vlgmr.msra.gmra.mrb[68].mxu0 %v5734_v58  ;;  %6410 = vmatmul.mubr.bf16.vlgmr.msra.gmra.mrb[68].mxu1 %v5736_v28 }
 0xb5c   :  { %v7139_v61 = vpop.f32.mrb[64].mxu0 }
 0xb5d   :  { %v7161_v3 = vpop.f32.mrb[64].mxu1  ;;  %v7140_v13 = vpop.f32.mrb[65].mxu0 }
 0xb5e   :  { %v7141_v0 = vadd.f32 %v7140_v13, %v7139_v61  ;;  %v7162_v50 = vpop.f32.mrb[65].mxu1  ;;  %v7142_v4 = vpop.f32.mrb[66].mxu0 }
 0xb5f   :  { %v7163_v10 = vadd.f32 %v7162_v50, %v7161_v3  ;;  %v7164_v24 = vpop.f32.mrb[66].mxu1  ;;  %v7143_v1 = vpop.f32.mrb[67].mxu0 }
 0xb60   :  { %v6292_v38 = vadd.f32 %v7141_v0, %v6461_v43  ;;  %v7165_v2 = vpop.f32.mrb[67].mxu1 }
 0xb62   :  { %v6332_v6 = vadd.f32 %v7163_v10, %v6292_v38 }
 0xc16   :  { %v7183_v11 = vpop.f32.mrb[68].mxu0  ;;  %v7205_v49 = vpop.f32.mrb[68].mxu1 }
 0xc17   :  { %v7184_v53 = vpop.f32.mrb[69].mxu0  ;;  %v7206_v8 = vpop.f32.mrb[69].mxu1 }
 0xc18   :  { %v7185_v27 = vadd.f32 %v7184_v53, %v7183_v11  ;;  %v7207_v63 = vadd.f32 %v7206_v8, %v7205_v49  ;;  %v7186_v56 = vpop.f32.mrb[70].mxu0  ;;  %v7208_v51 = vpop.f32.mrb[70].mxu1 }
 0xc19   :  { %v7187_v42 = vpop.f32.mrb[71].mxu0  ;;  %v7209_v54 = vpop.f32.mrb[71].mxu1 }
 0xc1a   :  { %v6372_v40 = vadd.f32 %v7185_v27, %v6332_v6 }
 0xc1c   :  { %v6412_v52 = vadd.f32 %v7207_v63, %v6372_v40 }
 0xc1e   :  { %6417 = vst [vmem:[#allocation30] sm:$0x3] %v6412_v52 }
 0xc1f   :  { %8412 = shalt.err (!%p8409_p6)
}
 0xc20   :  { %s8413_s11 = scalar_lea.hbm %s10731_s18, 32 }
 0xc21   :  { %p8414_p7 = scmp.ne.s32.totalorder %s10731_s18, %s8413_s11  ;;  %p8417_p8 = scmp.lt.u32.totalorder %s8413_s11, %s10731_s18 }
 0xc23   :  { %p8419_p9 = pnand %p8417_p8, %p8414_p7 }
 0xc25   :  { %8422 = shalt.err (!%p8419_p9)
}
 0xc26   :  { %6427 = dma.vmem_to_hbm [thread:$0]  %s6425_s2, 32, %s10731_s18, [#allocation6]  }
 0xc27   :  { %8443 = dma.done.wait [#allocation6], 32  }
 0xc28   :  { %8444 = vsyncadd [#allocation6], 4294967264 }
 0xc29   :  { %6431 = vsyncpa [#allocation5], 1 }
 0xc2a   :  { %6432 = vsyncpa [#allocation8], 1 }
 0xc2b   :  { %6433 = vsyncpa [#allocation11], 1 }
 0xc2c   :  { %6434 = vsyncpa [#allocation14], 1 }
 0xc2d   :  { %6435 = vsyncpa [#allocation17], 1 }
 0xc2e   :  { %6436 = vsyncpa [#allocation20], 1 }
 0xc2f   :  { %6437 = vsyncpa [#allocation23], 1 }
 0xc30   :  { %6438 = vsyncpa [#allocation26], 1 }
 0xc31   :  { %6439 = vsyncpa [#allocation29], 1 }
 0xc32   :  { %6440 = vsyncpa [#allocation6], 1 }
 0xc33   :  { %6441 = vsyncmov [#allocation3] }
 0xc36   :  { %s6442_s4 = vpop.sfrf %6441 }
 0xc37   :  { %p6526_p10 = scmp.ne.s32.totalorder %s6442_s4, 0 }
 0xc39   :  { %6446 = shalt.err (%p6526_p10)  }

</bundles_post_ra>
